<compile_context>
chip_gen: v7x
topology: tpu7x:2x2x1
jax: 0.10.0
libtpu: 0.0.40
codegen_flags: <defaults>
</compile_context>

<pallas_src>
import numpy as np

import jax
import jax.numpy as jnp
from jax.experimental import pallas as pl
from jax.experimental.pallas import tpu as pltpu


# ----------------------------------------------------------------------------
# Kernel
# ----------------------------------------------------------------------------
def _make_proposal_kernel(bb, M1, M2, M3, C1, C2, C3, KPAD, FLAT, use_fc):
    """Builds the fused backbone(+fc) kernel for a batch block of `bb` images."""
    f32 = jnp.float32
    bf16 = jnp.bfloat16

    def kernel(x_ref, g1_ref, w1_ref, b1_ref,
               g2_ref, w2_ref, b2_ref,
               g3_ref, w3_ref, b3_ref,
               tw1_ref, tb1_ref, tw2_ref, tb2_ref, tw3_ref, tb3_ref,
               *rest):
        if use_fc:
            fcw_ref, fcb_ref, out_ref, pack_ref = rest
        else:
            out_ref, pack_ref = rest

        def conv3x3_relu_T(d_prevT, g_ref, w_ref, b_ref):
            # "Transposed" 3x3 conv (pad=1): d_prevT is (Cin, M_in).
            #   tap_k = d_prevT @ G_T[k]  -- exact 0/1 spatial selection (zero pad)
            #   acc  += W_k^T @ tap_k     -- fp32 accumulation on the MXU
            acc = None
            for k in range(9):
                tap = jnp.dot(d_prevT, g_ref[k],
                              preferred_element_type=f32).astype(bf16)
                part = jnp.dot(w_ref[k], tap, preferred_element_type=f32)
                acc = part if acc is None else acc + part
            return jnp.maximum(acc + b_ref[...], 0.0)            # (128, M_out) f32

        # Keep the 128-pad tail of the packed tidy vector zeroed (fc pad rows are
        # also zero, but never let uninitialized VMEM feed the matmul).
        if KPAD > FLAT:
            pack_ref[:, pl.ds(FLAT, KPAD - FLAT)] = jnp.zeros(
                (bb, KPAD - FLAT), pack_ref.dtype)

        for b in range(bb):                                       # static unroll
            xT = x_ref[b]                                         # (Cin, M1) bf16
            d1T = conv3x3_relu_T(xT, g1_ref, w1_ref, b1_ref).astype(bf16)   # (128, M1)
            d2T = conv3x3_relu_T(d1T, g2_ref, w2_ref, b2_ref).astype(bf16)  # (128, M2)
            d3T = conv3x3_relu_T(d2T, g3_ref, w3_ref, b3_ref).astype(bf16)  # (128, M3)

            # tidy 1x1 convs in transposed form + channel-major packing into the
            # per-image 1161-vector (== torch NCHW .view order).
            off = 0
            for dT, tw_ref, tb_ref, c_out, m in (
                    (d1T, tw1_ref, tb1_ref, C1, M1),
                    (d2T, tw2_ref, tb2_ref, C2, M2),
                    (d3T, tw3_ref, tb3_ref, C3, M3)):
                t = (jnp.dot(tw_ref[...], dT, preferred_element_type=f32)
                     + tb_ref[...]).astype(pack_ref.dtype)        # (c_out, m)
                for c in range(c_out):
                    pack_ref[pl.ds(b, 1), pl.ds(off + c * m, m)] = t[c:c + 1, :]
                off += c_out * m

        if use_fc:
            fc = (jnp.dot(pack_ref[...].astype(bf16), fcw_ref[...],
                          preferred_element_type=f32) + fcb_ref[...])
            out_ref[...] = fc[None].astype(out_ref.dtype)         # (1, bb, NPAD)
        else:
            out_ref[...] = pack_ref[...][None].astype(out_ref.dtype)

    return kernel


# ----------------------------------------------------------------------------
# Constant 0/1 gather matrices (transposed: (M_in, M_out) per tap)
# ----------------------------------------------------------------------------
def _gather_matrices_T(h_in, w_in, h_out, w_out, stride):
    """(9, h_in*w_in, h_out*w_out) selectors: (C, M_in) @ G_T[k] yields the k-th
    3x3 tap (padding=1); out-of-range taps stay all-zero => zero padding."""
    g = np.zeros((9, h_in * w_in, h_out * w_out), np.float32)
    for kh in range(3):
        for kw in range(3):
            k = kh * 3 + kw
            for oh in range(h_out):
                ih = oh * stride + kh - 1
                if not (0 <= ih < h_in):
                    continue
                for ow in range(w_out):
                    iw = ow * stride + kw - 1
                    if not (0 <= iw < w_in):
                        continue
                    g[k, ih * w_in + iw, oh * w_out + ow] = 1.0
    return g


# ----------------------------------------------------------------------------
# ProposalNet forward (one fused pallas_call)
# ----------------------------------------------------------------------------
def proposal_net_forward(x_nchw, params, *, arch, batch_block=4):
    use_fc = arch in ('inceptionresnetv2', 'inceptionv4')
    N, Cin, H, W = x_nchw.shape
    H1, W1 = H, W
    H2, W2 = (H1 - 1) // 2 + 1, (W1 - 1) // 2 + 1      # k=3, pad=1, stride=2
    H3, W3 = (H2 - 1) // 2 + 1, (W2 - 1) // 2 + 1
    M1, M2, M3 = H1 * W1, H2 * W2, H3 * W3
    C1 = params['tidy1_w'].shape[1]
    C2 = params['tidy2_w'].shape[1]
    C3 = params['tidy3_w'].shape[1]
    FLAT = C1 * M1 + C2 * M2 + C3 * M3                  # 1161 for a 12x12 map
    KPAD = int(pl.cdiv(FLAT, 128)) * 128                # 1280: lane/tile aligned
    bf16, f32 = jnp.bfloat16, jnp.float32

    # Batch blocking; keep >=2 grid steps when possible so v7x's 2 TCs both work.
    bb = max(1, min(batch_block, N))
    if N >= 2:
        bb = min(bb, (N + 1) // 2)
    grid_n = int(pl.cdiv(N, bb))
    n_pad = grid_n * bb

    # NCHW -> (N, Cin, H*W): contiguous reshape (no transpose); im2col is in-kernel.
    x_flat = x_nchw.reshape(N, Cin, M1).astype(bf16)
    if n_pad != N:
        x_flat = jnp.pad(x_flat, ((0, n_pad - N), (0, 0), (0, 0)))

    g1t = jnp.asarray(_gather_matrices_T(H1, W1, H1, W1, 1), bf16)   # (9, M1, M1)
    g2t = jnp.asarray(_gather_matrices_T(H1, W1, H2, W2, 2), bf16)   # (9, M1, M2)
    g3t = jnp.asarray(_gather_matrices_T(H2, W2, H3, W3, 2), bf16)   # (9, M2, M3)

    # Per-tap transposed conv weights: (9, Cout, Cin).
    wt1 = params['down1_w'].reshape(9, Cin, 128).transpose(0, 2, 1).astype(bf16)
    wt2 = params['down2_w'].reshape(9, 128, 128).transpose(0, 2, 1).astype(bf16)
    wt3 = params['down3_w'].reshape(9, 128, 128).transpose(0, 2, 1).astype(bf16)
    b1 = params['down1_b'].reshape(128, 1).astype(f32)
    b2 = params['down2_b'].reshape(128, 1).astype(f32)
    b3 = params['down3_b'].reshape(128, 1).astype(f32)
    tw1 = params['tidy1_w'].T.astype(bf16)                            # (6, 128)
    tw2 = params['tidy2_w'].T.astype(bf16)                            # (6, 128)
    tw3 = params['tidy3_w'].T.astype(bf16)                            # (9, 128)
    tb1 = params['tidy1_b'].reshape(C1, 1).astype(f32)
    tb2 = params['tidy2_b'].reshape(C2, 1).astype(f32)
    tb3 = params['tidy3_b'].reshape(C3, 1).astype(f32)

    def const_spec(shape):
        # Constant-index operand: DMA'd once, single-buffered to save VMEM.
        nd = len(shape)
        return pl.BlockSpec(shape, lambda i, _nd=nd: (0,) * _nd,
                            pipeline_mode=pl.Buffered(1))

    inputs = [x_flat, g1t, wt1, b1, g2t, wt2, b2, g3t, wt3, b3,
              tw1, tb1, tw2, tb2, tw3, tb3]
    in_specs = [pl.BlockSpec((bb, Cin, M1), lambda i: (i, 0, 0))]
    in_specs += [const_spec(a.shape) for a in inputs[1:]]

    if use_fc:
        fc_w, fc_b = params['fc_w'], params['fc_b']
        k_fc, n_out = fc_w.shape
        assert k_fc == FLAT, (k_fc, FLAT)
        NPAD = int(pl.cdiv(n_out, 128)) * 128
        fcw = jnp.pad(fc_w, ((0, KPAD - k_fc), (0, NPAD - n_out))).astype(bf16)
        fcb = jnp.pad(fc_b, (0, NPAD - n_out)).reshape(1, NPAD).astype(f32)
        inputs += [fcw, fcb]
        in_specs += [const_spec(fcw.shape), const_spec(fcb.shape)]
        out_cols = NPAD
    else:
        n_out = FLAT
        out_cols = KPAD

    kernel = _make_proposal_kernel(bb, M1, M2, M3, C1, C2, C3, KPAD, FLAT, use_fc)

    out = pl.pallas_call(
        kernel,
        out_shape=jax.ShapeDtypeStruct((grid_n, bb, out_cols), f32),
        grid=(grid_n,),
        in_specs=in_specs,
        out_specs=pl.BlockSpec((1, bb, out_cols), lambda i: (i, 0, 0)),
        scratch_shapes=[pltpu.VMEM((bb, KPAD), f32)],    # packed tidy vectors
        compiler_params=pltpu.CompilerParams(
            dimension_semantics=("parallel",),
            vmem_limit_bytes=48 * 1024 * 1024),
    )(*inputs)

    # (grid_n, bb, pad) -> (N, n_out): contiguous reshape + one slice.
    return out.reshape(n_pad, out_cols)[:N, :n_out]


# ----------------------------------------------------------------------------
# Pure-JAX fp32 reference (correctness check only)
# ----------------------------------------------------------------------------
def ref_forward(x_nchw, params, arch):
    x = jnp.transpose(x_nchw, (0, 2, 3, 1))

    def conv(xx, w, b, stride):
        y = jax.lax.conv_general_dilated(
            xx, w, window_strides=(stride, stride), padding=((1, 1), (1, 1)),
            dimension_numbers=('NHWC', 'HWIO', 'NHWC'))
        return y + b

    d1 = jax.nn.relu(conv(x, params['down1_w'], params['down1_b'], 1))
    d2 = jax.nn.relu(conv(d1, params['down2_w'], params['down2_b'], 2))
    d3 = jax.nn.relu(conv(d2, params['down3_w'], params['down3_b'], 2))

    def tidy(feat, w, b):
        y = jnp.einsum('nhwc,cd->nhwd', feat, w) + b
        return jnp.transpose(y, (0, 3, 1, 2)).reshape(feat.shape[0], -1)

    t1 = tidy(d1, params['tidy1_w'], params['tidy1_b'])
    t2 = tidy(d2, params['tidy2_w'], params['tidy2_b'])
    t3 = tidy(d3, params['tidy3_w'], params['tidy3_b'])
    f = jnp.concatenate([t1, t2, t3], axis=1)
    if arch in ('inceptionresnetv2', 'inceptionv4'):
        f = f @ params['fc_w'] + params['fc_b']
    return f


# ----------------------------------------------------------------------------
# Deterministic synthetic parameters (shapes follow the module __init__)
# ----------------------------------------------------------------------------
def init_params(key, fv_size):
    ks = jax.random.split(key, 14)

    def nrm(k, shape, scale):
        return jax.random.normal(k, shape, jnp.float32) * scale

    return {
        'down1_w': nrm(ks[0], (3, 3, fv_size, 128), 0.05),
        'down1_b': nrm(ks[1], (128,), 0.01),
        'down2_w': nrm(ks[2], (3, 3, 128, 128), 0.02),
        'down2_b': nrm(ks[3], (128,), 0.01),
        'down3_w': nrm(ks[4], (3, 3, 128, 128), 0.02),
        'down3_b': nrm(ks[5], (128,), 0.01),
        'tidy1_w': nrm(ks[6], (128, 6), 0.05),
        'tidy1_b': nrm(ks[7], (6,), 0.01),
        'tidy2_w': nrm(ks[8], (128, 6), 0.05),
        'tidy2_b': nrm(ks[9], (6,), 0.01),
        'tidy3_w': nrm(ks[10], (128, 9), 0.05),
        'tidy3_b': nrm(ks[11], (9,), 0.01),
        'fc_w': nrm(ks[12], (1161, 1614), 0.02),
        'fc_b': nrm(ks[13], (1614,), 0.01),
    }


if __name__ == "__main__":
    key = jax.random.PRNGKey(0)
    fv_size = 8                      # small synthetic stand-in for args.fv_size
    arch = 'inceptionv4'             # 12x12 map -> 6*144 + 6*36 + 9*9 = 1161 -> fc
    pkey, xkey = jax.random.split(key)
    params = init_params(pkey, fv_size)

    x = jax.random.normal(xkey, (2, fv_size, 12, 12), jnp.float32)  # NCHW, like torch

    fwd = jax.jit(proposal_net_forward, static_argnames=('arch',))
    f = jax.block_until_ready(fwd(x, params, arch=arch))

    assert f.shape == (2, 1614), f.shape
    f_ref = ref_forward(x, params, arch)
    # bf16 MXU inputs with fp32 accumulation vs fp32 reference -> ~1e-2 agreement
    np.testing.assert_allclose(np.asarray(f), np.asarray(f_ref),
                               rtol=2e-2, atol=2e-2)
    print("KERNEL_OK")
</pallas_src>

<mosaic_0001>
module attributes {stable_mosaic.version = 11 : i64} {
  func.func @kernel(%arg0: i32, %arg1: memref<1x8x144xbf16, #tpu.memory_space<vmem>>, %arg2: memref<9x144x144xbf16, #tpu.memory_space<vmem>>, %arg3: memref<9x128x8xbf16, #tpu.memory_space<vmem>>, %arg4: memref<128x1xf32, #tpu.memory_space<vmem>>, %arg5: memref<9x144x36xbf16, #tpu.memory_space<vmem>>, %arg6: memref<9x128x128xbf16, #tpu.memory_space<vmem>>, %arg7: memref<128x1xf32, #tpu.memory_space<vmem>>, %arg8: memref<9x36x9xbf16, #tpu.memory_space<vmem>>, %arg9: memref<9x128x128xbf16, #tpu.memory_space<vmem>>, %arg10: memref<128x1xf32, #tpu.memory_space<vmem>>, %arg11: memref<6x128xbf16, #tpu.memory_space<vmem>>, %arg12: memref<6x1xf32, #tpu.memory_space<vmem>>, %arg13: memref<6x128xbf16, #tpu.memory_space<vmem>>, %arg14: memref<6x1xf32, #tpu.memory_space<vmem>>, %arg15: memref<9x128xbf16, #tpu.memory_space<vmem>>, %arg16: memref<9x1xf32, #tpu.memory_space<vmem>>, %arg17: memref<1280x1664xbf16, #tpu.memory_space<vmem>>, %arg18: memref<1x1664xf32, #tpu.memory_space<vmem>>, %arg19: memref<1x1x1664xf32, #tpu.memory_space<vmem>>, %arg20: memref<1x1280xf32, #tpu.memory_space<vmem>>) attributes {dimension_semantics = [#tpu.dimension_semantics<parallel>], iteration_bounds = array<i64: 2>, scalar_prefetch = 0 : i64, scratch_operands = 1 : i64, tpu.core_type = #tpu.core_type<tc>, window_params = [{transform_indices = @transform_0, window_bounds = array<i64: 1, 8, 144>}, {pipeline_mode = #tpu.pipeline_mode<synchronous>, transform_indices = @transform_1, window_bounds = array<i64: 9, 144, 144>}, {pipeline_mode = #tpu.pipeline_mode<synchronous>, transform_indices = @transform_2, window_bounds = array<i64: 9, 128, 8>}, {pipeline_mode = #tpu.pipeline_mode<synchronous>, transform_indices = @transform_3, window_bounds = array<i64: 128, 1>}, {pipeline_mode = #tpu.pipeline_mode<synchronous>, transform_indices = @transform_4, window_bounds = array<i64: 9, 144, 36>}, {pipeline_mode = #tpu.pipeline_mode<synchronous>, transform_indices = @transform_5, window_bounds = array<i64: 9, 128, 128>}, {pipeline_mode = #tpu.pipeline_mode<synchronous>, transform_indices = @transform_6, window_bounds = array<i64: 128, 1>}, {pipeline_mode = #tpu.pipeline_mode<synchronous>, transform_indices = @transform_7, window_bounds = array<i64: 9, 36, 9>}, {pipeline_mode = #tpu.pipeline_mode<synchronous>, transform_indices = @transform_8, window_bounds = array<i64: 9, 128, 128>}, {pipeline_mode = #tpu.pipeline_mode<synchronous>, transform_indices = @transform_9, window_bounds = array<i64: 128, 1>}, {pipeline_mode = #tpu.pipeline_mode<synchronous>, transform_indices = @transform_10, window_bounds = array<i64: 6, 128>}, {pipeline_mode = #tpu.pipeline_mode<synchronous>, transform_indices = @transform_11, window_bounds = array<i64: 6, 1>}, {pipeline_mode = #tpu.pipeline_mode<synchronous>, transform_indices = @transform_12, window_bounds = array<i64: 6, 128>}, {pipeline_mode = #tpu.pipeline_mode<synchronous>, transform_indices = @transform_13, window_bounds = array<i64: 6, 1>}, {pipeline_mode = #tpu.pipeline_mode<synchronous>, transform_indices = @transform_14, window_bounds = array<i64: 9, 128>}, {pipeline_mode = #tpu.pipeline_mode<synchronous>, transform_indices = @transform_15, window_bounds = array<i64: 9, 1>}, {pipeline_mode = #tpu.pipeline_mode<synchronous>, transform_indices = @transform_16, window_bounds = array<i64: 1280, 1664>}, {pipeline_mode = #tpu.pipeline_mode<synchronous>, transform_indices = @transform_17, window_bounds = array<i64: 1, 1664>}, {transform_indices = @transform_18, window_bounds = array<i64: 1, 1, 1664>}]} {
    %cst = arith.constant 0.000000e+00 : f32
    %0 = vector.broadcast %cst : f32 to vector<1x119xf32>
    %c0 = arith.constant 0 : index
    %c1161 = arith.constant 1161 : index
    %1 = vector.load %arg20[%c0, %c1161] : memref<1x1280xf32, #tpu.memory_space<vmem>>, vector<1x119xf32>
    tpu.vector_store %arg20[%c0, %c1161], %0 {strides = array<i32>} : memref<1x1280xf32, #tpu.memory_space<vmem>>, vector<1x119xf32>,
    %c0_0 = arith.constant 0 : index
    %c0_1 = arith.constant 0 : index
    %c0_2 = arith.constant 0 : index
    %2 = vector.load %arg1[%c0_0, %c0_1, %c0_2] : memref<1x8x144xbf16, #tpu.memory_space<vmem>>, vector<1x8x144xbf16>
    %3 = vector.shape_cast %2 : vector<1x8x144xbf16> to vector<8x144xbf16>
    %c0_3 = arith.constant 0 : index
    %c0_4 = arith.constant 0 : index
    %c0_5 = arith.constant 0 : index
    %4 = vector.load %arg2[%c0_3, %c0_4, %c0_5] : memref<9x144x144xbf16, #tpu.memory_space<vmem>>, vector<1x144x144xbf16>
    %5 = vector.shape_cast %4 : vector<1x144x144xbf16> to vector<144x144xbf16>
    %cst_6 = arith.constant dense<0.000000e+00> : vector<8x144xf32>
    %6 = tpu.matmul %3, %5, %cst_6 {dimension_numbers = #tpu.dot_dimension_numbers<[1], [0], [0], [1], [0, 0, 1, 1], [], []>} : vector<8x144xbf16>, vector<144x144xbf16>, vector<8x144xf32> -> vector<8x144xf32>
    %7 = arith.truncf %6 : vector<8x144xf32> to vector<8x144xbf16>
    %c0_7 = arith.constant 0 : index
    %c0_8 = arith.constant 0 : index
    %c0_9 = arith.constant 0 : index
    %8 = vector.load %arg3[%c0_7, %c0_8, %c0_9] : memref<9x128x8xbf16, #tpu.memory_space<vmem>>, vector<1x128x8xbf16>
    %9 = vector.shape_cast %8 : vector<1x128x8xbf16> to vector<128x8xbf16>
    %cst_10 = arith.constant dense<0.000000e+00> : vector<128x144xf32>
    %10 = tpu.matmul %9, %7, %cst_10 {dimension_numbers = #tpu.dot_dimension_numbers<[1], [0], [0], [1], [0, 0, 1, 1], [], []>} : vector<128x8xbf16>, vector<8x144xbf16>, vector<128x144xf32> -> vector<128x144xf32>
    %c1 = arith.constant 1 : index
    %c0_11 = arith.constant 0 : index
    %c0_12 = arith.constant 0 : index
    %11 = vector.load %arg2[%c1, %c0_11, %c0_12] : memref<9x144x144xbf16, #tpu.memory_space<vmem>>, vector<1x144x144xbf16>
    %12 = vector.shape_cast %11 : vector<1x144x144xbf16> to vector<144x144xbf16>
    %cst_13 = arith.constant dense<0.000000e+00> : vector<8x144xf32>
    %13 = tpu.matmul %3, %12, %cst_13 {dimension_numbers = #tpu.dot_dimension_numbers<[1], [0], [0], [1], [0, 0, 1, 1], [], []>} : vector<8x144xbf16>, vector<144x144xbf16>, vector<8x144xf32> -> vector<8x144xf32>
    %14 = arith.truncf %13 : vector<8x144xf32> to vector<8x144xbf16>
    %c1_14 = arith.constant 1 : index
    %c0_15 = arith.constant 0 : index
    %c0_16 = arith.constant 0 : index
    %15 = vector.load %arg3[%c1_14, %c0_15, %c0_16] : memref<9x128x8xbf16, #tpu.memory_space<vmem>>, vector<1x128x8xbf16>
    %16 = vector.shape_cast %15 : vector<1x128x8xbf16> to vector<128x8xbf16>
    %cst_17 = arith.constant dense<0.000000e+00> : vector<128x144xf32>
    %17 = tpu.matmul %16, %14, %cst_17 {dimension_numbers = #tpu.dot_dimension_numbers<[1], [0], [0], [1], [0, 0, 1, 1], [], []>} : vector<128x8xbf16>, vector<8x144xbf16>, vector<128x144xf32> -> vector<128x144xf32>
    %18 = arith.addf %10, %17 : vector<128x144xf32>
    %c2 = arith.constant 2 : index
    %c0_18 = arith.constant 0 : index
    %c0_19 = arith.constant 0 : index
    %19 = vector.load %arg2[%c2, %c0_18, %c0_19] : memref<9x144x144xbf16, #tpu.memory_space<vmem>>, vector<1x144x144xbf16>
    %20 = vector.shape_cast %19 : vector<1x144x144xbf16> to vector<144x144xbf16>
    %cst_20 = arith.constant dense<0.000000e+00> : vector<8x144xf32>
    %21 = tpu.matmul %3, %20, %cst_20 {dimension_numbers = #tpu.dot_dimension_numbers<[1], [0], [0], [1], [0, 0, 1, 1], [], []>} : vector<8x144xbf16>, vector<144x144xbf16>, vector<8x144xf32> -> vector<8x144xf32>
    %22 = arith.truncf %21 : vector<8x144xf32> to vector<8x144xbf16>
    %c2_21 = arith.constant 2 : index
    %c0_22 = arith.constant 0 : index
    %c0_23 = arith.constant 0 : index
    %23 = vector.load %arg3[%c2_21, %c0_22, %c0_23] : memref<9x128x8xbf16, #tpu.memory_space<vmem>>, vector<1x128x8xbf16>
    %24 = vector.shape_cast %23 : vector<1x128x8xbf16> to vector<128x8xbf16>
    %cst_24 = arith.constant dense<0.000000e+00> : vector<128x144xf32>
    %25 = tpu.matmul %24, %22, %cst_24 {dimension_numbers = #tpu.dot_dimension_numbers<[1], [0], [0], [1], [0, 0, 1, 1], [], []>} : vector<128x8xbf16>, vector<8x144xbf16>, vector<128x144xf32> -> vector<128x144xf32>
    %26 = arith.addf %18, %25 : vector<128x144xf32>
    %c3 = arith.constant 3 : index
    %c0_25 = arith.constant 0 : index
    %c0_26 = arith.constant 0 : index
    %27 = vector.load %arg2[%c3, %c0_25, %c0_26] : memref<9x144x144xbf16, #tpu.memory_space<vmem>>, vector<1x144x144xbf16>
    %28 = vector.shape_cast %27 : vector<1x144x144xbf16> to vector<144x144xbf16>
    %cst_27 = arith.constant dense<0.000000e+00> : vector<8x144xf32>
    %29 = tpu.matmul %3, %28, %cst_27 {dimension_numbers = #tpu.dot_dimension_numbers<[1], [0], [0], [1], [0, 0, 1, 1], [], []>} : vector<8x144xbf16>, vector<144x144xbf16>, vector<8x144xf32> -> vector<8x144xf32>
    %30 = arith.truncf %29 : vector<8x144xf32> to vector<8x144xbf16>
    %c3_28 = arith.constant 3 : index
    %c0_29 = arith.constant 0 : index
    %c0_30 = arith.constant 0 : index
    %31 = vector.load %arg3[%c3_28, %c0_29, %c0_30] : memref<9x128x8xbf16, #tpu.memory_space<vmem>>, vector<1x128x8xbf16>
    %32 = vector.shape_cast %31 : vector<1x128x8xbf16> to vector<128x8xbf16>
    %cst_31 = arith.constant dense<0.000000e+00> : vector<128x144xf32>
    %33 = tpu.matmul %32, %30, %cst_31 {dimension_numbers = #tpu.dot_dimension_numbers<[1], [0], [0], [1], [0, 0, 1, 1], [], []>} : vector<128x8xbf16>, vector<8x144xbf16>, vector<128x144xf32> -> vector<128x144xf32>
    %34 = arith.addf %26, %33 : vector<128x144xf32>
    %c4 = arith.constant 4 : index
    %c0_32 = arith.constant 0 : index
    %c0_33 = arith.constant 0 : index
    %35 = vector.load %arg2[%c4, %c0_32, %c0_33] : memref<9x144x144xbf16, #tpu.memory_space<vmem>>, vector<1x144x144xbf16>
    %36 = vector.shape_cast %35 : vector<1x144x144xbf16> to vector<144x144xbf16>
    %cst_34 = arith.constant dense<0.000000e+00> : vector<8x144xf32>
    %37 = tpu.matmul %3, %36, %cst_34 {dimension_numbers = #tpu.dot_dimension_numbers<[1], [0], [0], [1], [0, 0, 1, 1], [], []>} : vector<8x144xbf16>, vector<144x144xbf16>, vector<8x144xf32> -> vector<8x144xf32>
    %38 = arith.truncf %37 : vector<8x144xf32> to vector<8x144xbf16>
    %c4_35 = arith.constant 4 : index
    %c0_36 = arith.constant 0 : index
    %c0_37 = arith.constant 0 : index
    %39 = vector.load %arg3[%c4_35, %c0_36, %c0_37] : memref<9x128x8xbf16, #tpu.memory_space<vmem>>, vector<1x128x8xbf16>
    %40 = vector.shape_cast %39 : vector<1x128x8xbf16> to vector<128x8xbf16>
    %cst_38 = arith.constant dense<0.000000e+00> : vector<128x144xf32>
    %41 = tpu.matmul %40, %38, %cst_38 {dimension_numbers = #tpu.dot_dimension_numbers<[1], [0], [0], [1], [0, 0, 1, 1], [], []>} : vector<128x8xbf16>, vector<8x144xbf16>, vector<128x144xf32> -> vector<128x144xf32>
    %42 = arith.addf %34, %41 : vector<128x144xf32>
    %c5 = arith.constant 5 : index
    %c0_39 = arith.constant 0 : index
    %c0_40 = arith.constant 0 : index
    %43 = vector.load %arg2[%c5, %c0_39, %c0_40] : memref<9x144x144xbf16, #tpu.memory_space<vmem>>, vector<1x144x144xbf16>
    %44 = vector.shape_cast %43 : vector<1x144x144xbf16> to vector<144x144xbf16>
    %cst_41 = arith.constant dense<0.000000e+00> : vector<8x144xf32>
    %45 = tpu.matmul %3, %44, %cst_41 {dimension_numbers = #tpu.dot_dimension_numbers<[1], [0], [0], [1], [0, 0, 1, 1], [], []>} : vector<8x144xbf16>, vector<144x144xbf16>, vector<8x144xf32> -> vector<8x144xf32>
    %46 = arith.truncf %45 : vector<8x144xf32> to vector<8x144xbf16>
    %c5_42 = arith.constant 5 : index
    %c0_43 = arith.constant 0 : index
    %c0_44 = arith.constant 0 : index
    %47 = vector.load %arg3[%c5_42, %c0_43, %c0_44] : memref<9x128x8xbf16, #tpu.memory_space<vmem>>, vector<1x128x8xbf16>
    %48 = vector.shape_cast %47 : vector<1x128x8xbf16> to vector<128x8xbf16>
    %cst_45 = arith.constant dense<0.000000e+00> : vector<128x144xf32>
    %49 = tpu.matmul %48, %46, %cst_45 {dimension_numbers = #tpu.dot_dimension_numbers<[1], [0], [0], [1], [0, 0, 1, 1], [], []>} : vector<128x8xbf16>, vector<8x144xbf16>, vector<128x144xf32> -> vector<128x144xf32>
    %50 = arith.addf %42, %49 : vector<128x144xf32>
    %c6 = arith.constant 6 : index
    %c0_46 = arith.constant 0 : index
    %c0_47 = arith.constant 0 : index
    %51 = vector.load %arg2[%c6, %c0_46, %c0_47] : memref<9x144x144xbf16, #tpu.memory_space<vmem>>, vector<1x144x144xbf16>
    %52 = vector.shape_cast %51 : vector<1x144x144xbf16> to vector<144x144xbf16>
    %cst_48 = arith.constant dense<0.000000e+00> : vector<8x144xf32>
    %53 = tpu.matmul %3, %52, %cst_48 {dimension_numbers = #tpu.dot_dimension_numbers<[1], [0], [0], [1], [0, 0, 1, 1], [], []>} : vector<8x144xbf16>, vector<144x144xbf16>, vector<8x144xf32> -> vector<8x144xf32>
    %54 = arith.truncf %53 : vector<8x144xf32> to vector<8x144xbf16>
    %c6_49 = arith.constant 6 : index
    %c0_50 = arith.constant 0 : index
    %c0_51 = arith.constant 0 : index
    %55 = vector.load %arg3[%c6_49, %c0_50, %c0_51] : memref<9x128x8xbf16, #tpu.memory_space<vmem>>, vector<1x128x8xbf16>
    %56 = vector.shape_cast %55 : vector<1x128x8xbf16> to vector<128x8xbf16>
    %cst_52 = arith.constant dense<0.000000e+00> : vector<128x144xf32>
    %57 = tpu.matmul %56, %54, %cst_52 {dimension_numbers = #tpu.dot_dimension_numbers<[1], [0], [0], [1], [0, 0, 1, 1], [], []>} : vector<128x8xbf16>, vector<8x144xbf16>, vector<128x144xf32> -> vector<128x144xf32>
    %58 = arith.addf %50, %57 : vector<128x144xf32>
    %c7 = arith.constant 7 : index
    %c0_53 = arith.constant 0 : index
    %c0_54 = arith.constant 0 : index
    %59 = vector.load %arg2[%c7, %c0_53, %c0_54] : memref<9x144x144xbf16, #tpu.memory_space<vmem>>, vector<1x144x144xbf16>
    %60 = vector.shape_cast %59 : vector<1x144x144xbf16> to vector<144x144xbf16>
    %cst_55 = arith.constant dense<0.000000e+00> : vector<8x144xf32>
    %61 = tpu.matmul %3, %60, %cst_55 {dimension_numbers = #tpu.dot_dimension_numbers<[1], [0], [0], [1], [0, 0, 1, 1], [], []>} : vector<8x144xbf16>, vector<144x144xbf16>, vector<8x144xf32> -> vector<8x144xf32>
    %62 = arith.truncf %61 : vector<8x144xf32> to vector<8x144xbf16>
    %c7_56 = arith.constant 7 : index
    %c0_57 = arith.constant 0 : index
    %c0_58 = arith.constant 0 : index
    %63 = vector.load %arg3[%c7_56, %c0_57, %c0_58] : memref<9x128x8xbf16, #tpu.memory_space<vmem>>, vector<1x128x8xbf16>
    %64 = vector.shape_cast %63 : vector<1x128x8xbf16> to vector<128x8xbf16>
    %cst_59 = arith.constant dense<0.000000e+00> : vector<128x144xf32>
    %65 = tpu.matmul %64, %62, %cst_59 {dimension_numbers = #tpu.dot_dimension_numbers<[1], [0], [0], [1], [0, 0, 1, 1], [], []>} : vector<128x8xbf16>, vector<8x144xbf16>, vector<128x144xf32> -> vector<128x144xf32>
    %66 = arith.addf %58, %65 : vector<128x144xf32>
    %c8 = arith.constant 8 : index
    %c0_60 = arith.constant 0 : index
    %c0_61 = arith.constant 0 : index
    %67 = vector.load %arg2[%c8, %c0_60, %c0_61] : memref<9x144x144xbf16, #tpu.memory_space<vmem>>, vector<1x144x144xbf16>
    %68 = vector.shape_cast %67 : vector<1x144x144xbf16> to vector<144x144xbf16>
    %cst_62 = arith.constant dense<0.000000e+00> : vector<8x144xf32>
    %69 = tpu.matmul %3, %68, %cst_62 {dimension_numbers = #tpu.dot_dimension_numbers<[1], [0], [0], [1], [0, 0, 1, 1], [], []>} : vector<8x144xbf16>, vector<144x144xbf16>, vector<8x144xf32> -> vector<8x144xf32>
    %70 = arith.truncf %69 : vector<8x144xf32> to vector<8x144xbf16>
    %c8_63 = arith.constant 8 : index
    %c0_64 = arith.constant 0 : index
    %c0_65 = arith.constant 0 : index
    %71 = vector.load %arg3[%c8_63, %c0_64, %c0_65] : memref<9x128x8xbf16, #tpu.memory_space<vmem>>, vector<1x128x8xbf16>
    %72 = vector.shape_cast %71 : vector<1x128x8xbf16> to vector<128x8xbf16>
    %cst_66 = arith.constant dense<0.000000e+00> : vector<128x144xf32>
    %73 = tpu.matmul %72, %70, %cst_66 {dimension_numbers = #tpu.dot_dimension_numbers<[1], [0], [0], [1], [0, 0, 1, 1], [], []>} : vector<128x8xbf16>, vector<8x144xbf16>, vector<128x144xf32> -> vector<128x144xf32>
    %74 = arith.addf %66, %73 : vector<128x144xf32>
    %c0_67 = arith.constant 0 : index
    %c0_68 = arith.constant 0 : index
    %75 = vector.load %arg4[%c0_67, %c0_68] : memref<128x1xf32, #tpu.memory_space<vmem>>, vector<128x1xf32>
    %76 = vector.broadcast %75 : vector<128x1xf32> to vector<128x144xf32>
    %77 = arith.addf %74, %76 : vector<128x144xf32>
    %cst_69 = arith.constant 0.000000e+00 : f32
    %78 = vector.broadcast %cst_69 : f32 to vector<128x144xf32>
    %79 = arith.maximumf %77, %78 : vector<128x144xf32>
    %80 = arith.truncf %79 : vector<128x144xf32> to vector<128x144xbf16>
    %c0_70 = arith.constant 0 : index
    %c0_71 = arith.constant 0 : index
    %c0_72 = arith.constant 0 : index
    %81 = vector.load %arg5[%c0_70, %c0_71, %c0_72] : memref<9x144x36xbf16, #tpu.memory_space<vmem>>, vector<1x144x36xbf16>
    %82 = vector.shape_cast %81 : vector<1x144x36xbf16> to vector<144x36xbf16>
    %cst_73 = arith.constant dense<0.000000e+00> : vector<128x36xf32>
    %83 = tpu.matmul %80, %82, %cst_73 {dimension_numbers = #tpu.dot_dimension_numbers<[1], [0], [0], [1], [0, 0, 1, 1], [], []>} : vector<128x144xbf16>, vector<144x36xbf16>, vector<128x36xf32> -> vector<128x36xf32>
    %84 = arith.truncf %83 : vector<128x36xf32> to vector<128x36xbf16>
    %c0_74 = arith.constant 0 : index
    %c0_75 = arith.constant 0 : index
    %c0_76 = arith.constant 0 : index
    %85 = vector.load %arg6[%c0_74, %c0_75, %c0_76] : memref<9x128x128xbf16, #tpu.memory_space<vmem>>, vector<1x128x128xbf16>
    %86 = vector.shape_cast %85 : vector<1x128x128xbf16> to vector<128x128xbf16>
    %cst_77 = arith.constant dense<0.000000e+00> : vector<128x36xf32>
    %87 = tpu.matmul %86, %84, %cst_77 {dimension_numbers = #tpu.dot_dimension_numbers<[1], [0], [0], [1], [0, 0, 1, 1], [], []>} : vector<128x128xbf16>, vector<128x36xbf16>, vector<128x36xf32> -> vector<128x36xf32>
    %c1_78 = arith.constant 1 : index
    %c0_79 = arith.constant 0 : index
    %c0_80 = arith.constant 0 : index
    %88 = vector.load %arg5[%c1_78, %c0_79, %c0_80] : memref<9x144x36xbf16, #tpu.memory_space<vmem>>, vector<1x144x36xbf16>
    %89 = vector.shape_cast %88 : vector<1x144x36xbf16> to vector<144x36xbf16>
    %cst_81 = arith.constant dense<0.000000e+00> : vector<128x36xf32>
    %90 = tpu.matmul %80, %89, %cst_81 {dimension_numbers = #tpu.dot_dimension_numbers<[1], [0], [0], [1], [0, 0, 1, 1], [], []>} : vector<128x144xbf16>, vector<144x36xbf16>, vector<128x36xf32> -> vector<128x36xf32>
    %91 = arith.truncf %90 : vector<128x36xf32> to vector<128x36xbf16>
    %c1_82 = arith.constant 1 : index
    %c0_83 = arith.constant 0 : index
    %c0_84 = arith.constant 0 : index
    %92 = vector.load %arg6[%c1_82, %c0_83, %c0_84] : memref<9x128x128xbf16, #tpu.memory_space<vmem>>, vector<1x128x128xbf16>
    %93 = vector.shape_cast %92 : vector<1x128x128xbf16> to vector<128x128xbf16>
    %cst_85 = arith.constant dense<0.000000e+00> : vector<128x36xf32>
    %94 = tpu.matmul %93, %91, %cst_85 {dimension_numbers = #tpu.dot_dimension_numbers<[1], [0], [0], [1], [0, 0, 1, 1], [], []>} : vector<128x128xbf16>, vector<128x36xbf16>, vector<128x36xf32> -> vector<128x36xf32>
    %95 = arith.addf %87, %94 : vector<128x36xf32>
    %c2_86 = arith.constant 2 : index
    %c0_87 = arith.constant 0 : index
    %c0_88 = arith.constant 0 : index
    %96 = vector.load %arg5[%c2_86, %c0_87, %c0_88] : memref<9x144x36xbf16, #tpu.memory_space<vmem>>, vector<1x144x36xbf16>
    %97 = vector.shape_cast %96 : vector<1x144x36xbf16> to vector<144x36xbf16>
    %cst_89 = arith.constant dense<0.000000e+00> : vector<128x36xf32>
    %98 = tpu.matmul %80, %97, %cst_89 {dimension_numbers = #tpu.dot_dimension_numbers<[1], [0], [0], [1], [0, 0, 1, 1], [], []>} : vector<128x144xbf16>, vector<144x36xbf16>, vector<128x36xf32> -> vector<128x36xf32>
    %99 = arith.truncf %98 : vector<128x36xf32> to vector<128x36xbf16>
    %c2_90 = arith.constant 2 : index
    %c0_91 = arith.constant 0 : index
    %c0_92 = arith.constant 0 : index
    %100 = vector.load %arg6[%c2_90, %c0_91, %c0_92] : memref<9x128x128xbf16, #tpu.memory_space<vmem>>, vector<1x128x128xbf16>
    %101 = vector.shape_cast %100 : vector<1x128x128xbf16> to vector<128x128xbf16>
    %cst_93 = arith.constant dense<0.000000e+00> : vector<128x36xf32>
    %102 = tpu.matmul %101, %99, %cst_93 {dimension_numbers = #tpu.dot_dimension_numbers<[1], [0], [0], [1], [0, 0, 1, 1], [], []>} : vector<128x128xbf16>, vector<128x36xbf16>, vector<128x36xf32> -> vector<128x36xf32>
    %103 = arith.addf %95, %102 : vector<128x36xf32>
    %c3_94 = arith.constant 3 : index
    %c0_95 = arith.constant 0 : index
    %c0_96 = arith.constant 0 : index
    %104 = vector.load %arg5[%c3_94, %c0_95, %c0_96] : memref<9x144x36xbf16, #tpu.memory_space<vmem>>, vector<1x144x36xbf16>
    %105 = vector.shape_cast %104 : vector<1x144x36xbf16> to vector<144x36xbf16>
    %cst_97 = arith.constant dense<0.000000e+00> : vector<128x36xf32>
    %106 = tpu.matmul %80, %105, %cst_97 {dimension_numbers = #tpu.dot_dimension_numbers<[1], [0], [0], [1], [0, 0, 1, 1], [], []>} : vector<128x144xbf16>, vector<144x36xbf16>, vector<128x36xf32> -> vector<128x36xf32>
    %107 = arith.truncf %106 : vector<128x36xf32> to vector<128x36xbf16>
    %c3_98 = arith.constant 3 : index
    %c0_99 = arith.constant 0 : index
    %c0_100 = arith.constant 0 : index
    %108 = vector.load %arg6[%c3_98, %c0_99, %c0_100] : memref<9x128x128xbf16, #tpu.memory_space<vmem>>, vector<1x128x128xbf16>
    %109 = vector.shape_cast %108 : vector<1x128x128xbf16> to vector<128x128xbf16>
    %cst_101 = arith.constant dense<0.000000e+00> : vector<128x36xf32>
    %110 = tpu.matmul %109, %107, %cst_101 {dimension_numbers = #tpu.dot_dimension_numbers<[1], [0], [0], [1], [0, 0, 1, 1], [], []>} : vector<128x128xbf16>, vector<128x36xbf16>, vector<128x36xf32> -> vector<128x36xf32>
    %111 = arith.addf %103, %110 : vector<128x36xf32>
    %c4_102 = arith.constant 4 : index
    %c0_103 = arith.constant 0 : index
    %c0_104 = arith.constant 0 : index
    %112 = vector.load %arg5[%c4_102, %c0_103, %c0_104] : memref<9x144x36xbf16, #tpu.memory_space<vmem>>, vector<1x144x36xbf16>
    %113 = vector.shape_cast %112 : vector<1x144x36xbf16> to vector<144x36xbf16>
    %cst_105 = arith.constant dense<0.000000e+00> : vector<128x36xf32>
    %114 = tpu.matmul %80, %113, %cst_105 {dimension_numbers = #tpu.dot_dimension_numbers<[1], [0], [0], [1], [0, 0, 1, 1], [], []>} : vector<128x144xbf16>, vector<144x36xbf16>, vector<128x36xf32> -> vector<128x36xf32>
    %115 = arith.truncf %114 : vector<128x36xf32> to vector<128x36xbf16>
    %c4_106 = arith.constant 4 : index
    %c0_107 = arith.constant 0 : index
    %c0_108 = arith.constant 0 : index
    %116 = vector.load %arg6[%c4_106, %c0_107, %c0_108] : memref<9x128x128xbf16, #tpu.memory_space<vmem>>, vector<1x128x128xbf16>
    %117 = vector.shape_cast %116 : vector<1x128x128xbf16> to vector<128x128xbf16>
    %cst_109 = arith.constant dense<0.000000e+00> : vector<128x36xf32>
    %118 = tpu.matmul %117, %115, %cst_109 {dimension_numbers = #tpu.dot_dimension_numbers<[1], [0], [0], [1], [0, 0, 1, 1], [], []>} : vector<128x128xbf16>, vector<128x36xbf16>, vector<128x36xf32> -> vector<128x36xf32>
    %119 = arith.addf %111, %118 : vector<128x36xf32>
    %c5_110 = arith.constant 5 : index
    %c0_111 = arith.constant 0 : index
    %c0_112 = arith.constant 0 : index
    %120 = vector.load %arg5[%c5_110, %c0_111, %c0_112] : memref<9x144x36xbf16, #tpu.memory_space<vmem>>, vector<1x144x36xbf16>
    %121 = vector.shape_cast %120 : vector<1x144x36xbf16> to vector<144x36xbf16>
    %cst_113 = arith.constant dense<0.000000e+00> : vector<128x36xf32>
    %122 = tpu.matmul %80, %121, %cst_113 {dimension_numbers = #tpu.dot_dimension_numbers<[1], [0], [0], [1], [0, 0, 1, 1], [], []>} : vector<128x144xbf16>, vector<144x36xbf16>, vector<128x36xf32> -> vector<128x36xf32>
    %123 = arith.truncf %122 : vector<128x36xf32> to vector<128x36xbf16>
    %c5_114 = arith.constant 5 : index
    %c0_115 = arith.constant 0 : index
    %c0_116 = arith.constant 0 : index
    %124 = vector.load %arg6[%c5_114, %c0_115, %c0_116] : memref<9x128x128xbf16, #tpu.memory_space<vmem>>, vector<1x128x128xbf16>
    %125 = vector.shape_cast %124 : vector<1x128x128xbf16> to vector<128x128xbf16>
    %cst_117 = arith.constant dense<0.000000e+00> : vector<128x36xf32>
    %126 = tpu.matmul %125, %123, %cst_117 {dimension_numbers = #tpu.dot_dimension_numbers<[1], [0], [0], [1], [0, 0, 1, 1], [], []>} : vector<128x128xbf16>, vector<128x36xbf16>, vector<128x36xf32> -> vector<128x36xf32>
    %127 = arith.addf %119, %126 : vector<128x36xf32>
    %c6_118 = arith.constant 6 : index
    %c0_119 = arith.constant 0 : index
    %c0_120 = arith.constant 0 : index
    %128 = vector.load %arg5[%c6_118, %c0_119, %c0_120] : memref<9x144x36xbf16, #tpu.memory_space<vmem>>, vector<1x144x36xbf16>
    %129 = vector.shape_cast %128 : vector<1x144x36xbf16> to vector<144x36xbf16>
    %cst_121 = arith.constant dense<0.000000e+00> : vector<128x36xf32>
    %130 = tpu.matmul %80, %129, %cst_121 {dimension_numbers = #tpu.dot_dimension_numbers<[1], [0], [0], [1], [0, 0, 1, 1], [], []>} : vector<128x144xbf16>, vector<144x36xbf16>, vector<128x36xf32> -> vector<128x36xf32>
    %131 = arith.truncf %130 : vector<128x36xf32> to vector<128x36xbf16>
    %c6_122 = arith.constant 6 : index
    %c0_123 = arith.constant 0 : index
    %c0_124 = arith.constant 0 : index
    %132 = vector.load %arg6[%c6_122, %c0_123, %c0_124] : memref<9x128x128xbf16, #tpu.memory_space<vmem>>, vector<1x128x128xbf16>
    %133 = vector.shape_cast %132 : vector<1x128x128xbf16> to vector<128x128xbf16>
    %cst_125 = arith.constant dense<0.000000e+00> : vector<128x36xf32>
    %134 = tpu.matmul %133, %131, %cst_125 {dimension_numbers = #tpu.dot_dimension_numbers<[1], [0], [0], [1], [0, 0, 1, 1], [], []>} : vector<128x128xbf16>, vector<128x36xbf16>, vector<128x36xf32> -> vector<128x36xf32>
    %135 = arith.addf %127, %134 : vector<128x36xf32>
    %c7_126 = arith.constant 7 : index
    %c0_127 = arith.constant 0 : index
    %c0_128 = arith.constant 0 : index
    %136 = vector.load %arg5[%c7_126, %c0_127, %c0_128] : memref<9x144x36xbf16, #tpu.memory_space<vmem>>, vector<1x144x36xbf16>
    %137 = vector.shape_cast %136 : vector<1x144x36xbf16> to vector<144x36xbf16>
    %cst_129 = arith.constant dense<0.000000e+00> : vector<128x36xf32>
    %138 = tpu.matmul %80, %137, %cst_129 {dimension_numbers = #tpu.dot_dimension_numbers<[1], [0], [0], [1], [0, 0, 1, 1], [], []>} : vector<128x144xbf16>, vector<144x36xbf16>, vector<128x36xf32> -> vector<128x36xf32>
    %139 = arith.truncf %138 : vector<128x36xf32> to vector<128x36xbf16>
    %c7_130 = arith.constant 7 : index
    %c0_131 = arith.constant 0 : index
    %c0_132 = arith.constant 0 : index
    %140 = vector.load %arg6[%c7_130, %c0_131, %c0_132] : memref<9x128x128xbf16, #tpu.memory_space<vmem>>, vector<1x128x128xbf16>
    %141 = vector.shape_cast %140 : vector<1x128x128xbf16> to vector<128x128xbf16>
    %cst_133 = arith.constant dense<0.000000e+00> : vector<128x36xf32>
    %142 = tpu.matmul %141, %139, %cst_133 {dimension_numbers = #tpu.dot_dimension_numbers<[1], [0], [0], [1], [0, 0, 1, 1], [], []>} : vector<128x128xbf16>, vector<128x36xbf16>, vector<128x36xf32> -> vector<128x36xf32>
    %143 = arith.addf %135, %142 : vector<128x36xf32>
    %c8_134 = arith.constant 8 : index
    %c0_135 = arith.constant 0 : index
    %c0_136 = arith.constant 0 : index
    %144 = vector.load %arg5[%c8_134, %c0_135, %c0_136] : memref<9x144x36xbf16, #tpu.memory_space<vmem>>, vector<1x144x36xbf16>
    %145 = vector.shape_cast %144 : vector<1x144x36xbf16> to vector<144x36xbf16>
    %cst_137 = arith.constant dense<0.000000e+00> : vector<128x36xf32>
    %146 = tpu.matmul %80, %145, %cst_137 {dimension_numbers = #tpu.dot_dimension_numbers<[1], [0], [0], [1], [0, 0, 1, 1], [], []>} : vector<128x144xbf16>, vector<144x36xbf16>, vector<128x36xf32> -> vector<128x36xf32>
    %147 = arith.truncf %146 : vector<128x36xf32> to vector<128x36xbf16>
    %c8_138 = arith.constant 8 : index
    %c0_139 = arith.constant 0 : index
    %c0_140 = arith.constant 0 : index
    %148 = vector.load %arg6[%c8_138, %c0_139, %c0_140] : memref<9x128x128xbf16, #tpu.memory_space<vmem>>, vector<1x128x128xbf16>
    %149 = vector.shape_cast %148 : vector<1x128x128xbf16> to vector<128x128xbf16>
    %cst_141 = arith.constant dense<0.000000e+00> : vector<128x36xf32>
    %150 = tpu.matmul %149, %147, %cst_141 {dimension_numbers = #tpu.dot_dimension_numbers<[1], [0], [0], [1], [0, 0, 1, 1], [], []>} : vector<128x128xbf16>, vector<128x36xbf16>, vector<128x36xf32> -> vector<128x36xf32>
    %151 = arith.addf %143, %150 : vector<128x36xf32>
    %c0_142 = arith.constant 0 : index
    %c0_143 = arith.constant 0 : index
    %152 = vector.load %arg7[%c0_142, %c0_143] : memref<128x1xf32, #tpu.memory_space<vmem>>, vector<128x1xf32>
    %153 = vector.broadcast %152 : vector<128x1xf32> to vector<128x36xf32>
    %154 = arith.addf %151, %153 : vector<128x36xf32>
    %cst_144 = arith.constant 0.000000e+00 : f32
    %155 = vector.broadcast %cst_144 : f32 to vector<128x36xf32>
    %156 = arith.maximumf %154, %155 : vector<128x36xf32>
    %157 = arith.truncf %156 : vector<128x36xf32> to vector<128x36xbf16>
    %c0_145 = arith.constant 0 : index
    %c0_146 = arith.constant 0 : index
    %c0_147 = arith.constant 0 : index
    %158 = vector.load %arg8[%c0_145, %c0_146, %c0_147] : memref<9x36x9xbf16, #tpu.memory_space<vmem>>, vector<1x36x9xbf16>
    %159 = vector.shape_cast %158 : vector<1x36x9xbf16> to vector<36x9xbf16>
    %cst_148 = arith.constant dense<0.000000e+00> : vector<128x9xf32>
    %160 = tpu.matmul %157, %159, %cst_148 {dimension_numbers = #tpu.dot_dimension_numbers<[1], [0], [0], [1], [0, 0, 1, 1], [], []>} : vector<128x36xbf16>, vector<36x9xbf16>, vector<128x9xf32> -> vector<128x9xf32>
    %161 = arith.truncf %160 : vector<128x9xf32> to vector<128x9xbf16>
    %c0_149 = arith.constant 0 : index
    %c0_150 = arith.constant 0 : index
    %c0_151 = arith.constant 0 : index
    %162 = vector.load %arg9[%c0_149, %c0_150, %c0_151] : memref<9x128x128xbf16, #tpu.memory_space<vmem>>, vector<1x128x128xbf16>
    %163 = vector.shape_cast %162 : vector<1x128x128xbf16> to vector<128x128xbf16>
    %cst_152 = arith.constant dense<0.000000e+00> : vector<128x9xf32>
    %164 = tpu.matmul %163, %161, %cst_152 {dimension_numbers = #tpu.dot_dimension_numbers<[1], [0], [0], [1], [0, 0, 1, 1], [], []>} : vector<128x128xbf16>, vector<128x9xbf16>, vector<128x9xf32> -> vector<128x9xf32>
    %c1_153 = arith.constant 1 : index
    %c0_154 = arith.constant 0 : index
    %c0_155 = arith.constant 0 : index
    %165 = vector.load %arg8[%c1_153, %c0_154, %c0_155] : memref<9x36x9xbf16, #tpu.memory_space<vmem>>, vector<1x36x9xbf16>
    %166 = vector.shape_cast %165 : vector<1x36x9xbf16> to vector<36x9xbf16>
    %cst_156 = arith.constant dense<0.000000e+00> : vector<128x9xf32>
    %167 = tpu.matmul %157, %166, %cst_156 {dimension_numbers = #tpu.dot_dimension_numbers<[1], [0], [0], [1], [0, 0, 1, 1], [], []>} : vector<128x36xbf16>, vector<36x9xbf16>, vector<128x9xf32> -> vector<128x9xf32>
    %168 = arith.truncf %167 : vector<128x9xf32> to vector<128x9xbf16>
    %c1_157 = arith.constant 1 : index
    %c0_158 = arith.constant 0 : index
    %c0_159 = arith.constant 0 : index
    %169 = vector.load %arg9[%c1_157, %c0_158, %c0_159] : memref<9x128x128xbf16, #tpu.memory_space<vmem>>, vector<1x128x128xbf16>
    %170 = vector.shape_cast %169 : vector<1x128x128xbf16> to vector<128x128xbf16>
    %cst_160 = arith.constant dense<0.000000e+00> : vector<128x9xf32>
    %171 = tpu.matmul %170, %168, %cst_160 {dimension_numbers = #tpu.dot_dimension_numbers<[1], [0], [0], [1], [0, 0, 1, 1], [], []>} : vector<128x128xbf16>, vector<128x9xbf16>, vector<128x9xf32> -> vector<128x9xf32>
    %172 = arith.addf %164, %171 : vector<128x9xf32>
    %c2_161 = arith.constant 2 : index
    %c0_162 = arith.constant 0 : index
    %c0_163 = arith.constant 0 : index
    %173 = vector.load %arg8[%c2_161, %c0_162, %c0_163] : memref<9x36x9xbf16, #tpu.memory_space<vmem>>, vector<1x36x9xbf16>
    %174 = vector.shape_cast %173 : vector<1x36x9xbf16> to vector<36x9xbf16>
    %cst_164 = arith.constant dense<0.000000e+00> : vector<128x9xf32>
    %175 = tpu.matmul %157, %174, %cst_164 {dimension_numbers = #tpu.dot_dimension_numbers<[1], [0], [0], [1], [0, 0, 1, 1], [], []>} : vector<128x36xbf16>, vector<36x9xbf16>, vector<128x9xf32> -> vector<128x9xf32>
    %176 = arith.truncf %175 : vector<128x9xf32> to vector<128x9xbf16>
    %c2_165 = arith.constant 2 : index
    %c0_166 = arith.constant 0 : index
    %c0_167 = arith.constant 0 : index
    %177 = vector.load %arg9[%c2_165, %c0_166, %c0_167] : memref<9x128x128xbf16, #tpu.memory_space<vmem>>, vector<1x128x128xbf16>
    %178 = vector.shape_cast %177 : vector<1x128x128xbf16> to vector<128x128xbf16>
    %cst_168 = arith.constant dense<0.000000e+00> : vector<128x9xf32>
    %179 = tpu.matmul %178, %176, %cst_168 {dimension_numbers = #tpu.dot_dimension_numbers<[1], [0], [0], [1], [0, 0, 1, 1], [], []>} : vector<128x128xbf16>, vector<128x9xbf16>, vector<128x9xf32> -> vector<128x9xf32>
    %180 = arith.addf %172, %179 : vector<128x9xf32>
    %c3_169 = arith.constant 3 : index
    %c0_170 = arith.constant 0 : index
    %c0_171 = arith.constant 0 : index
    %181 = vector.load %arg8[%c3_169, %c0_170, %c0_171] : memref<9x36x9xbf16, #tpu.memory_space<vmem>>, vector<1x36x9xbf16>
    %182 = vector.shape_cast %181 : vector<1x36x9xbf16> to vector<36x9xbf16>
    %cst_172 = arith.constant dense<0.000000e+00> : vector<128x9xf32>
    %183 = tpu.matmul %157, %182, %cst_172 {dimension_numbers = #tpu.dot_dimension_numbers<[1], [0], [0], [1], [0, 0, 1, 1], [], []>} : vector<128x36xbf16>, vector<36x9xbf16>, vector<128x9xf32> -> vector<128x9xf32>
    %184 = arith.truncf %183 : vector<128x9xf32> to vector<128x9xbf16>
    %c3_173 = arith.constant 3 : index
    %c0_174 = arith.constant 0 : index
    %c0_175 = arith.constant 0 : index
    %185 = vector.load %arg9[%c3_173, %c0_174, %c0_175] : memref<9x128x128xbf16, #tpu.memory_space<vmem>>, vector<1x128x128xbf16>
    %186 = vector.shape_cast %185 : vector<1x128x128xbf16> to vector<128x128xbf16>
    %cst_176 = arith.constant dense<0.000000e+00> : vector<128x9xf32>
    %187 = tpu.matmul %186, %184, %cst_176 {dimension_numbers = #tpu.dot_dimension_numbers<[1], [0], [0], [1], [0, 0, 1, 1], [], []>} : vector<128x128xbf16>, vector<128x9xbf16>, vector<128x9xf32> -> vector<128x9xf32>
    %188 = arith.addf %180, %187 : vector<128x9xf32>
    %c4_177 = arith.constant 4 : index
    %c0_178 = arith.constant 0 : index
    %c0_179 = arith.constant 0 : index
    %189 = vector.load %arg8[%c4_177, %c0_178, %c0_179] : memref<9x36x9xbf16, #tpu.memory_space<vmem>>, vector<1x36x9xbf16>
    %190 = vector.shape_cast %189 : vector<1x36x9xbf16> to vector<36x9xbf16>
    %cst_180 = arith.constant dense<0.000000e+00> : vector<128x9xf32>
    %191 = tpu.matmul %157, %190, %cst_180 {dimension_numbers = #tpu.dot_dimension_numbers<[1], [0], [0], [1], [0, 0, 1, 1], [], []>} : vector<128x36xbf16>, vector<36x9xbf16>, vector<128x9xf32> -> vector<128x9xf32>
    %192 = arith.truncf %191 : vector<128x9xf32> to vector<128x9xbf16>
    %c4_181 = arith.constant 4 : index
    %c0_182 = arith.constant 0 : index
    %c0_183 = arith.constant 0 : index
    %193 = vector.load %arg9[%c4_181, %c0_182, %c0_183] : memref<9x128x128xbf16, #tpu.memory_space<vmem>>, vector<1x128x128xbf16>
    %194 = vector.shape_cast %193 : vector<1x128x128xbf16> to vector<128x128xbf16>
    %cst_184 = arith.constant dense<0.000000e+00> : vector<128x9xf32>
    %195 = tpu.matmul %194, %192, %cst_184 {dimension_numbers = #tpu.dot_dimension_numbers<[1], [0], [0], [1], [0, 0, 1, 1], [], []>} : vector<128x128xbf16>, vector<128x9xbf16>, vector<128x9xf32> -> vector<128x9xf32>
    %196 = arith.addf %188, %195 : vector<128x9xf32>
    %c5_185 = arith.constant 5 : index
    %c0_186 = arith.constant 0 : index
    %c0_187 = arith.constant 0 : index
    %197 = vector.load %arg8[%c5_185, %c0_186, %c0_187] : memref<9x36x9xbf16, #tpu.memory_space<vmem>>, vector<1x36x9xbf16>
    %198 = vector.shape_cast %197 : vector<1x36x9xbf16> to vector<36x9xbf16>
    %cst_188 = arith.constant dense<0.000000e+00> : vector<128x9xf32>
    %199 = tpu.matmul %157, %198, %cst_188 {dimension_numbers = #tpu.dot_dimension_numbers<[1], [0], [0], [1], [0, 0, 1, 1], [], []>} : vector<128x36xbf16>, vector<36x9xbf16>, vector<128x9xf32> -> vector<128x9xf32>
    %200 = arith.truncf %199 : vector<128x9xf32> to vector<128x9xbf16>
    %c5_189 = arith.constant 5 : index
    %c0_190 = arith.constant 0 : index
    %c0_191 = arith.constant 0 : index
    %201 = vector.load %arg9[%c5_189, %c0_190, %c0_191] : memref<9x128x128xbf16, #tpu.memory_space<vmem>>, vector<1x128x128xbf16>
    %202 = vector.shape_cast %201 : vector<1x128x128xbf16> to vector<128x128xbf16>
    %cst_192 = arith.constant dense<0.000000e+00> : vector<128x9xf32>
    %203 = tpu.matmul %202, %200, %cst_192 {dimension_numbers = #tpu.dot_dimension_numbers<[1], [0], [0], [1], [0, 0, 1, 1], [], []>} : vector<128x128xbf16>, vector<128x9xbf16>, vector<128x9xf32> -> vector<128x9xf32>
    %204 = arith.addf %196, %203 : vector<128x9xf32>
    %c6_193 = arith.constant 6 : index
    %c0_194 = arith.constant 0 : index
    %c0_195 = arith.constant 0 : index
    %205 = vector.load %arg8[%c6_193, %c0_194, %c0_195] : memref<9x36x9xbf16, #tpu.memory_space<vmem>>, vector<1x36x9xbf16>
    %206 = vector.shape_cast %205 : vector<1x36x9xbf16> to vector<36x9xbf16>
    %cst_196 = arith.constant dense<0.000000e+00> : vector<128x9xf32>
    %207 = tpu.matmul %157, %206, %cst_196 {dimension_numbers = #tpu.dot_dimension_numbers<[1], [0], [0], [1], [0, 0, 1, 1], [], []>} : vector<128x36xbf16>, vector<36x9xbf16>, vector<128x9xf32> -> vector<128x9xf32>
    %208 = arith.truncf %207 : vector<128x9xf32> to vector<128x9xbf16>
    %c6_197 = arith.constant 6 : index
    %c0_198 = arith.constant 0 : index
    %c0_199 = arith.constant 0 : index
    %209 = vector.load %arg9[%c6_197, %c0_198, %c0_199] : memref<9x128x128xbf16, #tpu.memory_space<vmem>>, vector<1x128x128xbf16>
    %210 = vector.shape_cast %209 : vector<1x128x128xbf16> to vector<128x128xbf16>
    %cst_200 = arith.constant dense<0.000000e+00> : vector<128x9xf32>
    %211 = tpu.matmul %210, %208, %cst_200 {dimension_numbers = #tpu.dot_dimension_numbers<[1], [0], [0], [1], [0, 0, 1, 1], [], []>} : vector<128x128xbf16>, vector<128x9xbf16>, vector<128x9xf32> -> vector<128x9xf32>
    %212 = arith.addf %204, %211 : vector<128x9xf32>
    %c7_201 = arith.constant 7 : index
    %c0_202 = arith.constant 0 : index
    %c0_203 = arith.constant 0 : index
    %213 = vector.load %arg8[%c7_201, %c0_202, %c0_203] : memref<9x36x9xbf16, #tpu.memory_space<vmem>>, vector<1x36x9xbf16>
    %214 = vector.shape_cast %213 : vector<1x36x9xbf16> to vector<36x9xbf16>
    %cst_204 = arith.constant dense<0.000000e+00> : vector<128x9xf32>
    %215 = tpu.matmul %157, %214, %cst_204 {dimension_numbers = #tpu.dot_dimension_numbers<[1], [0], [0], [1], [0, 0, 1, 1], [], []>} : vector<128x36xbf16>, vector<36x9xbf16>, vector<128x9xf32> -> vector<128x9xf32>
    %216 = arith.truncf %215 : vector<128x9xf32> to vector<128x9xbf16>
    %c7_205 = arith.constant 7 : index
    %c0_206 = arith.constant 0 : index
    %c0_207 = arith.constant 0 : index
    %217 = vector.load %arg9[%c7_205, %c0_206, %c0_207] : memref<9x128x128xbf16, #tpu.memory_space<vmem>>, vector<1x128x128xbf16>
    %218 = vector.shape_cast %217 : vector<1x128x128xbf16> to vector<128x128xbf16>
    %cst_208 = arith.constant dense<0.000000e+00> : vector<128x9xf32>
    %219 = tpu.matmul %218, %216, %cst_208 {dimension_numbers = #tpu.dot_dimension_numbers<[1], [0], [0], [1], [0, 0, 1, 1], [], []>} : vector<128x128xbf16>, vector<128x9xbf16>, vector<128x9xf32> -> vector<128x9xf32>
    %220 = arith.addf %212, %219 : vector<128x9xf32>
    %c8_209 = arith.constant 8 : index
    %c0_210 = arith.constant 0 : index
    %c0_211 = arith.constant 0 : index
    %221 = vector.load %arg8[%c8_209, %c0_210, %c0_211] : memref<9x36x9xbf16, #tpu.memory_space<vmem>>, vector<1x36x9xbf16>
    %222 = vector.shape_cast %221 : vector<1x36x9xbf16> to vector<36x9xbf16>
    %cst_212 = arith.constant dense<0.000000e+00> : vector<128x9xf32>
    %223 = tpu.matmul %157, %222, %cst_212 {dimension_numbers = #tpu.dot_dimension_numbers<[1], [0], [0], [1], [0, 0, 1, 1], [], []>} : vector<128x36xbf16>, vector<36x9xbf16>, vector<128x9xf32> -> vector<128x9xf32>
    %224 = arith.truncf %223 : vector<128x9xf32> to vector<128x9xbf16>
    %c8_213 = arith.constant 8 : index
    %c0_214 = arith.constant 0 : index
    %c0_215 = arith.constant 0 : index
    %225 = vector.load %arg9[%c8_213, %c0_214, %c0_215] : memref<9x128x128xbf16, #tpu.memory_space<vmem>>, vector<1x128x128xbf16>
    %226 = vector.shape_cast %225 : vector<1x128x128xbf16> to vector<128x128xbf16>
    %cst_216 = arith.constant dense<0.000000e+00> : vector<128x9xf32>
    %227 = tpu.matmul %226, %224, %cst_216 {dimension_numbers = #tpu.dot_dimension_numbers<[1], [0], [0], [1], [0, 0, 1, 1], [], []>} : vector<128x128xbf16>, vector<128x9xbf16>, vector<128x9xf32> -> vector<128x9xf32>
    %228 = arith.addf %220, %227 : vector<128x9xf32>
    %c0_217 = arith.constant 0 : index
    %c0_218 = arith.constant 0 : index
    %229 = vector.load %arg10[%c0_217, %c0_218] : memref<128x1xf32, #tpu.memory_space<vmem>>, vector<128x1xf32>
    %230 = vector.broadcast %229 : vector<128x1xf32> to vector<128x9xf32>
    %231 = arith.addf %228, %230 : vector<128x9xf32>
    %cst_219 = arith.constant 0.000000e+00 : f32
    %232 = vector.broadcast %cst_219 : f32 to vector<128x9xf32>
    %233 = arith.maximumf %231, %232 : vector<128x9xf32>
    %234 = arith.truncf %233 : vector<128x9xf32> to vector<128x9xbf16>
    %c0_220 = arith.constant 0 : index
    %c0_221 = arith.constant 0 : index
    %235 = vector.load %arg11[%c0_220, %c0_221] : memref<6x128xbf16, #tpu.memory_space<vmem>>, vector<6x128xbf16>
    %cst_222 = arith.constant dense<0.000000e+00> : vector<6x144xf32>
    %236 = tpu.matmul %235, %80, %cst_222 {dimension_numbers = #tpu.dot_dimension_numbers<[1], [0], [0], [1], [0, 0, 1, 1], [], []>} : vector<6x128xbf16>, vector<128x144xbf16>, vector<6x144xf32> -> vector<6x144xf32>
    %c0_223 = arith.constant 0 : index
    %c0_224 = arith.constant 0 : index
    %237 = vector.load %arg12[%c0_223, %c0_224] : memref<6x1xf32, #tpu.memory_space<vmem>>, vector<6x1xf32>
    %238 = vector.broadcast %237 : vector<6x1xf32> to vector<6x144xf32>
    %239 = arith.addf %236, %238 : vector<6x144xf32>
    %240 = vector.extract_strided_slice %239 {offsets = [0, 0], sizes = [1, 144], strides = [1, 1]} : vector<6x144xf32> to vector<1x144xf32>
    %c0_225 = arith.constant 0 : index
    %c0_226 = arith.constant 0 : index
    %241 = vector.load %arg20[%c0_225, %c0_226] : memref<1x1280xf32, #tpu.memory_space<vmem>>, vector<1x144xf32>
    tpu.vector_store %arg20[%c0_225, %c0_226], %240 {strides = array<i32>} : memref<1x1280xf32, #tpu.memory_space<vmem>>, vector<1x144xf32>,
    %242 = vector.extract_strided_slice %239 {offsets = [1, 0], sizes = [1, 144], strides = [1, 1]} : vector<6x144xf32> to vector<1x144xf32>
    %c0_227 = arith.constant 0 : index
    %c144 = arith.constant 144 : index
    %243 = vector.load %arg20[%c0_227, %c144] : memref<1x1280xf32, #tpu.memory_space<vmem>>, vector<1x144xf32>
    tpu.vector_store %arg20[%c0_227, %c144], %242 {strides = array<i32>} : memref<1x1280xf32, #tpu.memory_space<vmem>>, vector<1x144xf32>,
    %244 = vector.extract_strided_slice %239 {offsets = [2, 0], sizes = [1, 144], strides = [1, 1]} : vector<6x144xf32> to vector<1x144xf32>
    %c0_228 = arith.constant 0 : index
    %c288 = arith.constant 288 : index
    %245 = vector.load %arg20[%c0_228, %c288] : memref<1x1280xf32, #tpu.memory_space<vmem>>, vector<1x144xf32>
    tpu.vector_store %arg20[%c0_228, %c288], %244 {strides = array<i32>} : memref<1x1280xf32, #tpu.memory_space<vmem>>, vector<1x144xf32>,
    %246 = vector.extract_strided_slice %239 {offsets = [3, 0], sizes = [1, 144], strides = [1, 1]} : vector<6x144xf32> to vector<1x144xf32>
    %c0_229 = arith.constant 0 : index
    %c432 = arith.constant 432 : index
    %247 = vector.load %arg20[%c0_229, %c432] : memref<1x1280xf32, #tpu.memory_space<vmem>>, vector<1x144xf32>
    tpu.vector_store %arg20[%c0_229, %c432], %246 {strides = array<i32>} : memref<1x1280xf32, #tpu.memory_space<vmem>>, vector<1x144xf32>,
    %248 = vector.extract_strided_slice %239 {offsets = [4, 0], sizes = [1, 144], strides = [1, 1]} : vector<6x144xf32> to vector<1x144xf32>
    %c0_230 = arith.constant 0 : index
    %c576 = arith.constant 576 : index
    %249 = vector.load %arg20[%c0_230, %c576] : memref<1x1280xf32, #tpu.memory_space<vmem>>, vector<1x144xf32>
    tpu.vector_store %arg20[%c0_230, %c576], %248 {strides = array<i32>} : memref<1x1280xf32, #tpu.memory_space<vmem>>, vector<1x144xf32>,
    %250 = vector.extract_strided_slice %239 {offsets = [5, 0], sizes = [1, 144], strides = [1, 1]} : vector<6x144xf32> to vector<1x144xf32>
    %c0_231 = arith.constant 0 : index
    %c720 = arith.constant 720 : index
    %251 = vector.load %arg20[%c0_231, %c720] : memref<1x1280xf32, #tpu.memory_space<vmem>>, vector<1x144xf32>
    tpu.vector_store %arg20[%c0_231, %c720], %250 {strides = array<i32>} : memref<1x1280xf32, #tpu.memory_space<vmem>>, vector<1x144xf32>,
    %c0_232 = arith.constant 0 : index
    %c0_233 = arith.constant 0 : index
    %252 = vector.load %arg13[%c0_232, %c0_233] : memref<6x128xbf16, #tpu.memory_space<vmem>>, vector<6x128xbf16>
    %cst_234 = arith.constant dense<0.000000e+00> : vector<6x36xf32>
    %253 = tpu.matmul %252, %157, %cst_234 {dimension_numbers = #tpu.dot_dimension_numbers<[1], [0], [0], [1], [0, 0, 1, 1], [], []>} : vector<6x128xbf16>, vector<128x36xbf16>, vector<6x36xf32> -> vector<6x36xf32>
    %c0_235 = arith.constant 0 : index
    %c0_236 = arith.constant 0 : index
    %254 = vector.load %arg14[%c0_235, %c0_236] : memref<6x1xf32, #tpu.memory_space<vmem>>, vector<6x1xf32>
    %255 = vector.broadcast %254 : vector<6x1xf32> to vector<6x36xf32>
    %256 = arith.addf %253, %255 : vector<6x36xf32>
    %257 = vector.extract_strided_slice %256 {offsets = [0, 0], sizes = [1, 36], strides = [1, 1]} : vector<6x36xf32> to vector<1x36xf32>
    %c0_237 = arith.constant 0 : index
    %c864 = arith.constant 864 : index
    %258 = vector.load %arg20[%c0_237, %c864] : memref<1x1280xf32, #tpu.memory_space<vmem>>, vector<1x36xf32>
    tpu.vector_store %arg20[%c0_237, %c864], %257 {strides = array<i32>} : memref<1x1280xf32, #tpu.memory_space<vmem>>, vector<1x36xf32>,
    %259 = vector.extract_strided_slice %256 {offsets = [1, 0], sizes = [1, 36], strides = [1, 1]} : vector<6x36xf32> to vector<1x36xf32>
    %c0_238 = arith.constant 0 : index
    %c900 = arith.constant 900 : index
    %260 = vector.load %arg20[%c0_238, %c900] : memref<1x1280xf32, #tpu.memory_space<vmem>>, vector<1x36xf32>
    tpu.vector_store %arg20[%c0_238, %c900], %259 {strides = array<i32>} : memref<1x1280xf32, #tpu.memory_space<vmem>>, vector<1x36xf32>,
    %261 = vector.extract_strided_slice %256 {offsets = [2, 0], sizes = [1, 36], strides = [1, 1]} : vector<6x36xf32> to vector<1x36xf32>
    %c0_239 = arith.constant 0 : index
    %c936 = arith.constant 936 : index
    %262 = vector.load %arg20[%c0_239, %c936] : memref<1x1280xf32, #tpu.memory_space<vmem>>, vector<1x36xf32>
    tpu.vector_store %arg20[%c0_239, %c936], %261 {strides = array<i32>} : memref<1x1280xf32, #tpu.memory_space<vmem>>, vector<1x36xf32>,
    %263 = vector.extract_strided_slice %256 {offsets = [3, 0], sizes = [1, 36], strides = [1, 1]} : vector<6x36xf32> to vector<1x36xf32>
    %c0_240 = arith.constant 0 : index
    %c972 = arith.constant 972 : index
    %264 = vector.load %arg20[%c0_240, %c972] : memref<1x1280xf32, #tpu.memory_space<vmem>>, vector<1x36xf32>
    tpu.vector_store %arg20[%c0_240, %c972], %263 {strides = array<i32>} : memref<1x1280xf32, #tpu.memory_space<vmem>>, vector<1x36xf32>,
    %265 = vector.extract_strided_slice %256 {offsets = [4, 0], sizes = [1, 36], strides = [1, 1]} : vector<6x36xf32> to vector<1x36xf32>
    %c0_241 = arith.constant 0 : index
    %c1008 = arith.constant 1008 : index
    %266 = vector.load %arg20[%c0_241, %c1008] : memref<1x1280xf32, #tpu.memory_space<vmem>>, vector<1x36xf32>
    tpu.vector_store %arg20[%c0_241, %c1008], %265 {strides = array<i32>} : memref<1x1280xf32, #tpu.memory_space<vmem>>, vector<1x36xf32>,
    %267 = vector.extract_strided_slice %256 {offsets = [5, 0], sizes = [1, 36], strides = [1, 1]} : vector<6x36xf32> to vector<1x36xf32>
    %c0_242 = arith.constant 0 : index
    %c1044 = arith.constant 1044 : index
    %268 = vector.load %arg20[%c0_242, %c1044] : memref<1x1280xf32, #tpu.memory_space<vmem>>, vector<1x36xf32>
    tpu.vector_store %arg20[%c0_242, %c1044], %267 {strides = array<i32>} : memref<1x1280xf32, #tpu.memory_space<vmem>>, vector<1x36xf32>,
    %c0_243 = arith.constant 0 : index
    %c0_244 = arith.constant 0 : index
    %269 = vector.load %arg15[%c0_243, %c0_244] : memref<9x128xbf16, #tpu.memory_space<vmem>>, vector<9x128xbf16>
    %cst_245 = arith.constant dense<0.000000e+00> : vector<9x9xf32>
    %270 = tpu.matmul %269, %234, %cst_245 {dimension_numbers = #tpu.dot_dimension_numbers<[1], [0], [0], [1], [0, 0, 1, 1], [], []>} : vector<9x128xbf16>, vector<128x9xbf16>, vector<9x9xf32> -> vector<9x9xf32>
    %c0_246 = arith.constant 0 : index
    %c0_247 = arith.constant 0 : index
    %271 = vector.load %arg16[%c0_246, %c0_247] : memref<9x1xf32, #tpu.memory_space<vmem>>, vector<9x1xf32>
    %272 = vector.broadcast %271 : vector<9x1xf32> to vector<9x9xf32>
    %273 = arith.addf %270, %272 : vector<9x9xf32>
    %274 = vector.extract_strided_slice %273 {offsets = [0, 0], sizes = [1, 9], strides = [1, 1]} : vector<9x9xf32> to vector<1x9xf32>
    %c0_248 = arith.constant 0 : index
    %c1080 = arith.constant 1080 : index
    %275 = vector.load %arg20[%c0_248, %c1080] : memref<1x1280xf32, #tpu.memory_space<vmem>>, vector<1x9xf32>
    tpu.vector_store %arg20[%c0_248, %c1080], %274 {strides = array<i32>} : memref<1x1280xf32, #tpu.memory_space<vmem>>, vector<1x9xf32>,
    %276 = vector.extract_strided_slice %273 {offsets = [1, 0], sizes = [1, 9], strides = [1, 1]} : vector<9x9xf32> to vector<1x9xf32>
    %c0_249 = arith.constant 0 : index
    %c1089 = arith.constant 1089 : index
    %277 = vector.load %arg20[%c0_249, %c1089] : memref<1x1280xf32, #tpu.memory_space<vmem>>, vector<1x9xf32>
    tpu.vector_store %arg20[%c0_249, %c1089], %276 {strides = array<i32>} : memref<1x1280xf32, #tpu.memory_space<vmem>>, vector<1x9xf32>,
    %278 = vector.extract_strided_slice %273 {offsets = [2, 0], sizes = [1, 9], strides = [1, 1]} : vector<9x9xf32> to vector<1x9xf32>
    %c0_250 = arith.constant 0 : index
    %c1098 = arith.constant 1098 : index
    %279 = vector.load %arg20[%c0_250, %c1098] : memref<1x1280xf32, #tpu.memory_space<vmem>>, vector<1x9xf32>
    tpu.vector_store %arg20[%c0_250, %c1098], %278 {strides = array<i32>} : memref<1x1280xf32, #tpu.memory_space<vmem>>, vector<1x9xf32>,
    %280 = vector.extract_strided_slice %273 {offsets = [3, 0], sizes = [1, 9], strides = [1, 1]} : vector<9x9xf32> to vector<1x9xf32>
    %c0_251 = arith.constant 0 : index
    %c1107 = arith.constant 1107 : index
    %281 = vector.load %arg20[%c0_251, %c1107] : memref<1x1280xf32, #tpu.memory_space<vmem>>, vector<1x9xf32>
    tpu.vector_store %arg20[%c0_251, %c1107], %280 {strides = array<i32>} : memref<1x1280xf32, #tpu.memory_space<vmem>>, vector<1x9xf32>,
    %282 = vector.extract_strided_slice %273 {offsets = [4, 0], sizes = [1, 9], strides = [1, 1]} : vector<9x9xf32> to vector<1x9xf32>
    %c0_252 = arith.constant 0 : index
    %c1116 = arith.constant 1116 : index
    %283 = vector.load %arg20[%c0_252, %c1116] : memref<1x1280xf32, #tpu.memory_space<vmem>>, vector<1x9xf32>
    tpu.vector_store %arg20[%c0_252, %c1116], %282 {strides = array<i32>} : memref<1x1280xf32, #tpu.memory_space<vmem>>, vector<1x9xf32>,
    %284 = vector.extract_strided_slice %273 {offsets = [5, 0], sizes = [1, 9], strides = [1, 1]} : vector<9x9xf32> to vector<1x9xf32>
    %c0_253 = arith.constant 0 : index
    %c1125 = arith.constant 1125 : index
    %285 = vector.load %arg20[%c0_253, %c1125] : memref<1x1280xf32, #tpu.memory_space<vmem>>, vector<1x9xf32>
    tpu.vector_store %arg20[%c0_253, %c1125], %284 {strides = array<i32>} : memref<1x1280xf32, #tpu.memory_space<vmem>>, vector<1x9xf32>,
    %286 = vector.extract_strided_slice %273 {offsets = [6, 0], sizes = [1, 9], strides = [1, 1]} : vector<9x9xf32> to vector<1x9xf32>
    %c0_254 = arith.constant 0 : index
    %c1134 = arith.constant 1134 : index
    %287 = vector.load %arg20[%c0_254, %c1134] : memref<1x1280xf32, #tpu.memory_space<vmem>>, vector<1x9xf32>
    tpu.vector_store %arg20[%c0_254, %c1134], %286 {strides = array<i32>} : memref<1x1280xf32, #tpu.memory_space<vmem>>, vector<1x9xf32>,
    %288 = vector.extract_strided_slice %273 {offsets = [7, 0], sizes = [1, 9], strides = [1, 1]} : vector<9x9xf32> to vector<1x9xf32>
    %c0_255 = arith.constant 0 : index
    %c1143 = arith.constant 1143 : index
    %289 = vector.load %arg20[%c0_255, %c1143] : memref<1x1280xf32, #tpu.memory_space<vmem>>, vector<1x9xf32>
    tpu.vector_store %arg20[%c0_255, %c1143], %288 {strides = array<i32>} : memref<1x1280xf32, #tpu.memory_space<vmem>>, vector<1x9xf32>,
    %290 = vector.extract_strided_slice %273 {offsets = [8, 0], sizes = [1, 9], strides = [1, 1]} : vector<9x9xf32> to vector<1x9xf32>
    %c0_256 = arith.constant 0 : index
    %c1152 = arith.constant 1152 : index
    %291 = vector.load %arg20[%c0_256, %c1152] : memref<1x1280xf32, #tpu.memory_space<vmem>>, vector<1x9xf32>
    tpu.vector_store %arg20[%c0_256, %c1152], %290 {strides = array<i32>} : memref<1x1280xf32, #tpu.memory_space<vmem>>, vector<1x9xf32>,
    %c0_257 = arith.constant 0 : index
    %c0_258 = arith.constant 0 : index
    %292 = vector.load %arg20[%c0_257, %c0_258] : memref<1x1280xf32, #tpu.memory_space<vmem>>, vector<1x1280xf32>
    %293 = arith.truncf %292 : vector<1x1280xf32> to vector<1x1280xbf16>
    %c0_259 = arith.constant 0 : index
    %c0_260 = arith.constant 0 : index
    %294 = vector.load %arg17[%c0_259, %c0_260] : memref<1280x1664xbf16, #tpu.memory_space<vmem>>, vector<1280x1664xbf16>
    %cst_261 = arith.constant dense<0.000000e+00> : vector<1x1664xf32>
    %295 = tpu.matmul %293, %294, %cst_261 {dimension_numbers = #tpu.dot_dimension_numbers<[1], [0], [0], [1], [0, 0, 1, 1], [], []>} : vector<1x1280xbf16>, vector<1280x1664xbf16>, vector<1x1664xf32> -> vector<1x1664xf32>
    %c0_262 = arith.constant 0 : index
    %c0_263 = arith.constant 0 : index
    %296 = vector.load %arg18[%c0_262, %c0_263] : memref<1x1664xf32, #tpu.memory_space<vmem>>, vector<1x1664xf32>
    %297 = arith.addf %295, %296 : vector<1x1664xf32>
    %298 = vector.shape_cast %297 : vector<1x1664xf32> to vector<1x1x1664xf32>
    %c0_264 = arith.constant 0 : index
    %c0_265 = arith.constant 0 : index
    %c0_266 = arith.constant 0 : index
    %299 = vector.load %arg19[%c0_264, %c0_265, %c0_266] : memref<1x1x1664xf32, #tpu.memory_space<vmem>>, vector<1x1x1664xf32>
    tpu.vector_store %arg19[%c0_264, %c0_265, %c0_266], %298 {strides = array<i32>} : memref<1x1x1664xf32, #tpu.memory_space<vmem>>, vector<1x1x1664xf32>,
    return
  }
  func.func @transform_0(%arg0: i32) -> (i32, i32, i32) {
    %c0_i32 = arith.constant 0 : i32
    %c0_i32_0 = arith.constant 0 : i32
    %c0_i32_1 = arith.constant 0 : i32
    return %arg0, %c0_i32, %c0_i32_0 : i32, i32, i32
  }
  func.func @transform_1(%arg0: i32) -> (i32, i32, i32) {
    %c0_i32 = arith.constant 0 : i32
    %c0_i32_0 = arith.constant 0 : i32
    %c0_i32_1 = arith.constant 0 : i32
    %c0_i32_2 = arith.constant 0 : i32
    return %c0_i32, %c0_i32_0, %c0_i32_1 : i32, i32, i32
  }
  func.func @transform_2(%arg0: i32) -> (i32, i32, i32) {
    %c0_i32 = arith.constant 0 : i32
    %c0_i32_0 = arith.constant 0 : i32
    %c0_i32_1 = arith.constant 0 : i32
    %c0_i32_2 = arith.constant 0 : i32
    return %c0_i32, %c0_i32_0, %c0_i32_1 : i32, i32, i32
  }
  func.func @transform_3(%arg0: i32) -> (i32, i32) {
    %c0_i32 = arith.constant 0 : i32
    %c0_i32_0 = arith.constant 0 : i32
    %c0_i32_1 = arith.constant 0 : i32
    return %c0_i32, %c0_i32_0 : i32, i32
  }
  func.func @transform_4(%arg0: i32) -> (i32, i32, i32) {
    %c0_i32 = arith.constant 0 : i32
    %c0_i32_0 = arith.constant 0 : i32
    %c0_i32_1 = arith.constant 0 : i32
    %c0_i32_2 = arith.constant 0 : i32
    return %c0_i32, %c0_i32_0, %c0_i32_1 : i32, i32, i32
  }
  func.func @transform_5(%arg0: i32) -> (i32, i32, i32) {
    %c0_i32 = arith.constant 0 : i32
    %c0_i32_0 = arith.constant 0 : i32
    %c0_i32_1 = arith.constant 0 : i32
    %c0_i32_2 = arith.constant 0 : i32
    return %c0_i32, %c0_i32_0, %c0_i32_1 : i32, i32, i32
  }
  func.func @transform_6(%arg0: i32) -> (i32, i32) {
    %c0_i32 = arith.constant 0 : i32
    %c0_i32_0 = arith.constant 0 : i32
    %c0_i32_1 = arith.constant 0 : i32
    return %c0_i32, %c0_i32_0 : i32, i32
  }
  func.func @transform_7(%arg0: i32) -> (i32, i32, i32) {
    %c0_i32 = arith.constant 0 : i32
    %c0_i32_0 = arith.constant 0 : i32
    %c0_i32_1 = arith.constant 0 : i32
    %c0_i32_2 = arith.constant 0 : i32
    return %c0_i32, %c0_i32_0, %c0_i32_1 : i32, i32, i32
  }
  func.func @transform_8(%arg0: i32) -> (i32, i32, i32) {
    %c0_i32 = arith.constant 0 : i32
    %c0_i32_0 = arith.constant 0 : i32
    %c0_i32_1 = arith.constant 0 : i32
    %c0_i32_2 = arith.constant 0 : i32
    return %c0_i32, %c0_i32_0, %c0_i32_1 : i32, i32, i32
  }
  func.func @transform_9(%arg0: i32) -> (i32, i32) {
    %c0_i32 = arith.constant 0 : i32
    %c0_i32_0 = arith.constant 0 : i32
    %c0_i32_1 = arith.constant 0 : i32
    return %c0_i32, %c0_i32_0 : i32, i32
  }
  func.func @transform_10(%arg0: i32) -> (i32, i32) {
    %c0_i32 = arith.constant 0 : i32
    %c0_i32_0 = arith.constant 0 : i32
    %c0_i32_1 = arith.constant 0 : i32
    return %c0_i32, %c0_i32_0 : i32, i32
  }
  func.func @transform_11(%arg0: i32) -> (i32, i32) {
    %c0_i32 = arith.constant 0 : i32
    %c0_i32_0 = arith.constant 0 : i32
    %c0_i32_1 = arith.constant 0 : i32
    return %c0_i32, %c0_i32_0 : i32, i32
  }
  func.func @transform_12(%arg0: i32) -> (i32, i32) {
    %c0_i32 = arith.constant 0 : i32
    %c0_i32_0 = arith.constant 0 : i32
    %c0_i32_1 = arith.constant 0 : i32
    return %c0_i32, %c0_i32_0 : i32, i32
  }
  func.func @transform_13(%arg0: i32) -> (i32, i32) {
    %c0_i32 = arith.constant 0 : i32
    %c0_i32_0 = arith.constant 0 : i32
    %c0_i32_1 = arith.constant 0 : i32
    return %c0_i32, %c0_i32_0 : i32, i32
  }
  func.func @transform_14(%arg0: i32) -> (i32, i32) {
    %c0_i32 = arith.constant 0 : i32
    %c0_i32_0 = arith.constant 0 : i32
    %c0_i32_1 = arith.constant 0 : i32
    return %c0_i32, %c0_i32_0 : i32, i32
  }
  func.func @transform_15(%arg0: i32) -> (i32, i32) {
    %c0_i32 = arith.constant 0 : i32
    %c0_i32_0 = arith.constant 0 : i32
    %c0_i32_1 = arith.constant 0 : i32
    return %c0_i32, %c0_i32_0 : i32, i32
  }
  func.func @transform_16(%arg0: i32) -> (i32, i32) {
    %c0_i32 = arith.constant 0 : i32
    %c0_i32_0 = arith.constant 0 : i32
    %c0_i32_1 = arith.constant 0 : i32
    return %c0_i32, %c0_i32_0 : i32, i32
  }
  func.func @transform_17(%arg0: i32) -> (i32, i32) {
    %c0_i32 = arith.constant 0 : i32
    %c0_i32_0 = arith.constant 0 : i32
    %c0_i32_1 = arith.constant 0 : i32
    return %c0_i32, %c0_i32_0 : i32, i32
  }
  func.func @transform_18(%arg0: i32) -> (i32, i32, i32) {
    %c0_i32 = arith.constant 0 : i32
    %c0_i32_0 = arith.constant 0 : i32
    %c0_i32_1 = arith.constant 0 : i32
    return %arg0, %c0_i32, %c0_i32_0 : i32, i32, i32
  }
}

</mosaic_0001>

<bundles_post_ra>
// kernel: proposal_net_forward.1
= control target key start
LH: loop header
LB: loop body
LE: loop exit
PB: predicated region body
PF: predicated region fallthrough
CT: control target
= control target key end

     0   :  { %s25661_s27 = smov 0   ;;  %s31981_s0 = inlined_call_operand.vmem [shape: bf16[2,8,144], index: 0, kind: input, shape index: {}]   ;;  %s31982_s1 = inlined_call_operand.vmem [shape: bf16[9,144,144], index: 1, kind: input, shape index: {}]   ;;  %s31983_s2 = inlined_call_operand.vmem [shape: bf16[9,128,8], index: 2, kind: input, shape index: {}]   ;;  %s31984_s3 = inlined_call_operand.vmem [shape: f32[128,1], index: 3, kind: input, shape index: {}]   ;;  %s31985_s4 = inlined_call_operand.vmem [shape: bf16[9,144,36], index: 4, kind: input, shape index: {}]   ;;  %s31986_s5 = inlined_call_operand.vmem [shape: bf16[9,128,128], index: 5, kind: input, shape index: {}]   ;;  %s31987_s6 = inlined_call_operand.vmem [shape: f32[128,1], index: 6, kind: input, shape index: {}]   ;;  %s31988_s7 = inlined_call_operand.vmem [shape: bf16[9,36,9], index: 7, kind: input, shape index: {}]   ;;  %s31989_s8 = inlined_call_operand.vmem [shape: bf16[9,128,128], index: 8, kind: input, shape index: {}]   ;;  %s31990_s9 = inlined_call_operand.vmem [shape: f32[128,1], index: 9, kind: input, shape index: {}]   ;;  %s31991_s10 = inlined_call_operand.vmem [shape: bf16[6,128], index: 10, kind: input, shape index: {}]   ;;  %s31992_s11 = inlined_call_operand.vmem [shape: f32[6,1], index: 11, kind: input, shape index: {}]   ;;  %s31993_s12 = inlined_call_operand.vmem [shape: bf16[6,128], index: 12, kind: input, shape index: {}]   ;;  %s31994_s13 = inlined_call_operand.vmem [shape: f32[6,1], index: 13, kind: input, shape index: {}]   ;;  %s31995_s14 = inlined_call_operand.vmem [shape: bf16[9,128], index: 14, kind: input, shape index: {}]   ;;  %s31996_s15 = inlined_call_operand.vmem [shape: f32[9,1], index: 15, kind: input, shape index: {}]   ;;  %s31997_s16 = inlined_call_operand.vmem [shape: bf16[1280,1664], index: 16, kind: input, shape index: {}]   ;;  %s31998_s17 = inlined_call_operand.vmem [shape: f32[1,1664], index: 17, kind: input, shape index: {}]   ;;  %s31999_s18 = inlined_call_operand.vmem [shape: f32[2,1,1664], index: 18, kind: output, shape index: {}]  }
   0x1   :  { %32005 = sst [smem:[#allocation4_spill]] %s31981_s0 }
   0x2   :  { %32006 = sst [smem:[#allocation5_spill]] %s31982_s1 }
   0x3   :  { %32007 = sst [smem:[#allocation6_spill]] %s31983_s2 }
   0x4 LB: > { %32008 = sst [smem:[#allocation3_spill]] %s25541_s27  ;;  %s18967_s28 = sadd.s32 4294967295, %s25541_s27   ;;  %s25541_s27 = sphi %s25661_s27, %s28_s27  }
   0x5   : > { %p18971_p0 = scmp.ge.s32.totalorder %s25541_s27, 1  ;;  %p512_p1 = scmp.lt.s32.totalorder %s25541_s27, 3 }
   0x7   : > { %p513_p2 = pnand %p18971_p0, %p512_p1 }
   0x8   : > { %s32009_s0 = sld [smem:[#allocation5_spill]] (!%p513_p2)  ;;  %p565_p3 = scmp.lt.s32.totalorder (!%p513_p2), %s18967_s28, 1  ;;  %vm695_vm0 = vcmask (!%p513_p2), 130048   ;;  %vm992_vm1 = vcmask (!%p513_p2), 1043456   ;;  %vm967_vm2 = vcmask (!%p513_p2), 64512   ;;  %vm7534_vm3 = vcmask (!%p513_p2), 1041408  }
   0x9   : > { %516 = sbr.rel (%p513_p2) target bundleno = 4771 (0x12a3), region = 92  ;;  %s32010_s30 = sld [smem:[#allocation4_spill]] (!%p513_p2)  ;;  %vm7509_vm4 = vcmask (!%p513_p2), 293888   ;;  %vm25545_vm5 = vmmov (!%p513_p2), 0   ;;  %vm10471_vm12 = vcmask (!%p513_p2), 261120  }
   0xa   : > { %s25547_s1 = smov (!%p513_p2), 64   ;;  %s25548_s27 = smov (!%p513_p2), 16  }
   0xb   : > { %s25549_s29 = smov (!%p513_p2), 32   ;;  %s25550_s21 = smov (!%p513_p2), 80  }
   0xc   : > { %s25552_s2 = smov (!%p513_p2), 96   ;;  %s25553_s23 = smov (!%p513_p2), 4  }
   0xd   : > { %s25555_s22 = smov (!%p513_p2), 40   ;;  %s25556_s26 = smov (!%p513_p2), 76  }
   0xe   : > { %v23444_v0 = vld [vmem:[%s32009_s0 + $0x94] ss:$8 sps:$4 sm:$0xff] (!%p513_p2)   ;;  %v23446_v1 = vld [vmem:[%s32009_s0 + $0x90] ss:$8 sps:$4 sm:$0xff] (!%p513_p2)   ;;  %v23447_v2 = vld [vmem:[%s32009_s0 + $0xa4] ss:$8 sps:$4 sm:$0xff] (!%p513_p2)  }
   0xf   : > { %867 = vmatprep.subr.bf16.mxu1 (!%p513_p2), %v23444_v0  ;;  %v23449_v3 = vld [vmem:[%s32009_s0 + $0x4] ss:$8 sps:$4 sm:$0xff] (!%p513_p2)   ;;  %v23451_v4 = vld [vmem:[%s32009_s0 + $0xa0] ss:$8 sps:$4 sm:$0xff] (!%p513_p2)   ;;  %v23453_v6 = vld [vmem:[%s32009_s0 + $0xb4] ss:$8 sps:$4 sm:$0xff] (!%p513_p2)  }
  0x10   : > { %868 = vmatpush1.bf16.msra.mxu1 %v23446_v1  ;;  %v23452_v5 = vld [vmem:[%s32009_s0] ss:$8 sps:$4 sm:$0xff]   ;;  %699 = vmatprep.subr.bf16.mxu0 %v23449_v3  ;;  %v23455_v7 = vld [vmem:[%s32009_s0 + $0x14] ss:$8 sps:$4 sm:$0xff]   ;;  %v23458_v8 = vld [vmem:[%s32009_s0 + $0x10] ss:$8 sps:$4 sm:$0xff]  }
  0x11   : > { %869 = vmatprep.subr.bf16.mxu1 %v23447_v2  ;;  %700 = vmatpush1.bf16.msra.mxu0 %v23452_v5  ;;  %v23457_v9 = vld [vmem:[%s32009_s0 + $0xb0] ss:$8 sps:$4 sm:$0xff]   ;;  %v23459_v10 = vld [vmem:[%s32009_s0 + $0xc4] ss:$8 sps:$4 sm:$0xff]   ;;  %v23464_v12 = vld [vmem:[%s32009_s0 + $0x20] ss:$8 sps:$4 sm:$0xff]  }
  0x12   : > { %701 = vmatprep.subr.bf16.mxu0 %v23455_v7  ;;  %v23461_v11 = vld [vmem:[%s32009_s0 + $0x24] ss:$8 sps:$4 sm:$0xff]   ;;  %v23463_v13 = vld [vmem:[%s32009_s0 + $0xc0] ss:$8 sps:$4 sm:$0xff]   ;;  %v23467_v14 = vld [vmem:[%s32009_s0 + $0x34] ss:$8 sps:$4 sm:$0xff]  }
  0x13   : > { %v23465_v15 = vld [vmem:[%s32009_s0 + $0xd4] ss:$8 sps:$4 sm:$0xff]   ;;  %s32039_s28 = smov (!%p565_p3, %s18967_s28), 1  ;;  %v23469_v16 = vld [vmem:[%s32009_s0 + $0xd0] ss:$8 sps:$4 sm:$0xff]   ;;  %s25561_s25 = smov 83  }
  0x14   : > { %870 = vmatpush1.bf16.msra.mxu1 %v23451_v4  ;;  %v23470_v17 = vld [vmem:[%s32009_s0 + $0x30] ss:$8 sps:$4 sm:$0xff]   ;;  %v23473_v18 = vld [vmem:[%s32009_s0 + $0x44] ss:$8 sps:$4 sm:$0xff]   ;;  %s21451_s20 = sshll.u32 %s32039_s28, 3 }
  0x15   : > { %871 = vmatprep.subr.bf16.mxu1 %v23453_v6  ;;  %702 = vmatpush1.bf16.msra.mxu0 %v23458_v8  ;;  %v23471_v19 = vld [vmem:[%s32009_s0 + $0xe4] ss:$8 sps:$4 sm:$0xff]   ;;  %v23476_v20 = vld [vmem:[%s32009_s0 + $0x40] ss:$8 sps:$4 sm:$0xff]   ;;  %v23479_v22 = vld [vmem:[%s32009_s0 + $0x54] ss:$8 sps:$4 sm:$0xff]   ;;  %s569_s19 = scalar_lea.vmem %s32010_s30, %s21451_s20 }
  0x16   : > { %703 = vmatprep.subr.bf16.mxu0 %v23461_v11  ;;  %v23475_v21 = vld [vmem:[%s32009_s0 + $0xe0] ss:$8 sps:$4 sm:$0xff]   ;;  %v23477_v23 = vld [vmem:[%s32009_s0 + $0xf4] ss:$8 sps:$4 sm:$0xff]   ;;  %v23481_v24 = vld [vmem:[%s32009_s0 + $0xf0] ss:$8 sps:$4 sm:$0xff]  }
  0x17   : > { %v23482_v25 = vld [vmem:[%s32009_s0 + $0x50] ss:$8 sps:$4 sm:$0xff]   ;;  %v580_v26 = vld [vmem:[%s569_s19] sm:$0xff]  ;;  %v23491_v32 = vld [vmem:[%s32009_s0 + $0x74] ss:$8 sps:$4 sm:$0xff]   ;;  %s32011_s19 = sld [smem:[#allocation6_spill]] }
  0x18   : > { %872 = vmatpush1.bf16.msra.mxu1 %v23457_v9  ;;  %v23485_v27 = vld [vmem:[%s32009_s0 + $0x64] ss:$8 sps:$4 sm:$0xff]   ;;  %v25760_v28 = vcombine.high %v580_v26, %v580_v26  ;;  %v23487_v30 = vld [vmem:[%s32009_s0 + $0x100] ss:$8 sps:$4 sm:$0xff]   ;;  %v23489_v33 = vld [vmem:[%s32009_s0 + $0x114] ss:$8 sps:$4 sm:$0xff]   ;;  %v25793_v38 = vcombine.low %v580_v26, %v580_v26 }
  0x19   : > { %873 = vmatprep.subr.bf16.mxu1 %v23459_v10  ;;  %704 = vmatpush1.bf16.msra.mxu0 %v23464_v12  ;;  %v23483_v29 = vld [vmem:[%s32009_s0 + $0x104] ss:$8 sps:$4 sm:$0xff]   ;;  %v23488_v31 = vld [vmem:[%s32009_s0 + $0x60] ss:$8 sps:$4 sm:$0xff]   ;;  %v23493_v34 = vld [vmem:[%s32009_s0 + $0x110] ss:$8 sps:$4 sm:$0xff]  }
  0x1a   : > { %705 = vmatprep.subr.bf16.mxu0 %v23467_v14  ;;  %19031 = vmatprep.mubr.msk.bf16.mxu1 %vm695_vm0, %v25760_v28  ;;  %v23494_v35 = vld [vmem:[%s32009_s0 + $0x70] ss:$8 sps:$4 sm:$0xff]   ;;  %v23497_v36 = vld [vmem:[%s32009_s0 + $0x84] ss:$8 sps:$4 sm:$0xff]   ;;  %v23499_v39 = vld [vmem:[%s32009_s0 + $0x80] ss:$8 sps:$4 sm:$0xff]  }
  0x1b   : > { %18994 = vmatprep.mubr.msk.bf16.mxu0 %vm695_vm0, %v25760_v28  ;;  %v23502_v37 = vld [vmem:[%s32009_s0 + $0x124] ss:$8 sps:$4 sm:$0xff]   ;;  %v23500_v40 = vld [vmem:[%s32009_s0 + $0x120] ss:$8 sps:$4 sm:$0xff]   ;;  %v23505_v41 = vld [vmem:[%s32009_s0 + $0x134] ss:$8 sps:$4 sm:$0xff]  }
  0x1c   : > { %874 = vmatpush1.bf16.msra.mxu1 %v23463_v13  ;;  %v23503_v42 = vld [vmem:[%s32009_s0 + $0x130] ss:$8 sps:$4 sm:$0xff]   ;;  %v23508_v43 = vld [vmem:[%s32009_s0 + $0x144] ss:$8 sps:$4 sm:$0xff]   ;;  %v23506_v44 = vld [vmem:[%s32009_s0 + $0x140] ss:$8 sps:$4 sm:$0xff]  }
  0x1d   : > { %875 = vmatprep.subr.bf16.mxu1 %v23465_v15  ;;  %706 = vmatpush1.bf16.msra.mxu0 %v23470_v17  ;;  %v23511_v45 = vld [vmem:[%s32009_s0 + $0x154] ss:$8 sps:$4 sm:$0xff]   ;;  %v23509_v46 = vld [vmem:[%s32009_s0 + $0x150] ss:$8 sps:$4 sm:$0xff]   ;;  %v23514_v47 = vld [vmem:[%s32009_s0 + $0x164] ss:$8 sps:$4 sm:$0xff]  }
  0x1e   : > { %707 = vmatprep.subr.bf16.mxu0 %v23473_v18  ;;  %v23512_v48 = vld [vmem:[%s32009_s0 + $0x160] ss:$8 sps:$4 sm:$0xff]   ;;  %v23517_v49 = vld [vmem:[%s32009_s0 + $0x174] ss:$8 sps:$4 sm:$0xff]   ;;  %v23515_v50 = vld [vmem:[%s32009_s0 + $0x170] ss:$8 sps:$4 sm:$0xff]  }
  0x1f   : > { %v23520_v51 = vld [vmem:[%s32009_s0 + $0x184] ss:$8 sps:$4 sm:$0xff]   ;;  %v23518_v52 = vld [vmem:[%s32009_s0 + $0x180] ss:$8 sps:$4 sm:$0xff]   ;;  %v23523_v53 = vld [vmem:[%s32009_s0 + $0x194] ss:$8 sps:$4 sm:$0xff]  }
  0x20   : > { %876 = vmatpush1.bf16.msra.mxu1 %v23469_v16  ;;  %v23521_v54 = vld [vmem:[%s32009_s0 + $0x190] ss:$8 sps:$4 sm:$0xff]   ;;  %v23526_v55 = vld [vmem:[%s32009_s0 + $0x1a4] ss:$8 sps:$4 sm:$0xff]   ;;  %v23524_v56 = vld [vmem:[%s32009_s0 + $0x1a0] ss:$8 sps:$4 sm:$0xff]  }
  0x21   : > { %877 = vmatprep.subr.bf16.mxu1 %v23471_v19  ;;  %708 = vmatpush1.bf16.msra.mxu0 %v23476_v20  ;;  %v23529_v57 = vld [vmem:[%s32009_s0 + $0x1b4] ss:$8 sps:$4 sm:$0xff]   ;;  %v23527_v58 = vld [vmem:[%s32009_s0 + $0x1b0] ss:$8 sps:$4 sm:$0xff]   ;;  %v23532_v59 = vld [vmem:[%s32009_s0 + $0x1c4] ss:$8 sps:$4 sm:$0xff]  }
  0x22   : > { %709 = vmatprep.subr.bf16.mxu0 %v23479_v22  ;;  %v23530_v60 = vld [vmem:[%s32009_s0 + $0x1c0] ss:$8 sps:$4 sm:$0xff]   ;;  %v23535_v61 = vld [vmem:[%s32009_s0 + $0x1d4] ss:$8 sps:$4 sm:$0xff]   ;;  %v23533_v62 = vld [vmem:[%s32009_s0 + $0x1d0] ss:$8 sps:$4 sm:$0xff]  }
  0x23   : > { %v23538_v63 = vld [vmem:[%s32009_s0 + $0x1e4] ss:$8 sps:$4 sm:$0xff]   ;;  %v23536_v0 = vld [vmem:[%s32009_s0 + $0x1e0] ss:$8 sps:$4 sm:$0xff]   ;;  %v23541_v1 = vld [vmem:[%s32009_s0 + $0x1f4] ss:$8 sps:$4 sm:$0xff]  }
  0x24   : > { %878 = vmatpush1.bf16.msra.mxu1 %v23475_v21  ;;  %v23539_v2 = vld [vmem:[%s32009_s0 + $0x1f0] ss:$8 sps:$4 sm:$0xff]   ;;  %v23544_v3 = vld [vmem:[%s32009_s0 + $0x204] ss:$8 sps:$4 sm:$0xff]   ;;  %v23542_v4 = vld [vmem:[%s32009_s0 + $0x200] ss:$8 sps:$4 sm:$0xff]  }
  0x25   : > { %879 = vmatprep.subr.bf16.mxu1 %v23477_v23  ;;  %710 = vmatpush1.bf16.msra.mxu0 %v23482_v25  ;;  %v23547_v5 = vld [vmem:[%s32009_s0 + $0x214] ss:$8 sps:$4 sm:$0xff]   ;;  %v23545_v6 = vld [vmem:[%s32009_s0 + $0x210] ss:$8 sps:$4 sm:$0xff]   ;;  %v23550_v7 = vld [vmem:[%s32009_s0 + $0x224] ss:$8 sps:$4 sm:$0xff]  }
  0x26   : > { %711 = vmatprep.subr.bf16.mxu0 %v23485_v27  ;;  %v23548_v8 = vld [vmem:[%s32009_s0 + $0x220] ss:$8 sps:$4 sm:$0xff]   ;;  %v23553_v9 = vld [vmem:[%s32009_s0 + $0x234] ss:$8 sps:$4 sm:$0xff]   ;;  %v23551_v10 = vld [vmem:[%s32009_s0 + $0x230] ss:$8 sps:$4 sm:$0xff]  }
  0x27   : > { %v23556_v11 = vld [vmem:[%s32009_s0 + $0x244] ss:$8 sps:$4 sm:$0xff]   ;;  %v23554_v12 = vld [vmem:[%s32009_s0 + $0x240] ss:$8 sps:$4 sm:$0xff]   ;;  %v23559_v13 = vld [vmem:[%s32009_s0 + $0x254] ss:$8 sps:$4 sm:$0xff]  }
  0x28   : > { %880 = vmatpush1.bf16.msra.mxu1 %v23481_v24  ;;  %v23557_v14 = vld [vmem:[%s32009_s0 + $0x250] ss:$8 sps:$4 sm:$0xff]   ;;  %v23562_v15 = vld [vmem:[%s32009_s0 + $0x264] ss:$8 sps:$4 sm:$0xff]   ;;  %v23560_v16 = vld [vmem:[%s32009_s0 + $0x260] ss:$8 sps:$4 sm:$0xff]  }
  0x29   : > { %881 = vmatprep.subr.bf16.mxu1 %v23483_v29  ;;  %712 = vmatpush1.bf16.msra.mxu0 %v23488_v31  ;;  %v23565_v17 = vld [vmem:[%s32009_s0 + $0x274] ss:$8 sps:$4 sm:$0xff]   ;;  %v23563_v18 = vld [vmem:[%s32009_s0 + $0x270] ss:$8 sps:$4 sm:$0xff]   ;;  %v23568_v19 = vld [vmem:[%s32009_s0 + $0x284] ss:$8 sps:$4 sm:$0xff]  }
  0x2a   : > { %713 = vmatprep.subr.bf16.mxu0 %v23491_v32  ;;  %v23566_v20 = vld [vmem:[%s32009_s0 + $0x280] ss:$8 sps:$4 sm:$0xff]   ;;  %v23571_v21 = vld [vmem:[%s32009_s0 + $0x294] ss:$8 sps:$4 sm:$0xff]   ;;  %v23569_v22 = vld [vmem:[%s32009_s0 + $0x290] ss:$8 sps:$4 sm:$0xff]  }
  0x2b   : > { %v23574_v23 = vld [vmem:[%s32009_s0 + $0x2a4] ss:$8 sps:$4 sm:$0xff]   ;;  %v32003_v24 = vmov 0   ;;  %v23572_v25 = vld [vmem:[%s32009_s0 + $0x2a0] ss:$8 sps:$4 sm:$0xff]   ;;  %s25554_s30 = smov 112  }
  0x2c   : > { %882 = vmatpush1.bf16.msra.mxu1 %v23487_v30  ;;  %23442 = vset.pattern.permute.xlu0 %v32003_v24  ;;  %v23577_v26 = vld [vmem:[%s32009_s0 + $0x2b4] ss:$8 sps:$4 sm:$0xff]   ;;  %v23575_v27 = vld [vmem:[%s32009_s0 + $0x2b0] ss:$8 sps:$4 sm:$0xff]   ;;  %v23580_v29 = vld [vmem:[%s32009_s0 + $0x2c4] ss:$8 sps:$4 sm:$0xff]  }
  0x2d   : > { %883 = vmatprep.subr.bf16.mxu1 %v23489_v33  ;;  %714 = vmatpush1.bf16.msra.mxu0 %v23494_v35  ;;  %v23578_v30 = vld [vmem:[%s32009_s0 + $0x2c0] ss:$8 sps:$4 sm:$0xff]   ;;  %v23584_v31 = vld [vmem:[%s32009_s0 + $0x2d4] ss:$8 sps:$4 sm:$0xff]   ;;  %v23582_v32 = vld [vmem:[%s32009_s0 + $0x2d0] ss:$8 sps:$4 sm:$0xff]  }
  0x2e   : > { %715 = vmatprep.subr.bf16.mxu0 %v23497_v36  ;;  %23443 = vset.pattern.permute.xlu1 %v32003_v24  ;;  %v23588_v33 = vld [vmem:[%s32009_s0 + $0x2e4] ss:$8 sps:$4 sm:$0xff]   ;;  %v23591_v35 = vld [vmem:[%s32009_s0 + $0x2f4] ss:$8 sps:$4 sm:$0xff]   ;;  %v23589_v36 = vld [vmem:[%s32009_s0 + $0x2f0] ss:$8 sps:$4 sm:$0xff]  }
  0x2f   : > { %s25563_s20 = smov 101  }
  0x30   : > { %884 = vmatpush1.bf16.msra.mxu1 %v23493_v34  ;;  %v23586_v34 = vld [vmem:[%s32009_s0 + $0x2e0] ss:$8 sps:$4 sm:$0xff]  }
  0x31   : > { %1404 = vmatprep.subr.bf16.mxu1 %v23502_v37  ;;  %716 = vmatpush1.bf16.msra.mxu0 %v23499_v39  ;;  %v23595_v37 = vld [vmem:[%s32009_s0 + $0x304] ss:$8 sps:$4 sm:$0xff]   ;;  %v23593_v39 = vld [vmem:[%s32009_s0 + $0x300] ss:$8 sps:$4 sm:$0xff]  }
  0x33   : > { %900 = vmatmul.mubr.bf16.vlgmr.msra.gmra.mrb[0].mxu1 %v25793_v38 }
  0x34   : > { %1405 = vmatpush1.bf16.msra.mxu1 %v23500_v40  ;;  %19118 = vmatprep.mubr.msk.bf16.mxu1 %vm695_vm0, %v25760_v28  ;;  %v23598_v40 = vld [vmem:[%s32009_s0 + $0x314] ss:$8 sps:$4 sm:$0xff]  }
  0x35   : > { %1406 = vmatprep.subr.bf16.mxu1 %v23505_v41  ;;  %732 = vmatmul.mubr.bf16.vlgmr.msra.gmra.mrb[0].mxu0 %v25793_v38  ;;  %v23596_v41 = vld [vmem:[%s32009_s0 + $0x310] ss:$8 sps:$4 sm:$0xff]  }
  0x36   : > { %1031 = vmatprep.mubr.bf16.mxu0 %v32003_v24 }
  0x38   : > { %1407 = vmatpush1.bf16.msra.mxu1 %v23503_v42  ;;  %v23602_v42 = vld [vmem:[%s32009_s0 + $0x324] ss:$8 sps:$4 sm:$0xff]  }
  0x39   : > { %1408 = vmatprep.subr.bf16.mxu1 %v23508_v43  ;;  %v23600_v43 = vld [vmem:[%s32009_s0 + $0x320] ss:$8 sps:$4 sm:$0xff]  }
  0x3c   : > { %1409 = vmatpush1.bf16.msra.mxu1 %v23506_v44  ;;  %v23605_v44 = vld [vmem:[%s32009_s0 + $0x334] ss:$8 sps:$4 sm:$0xff]  }
  0x3d   : > { %1410 = vmatprep.subr.bf16.mxu1 %v23511_v45  ;;  %v23603_v45 = vld [vmem:[%s32009_s0 + $0x330] ss:$8 sps:$4 sm:$0xff]  }
  0x40   : > { %1411 = vmatpush1.bf16.msra.mxu1 %v23509_v46  ;;  %v23609_v46 = vld [vmem:[%s32009_s0 + $0x344] ss:$8 sps:$4 sm:$0xff]  }
  0x41   : > { %1412 = vmatprep.subr.bf16.mxu1 %v23514_v47  ;;  %v23607_v47 = vld [vmem:[%s32009_s0 + $0x340] ss:$8 sps:$4 sm:$0xff]  }
  0x44   : > { %1413 = vmatpush1.bf16.msra.mxu1 %v23512_v48  ;;  %v23612_v48 = vld [vmem:[%s32009_s0 + $0x354] ss:$8 sps:$4 sm:$0xff]  }
  0x45   : > { %1414 = vmatprep.subr.bf16.mxu1 %v23517_v49  ;;  %v23610_v49 = vld [vmem:[%s32009_s0 + $0x350] ss:$8 sps:$4 sm:$0xff]  }
  0x48   : > { %1415 = vmatpush1.bf16.msra.mxu1 %v23515_v50  ;;  %v23617_v50 = vld [vmem:[%s32009_s0 + $0x360] ss:$8 sps:$4 sm:$0xff]  }
  0x49   : > { %1416 = vmatprep.subr.bf16.mxu1 %v23520_v51  ;;  %v23619_v51 = vld [vmem:[%s32009_s0 + $0x364] ss:$8 sps:$4 sm:$0xff]  }
  0x4c   : > { %1417 = vmatpush1.bf16.msra.mxu1 %v23518_v52  ;;  %v23621_v52 = vld [vmem:[%s32009_s0 + $0x370] ss:$8 sps:$4 sm:$0xff]  }
  0x4d   : > { %1418 = vmatprep.subr.bf16.mxu1 %v23523_v53  ;;  %v23623_v53 = vld [vmem:[%s32009_s0 + $0x374] ss:$8 sps:$4 sm:$0xff]  }
  0x50   : > { %1419 = vmatpush1.bf16.msra.mxu1 %v23521_v54  ;;  %v23624_v54 = vld [vmem:[%s32009_s0 + $0x380] ss:$8 sps:$4 sm:$0xff]  }
  0x51   : > { %1420 = vmatprep.subr.bf16.mxu1 %v23526_v55  ;;  %v23626_v55 = vld [vmem:[%s32009_s0 + $0x384] ss:$8 sps:$4 sm:$0xff]  }
  0x54   : > { %1421 = vmatpush1.bf16.msra.mxu1 %v23524_v56  ;;  %v23628_v56 = vld [vmem:[%s32009_s0 + $0x390] ss:$8 sps:$4 sm:$0xff]  }
  0x55   : > { %1788 = vmatprep.subr.bf16.mxu1 %v23529_v57  ;;  %v23630_v57 = vld [vmem:[%s32009_s0 + $0x394] ss:$8 sps:$4 sm:$0xff]  }
  0x57   : > { %1437 = vmatmul.mubr.bf16.vlgmr.msra.gmra.mrb[4].mxu1 %v25793_v38 }
  0x58   : > { %1789 = vmatpush1.bf16.msra.mxu1 %v23527_v58  ;;  %19188 = vmatprep.mubr.msk.bf16.mxu1 %vm695_vm0, %v25760_v28  ;;  %v23631_v58 = vld [vmem:[%s32009_s0 + $0x3a0] ss:$8 sps:$4 sm:$0xff]  }
  0x59   : > { %1790 = vmatprep.subr.bf16.mxu1 %v23532_v59  ;;  %v23633_v59 = vld [vmem:[%s32009_s0 + $0x3a4] ss:$8 sps:$4 sm:$0xff]  }
  0x5c   : > { %1791 = vmatpush1.bf16.msra.mxu1 %v23530_v60  ;;  %v23635_v60 = vld [vmem:[%s32009_s0 + $0x3b0] ss:$8 sps:$4 sm:$0xff]  }
  0x5d   : > { %1792 = vmatprep.subr.bf16.mxu1 %v23535_v61  ;;  %v23637_v61 = vld [vmem:[%s32009_s0 + $0x3b4] ss:$8 sps:$4 sm:$0xff]  }
  0x60   : > { %1793 = vmatpush1.bf16.msra.mxu1 %v23533_v62  ;;  %v23638_v62 = vld [vmem:[%s32009_s0 + $0x3c0] ss:$8 sps:$4 sm:$0xff]  }
  0x61   : > { %1794 = vmatprep.subr.bf16.mxu1 %v23538_v63  ;;  %v23640_v63 = vld [vmem:[%s32009_s0 + $0x3c4] ss:$8 sps:$4 sm:$0xff]  }
  0x64   : > { %1795 = vmatpush1.bf16.msra.mxu1 %v23536_v0  ;;  %v23642_v0 = vld [vmem:[%s32009_s0 + $0x3d0] ss:$8 sps:$4 sm:$0xff]  }
  0x65   : > { %1796 = vmatprep.subr.bf16.mxu1 %v23541_v1  ;;  %v23644_v1 = vld [vmem:[%s32009_s0 + $0x3d4] ss:$8 sps:$4 sm:$0xff]  }
  0x68   : > { %1797 = vmatpush1.bf16.msra.mxu1 %v23539_v2  ;;  %v23645_v2 = vld [vmem:[%s32009_s0 + $0x3e0] ss:$8 sps:$4 sm:$0xff]  }
  0x69   : > { %1798 = vmatprep.subr.bf16.mxu1 %v23544_v3  ;;  %v23647_v3 = vld [vmem:[%s32009_s0 + $0x3e4] ss:$8 sps:$4 sm:$0xff]  }
  0x6c   : > { %1799 = vmatpush1.bf16.msra.mxu1 %v23542_v4 }
  0x6d   : > { %1800 = vmatprep.subr.bf16.mxu1 %v23547_v5 }
  0x70   : > { %1801 = vmatpush1.bf16.msra.mxu1 %v23545_v6 }
  0x71   : > { %1802 = vmatprep.subr.bf16.mxu1 %v23550_v7 }
  0x74   : > { %1803 = vmatpush1.bf16.msra.mxu1 %v23548_v8 }
  0x75   : > { %1804 = vmatprep.subr.bf16.mxu1 %v23553_v9  ;;  %v23581_v9 = vld [vmem:[%s32011_s19 + $0x40] sm:$0xff]  }
  0x78   : > { %1805 = vmatpush1.bf16.msra.mxu1 %v23551_v10 }
  0x79   : > { %2172 = vmatprep.subr.bf16.mxu1 %v23556_v11 }
  0x7b   : > { %1821 = vmatmul.mubr.bf16.vlgmr.msra.gmra.mrb[8].mxu1 %v25793_v38 }
  0x7c   : > { %2173 = vmatpush1.bf16.msra.mxu1 %v23554_v12  ;;  %19258 = vmatprep.mubr.msk.bf16.mxu1 %vm695_vm0, %v25760_v28 }
  0x7d   : > { %2174 = vmatprep.subr.bf16.mxu1 %v23559_v13 }
  0x80   : > { %2175 = vmatpush1.bf16.msra.mxu1 %v23557_v14 }
  0x81   : > { %2176 = vmatprep.subr.bf16.mxu1 %v23562_v15 }
  0x84   : > { %2177 = vmatpush1.bf16.msra.mxu1 %v23560_v16 }
  0x85   : > { %2178 = vmatprep.subr.bf16.mxu1 %v23565_v17 }
  0x88   : > { %2179 = vmatpush1.bf16.msra.mxu1 %v23563_v18 }
  0x89   : > { %2180 = vmatprep.subr.bf16.mxu1 %v23568_v19  ;;  %v23652_v19 = vld [vmem:[%s32009_s0 + $0x3f0] ss:$8 sps:$4 sm:$0xff]  }
  0x8c   : > { %2181 = vmatpush1.bf16.msra.mxu1 %v23566_v20  ;;  %v23654_v20 = vld [vmem:[%s32009_s0 + $0x3f4] ss:$8 sps:$4 sm:$0xff]  }
  0x8d   : > { %2182 = vmatprep.subr.bf16.mxu1 %v23571_v21  ;;  %v23585_v21 = vld [vmem:[%s32011_s19 + $0x48] sm:$0xff]  }
  0x90   : > { %2183 = vmatpush1.bf16.msra.mxu1 %v23569_v22  ;;  %v23656_v22 = vld [vmem:[%s32009_s0 + $0x400] ss:$8 sps:$4 sm:$0xff]  }
  0x91   : > { %2184 = vmatprep.subr.bf16.mxu1 %v23574_v23  ;;  %v23658_v23 = vld [vmem:[%s32009_s0 + $0x404] ss:$8 sps:$4 sm:$0xff]  }
  0x94   : > { %2185 = vmatpush1.bf16.msra.mxu1 %v23572_v25  ;;  %v23659_v25 = vld [vmem:[%s32009_s0 + $0x410] ss:$8 sps:$4 sm:$0xff]  }
  0x95   : > { %2186 = vmatprep.subr.bf16.mxu1 %v23577_v26  ;;  %v23661_v26 = vld [vmem:[%s32009_s0 + $0x414] ss:$8 sps:$4 sm:$0xff]  }
  0x98   : > { %2187 = vmatpush1.bf16.msra.mxu1 %v23575_v27  ;;  %v23592_v27 = vld [vmem:[%s32011_s19 + $0x50] sm:$0xff]  }
  0x99   : > { %2188 = vmatprep.subr.bf16.mxu1 %v23580_v29  ;;  %v23663_v29 = vld [vmem:[%s32009_s0 + $0x420] ss:$8 sps:$4 sm:$0xff]  }
  0x9c   : > { %2189 = vmatpush1.bf16.msra.mxu1 %v23578_v30  ;;  %v23665_v30 = vld [vmem:[%s32009_s0 + $0x424] ss:$8 sps:$4 sm:$0xff]  }
  0x9d   : > { %2556 = vmatprep.subr.bf16.mxu1 %v23584_v31  ;;  %v23666_v31 = vld [vmem:[%s32009_s0 + $0x430] ss:$8 sps:$4 sm:$0xff]  }
  0x9f   : > { %2205 = vmatmul.mubr.bf16.vlgmr.msra.gmra.mrb[12].mxu1 %v25793_v38 }
  0xa0   : > { %2557 = vmatpush1.bf16.msra.mxu1 %v23582_v32  ;;  %19328 = vmatprep.mubr.msk.bf16.mxu1 %vm695_vm0, %v25760_v28  ;;  %v23668_v32 = vld [vmem:[%s32009_s0 + $0x434] ss:$8 sps:$4 sm:$0xff]  }
  0xa1   : > { %2558 = vmatprep.subr.bf16.mxu1 %v23588_v33  ;;  %v23599_v33 = vld [vmem:[%s32011_s19 + $0x58] sm:$0xff]  }
  0xa4   : > { %2559 = vmatpush1.bf16.msra.mxu1 %v23586_v34  ;;  %v23670_v34 = vld [vmem:[%s32009_s0 + $0x440] ss:$8 sps:$4 sm:$0xff]  }
  0xa5   : > { %2560 = vmatprep.subr.bf16.mxu1 %v23591_v35  ;;  %v23672_v35 = vld [vmem:[%s32009_s0 + $0x444] ss:$8 sps:$4 sm:$0xff]  }
  0xa8   : > { %2561 = vmatpush1.bf16.msra.mxu1 %v23589_v36  ;;  %v23673_v36 = vld [vmem:[%s32009_s0 + $0x450] ss:$8 sps:$4 sm:$0xff]  }
  0xa9   : > { %2562 = vmatprep.subr.bf16.mxu1 %v23595_v37  ;;  %v23675_v37 = vld [vmem:[%s32009_s0 + $0x454] ss:$8 sps:$4 sm:$0xff]  }
  0xac   : > { %2563 = vmatpush1.bf16.msra.mxu1 %v23593_v39  ;;  %v23606_v39 = vld [vmem:[%s32011_s19 + $0x60] sm:$0xff]  }
  0xad   : > { %2564 = vmatprep.subr.bf16.mxu1 %v23598_v40 }
  0xb0   : > { %2565 = vmatpush1.bf16.msra.mxu1 %v23596_v41 }
  0xb1   : > { %2566 = vmatprep.subr.bf16.mxu1 %v23602_v42 }
  0xb4   : > { %2567 = vmatpush1.bf16.msra.mxu1 %v23600_v43 }
  0xb5   : > { %2568 = vmatprep.subr.bf16.mxu1 %v23605_v44 }
  0xb8   : > { %2569 = vmatpush1.bf16.msra.mxu1 %v23603_v45  ;;  %v23677_v45 = vld [vmem:[%s32009_s0 + $0x460] ss:$8 sps:$4 sm:$0xff]  }
  0xb9   : > { %2570 = vmatprep.subr.bf16.mxu1 %v23609_v46  ;;  %v23679_v46 = vld [vmem:[%s32009_s0 + $0x464] ss:$8 sps:$4 sm:$0xff]  }
  0xbc   : > { %2571 = vmatpush1.bf16.msra.mxu1 %v23607_v47  ;;  %v23680_v47 = vld [vmem:[%s32009_s0 + $0x470] ss:$8 sps:$4 sm:$0xff]  }
  0xbd   : > { %2572 = vmatprep.subr.bf16.mxu1 %v23612_v48  ;;  %v23682_v48 = vld [vmem:[%s32009_s0 + $0x474] ss:$8 sps:$4 sm:$0xff]  }
  0xc0   : > { %2573 = vmatpush1.bf16.msra.mxu1 %v23610_v49  ;;  %v23613_v49 = vld [vmem:[%s32011_s19 + $0x68] sm:$0xff]  }
  0xc1   : > { %2940 = vmatprep.subr.bf16.mxu1 %v23619_v51  ;;  %v23615_v51 = vld [vmem:[%s32011_s19 + $0x78] sm:$0xff]  }
  0xc3   : > { %2589 = vmatmul.mubr.bf16.vlgmr.msra.gmra.mrb[16].mxu1 %v25793_v38 }
  0xc4   : > { %19398 = vmatprep.mubr.msk.bf16.mxu1 %vm695_vm0, %v25760_v28  ;;  %2941 = vmatpush1.bf16.msra.mxu1 %v23617_v50  ;;  %v23614_v50 = vld [vmem:[%s32011_s19 + $0x70] sm:$0xff]  }
  0xc5   : > { %2942 = vmatprep.subr.bf16.mxu1 %v23623_v53 }
  0xc8   : > { %2943 = vmatpush1.bf16.msra.mxu1 %v23621_v52 }
  0xc9   : > { %2944 = vmatprep.subr.bf16.mxu1 %v23626_v55 }
  0xcc   : > { %2945 = vmatpush1.bf16.msra.mxu1 %v23624_v54  ;;  %v23616_v54 = vld [vmem:[%s32011_s19] sm:$0xff]  }
  0xcd   : > { %2946 = vmatprep.subr.bf16.mxu1 %v23630_v57  ;;  %v23689_v57 = vld [vmem:[%s32009_s0 + $0x484] ss:$8 sps:$4 sm:$0xff]  }
  0xd0   : > { %2947 = vmatpush1.bf16.msra.mxu1 %v23628_v56  ;;  %v23687_v56 = vld [vmem:[%s32009_s0 + $0x480] ss:$8 sps:$4 sm:$0xff]  }
  0xd1   : > { %2948 = vmatprep.subr.bf16.mxu1 %v23633_v59 }
  0xd4   : > { %2949 = vmatpush1.bf16.msra.mxu1 %v23631_v58 }
  0xd5   : > { %2950 = vmatprep.subr.bf16.mxu1 %v23637_v61 }
  0xd8   : > { %2951 = vmatpush1.bf16.msra.mxu1 %v23635_v60  ;;  %v23620_v60 = vld [vmem:[%s32011_s19 + $0x8] sm:$0xff]  }
  0xd9   : > { %2952 = vmatprep.subr.bf16.mxu1 %v23640_v63  ;;  %v23693_v63 = vld [vmem:[%s32009_s0 + $0x494] ss:$8 sps:$4 sm:$0xff]  }
  0xdc   : > { %2953 = vmatpush1.bf16.msra.mxu1 %v23638_v62  ;;  %v23691_v62 = vld [vmem:[%s32009_s0 + $0x490] ss:$8 sps:$4 sm:$0xff]  }
  0xdd   : > { %2954 = vmatprep.subr.bf16.mxu1 %v23644_v1  ;;  %v23696_v1 = vld [vmem:[%s32009_s0 + $0x4a4] ss:$8 sps:$4 sm:$0xff]  }
  0xe0   : > { %2955 = vmatpush1.bf16.msra.mxu1 %v23642_v0  ;;  %v23694_v0 = vld [vmem:[%s32009_s0 + $0x4a0] ss:$8 sps:$4 sm:$0xff]  }
  0xe1   : > { %2956 = vmatprep.subr.bf16.mxu1 %v23647_v3  ;;  %v23698_v3 = vld [vmem:[%s32009_s0 + $0x4b0] ss:$8 sps:$4 sm:$0xff]  }
  0xe4   : > { %2957 = vmatpush1.bf16.msra.mxu1 %v23645_v2  ;;  %v23627_v2 = vld [vmem:[%s32011_s19 + $0x10] sm:$0xff]  }
  0xe5   : > { %3324 = vmatprep.subr.bf16.mxu1 %v23654_v20 }
  0xe7   : > { %2973 = vmatmul.mubr.bf16.vlgmr.msra.gmra.mrb[20].mxu1 %v25793_v38 }
  0xe8   : > { %19468 = vmatprep.mubr.msk.bf16.mxu1 %vm695_vm0, %v25760_v28  ;;  %3325 = vmatpush1.bf16.msra.mxu1 %v23652_v19 }
  0xe9   : > { %3326 = vmatprep.subr.bf16.mxu1 %v23658_v23  ;;  %v23650_v23 = vld [vmem:[%s32011_s19 + $0x38] sm:$0xff]  }
  0xec   : > { %3327 = vmatpush1.bf16.msra.mxu1 %v23656_v22  ;;  %v23649_v22 = vld [vmem:[%s32011_s19 + $0x30] sm:$0xff]  }
  0xed   : > { %3328 = vmatprep.subr.bf16.mxu1 %v23661_v26  ;;  %v23651_v26 = vld [vmem:[%s32011_s19 + $0x80] sm:$0xff]  }
  0xf0   : > { %3329 = vmatpush1.bf16.msra.mxu1 %v23659_v25 }
  0xf1   : > { %3330 = vmatprep.subr.bf16.mxu1 %v23665_v30 }
  0xf4   : > { %3331 = vmatpush1.bf16.msra.mxu1 %v23663_v29  ;;  %v23655_v29 = vld [vmem:[%s32011_s19 + $0x88] sm:$0xff]  }
  0xf5   : > { %3332 = vmatprep.subr.bf16.mxu1 %v23668_v32  ;;  %v23662_v32 = vld [vmem:[%s32011_s19 + $0x90] sm:$0xff]  }
  0xf8   : > { %3333 = vmatpush1.bf16.msra.mxu1 %v23666_v31 }
  0xf9   : > { %3334 = vmatprep.subr.bf16.mxu1 %v23672_v35  ;;  %v23669_v35 = vld [vmem:[%s32011_s19 + $0x98] sm:$0xff]  }
  0xfc   : > { %3335 = vmatpush1.bf16.msra.mxu1 %v23670_v34 }
  0xfd   : > { %3336 = vmatprep.subr.bf16.mxu1 %v23675_v37  ;;  %v23683_v37 = vld [vmem:[%s32011_s19 + $0xa8] sm:$0xff]  }
 0x100   : > { %3337 = vmatpush1.bf16.msra.mxu1 %v23673_v36  ;;  %v23676_v36 = vld [vmem:[%s32011_s19 + $0xa0] sm:$0xff]  }
 0x101   : > { %3338 = vmatprep.subr.bf16.mxu1 %v23679_v46 }
 0x104   : > { %3339 = vmatpush1.bf16.msra.mxu1 %v23677_v45 }
 0x105   : > { %3340 = vmatprep.subr.bf16.mxu1 %v23682_v48 }
 0x106   : > { %v901_v4 = vpop.f32.mrb[0].mxu1 }
 0x107   : > { %v908_v5 = vpack.c.bf16 %v901_v4, %v901_v4  ;;  %v903_v6 = vpop.f32.mrb[1].mxu1  ;;  %v23700_v4 = vld [vmem:[%s32009_s0 + $0x4b4] ss:$8 sps:$4 sm:$0xff]  }
 0x108   : > { %v909_v7 = vpack.c.bf16 %v903_v6, %v903_v6  ;;  %v905_v8 = vpop.f32.mrb[2].mxu1  ;;  %v733_v11 = vpop.f32.mrb[0].mxu0  ;;  %3341 = vmatpush1.bf16.msra.mxu1 %v23680_v47  ;;  %v23703_v6 = vld [vmem:[%s32009_s0 + $0x4c4] ss:$8 sps:$4 sm:$0xff]  }
 0x109   : > { %v906_v10 = vpop.f32.mrb[3].mxu1  ;;  %v994_v12 = vsel %vm992_vm1, %v908_v5, 0  ;;  %v740_v13 = vpack.c.bf16 %v733_v11, %v733_v11  ;;  %v735_v14 = vpop.f32.mrb[1].mxu0  ;;  %3708 = vmatprep.subr.bf16.mxu1 %v23689_v57  ;;  %v23701_v5 = vld [vmem:[%s32009_s0 + $0x4c0] ss:$8 sps:$4 sm:$0xff]  }
 0x10a   : > { %19056 = vmatprep.subr.msk.bf16.mxu0 %vm992_vm1, %v909_v7  ;;  %v741_v15 = vpack.c.bf16 %v735_v14, %v735_v14  ;;  %v737_v16 = vpop.f32.mrb[2].mxu0  ;;  %v23634_v7 = vld [vmem:[%s32011_s19 + $0x18] sm:$0xff]   ;;  %v23708_v10 = vld [vmem:[%s32009_s0 + $0x4e0] ss:$8 sps:$4 sm:$0xff]   ;;  %v23710_v11 = vld [vmem:[%s32009_s0 + $0x4e4] ss:$8 sps:$4 sm:$0xff]  }
 0x10b   : > { %1000 = vmatpush1.bf16.msra.mxu0 %v994_v12  ;;  %v1177_v17 = vsel %vm992_vm1, %v740_v13, 0  ;;  %v738_v18 = vpop.f32.mrb[3].mxu0  ;;  %3357 = vmatmul.mubr.bf16.vlgmr.msra.gmra.mrb[24].mxu1 %v25793_v38  ;;  %v23705_v8 = vld [vmem:[%s32009_s0 + $0x4d0] ss:$8 sps:$4 sm:$0xff]   ;;  %v23641_v12 = vld [vmem:[%s32011_s19 + $0x20] sm:$0xff]  }
 0x10c   : > { %19073 = vmatprep.subr.msk.bf16.mxu0 %vm992_vm1, %v741_v15  ;;  %19538 = vmatprep.mubr.msk.bf16.mxu1 %vm695_vm0, %v25760_v28  ;;  %v23712_v13 = vld [vmem:[%s32009_s0 + $0x4f0] ss:$8 sps:$4 sm:$0xff]   ;;  %v23714_v14 = vld [vmem:[%s32009_s0 + $0x4f4] ss:$8 sps:$4 sm:$0xff]   ;;  %v23715_v15 = vld [vmem:[%s32009_s0 + $0x500] ss:$8 sps:$4 sm:$0xff]  }
 0x10d   : > { %3709 = vmatpush1.bf16.msra.mxu1 %v23687_v56  ;;  %v23717_v16 = vld [vmem:[%s32009_s0 + $0x504] ss:$8 sps:$4 sm:$0xff]  }
 0x10e   : > { %19057 = vmatmul.mubr.msk.bf16.vlgmr.msra.gmra.mrb[4].mxu0 %vm967_vm2, %v23581_v9  ;;  %3710 = vmatprep.subr.bf16.mxu1 %v23693_v63  ;;  %v23707_v9 = vld [vmem:[%s32009_s0 + $0x4d4] ss:$8 sps:$4 sm:$0xff]   ;;  %v23721_v56 = vld [vmem:[%s32011_s19 + $0x100] sm:$0xff]   ;;  %v23722_v63 = vld [vmem:[%s32011_s19 + $0x108] sm:$0xff]  }
 0x10f   : > { %1183 = vmatpush1.bf16.msra.mxu0 %v1177_v17  ;;  %1041 = vmatprep.mubr.bf16.mxu0 %v32003_v24  ;;  %v23648_v17 = vld [vmem:[%s32011_s19 + $0x28] sm:$0xff]  }
 0x111   : > { %3711 = vmatpush1.bf16.msra.mxu1 %v23691_v62 }
 0x112   : > { %3712 = vmatprep.subr.bf16.mxu1 %v23696_v1  ;;  %v23724_v1 = vld [vmem:[%s32011_s19 + $0x118] sm:$0xff]  }
 0x115   : > { %3713 = vmatpush1.bf16.msra.mxu1 %v23694_v0  ;;  %v23723_v0 = vld [vmem:[%s32011_s19 + $0x110] sm:$0xff]  }
 0x116   : > { %19058 = vmatmul.mubr.msk.bf16.gmra.mrb[8].mxu0 %vm967_vm2, %v23585_v21  ;;  %3714 = vmatprep.subr.bf16.mxu1 %v23700_v4  ;;  %v23727_v4 = vld [vmem:[%s32011_s19 + $0x130] sm:$0xff]  }
 0x117   : > { %1051 = vmatprep.mubr.bf16.mxu0 %v32003_v24 }
 0x119   : > { %3715 = vmatpush1.bf16.msra.mxu1 %v23698_v3  ;;  %v23726_v3 = vld [vmem:[%s32011_s19 + $0x128] sm:$0xff]  }
 0x11a   : > { %3716 = vmatprep.subr.bf16.mxu1 %v23703_v6 }
 0x11d   : > { %3717 = vmatpush1.bf16.msra.mxu1 %v23701_v5  ;;  %v23728_v5 = vld [vmem:[%s32011_s19 + $0x138] sm:$0xff]  }
 0x11e   : > { %19059 = vmatmul.mubr.msk.bf16.gmra.mrb[12].mxu0 %vm967_vm2, %v23592_v27  ;;  %3718 = vmatprep.subr.bf16.mxu1 %v23707_v9 }
 0x11f   : > { %1061 = vmatprep.mubr.bf16.mxu0 %v32003_v24 }
 0x121   : > { %3719 = vmatpush1.bf16.msra.mxu1 %v23705_v8 }
 0x122   : > { %3720 = vmatprep.subr.bf16.mxu1 %v23710_v11 }
 0x125   : > { %3721 = vmatpush1.bf16.msra.mxu1 %v23708_v10 }
 0x126   : > { %19060 = vmatmul.mubr.msk.bf16.gmra.mrb[16].mxu0 %vm967_vm2, %v23599_v33  ;;  %3722 = vmatprep.subr.bf16.mxu1 %v23714_v14  ;;  %v23730_v14 = vld [vmem:[%s32011_s19 + $0x148] sm:$0xff]  }
 0x127   : > { %1071 = vmatprep.mubr.bf16.mxu0 %v32003_v24 }
 0x129   : > { %3723 = vmatpush1.bf16.msra.mxu1 %v23712_v13 }
 0x12a   : > { %v1438_v40 = vpop.f32.mrb[4].mxu1  ;;  %3724 = vmatprep.subr.bf16.mxu1 %v23717_v16  ;;  %v23732_v16 = vld [vmem:[%s32011_s19 + $0x158] sm:$0xff]  }
 0x12b   : > { %v1440_v41 = vpop.f32.mrb[5].mxu1  ;;  %v1445_v52 = vpack.c.bf16 %v1438_v40, %v1438_v40  ;;  %v23685_v40 = vld [vmem:[%s32011_s19 + $0xb8] sm:$0xff]  }
 0x12c   : > { %v1446_v42 = vpack.c.bf16 %v1440_v41, %v1440_v41  ;;  %v1442_v43 = vpop.f32.mrb[6].mxu1 }
 0x12d   : > { %v1443_v44 = vpop.f32.mrb[7].mxu1  ;;  %v1529_v53 = vsel %vm992_vm1, %v1445_v52, 0  ;;  %3725 = vmatpush1.bf16.msra.mxu1 %v23715_v15  ;;  %v23711_v52 = vld [vmem:[%s32011_s19 + $0xe0] sm:$0xff]   ;;  %v23731_v15 = vld [vmem:[%s32011_s19 + $0x150] sm:$0xff]  }
 0x12e   : > { %19061 = vmatmul.mubr.msk.bf16.gmra.mrb[20].mxu0 %vm967_vm2, %v23606_v39  ;;  %19143 = vmatprep.subr.msk.bf16.mxu0 %vm992_vm1, %v1446_v42  ;;  %v23684_v39 = vld [vmem:[%s32011_s19 + $0xb0] sm:$0xff]   ;;  %v23686_v42 = vld [vmem:[%s32011_s19 + $0xc0] sm:$0xff]  }
 0x12f   : > { %1081 = vmatprep.mubr.bf16.mxu0 %v32003_v24  ;;  %4255 = vmatprep.subr.bf16.mxu1 %v32003_v24 }
 0x130   : > { %3741 = vmatmul.mubr.bf16.vlgmr.msra.gmra.mrb[28].mxu1 %v25793_v38 }
 0x136   : > { %19062 = vmatmul.mubr.msk.bf16.gmra.mrb[24].mxu0 %vm967_vm2, %v23613_v49  ;;  %v23690_v49 = vld [vmem:[%s32011_s19 + $0xc8] sm:$0xff]  }
 0x137   : > { %1091 = vmatprep.mubr.bf16.mxu0 %v32003_v24 }
 0x13e   : > { %19063 = vmatmul.mubr.msk.bf16.gmra.mrb[28].mxu0 %vm967_vm2, %v23614_v50  ;;  %v23697_v50 = vld [vmem:[%s32011_s19 + $0xd0] sm:$0xff]  }
 0x13f   : > { %1101 = vmatprep.mubr.bf16.mxu0 %v32003_v24 }
 0x146   : > { %19064 = vmatmul.mubr.msk.bf16.gmra.mrb[32].mxu0 %vm967_vm2, %v23615_v51  ;;  %v23704_v51 = vld [vmem:[%s32011_s19 + $0xd8] sm:$0xff]  }
 0x147   : > { %1214 = vmatprep.mubr.bf16.mxu0 %v32003_v24 }
 0x14e   : > { %19074 = vmatmul.mubr.msk.bf16.vlgmr.msra.gmra.mrb[4].mxu0 %vm967_vm2, %v23616_v54  ;;  %v26194_v28 = vpop.f32.mrb[8].mxu1  ;;  %v23719_v54 = vld [vmem:[%s32011_s19 + $0xf0] sm:$0xff]  }
 0x14f   : > { %1535 = vmatpush1.bf16.msra.mxu0 %v1529_v53  ;;  %1224 = vmatprep.mubr.bf16.mxu0 %v32003_v24  ;;  %v1824_v55 = vpop.f32.mrb[9].mxu1  ;;  %v1829_v25 = vpack.c.bf16 %v26194_v28, %v26194_v28  ;;  %v23718_v53 = vld [vmem:[%s32011_s19 + $0xe8] sm:$0xff]   ;;  %v23720_v28 = vld [vmem:[%s32011_s19 + $0xf8] sm:$0xff]  }
 0x150   : > { %v1830_v58 = vpack.c.bf16 %v1824_v55, %v1824_v55  ;;  %v1826_v59 = vpop.f32.mrb[10].mxu1 }
 0x151   : > { %v1827_v61 = vpop.f32.mrb[11].mxu1  ;;  %v1913_v38 = vsel %vm992_vm1, %v1829_v25, 0  ;;  %v3987_v25 = vld [vmem:[%s31984_s3 + $0x20] sm:$0xff] }
 0x152   : > { %19213 = vmatprep.subr.msk.bf16.mxu0 %vm992_vm1, %v1830_v58 }
 0x156   : > { %19075 = vmatmul.mubr.msk.bf16.gmra.mrb[8].mxu0 %vm967_vm2, %v23620_v60 }
 0x157   : > { %1234 = vmatprep.mubr.bf16.mxu0 %v32003_v24 }
 0x15e   : > { %19076 = vmatmul.mubr.msk.bf16.gmra.mrb[12].mxu0 %vm967_vm2, %v23627_v2  ;;  %v23725_v2 = vld [vmem:[%s32011_s19 + $0x120] sm:$0xff]  }
 0x15f   : > { %1244 = vmatprep.mubr.bf16.mxu0 %v32003_v24 }
 0x166   : > { %19077 = vmatmul.mubr.msk.bf16.gmra.mrb[16].mxu0 %vm967_vm2, %v23634_v7  ;;  %v23729_v7 = vld [vmem:[%s32011_s19 + $0x140] sm:$0xff]  }
 0x167   : > { %1254 = vmatprep.mubr.bf16.mxu0 %v32003_v24 }
 0x16e   : > { %19078 = vmatmul.mubr.msk.bf16.gmra.mrb[20].mxu0 %vm967_vm2, %v23641_v12 }
 0x16f   : > { %1264 = vmatprep.mubr.bf16.mxu0 %v32003_v24 }
 0x172   : > { %v2206_v18 = vpop.f32.mrb[12].mxu1 }
 0x173   : > { %v2208_v19 = vpop.f32.mrb[13].mxu1  ;;  %v2213_v41 = vpack.c.bf16 %v2206_v18, %v2206_v18  ;;  %v23734_v18 = vld [vmem:[%s32011_s19 + $0x168] sm:$0xff]  }
 0x174   : > { %v2210_v20 = vpop.f32.mrb[14].mxu1  ;;  %v2214_v27 = vpack.c.bf16 %v2208_v19, %v2208_v19  ;;  %v23735_v19 = vld [vmem:[%s32011_s19 + $0x170] sm:$0xff]  }
 0x175   : > { %v2211_v21 = vpop.f32.mrb[15].mxu1  ;;  %v2297_v44 = vsel %vm992_vm1, %v2213_v41, 0  ;;  %v3983_v20 = vld [vmem:[%s31984_s3] sm:$0xff]  ;;  %v23739_v41 = vld [vmem:[%s32011_s19 + $0x190] sm:$0xff]  }
 0x176   : > { %19079 = vmatmul.mubr.msk.bf16.gmra.mrb[24].mxu0 %vm967_vm2, %v23648_v17  ;;  %v23733_v17 = vld [vmem:[%s32011_s19 + $0x160] sm:$0xff]   ;;  %4001 = vperm.xlu0 %23442, %v3983_v20   ;;  %v3984_v21 = vld [vmem:[%s31984_s3 + $0x8] sm:$0xff]  ;;  %v23767_v20 = vld [vmem:[%s31985_s4 + $0x18] sm:$0xff]  }
 0x177   : > { %1274 = vmatprep.mubr.bf16.mxu0 %v32003_v24 }
 0x17a   : > { %4006 = vperm.xlu0 %23442, %v3984_v21   ;;  %v10253_v21 = vld [vmem:[%s31990_s9 + $0x48] sm:$0xff] }
 0x17e   : > { %19080 = vmatmul.mubr.msk.bf16.gmra.mrb[28].mxu0 %vm967_vm2, %v23649_v22  ;;  %v23736_v22 = vld [vmem:[%s32011_s19 + $0x178] sm:$0xff]   ;;  %4021 = vperm.xlu0 %23442, %v3987_v25   ;;  %v23769_v25 = vld [vmem:[%s31985_s4 + $0x20] sm:$0xff]  }
 0x17f   : > { %1284 = vmatprep.mubr.bf16.mxu0 %v32003_v24 }
 0x186   : > { %19081 = vmatmul.mubr.msk.bf16.gmra.mrb[32].mxu0 %vm967_vm2, %v23650_v23  ;;  %v3985_v23 = vld [vmem:[%s31984_s3 + $0x10] sm:$0xff] }
 0x187   : > { %1566 = vmatprep.mubr.bf16.mxu0 %v32003_v24  ;;  %4011 = vperm.xlu1 %23443, %v3985_v23   ;;  %v10256_v23 = vld [vmem:[%s31990_s9 + $0x60] sm:$0xff] }
 0x18e   : > { %19144 = vmatmul.mubr.msk.bf16.vlgmr.msra.gmra.mrb[4].mxu0 %vm967_vm2, %v23651_v26  ;;  %v3986_v26 = vld [vmem:[%s31984_s3 + $0x18] sm:$0xff] }
 0x18f   : > { %1919 = vmatpush1.bf16.msra.mxu0 %v1913_v38  ;;  %1576 = vmatprep.mubr.bf16.mxu0 %v32003_v24  ;;  %v3989_v38 = vld [vmem:[%s31984_s3 + $0x30] sm:$0xff] }
 0x190   : > { %19283 = vmatprep.subr.msk.bf16.mxu0 %vm992_vm1, %v2214_v27  ;;  %4016 = vperm.xlu1 %23443, %v3986_v26   ;;  %v10255_v26 = vld [vmem:[%s31990_s9 + $0x58] sm:$0xff] }
 0x191   : > { %4031 = vperm.xlu0 %23442, %v3989_v38   ;;  %v10258_v38 = vld [vmem:[%s31990_s9 + $0x70] sm:$0xff] }
 0x196   : > { %19145 = vmatmul.mubr.msk.bf16.gmra.mrb[8].mxu0 %vm967_vm2, %v23655_v29  ;;  %v2590_v30 = vpop.f32.mrb[16].mxu1  ;;  %v23737_v29 = vld [vmem:[%s32011_s19 + $0x180] sm:$0xff]  }
 0x197   : > { %1586 = vmatprep.mubr.bf16.mxu0 %v32003_v24  ;;  %v2592_v31 = vpop.f32.mrb[17].mxu1  ;;  %v2597_v55 = vpack.c.bf16 %v2590_v30, %v2590_v30 }
 0x198   : > { %v2594_v33 = vpop.f32.mrb[18].mxu1  ;;  %v2598_v45 = vpack.c.bf16 %v2592_v31, %v2592_v31 }
 0x199   : > { %v2595_v34 = vpop.f32.mrb[19].mxu1  ;;  %v2681_v58 = vsel %vm992_vm1, %v2597_v55, 0  ;;  %v3991_v33 = vld [vmem:[%s31984_s3 + $0x40] sm:$0xff]  ;;  %v23742_v55 = vld [vmem:[%s32011_s19 + $0x1a8] sm:$0xff]  }
 0x19a   : > { %v3990_v34 = vld [vmem:[%s31984_s3 + $0x38] sm:$0xff]  ;;  %4041 = vperm.xlu0 %23442, %v3991_v33   ;;  %v23750_v33 = vld [vmem:[%s32011_s19 + $0x1e8] sm:$0xff]  }
 0x19e   : > { %19146 = vmatmul.mubr.msk.bf16.gmra.mrb[12].mxu0 %vm967_vm2, %v23662_v32  ;;  %v3988_v32 = vld [vmem:[%s31984_s3 + $0x28] sm:$0xff] }
 0x19f   : > { %1596 = vmatprep.mubr.bf16.mxu0 %v32003_v24  ;;  %4026 = vperm.xlu1 %23443, %v3988_v32   ;;  %v23749_v32 = vld [vmem:[%s32011_s19 + $0x1e0] sm:$0xff]  }
 0x1a3   : > { %4036 = vperm.xlu1 %23443, %v3990_v34   ;;  %v23751_v34 = vld [vmem:[%s32011_s19 + $0x1f0] sm:$0xff]  }
 0x1a6   : > { %19147 = vmatmul.mubr.msk.bf16.gmra.mrb[16].mxu0 %vm967_vm2, %v23669_v35  ;;  %v23738_v35 = vld [vmem:[%s32011_s19 + $0x188] sm:$0xff]  }
 0x1a7   : > { %1606 = vmatprep.mubr.bf16.mxu0 %v32003_v24 }
 0x1ae   : > { %19148 = vmatmul.mubr.msk.bf16.gmra.mrb[20].mxu0 %vm967_vm2, %v23676_v36  ;;  %v3993_v36 = vld [vmem:[%s31984_s3 + $0x50] sm:$0xff] }
 0x1af   : > { %1616 = vmatprep.mubr.bf16.mxu0 %v32003_v24  ;;  %4051 = vperm.xlu0 %23442, %v3993_v36   ;;  %v23753_v36 = vld [vmem:[%s32011_s19 + $0x200] sm:$0xff]  }
 0x1b6   : > { %19149 = vmatmul.mubr.msk.bf16.gmra.mrb[24].mxu0 %vm967_vm2, %v23683_v37  ;;  %v3992_v37 = vld [vmem:[%s31984_s3 + $0x48] sm:$0xff] }
 0x1b7   : > { %1626 = vmatprep.mubr.bf16.mxu0 %v32003_v24  ;;  %4046 = vperm.xlu1 %23443, %v3992_v37   ;;  %v23762_v37 = vld [vmem:[%s31985_s4 + $0xd8] sm:$0xff]  }
 0x1ba   : > { %v26336_v43 = vpop.f32.mrb[20].mxu1 }
 0x1bb   : > { %v2976_v46 = vpop.f32.mrb[21].mxu1  ;;  %v2981_v6 = vpack.c.bf16 %v26336_v43, %v26336_v43  ;;  %v3996_v43 = vld [vmem:[%s31984_s3 + $0x68] sm:$0xff] }
 0x1bc   : > { %v2978_v47 = vpop.f32.mrb[22].mxu1  ;;  %v2982_v59 = vpack.c.bf16 %v2976_v46, %v2976_v46  ;;  %v23740_v46 = vld [vmem:[%s32011_s19 + $0x198] sm:$0xff]  }
 0x1bd   : > { %v2979_v48 = vpop.f32.mrb[23].mxu1  ;;  %v3065_v9 = vsel %vm992_vm1, %v2981_v6, 0  ;;  %v7355_v47 = vld [vmem:[%s31987_s6 + $0x10] sm:$0xff]  ;;  %v10245_v6 = vld [vmem:[%s31990_s9 + $0x8] sm:$0xff] }
 0x1be   : > { %19150 = vmatmul.mubr.msk.bf16.gmra.mrb[28].mxu0 %vm967_vm2, %v23684_v39  ;;  %v3995_v39 = vld [vmem:[%s31984_s3 + $0x60] sm:$0xff]  ;;  %v7354_v48 = vld [vmem:[%s31987_s6 + $0x8] sm:$0xff] }
 0x1bf   : > { %1636 = vmatprep.mubr.bf16.mxu0 %v32003_v24  ;;  %4061 = vperm.xlu0 %23442, %v3995_v39   ;;  %v23764_v39 = vld [vmem:[%s31985_s4 + $0xe0] sm:$0xff]  }
 0x1c6   : > { %19151 = vmatmul.mubr.msk.bf16.gmra.mrb[32].mxu0 %vm967_vm2, %v23685_v40  ;;  %v3994_v40 = vld [vmem:[%s31984_s3 + $0x58] sm:$0xff] }
 0x1c7   : > { %1950 = vmatprep.mubr.bf16.mxu0 %v32003_v24  ;;  %4056 = vperm.xlu1 %23443, %v3994_v40   ;;  %v23754_v40 = vld [vmem:[%s32011_s19 + $0x208] sm:$0xff]  }
 0x1cb   : > { %4066 = vperm.xlu1 %23443, %v3996_v43   ;;  %v23755_v43 = vld [vmem:[%s32011_s19 + $0x210] sm:$0xff]  }
 0x1ce   : > { %19214 = vmatmul.mubr.msk.bf16.vlgmr.msra.gmra.mrb[4].mxu0 %vm967_vm2, %v23686_v42  ;;  %v3997_v42 = vld [vmem:[%s31984_s3 + $0x70] sm:$0xff] }
 0x1cf   : > { %2303 = vmatpush1.bf16.msra.mxu0 %v2297_v44  ;;  %1960 = vmatprep.mubr.bf16.mxu0 %v32003_v24  ;;  %v7353_v44 = vld [vmem:[%s31987_s6] sm:$0xff] }
 0x1d0   : > { %19353 = vmatprep.subr.msk.bf16.mxu0 %vm992_vm1, %v2598_v45  ;;  %4071 = vperm.xlu0 %23442, %v3997_v42   ;;  %v3998_v45 = vld [vmem:[%s31984_s3 + $0x78] sm:$0xff]  ;;  %v23768_v42 = vld [vmem:[%s31985_s4 + $0xf0] sm:$0xff]  }
 0x1d1   : > { %4076 = vperm.xlu1 %23443, %v3998_v45   ;;  %v23772_v45 = vld [vmem:[%s31985_s4 + $0x100] sm:$0xff]  }
 0x1d4   : > { %7371 = vperm.xlu0 %23442, %v7353_v44   ;;  %v23770_v44 = vld [vmem:[%s31985_s4 + $0xf8] sm:$0xff]  }
 0x1d5   : > { %7376 = vperm.xlu1 %23443, %v7354_v48   ;;  %v23758_v48 = vld [vmem:[%s32011_s19 + $0x228] sm:$0xff]  }
 0x1d6   : > { %19215 = vmatmul.mubr.msk.bf16.gmra.mrb[8].mxu0 %vm967_vm2, %v23690_v49  ;;  %v7357_v49 = vld [vmem:[%s31987_s6 + $0x20] sm:$0xff] }
 0x1d7   : > { %1970 = vmatprep.mubr.bf16.mxu0 %v32003_v24 }
 0x1d8   : > { %7381 = vperm.xlu0 %23442, %v7355_v47   ;;  %v23757_v47 = vld [vmem:[%s32011_s19 + $0x220] sm:$0xff]  }
 0x1dc   : > { %7391 = vperm.xlu0 %23442, %v7357_v49   ;;  %v23759_v49 = vld [vmem:[%s32011_s19 + $0x230] sm:$0xff]  }
 0x1de   : > { %19216 = vmatmul.mubr.msk.bf16.gmra.mrb[12].mxu0 %vm967_vm2, %v23697_v50  ;;  %v26380_v57 = vpop.f32.mrb[24].mxu1  ;;  %v7356_v50 = vld [vmem:[%s31987_s6 + $0x18] sm:$0xff] }
 0x1df   : > { %1980 = vmatprep.mubr.bf16.mxu0 %v32003_v24  ;;  %v3360_v60 = vpop.f32.mrb[25].mxu1  ;;  %v3365_v27 = vpack.c.bf16 %v26380_v57, %v26380_v57  ;;  %7386 = vperm.xlu1 %23443, %v7356_v50   ;;  %v7362_v57 = vld [vmem:[%s31987_s6 + $0x48] sm:$0xff]  ;;  %v23760_v50 = vld [vmem:[%s32011_s19 + $0x238] sm:$0xff]  }
 0x1e0   : > { %v3362_v61 = vpop.f32.mrb[26].mxu1  ;;  %v3366_v10 = vpack.c.bf16 %v3360_v60, %v3360_v60  ;;  %v23743_v60 = vld [vmem:[%s32011_s19 + $0x1b0] sm:$0xff]  }
 0x1e1   : > { %v3363_v62 = vpop.f32.mrb[27].mxu1  ;;  %v3449_v30 = vsel %vm992_vm1, %v3365_v27, 0  ;;  %v7367_v61 = vld [vmem:[%s31987_s6 + $0x70] sm:$0xff]  ;;  %v23771_v27 = vld [vmem:[%s31985_s4 + $0x28] sm:$0xff]  }
 0x1e2   : > { %v7366_v62 = vld [vmem:[%s31987_s6 + $0x68] sm:$0xff] }
 0x1e6   : > { %19217 = vmatmul.mubr.msk.bf16.gmra.mrb[16].mxu0 %vm967_vm2, %v23704_v51  ;;  %v23741_v51 = vld [vmem:[%s32011_s19 + $0x1a0] sm:$0xff]  }
 0x1e7   : > { %1990 = vmatprep.mubr.bf16.mxu0 %v32003_v24 }
 0x1ee   : > { %19218 = vmatmul.mubr.msk.bf16.gmra.mrb[20].mxu0 %vm967_vm2, %v23711_v52  ;;  %v7359_v52 = vld [vmem:[%s31987_s6 + $0x30] sm:$0xff] }
 0x1ef   : > { %2000 = vmatprep.mubr.bf16.mxu0 %v32003_v24  ;;  %7401 = vperm.xlu0 %23442, %v7359_v52   ;;  %v23774_v52 = vld [vmem:[%s31985_s4 + $0x108] sm:$0xff]  }
 0x1f6   : > { %19219 = vmatmul.mubr.msk.bf16.gmra.mrb[24].mxu0 %vm967_vm2, %v23718_v53  ;;  %v7358_v53 = vld [vmem:[%s31987_s6 + $0x28] sm:$0xff] }
 0x1f7   : > { %2010 = vmatprep.mubr.bf16.mxu0 %v32003_v24  ;;  %7396 = vperm.xlu1 %23443, %v7358_v53   ;;  %v23775_v53 = vld [vmem:[%s31985_s4 + $0x38] sm:$0xff]  }
 0x1fe   : > { %19220 = vmatmul.mubr.msk.bf16.gmra.mrb[28].mxu0 %vm967_vm2, %v23719_v54  ;;  %v7361_v54 = vld [vmem:[%s31987_s6 + $0x40] sm:$0xff] }
 0x1ff   : > { %2020 = vmatprep.mubr.bf16.mxu0 %v32003_v24  ;;  %7411 = vperm.xlu0 %23442, %v7361_v54   ;;  %v23776_v54 = vld [vmem:[%s31985_s4 + $0x110] sm:$0xff]  }
 0x203   : > { %v26426_v8 = vpop.f32.mrb[28].mxu1 }
 0x204   : > { %v3744_v11 = vpop.f32.mrb[29].mxu1 }
 0x205   : > { %v3746_v12 = vpop.f32.mrb[30].mxu1  ;;  %v3750_v31 = vpack.c.bf16 %v3744_v11, %v3744_v11 }
 0x206   : > { %19221 = vmatmul.mubr.msk.bf16.gmra.mrb[32].mxu0 %vm967_vm2, %v23720_v28  ;;  %v3747_v13 = vpop.f32.mrb[31].mxu1  ;;  %v7360_v28 = vld [vmem:[%s31987_s6 + $0x38] sm:$0xff]  ;;  %v10250_v12 = vld [vmem:[%s31990_s9 + $0x30] sm:$0xff] }
 0x207   : > { %2334 = vmatprep.mubr.bf16.mxu0 %v32003_v24  ;;  %7406 = vperm.xlu1 %23443, %v7360_v28   ;;  %v23763_v13 = vld [vmem:[%s31985_s4 + $0x8] sm:$0xff]   ;;  %v23777_v28 = vld [vmem:[%s31985_s4 + $0x40] sm:$0xff]  }
 0x20b   : > { %7416 = vperm.xlu1 %23443, %v7362_v57  }
 0x20e   : > { %19284 = vmatmul.mubr.msk.bf16.vlgmr.msra.gmra.mrb[4].mxu0 %vm967_vm2, %v23721_v56  ;;  %v7363_v56 = vld [vmem:[%s31987_s6 + $0x50] sm:$0xff] }
 0x20f   : > { %2687 = vmatpush1.bf16.msra.mxu0 %v2681_v58  ;;  %2344 = vmatprep.mubr.bf16.mxu0 %v32003_v24  ;;  %v7365_v58 = vld [vmem:[%s31987_s6 + $0x60] sm:$0xff] }
 0x210   : > { %19423 = vmatprep.subr.msk.bf16.mxu0 %vm992_vm1, %v2982_v59  ;;  %7421 = vperm.xlu0 %23442, %v7363_v56   ;;  %v7364_v59 = vld [vmem:[%s31987_s6 + $0x58] sm:$0xff]  ;;  %v4002_v56 = vpop.permute.xlu0 %4001 }
 0x211   : > { %7426 = vperm.xlu1 %23443, %v7364_v59  }
 0x214   : > { %7431 = vperm.xlu0 %23442, %v7365_v58  }
 0x215   : > { %7436 = vperm.xlu1 %23443, %v7366_v62  }
 0x216   : > { %19285 = vmatmul.mubr.msk.bf16.gmra.mrb[8].mxu0 %vm967_vm2, %v23722_v63  ;;  %v10381_v63 = vld [vmem:[%s31992_s11] sm:$0x3f] }
 0x217   : > { %2354 = vmatprep.mubr.bf16.mxu0 %v32003_v24 }
 0x218   : > { %7441 = vperm.xlu0 %23442, %v7367_v61  }
 0x21c   : > { %10384 = vperm.xlu0 %23442, %v10381_v63  }
 0x21e   : > { %19286 = vmatmul.mubr.msk.bf16.gmra.mrb[12].mxu0 %vm967_vm2, %v23723_v0  ;;  %v7368_v0 = vld [vmem:[%s31987_s6 + $0x78] sm:$0xff] }
 0x21f   : > { %2364 = vmatprep.mubr.bf16.mxu0 %v32003_v24  ;;  %7446 = vperm.xlu1 %23443, %v7368_v0  }
 0x226   : > { %19287 = vmatmul.mubr.msk.bf16.gmra.mrb[16].mxu0 %vm967_vm2, %v23724_v1  ;;  %v23744_v1 = vld [vmem:[%s32011_s19 + $0x1b8] sm:$0xff]  }
 0x227   : > { %2374 = vmatprep.mubr.bf16.mxu0 %v32003_v24 }
 0x22e   : > { %19288 = vmatmul.mubr.msk.bf16.gmra.mrb[20].mxu0 %vm967_vm2, %v23725_v2  ;;  %v10244_v2 = vld [vmem:[%s31990_s9] sm:$0xff] }
 0x22f   : > { %2384 = vmatprep.mubr.bf16.mxu0 %v32003_v24  ;;  %10262 = vperm.xlu0 %23442, %v10244_v2  }
 0x236   : > { %19289 = vmatmul.mubr.msk.bf16.gmra.mrb[24].mxu0 %vm967_vm2, %v23726_v3  ;;  %v10533_v3 = vld [vmem:[%s31994_s13] sm:$0x3f] }
 0x237   : > { %2394 = vmatprep.mubr.bf16.mxu0 %v32003_v24  ;;  %10536 = vperm.xlu1 %23443, %v10533_v3  }
 0x23b   : > { %10267 = vperm.xlu1 %23443, %v10245_v6  }
 0x23e   : > { %19290 = vmatmul.mubr.msk.bf16.gmra.mrb[28].mxu0 %vm967_vm2, %v23727_v4  ;;  %v10246_v4 = vld [vmem:[%s31990_s9 + $0x10] sm:$0xff] }
 0x23f   : > { %2404 = vmatprep.mubr.bf16.mxu0 %v32003_v24  ;;  %10272 = vperm.xlu0 %23442, %v10246_v4  }
 0x246   : > { %19291 = vmatmul.mubr.msk.bf16.gmra.mrb[32].mxu0 %vm967_vm2, %v23728_v5  ;;  %v3749_v5 = vpack.c.bf16 %v26426_v8, %v26426_v8  ;;  %v23761_v8 = vld [vmem:[%s31985_s4] sm:$0xff]  }
 0x247   : > { %2718 = vmatprep.mubr.bf16.mxu0 %v32003_v24  ;;  %4256 = vmatpush1.bf16.msra.mxu1 %v23761_v8  ;;  %v23779_v8 = vld [vmem:[%s31985_s4 + $0x48] sm:$0xff]  }
 0x248   : > { %v3833_v11 = vsel %vm992_vm1, %v3749_v5, 0  ;;  %4257 = vmatprep.subr.bf16.mxu1 %v32003_v24 }
 0x24b   : > { %4258 = vmatpush1.bf16.msra.mxu1 %v23763_v13 }
 0x24c   : > { %4259 = vmatprep.subr.bf16.mxu1 %v32003_v24 }
 0x24e   : > { %19354 = vmatmul.mubr.msk.bf16.vlgmr.msra.gmra.mrb[4].mxu0 %vm967_vm2, %v23729_v7  ;;  %v23745_v7 = vld [vmem:[%s32011_s19 + $0x1c0] sm:$0xff]  }
 0x24f   : > { %3071 = vmatpush1.bf16.msra.mxu0 %v3065_v9  ;;  %2728 = vmatprep.mubr.bf16.mxu0 %v32003_v24  ;;  %v10248_v9 = vld [vmem:[%s31990_s9 + $0x20] sm:$0xff] }
 0x250   : > { %19493 = vmatprep.subr.msk.bf16.mxu0 %vm992_vm1, %v3366_v10  ;;  %v10247_v10 = vld [vmem:[%s31990_s9 + $0x18] sm:$0xff]  ;;  %10282 = vperm.xlu0 %23442, %v10248_v9  }
 0x251   : > { %10277 = vperm.xlu1 %23443, %v10247_v10  }
 0x254   : > { %10292 = vperm.xlu0 %23442, %v10250_v12  }
 0x256   : > { %19355 = vmatmul.mubr.msk.bf16.gmra.mrb[8].mxu0 %vm967_vm2, %v23730_v14  ;;  %v10249_v14 = vld [vmem:[%s31990_s9 + $0x28] sm:$0xff] }
 0x257   : > { %2738 = vmatprep.mubr.bf16.mxu0 %v32003_v24  ;;  %10287 = vperm.xlu1 %23443, %v10249_v14  }
 0x25e   : > { %19356 = vmatmul.mubr.msk.bf16.gmra.mrb[12].mxu0 %vm967_vm2, %v23731_v15  ;;  %v23746_v15 = vld [vmem:[%s32011_s19 + $0x1c8] sm:$0xff]  }
 0x25f   : > { %2748 = vmatprep.mubr.bf16.mxu0 %v32003_v24 }
 0x266   : > { %19357 = vmatmul.mubr.msk.bf16.gmra.mrb[16].mxu0 %vm967_vm2, %v23732_v16  ;;  %v10252_v16 = vld [vmem:[%s31990_s9 + $0x40] sm:$0xff] }
 0x267   : > { %2758 = vmatprep.mubr.bf16.mxu0 %v32003_v24  ;;  %10302 = vperm.xlu0 %23442, %v10252_v16  }
 0x26e   : > { %19358 = vmatmul.mubr.msk.bf16.gmra.mrb[20].mxu0 %vm967_vm2, %v23733_v17  ;;  %v23765_v17 = vld [vmem:[%s31985_s4 + $0x10] sm:$0xff]  }
 0x26f   : > { %2768 = vmatprep.mubr.bf16.mxu0 %v32003_v24  ;;  %4260 = vmatpush1.bf16.msra.mxu1 %v23765_v17 }
 0x270   : > { %4261 = vmatprep.subr.bf16.mxu1 %v32003_v24 }
 0x273   : > { %4262 = vmatpush1.bf16.msra.mxu1 %v23767_v20  ;;  %v23780_v20 = vld [vmem:[%s31985_s4 + $0x50] sm:$0xff]  }
 0x274   : > { %4263 = vmatprep.subr.bf16.mxu1 %v32003_v24 }
 0x276   : > { %19359 = vmatmul.mubr.msk.bf16.gmra.mrb[24].mxu0 %vm967_vm2, %v23734_v18  ;;  %v10251_v18 = vld [vmem:[%s31990_s9 + $0x38] sm:$0xff] }
 0x277   : > { %2778 = vmatprep.mubr.bf16.mxu0 %v32003_v24  ;;  %10297 = vperm.xlu1 %23443, %v10251_v18  }
 0x278   : > { %4264 = vmatpush1.bf16.msra.mxu1 %v23769_v25 }
 0x279   : > { %4265 = vmatprep.subr.bf16.mxu1 %v32003_v24 }
 0x27b   : > { %10307 = vperm.xlu1 %23443, %v10253_v21   ;;  %v23784_v21 = vld [vmem:[%s31985_s4 + $0x170] sm:$0xff]  }
 0x27c   : > { %4266 = vmatpush1.bf16.msra.mxu1 %v23771_v27 }
 0x27d   : > { %4267 = vmatprep.subr.bf16.mxu1 %v32003_v24 }
 0x27e   : > { %19360 = vmatmul.mubr.msk.bf16.gmra.mrb[28].mxu0 %vm967_vm2, %v23735_v19  ;;  %v10254_v19 = vld [vmem:[%s31990_s9 + $0x50] sm:$0xff] }
 0x27f   : > { %2788 = vmatprep.mubr.bf16.mxu0 %v32003_v24  ;;  %10312 = vperm.xlu0 %23442, %v10254_v19  }
 0x280   : > { %10317 = vperm.xlu1 %23443, %v10255_v26  }
 0x283   : > { %10322 = vperm.xlu0 %23442, %v10256_v23  }
 0x286   : > { %19361 = vmatmul.mubr.msk.bf16.gmra.mrb[32].mxu0 %vm967_vm2, %v23736_v22  ;;  %v23747_v22 = vld [vmem:[%s32011_s19 + $0x1d0] sm:$0xff]  }
 0x287   : > { %3102 = vmatprep.mubr.bf16.mxu0 %v32003_v24  ;;  %10332 = vperm.xlu0 %23442, %v10258_v38  }
 0x28e   : > { %19424 = vmatmul.mubr.msk.bf16.vlgmr.msra.gmra.mrb[4].mxu0 %vm967_vm2, %v23737_v29  ;;  %v10257_v29 = vld [vmem:[%s31990_s9 + $0x68] sm:$0xff] }
 0x28f   : > { %3455 = vmatpush1.bf16.msra.mxu0 %v3449_v30  ;;  %3112 = vmatprep.mubr.bf16.mxu0 %v32003_v24  ;;  %v23748_v30 = vld [vmem:[%s32011_s19 + $0x1d8] sm:$0xff]  }
 0x290   : > { %19563 = vmatprep.subr.msk.bf16.mxu0 %vm992_vm1, %v3750_v31  ;;  %v10259_v31 = vld [vmem:[%s31990_s9 + $0x78] sm:$0xff]  ;;  %10327 = vperm.xlu1 %23443, %v10257_v29  }
 0x294   : > { %10337 = vperm.xlu1 %23443, %v10259_v31   ;;  %v23781_v31 = vld [vmem:[%s31985_s4 + $0x58] sm:$0xff]  }
 0x296   : > { %19425 = vmatmul.mubr.msk.bf16.gmra.mrb[8].mxu0 %vm967_vm2, %v23738_v35  ;;  %v23752_v35 = vld [vmem:[%s32011_s19 + $0x1f8] sm:$0xff]  }
 0x297   : > { %3122 = vmatprep.mubr.bf16.mxu0 %v32003_v24 }
 0x29e   : > { %19426 = vmatmul.mubr.msk.bf16.gmra.mrb[12].mxu0 %vm967_vm2, %v23739_v41  ;;  %v23766_v41 = vld [vmem:[%s31985_s4 + $0xe8] sm:$0xff]  }
 0x29f   : > { %3132 = vmatprep.mubr.bf16.mxu0 %v32003_v24 }
 0x2a6   : > { %19427 = vmatmul.mubr.msk.bf16.gmra.mrb[16].mxu0 %vm967_vm2, %v23740_v46  ;;  %v23756_v46 = vld [vmem:[%s32011_s19 + $0x218] sm:$0xff]  }
 0x2a7   : > { %3142 = vmatprep.mubr.bf16.mxu0 %v32003_v24 }
 0x2ae   : > { %19428 = vmatmul.mubr.msk.bf16.gmra.mrb[20].mxu0 %vm967_vm2, %v23741_v51  ;;  %v23773_v51 = vld [vmem:[%s31985_s4 + $0x30] sm:$0xff]  }
 0x2af   : > { %3152 = vmatprep.mubr.bf16.mxu0 %v32003_v24  ;;  %4268 = vmatpush1.bf16.msra.mxu1 %v23773_v51 }
 0x2b0   : > { %4269 = vmatprep.subr.bf16.mxu1 %v32003_v24 }
 0x2b3   : > { %4270 = vmatpush1.bf16.msra.mxu1 %v23775_v53  ;;  %v23789_v53 = vld [vmem:[%s31985_s4 + $0x188] sm:$0xff]  }
 0x2b4   : > { %4271 = vmatprep.subr.bf16.mxu1 %v32003_v24 }
 0x2b6   : > { %19429 = vmatmul.mubr.msk.bf16.gmra.mrb[24].mxu0 %vm967_vm2, %v23742_v55  ;;  %v23778_v55 = vld [vmem:[%s31985_s4 + $0x118] sm:$0xff]  }
 0x2b7   : > { %3162 = vmatprep.mubr.bf16.mxu0 %v32003_v24  ;;  %4272 = vmatpush1.bf16.msra.mxu1 %v23777_v28 }
 0x2b8   : > { %4449 = vmatprep.subr.bf16.mxu1 %v32003_v24 }
 0x2be   : > { %19430 = vmatmul.mubr.msk.bf16.gmra.mrb[28].mxu0 %vm967_vm2, %v23743_v60  ;;  %v4007_v60 = vpop.permute.xlu0 %4006 }
 0x2bf   : > { %3172 = vmatprep.mubr.bf16.mxu0 %v32003_v24 }
 0x2c2   : > { %v4022_v27 = vpop.permute.xlu0 %4021 }
 0x2c6   : > { %19431 = vmatmul.mubr.msk.bf16.gmra.mrb[32].mxu0 %vm967_vm2, %v23744_v1  ;;  %v4012_v1 = vpop.permute.xlu1 %4011 }
 0x2c7   : > { %3486 = vmatprep.mubr.bf16.mxu0 %v32003_v24 }
 0x2ca   : > { %v4017_v14 = vpop.permute.xlu1 %4016 }
 0x2ce   : > { %19494 = vmatmul.mubr.msk.bf16.vlgmr.msra.gmra.mrb[4].mxu0 %vm967_vm2, %v23745_v7 }
 0x2cf   : > { %3839 = vmatpush1.bf16.msra.mxu0 %v3833_v11  ;;  %3496 = vmatprep.mubr.bf16.mxu0 %v32003_v24  ;;  %v23783_v11 = vld [vmem:[%s31985_s4 + $0x168] sm:$0xff]  }
 0x2d0   : > { %5290 = vmatprep.subr.bf16.mxu0 %v32003_v24 }
 0x2d6   : > { %19495 = vmatmul.mubr.msk.bf16.gmra.mrb[8].mxu0 %vm967_vm2, %v23746_v15 }
 0x2d7   : > { %3506 = vmatprep.mubr.bf16.mxu0 %v32003_v24 }
 0x2de   : > { %19496 = vmatmul.mubr.msk.bf16.gmra.mrb[12].mxu0 %vm967_vm2, %v23747_v22 }
 0x2df   : > { %3516 = vmatprep.mubr.bf16.mxu0 %v32003_v24 }
 0x2e6   : > { %19497 = vmatmul.mubr.msk.bf16.gmra.mrb[16].mxu0 %vm967_vm2, %v23748_v30 }
 0x2e7   : > { %3526 = vmatprep.mubr.bf16.mxu0 %v32003_v24 }
 0x2ee   : > { %19498 = vmatmul.mubr.msk.bf16.gmra.mrb[20].mxu0 %vm967_vm2, %v23749_v32  ;;  %v23786_v32 = vld [vmem:[%s31985_s4 + $0x178] sm:$0xff]  }
 0x2ef   : > { %3536 = vmatprep.mubr.bf16.mxu0 %v32003_v24 }
 0x2f6   : > { %19499 = vmatmul.mubr.msk.bf16.gmra.mrb[24].mxu0 %vm967_vm2, %v23750_v33 }
 0x2f7   : > { %3546 = vmatprep.mubr.bf16.mxu0 %v32003_v24 }
 0x2fe   : > { %19500 = vmatmul.mubr.msk.bf16.gmra.mrb[28].mxu0 %vm967_vm2, %v23751_v34 }
 0x2ff   : > { %3556 = vmatprep.mubr.bf16.mxu0 %v32003_v24 }
 0x306   : > { %19501 = vmatmul.mubr.msk.bf16.gmra.mrb[32].mxu0 %vm967_vm2, %v23752_v35  ;;  %v4027_v35 = vpop.permute.xlu1 %4026 }
 0x307   : > { %3870 = vmatprep.mubr.bf16.mxu0 %v32003_v24 }
 0x30e   : > { %19564 = vmatmul.mubr.msk.bf16.vlgmr.msra.gmra.mrb[4].mxu0 %vm967_vm2, %v23753_v36 }
 0x30f   : > { %3880 = vmatprep.mubr.bf16.mxu0 %v32003_v24  ;;  %5291 = vmatpush1.bf16.msra.mxu0 %v23762_v37 }
 0x310   : > { %5292 = vmatprep.subr.bf16.mxu0 %v32003_v24 }
 0x313   : > { %5293 = vmatpush1.bf16.msra.mxu0 %v23764_v39 }
 0x314   : > { %5294 = vmatprep.subr.bf16.mxu0 %v32003_v24 }
 0x316   : > { %19565 = vmatmul.mubr.msk.bf16.gmra.mrb[8].mxu0 %vm967_vm2, %v23754_v40 }
 0x317   : > { %3890 = vmatprep.mubr.bf16.mxu0 %v32003_v24  ;;  %5295 = vmatpush1.bf16.msra.mxu0 %v23766_v41 }
 0x318   : > { %5296 = vmatprep.subr.bf16.mxu0 %v32003_v24 }
 0x31b   : > { %5297 = vmatpush1.bf16.msra.mxu0 %v23768_v42  ;;  %v23782_v42 = vld [vmem:[%s31985_s4 + $0x60] sm:$0xff]  }
 0x31c   : > { %5298 = vmatprep.subr.bf16.mxu0 %v32003_v24 }
 0x31e   : > { %19566 = vmatmul.mubr.msk.bf16.gmra.mrb[12].mxu0 %vm967_vm2, %v23755_v43  ;;  %v23788_v43 = vld [vmem:[%s31985_s4 + $0x180] sm:$0xff]  }
 0x31f   : > { %3900 = vmatprep.mubr.bf16.mxu0 %v32003_v24  ;;  %5299 = vmatpush1.bf16.msra.mxu0 %v23770_v44 }
 0x320   : > { %5300 = vmatprep.subr.bf16.mxu0 %v32003_v24 }
 0x323   : > { %5301 = vmatpush1.bf16.msra.mxu0 %v23772_v45 }
 0x324   : > { %5302 = vmatprep.subr.bf16.mxu0 %v32003_v24 }
 0x326   : > { %19567 = vmatmul.mubr.msk.bf16.gmra.mrb[16].mxu0 %vm967_vm2, %v23756_v46 }
 0x327   : > { %3910 = vmatprep.mubr.bf16.mxu0 %v32003_v24  ;;  %5303 = vmatpush1.bf16.msra.mxu0 %v23774_v52  ;;  %v23785_v52 = vld [vmem:[%s31985_s4 + $0x68] sm:$0xff]  }
 0x328   : > { %5304 = vmatprep.subr.bf16.mxu0 %v32003_v24 }
 0x32b   : > { %5305 = vmatpush1.bf16.msra.mxu0 %v23776_v54 }
 0x32c   : > { %5306 = vmatprep.subr.bf16.mxu0 %v32003_v24 }
 0x32e   : > { %19568 = vmatmul.mubr.msk.bf16.gmra.mrb[20].mxu0 %vm967_vm2, %v23757_v47 }
 0x32f   : > { %3920 = vmatprep.mubr.bf16.mxu0 %v32003_v24  ;;  %5307 = vmatpush1.bf16.msra.mxu0 %v23778_v55  ;;  %v4037_v55 = vpop.permute.xlu1 %4036 }
 0x330   : > { %6002 = vmatprep.subr.bf16.mxu0 %v32003_v24 }
 0x336   : > { %19569 = vmatmul.mubr.msk.bf16.gmra.mrb[24].mxu0 %vm967_vm2, %v23758_v48 }
 0x337   : > { %3930 = vmatprep.mubr.bf16.mxu0 %v32003_v24 }
 0x33e   : > { %19570 = vmatmul.mubr.msk.bf16.gmra.mrb[28].mxu0 %vm967_vm2, %v23759_v49  ;;  %v4032_v49 = vpop.permute.xlu0 %4031 }
 0x33f   : > { %3940 = vmatprep.mubr.bf16.mxu0 %v32003_v24 }
 0x346   : > { %19571 = vmatmul.mubr.msk.bf16.gmra.mrb[32].mxu0 %vm967_vm2, %v23760_v50  ;;  %vm10482_vm2 = vcmask 392192  }
 0x3e1   : > { %v3872_v57 = vpop.f32.mrb[4].mxu0 }
 0x3e2   : > { %v4079_v58 = vadd.f32 %v4002_v56, %v3872_v57  ;;  %v3874_v59 = vpop.f32.mrb[5].mxu0 }
 0x3e3   : > { %v4080_v61 = vadd.f32 %v4002_v56, %v3874_v59  ;;  %v3876_v62 = vpop.f32.mrb[6].mxu0 }
 0x3e4   : > { %v4081_v63 = vadd.f32 %v4007_v60, %v3876_v62  ;;  %v3878_v0 = vpop.f32.mrb[7].mxu0  ;;  %v4111_v3 = vmax.f32 %v4079_v58, 0.0  ;;  %v23791_v62 = vld [vmem:[%s31985_s4 + $0x190] sm:$0xff]  }
 0x3e5   : > { %v4082_v2 = vadd.f32 %v4007_v60, %v3878_v0  ;;  %v4112_v5 = vmax.f32 %v4080_v61, 0.0  ;;  %v23787_v61 = vld [vmem:[%s31985_s4 + $0x70] sm:$0xff]  }
 0x3e6   : > { %v4113_v4 = vmax.f32 %v4081_v63, 0.0 }
 0x3e7   : > { %v4114_v6 = vmax.f32 %v4082_v2, 0.0 }
 0x3e8   : > { %v26816_v7 = vpack.c.bf16 %v4113_v4, %v4111_v3  ;;  %v4042_v4 = vpop.permute.xlu0 %4041 }
 0x3e9   : > { %v26818_v9 = vpack.c.bf16 %v4114_v6, %v4112_v5  ;;  %v3882_v10 = vpop.f32.mrb[8].mxu0 }
 0x3ea   : > { %v4083_v12 = vadd.f32 %v4012_v1, %v3882_v10  ;;  %v3884_v13 = vpop.f32.mrb[9].mxu0  ;;  %v23790_v10 = vld [vmem:[%s31985_s4 + $0x78] sm:$0xff]  }
 0x3eb   : > { %v4084_v15 = vadd.f32 %v4012_v1, %v3884_v13  ;;  %v3886_v16 = vpop.f32.mrb[10].mxu0  ;;  %19581 = vmatprep.mubr.msk.bf16.mxu1 %vm695_vm0, %v26818_v9  ;;  %19742 = vmatprep.mubr.msk.bf16.mxu0 %vm695_vm0, %v26818_v9  ;;  %v4047_v13 = vpop.permute.xlu1 %4046 }
 0x3ec   : > { %v4085_v17 = vadd.f32 %v4017_v14, %v3886_v16  ;;  %v3888_v18 = vpop.f32.mrb[11].mxu0  ;;  %4288 = vmatmul.mubr.bf16.vlgmr.msra.gmra.mrb[32].mxu1 %v26816_v7  ;;  %5323 = vmatmul.mubr.bf16.vlgmr.msra.gmra.mrb[36].mxu0 %v26816_v7  ;;  %v4115_v22 = vmax.f32 %v4083_v12, 0.0 }
 0x3ed   : > { %v4086_v19 = vadd.f32 %v4017_v14, %v3888_v18  ;;  %4450 = vmatpush1.bf16.msra.mxu1 %v23779_v8  ;;  %6003 = vmatpush1.bf16.msra.mxu0 %v23783_v11  ;;  %v4116_v25 = vmax.f32 %v4084_v15, 0.0  ;;  %v23792_v8 = vld [vmem:[%s31985_s4 + $0x198] sm:$0xff]  }
 0x3ee   : > { %v4117_v23 = vmax.f32 %v4085_v17, 0.0  ;;  %4451 = vmatprep.subr.bf16.mxu1 %v32003_v24  ;;  %6004 = vmatprep.subr.bf16.mxu0 %v32003_v24 }
 0x3ef   : > { %v4118_v26 = vmax.f32 %v4086_v19, 0.0  ;;  %v23793_v19 = vld [vmem:[%s31985_s4 + $0x80] sm:$0xff]  }
 0x3f0   : > { %v26840_v38 = vpack.c.bf16 %v4117_v23, %v4115_v22 }
 0x3f1   : > { %v26842_v29 = vpack.c.bf16 %v4118_v26, %v4116_v25  ;;  %v3892_v30 = vpop.f32.mrb[12].mxu0  ;;  %4452 = vmatpush1.bf16.msra.mxu1 %v23780_v20  ;;  %6005 = vmatpush1.bf16.msra.mxu0 %v23784_v21  ;;  %v23794_v20 = vld [vmem:[%s31985_s4 + $0x1a0] sm:$0xff]  }
 0x3f2   : > { %v4087_v33 = vadd.f32 %v4022_v27, %v3892_v30  ;;  %v3894_v34 = vpop.f32.mrb[13].mxu0  ;;  %4453 = vmatprep.subr.bf16.mxu1 %v32003_v24  ;;  %6006 = vmatprep.subr.bf16.mxu0 %v32003_v24 }
 0x3f3   : > { %v4088_v36 = vadd.f32 %v4022_v27, %v3894_v34  ;;  %v3896_v37 = vpop.f32.mrb[14].mxu0  ;;  %19582 = vmatprep.mubr.msk.bf16.mxu1 %vm695_vm0, %v26842_v29  ;;  %19743 = vmatprep.mubr.msk.bf16.mxu0 %vm695_vm0, %v26842_v29  ;;  %v4052_v27 = vpop.permute.xlu0 %4051 }
 0x3f4   : > { %v4089_v39 = vadd.f32 %v4027_v35, %v3896_v37  ;;  %v3898_v40 = vpop.f32.mrb[15].mxu0  ;;  %4296 = vmatmul.mubr.bf16.gmra.mrb[36].mxu1 %v26840_v38  ;;  %5331 = vmatmul.mubr.bf16.gmra.mrb[40].mxu0 %v26840_v38  ;;  %v4119_v44 = vmax.f32 %v4087_v33, 0.0  ;;  %v23796_v33 = vld [vmem:[%s31985_s4 + $0x1a8] sm:$0xff]  }
 0x3f5   : > { %v4090_v41 = vadd.f32 %v4027_v35, %v3898_v40  ;;  %4454 = vmatpush1.bf16.msra.mxu1 %v23781_v31  ;;  %6007 = vmatpush1.bf16.msra.mxu0 %v23786_v32  ;;  %v4120_v46 = vmax.f32 %v4088_v36, 0.0  ;;  %v23795_v32 = vld [vmem:[%s31985_s4 + $0x88] sm:$0xff]   ;;  %v4057_v36 = vpop.permute.xlu1 %4056 }
 0x3f6   : > { %v4121_v45 = vmax.f32 %v4089_v39, 0.0  ;;  %4455 = vmatprep.subr.bf16.mxu1 %v32003_v24  ;;  %6008 = vmatprep.subr.bf16.mxu0 %v32003_v24 }
 0x3f7   : > { %v4122_v47 = vmax.f32 %v4090_v41, 0.0 }
 0x3f8   : > { %v26866_v48 = vpack.c.bf16 %v4121_v45, %v4119_v44 }
 0x3f9   : > { %v26868_v50 = vpack.c.bf16 %v4122_v47, %v4120_v46  ;;  %v3902_v51 = vpop.f32.mrb[16].mxu0  ;;  %4456 = vmatpush1.bf16.msra.mxu1 %v23782_v42  ;;  %6009 = vmatpush1.bf16.msra.mxu0 %v23788_v43 }
 0x3fa   : > { %v4091_v54 = vadd.f32 %v4032_v49, %v3902_v51  ;;  %v3904_v28 = vpop.f32.mrb[17].mxu0  ;;  %4457 = vmatprep.subr.bf16.mxu1 %v32003_v24  ;;  %6010 = vmatprep.subr.bf16.mxu0 %v32003_v24 }
 0x3fb   : > { %v4092_v56 = vadd.f32 %v4032_v49, %v3904_v28  ;;  %v3906_v57 = vpop.f32.mrb[18].mxu0  ;;  %19583 = vmatprep.mubr.msk.bf16.mxu1 %vm695_vm0, %v26868_v50  ;;  %19744 = vmatprep.mubr.msk.bf16.mxu0 %vm695_vm0, %v26868_v50  ;;  %v4062_v49 = vpop.permute.xlu0 %4061 }
 0x3fc   : > { %v4093_v58 = vadd.f32 %v4037_v55, %v3906_v57  ;;  %v3908_v59 = vpop.f32.mrb[19].mxu0  ;;  %4304 = vmatmul.mubr.bf16.gmra.mrb[40].mxu1 %v26866_v48  ;;  %5339 = vmatmul.mubr.bf16.gmra.mrb[44].mxu0 %v26866_v48  ;;  %v4123_v63 = vmax.f32 %v4091_v54, 0.0  ;;  %v4067_v28 = vpop.permute.xlu1 %4066 }
 0x3fd   : > { %v4094_v60 = vadd.f32 %v4037_v55, %v3908_v59  ;;  %4458 = vmatpush1.bf16.msra.mxu1 %v23785_v52  ;;  %6011 = vmatpush1.bf16.msra.mxu0 %v23789_v53  ;;  %v4124_v1 = vmax.f32 %v4092_v56, 0.0 }
 0x3fe   : > { %v4125_v0 = vmax.f32 %v4093_v58, 0.0  ;;  %4459 = vmatprep.subr.bf16.mxu1 %v32003_v24  ;;  %6012 = vmatprep.subr.bf16.mxu0 %v32003_v24 }
 0x3ff   : > { %v4126_v2 = vmax.f32 %v4094_v60, 0.0 }
 0x400   : > { %v26892_v3 = vpack.c.bf16 %v4125_v0, %v4123_v63 }
 0x401   : > { %v26894_v5 = vpack.c.bf16 %v4126_v2, %v4124_v1  ;;  %v3912_v6 = vpop.f32.mrb[20].mxu0  ;;  %4460 = vmatpush1.bf16.msra.mxu1 %v23787_v61  ;;  %6013 = vmatpush1.bf16.msra.mxu0 %v23791_v62  ;;  %v4072_v1 = vpop.permute.xlu0 %4071 }
 0x402   : > { %v4095_v11 = vadd.f32 %v4042_v4, %v3912_v6  ;;  %v3914_v12 = vpop.f32.mrb[21].mxu0  ;;  %4461 = vmatprep.subr.bf16.mxu1 %v32003_v24  ;;  %6014 = vmatprep.subr.bf16.mxu0 %v32003_v24 }
 0x403   : > { %v4096_v14 = vadd.f32 %v4042_v4, %v3914_v12  ;;  %v3916_v15 = vpop.f32.mrb[22].mxu0  ;;  %19584 = vmatprep.mubr.msk.bf16.mxu1 %vm695_vm0, %v26894_v5  ;;  %19745 = vmatprep.mubr.msk.bf16.mxu0 %vm695_vm0, %v26894_v5 }
 0x404   : > { %v4097_v16 = vadd.f32 %v4047_v13, %v3916_v15  ;;  %v3918_v17 = vpop.f32.mrb[23].mxu0  ;;  %4312 = vmatmul.mubr.bf16.gmra.mrb[44].mxu1 %v26892_v3  ;;  %5347 = vmatmul.mubr.bf16.gmra.mrb[48].mxu0 %v26892_v3  ;;  %v4127_v21 = vmax.f32 %v4095_v11, 0.0 }
 0x405   : > { %v4098_v18 = vadd.f32 %v4047_v13, %v3918_v17  ;;  %4462 = vmatpush1.bf16.msra.mxu1 %v23790_v10  ;;  %6015 = vmatpush1.bf16.msra.mxu0 %v23792_v8  ;;  %v4128_v23 = vmax.f32 %v4096_v14, 0.0  ;;  %v4077_v8 = vpop.permute.xlu1 %4076 }
 0x406   : > { %v4129_v22 = vmax.f32 %v4097_v16, 0.0  ;;  %4463 = vmatprep.subr.bf16.mxu1 %v32003_v24  ;;  %6016 = vmatprep.subr.bf16.mxu0 %v32003_v24 }
 0x407   : > { %v4130_v25 = vmax.f32 %v4098_v18, 0.0 }
 0x408   : > { %v26918_v26 = vpack.c.bf16 %v4129_v22, %v4127_v21  ;;  %v23797_v22 = vld [vmem:[%s31985_s4 + $0x1b0] sm:$0xff]  }
 0x409   : > { %v26920_v30 = vpack.c.bf16 %v4130_v25, %v4128_v23  ;;  %v3922_v31 = vpop.f32.mrb[24].mxu0  ;;  %4464 = vmatpush1.bf16.msra.mxu1 %v23793_v19  ;;  %6017 = vmatpush1.bf16.msra.mxu0 %v23794_v20  ;;  %v23798_v23 = vld [vmem:[%s31985_s4 + $0x1b8] sm:$0xff]   ;;  %v23799_v25 = vld [vmem:[%s31985_s4 + $0x1c0] sm:$0xff]  }
 0x40a   : > { %v4099_v34 = vadd.f32 %v4052_v27, %v3922_v31  ;;  %v3924_v35 = vpop.f32.mrb[25].mxu0  ;;  %4465 = vmatprep.subr.bf16.mxu1 %v32003_v24  ;;  %6018 = vmatprep.subr.bf16.mxu0 %v32003_v24  ;;  %v23801_v31 = vld [vmem:[%s31985_s4 + $0x1d0] sm:$0xff]  }
 0x40b   : > { %v4100_v37 = vadd.f32 %v4052_v27, %v3924_v35  ;;  %v3926_v39 = vpop.f32.mrb[26].mxu0  ;;  %19585 = vmatprep.mubr.msk.bf16.mxu1 %vm695_vm0, %v26920_v30  ;;  %19746 = vmatprep.mubr.msk.bf16.mxu0 %vm695_vm0, %v26920_v30  ;;  %v23800_v27 = vld [vmem:[%s31985_s4 + $0x1c8] sm:$0xff]   ;;  %v23805_v35 = vld [vmem:[%s31985_s4 + $0x1f0] sm:$0xff]  }
 0x40c   : > { %v4101_v40 = vadd.f32 %v4057_v36, %v3926_v39  ;;  %v3928_v41 = vpop.f32.mrb[27].mxu0  ;;  %4320 = vmatmul.mubr.bf16.gmra.mrb[48].mxu1 %v26918_v26  ;;  %5355 = vmatmul.mubr.bf16.gmra.mrb[52].mxu0 %v26918_v26  ;;  %v4131_v43 = vmax.f32 %v4099_v34, 0.0  ;;  %v23804_v34 = vld [vmem:[%s31985_s4 + $0x1e8] sm:$0xff]  }
 0x40d   : > { %v4102_v42 = vadd.f32 %v4057_v36, %v3928_v41  ;;  %4466 = vmatpush1.bf16.msra.mxu1 %v23795_v32  ;;  %6019 = vmatpush1.bf16.msra.mxu0 %v23796_v33  ;;  %v4132_v45 = vmax.f32 %v4100_v37, 0.0  ;;  %v23802_v32 = vld [vmem:[%s31985_s4 + $0x1d8] sm:$0xff]   ;;  %v23803_v33 = vld [vmem:[%s31985_s4 + $0x1e0] sm:$0xff]   ;;  %v23808_v39 = vld [vmem:[%s31985_s4 + $0x208] sm:$0xff]  }
 0x40e   : > { %v4133_v44 = vmax.f32 %v4101_v40, 0.0  ;;  %6358 = vmatprep.subr.bf16.mxu0 %v32003_v24  ;;  %v23806_v36 = vld [vmem:[%s31985_s4 + $0x1f8] sm:$0xff]   ;;  %v23807_v37 = vld [vmem:[%s31985_s4 + $0x200] sm:$0xff]   ;;  %v23809_v40 = vld [vmem:[%s31985_s4 + $0x210] sm:$0xff]  }
 0x40f   : > { %v4134_v46 = vmax.f32 %v4102_v42, 0.0  ;;  %v23810_v41 = vld [vmem:[%s31985_s4 + $0x218] sm:$0xff]   ;;  %v23811_v42 = vld [vmem:[%s31985_s4 + $0x220] sm:$0xff]  }
 0x410   : > { %v26937_v47 = vpack.c.bf16 %v4133_v44, %v4131_v43  ;;  %v23812_v43 = vld [vmem:[%s31985_s4 + $0x228] sm:$0xff]   ;;  %v23813_v44 = vld [vmem:[%s31985_s4 + $0x230] sm:$0xff]  }
 0x411   : > { %v26939_v51 = vpack.c.bf16 %v4134_v46, %v4132_v45  ;;  %v3932_v52 = vpop.f32.mrb[28].mxu0  ;;  %v23814_v45 = vld [vmem:[%s31985_s4 + $0x238] sm:$0xff]   ;;  %v23815_v46 = vld [vmem:[%s31986_s5 + $0x40] sm:$0xff]  }
 0x412   : > { %v4103_v53 = vadd.f32 %v4062_v49, %v3932_v52  ;;  %v3934_v54 = vpop.f32.mrb[29].mxu0 }
 0x413   : > { %v4104_v55 = vadd.f32 %v4062_v49, %v3934_v54  ;;  %v3936_v56 = vpop.f32.mrb[30].mxu0  ;;  %19586 = vmatprep.mubr.msk.bf16.mxu1 %vm695_vm0, %v26939_v51  ;;  %19747 = vmatprep.mubr.msk.bf16.mxu0 %vm695_vm0, %v26939_v51 }
 0x414   : > { %v4105_v57 = vadd.f32 %v4067_v28, %v3936_v56  ;;  %v3938_v58 = vpop.f32.mrb[31].mxu0  ;;  %4328 = vmatmul.mubr.bf16.gmra.mrb[52].mxu1 %v26937_v47  ;;  %5363 = vmatmul.mubr.bf16.gmra.mrb[56].mxu0 %v26937_v47  ;;  %v4135_v60 = vmax.f32 %v4103_v53, 0.0 }
 0x415   : > { %v4106_v59 = vadd.f32 %v4067_v28, %v3938_v58  ;;  %v4136_v62 = vmax.f32 %v4104_v55, 0.0 }
 0x416   : > { %v4137_v61 = vmax.f32 %v4105_v57, 0.0 }
 0x417   : > { %v4138_v63 = vmax.f32 %v4106_v59, 0.0 }
 0x418   : > { %v26947_v0 = vpack.c.bf16 %v4137_v61, %v4135_v60 }
 0x419   : > { %v26949_v2 = vpack.c.bf16 %v4138_v63, %v4136_v62  ;;  %v3942_v4 = vpop.f32.mrb[32].mxu0 }
 0x41a   : > { %v4107_v6 = vadd.f32 %v4072_v1, %v3942_v4  ;;  %v3944_v10 = vpop.f32.mrb[33].mxu0 }
 0x41b   : > { %v4108_v11 = vadd.f32 %v4072_v1, %v3944_v10  ;;  %v3946_v12 = vpop.f32.mrb[34].mxu0  ;;  %19587 = vmatprep.mubr.msk.bf16.mxu1 %vm695_vm0, %v26949_v2  ;;  %19748 = vmatprep.mubr.msk.bf16.mxu0 %vm695_vm0, %v26949_v2 }
 0x41c   : > { %v4109_v13 = vadd.f32 %v4077_v8, %v3946_v12  ;;  %v3948_v14 = vpop.f32.mrb[35].mxu0  ;;  %4336 = vmatmul.mubr.bf16.gmra.mrb[56].mxu1 %v26947_v0  ;;  %5371 = vmatmul.mubr.bf16.gmra.mrb[60].mxu0 %v26947_v0  ;;  %v4139_v16 = vmax.f32 %v4107_v6, 0.0 }
 0x41d   : > { %v4110_v15 = vadd.f32 %v4077_v8, %v3948_v14  ;;  %v4140_v18 = vmax.f32 %v4108_v11, 0.0 }
 0x41e   : > { %v4141_v17 = vmax.f32 %v4109_v13, 0.0 }
 0x41f   : > { %v4142_v19 = vmax.f32 %v4110_v15, 0.0 }
 0x420   : > { %v26957_v20 = vpack.c.bf16 %v4141_v17, %v4139_v16 }
 0x421   : > { %v26959_v21 = vpack.c.bf16 %v4142_v19, %v4140_v18 }
 0x423   : > { %19588 = vmatprep.mubr.msk.bf16.mxu1 %vm695_vm0, %v26959_v21  ;;  %19749 = vmatprep.mubr.msk.bf16.mxu0 %vm695_vm0, %v26959_v21 }
 0x424   : > { %4344 = vmatmul.mubr.bf16.gmra.mrb[60].mxu1 %v26957_v20  ;;  %5379 = vmatmul.mubr.bf16.gmra.mrb[64].mxu0 %v26957_v20 }
 0x425   : > { %19616 = vmatprep.mubr.msk.bf16.mxu1 %vm695_vm0, %v26818_v9  ;;  %19860 = vmatprep.mubr.msk.bf16.mxu0 %vm695_vm0, %v26818_v9 }
 0x42c   : > { %4482 = vmatmul.mubr.bf16.vlgmr.msra.gmra.mrb[64].mxu1 %v26816_v7  ;;  %6035 = vmatmul.mubr.bf16.vlgmr.msra.gmra.mrb[68].mxu0 %v26816_v7 }
 0x42d   : > { %19617 = vmatprep.mubr.msk.bf16.mxu1 %vm695_vm0, %v26842_v29  ;;  %19861 = vmatprep.mubr.msk.bf16.mxu0 %vm695_vm0, %v26842_v29 }
 0x42e   : > { %6359 = vmatpush1.bf16.msra.mxu0 %v23797_v22 }
 0x42f   : > { %6360 = vmatprep.subr.bf16.mxu0 %v32003_v24 }
 0x432   : > { %6361 = vmatpush1.bf16.msra.mxu0 %v23798_v23 }
 0x433   : > { %6362 = vmatprep.subr.bf16.mxu0 %v32003_v24 }
 0x434   : > { %4490 = vmatmul.mubr.bf16.gmra.mrb[68].mxu1 %v26840_v38  ;;  %6043 = vmatmul.mubr.bf16.gmra.mrb[72].mxu0 %v26840_v38 }
 0x435   : > { %19618 = vmatprep.mubr.msk.bf16.mxu1 %vm695_vm0, %v26868_v50  ;;  %19862 = vmatprep.mubr.msk.bf16.mxu0 %vm695_vm0, %v26868_v50 }
 0x436   : > { %6363 = vmatpush1.bf16.msra.mxu0 %v23799_v25 }
 0x437   : > { %6364 = vmatprep.subr.bf16.mxu0 %v32003_v24 }
 0x43a   : > { %6365 = vmatpush1.bf16.msra.mxu0 %v23800_v27 }
 0x43b   : > { %6366 = vmatprep.subr.bf16.mxu0 %v32003_v24 }
 0x43c   : > { %4498 = vmatmul.mubr.bf16.gmra.mrb[72].mxu1 %v26866_v48  ;;  %6051 = vmatmul.mubr.bf16.gmra.mrb[76].mxu0 %v26866_v48 }
 0x43d   : > { %19619 = vmatprep.mubr.msk.bf16.mxu1 %vm695_vm0, %v26894_v5  ;;  %19863 = vmatprep.mubr.msk.bf16.mxu0 %vm695_vm0, %v26894_v5 }
 0x43e   : > { %6367 = vmatpush1.bf16.msra.mxu0 %v23801_v31 }
 0x43f   : > { %6368 = vmatprep.subr.bf16.mxu0 %v32003_v24 }
 0x442   : > { %6369 = vmatpush1.bf16.msra.mxu0 %v23802_v32 }
 0x443   : > { %6370 = vmatprep.subr.bf16.mxu0 %v32003_v24 }
 0x444   : > { %4506 = vmatmul.mubr.bf16.gmra.mrb[76].mxu1 %v26892_v3  ;;  %6059 = vmatmul.mubr.bf16.gmra.mrb[80].mxu0 %v26892_v3 }
 0x445   : > { %19620 = vmatprep.mubr.msk.bf16.mxu1 %vm695_vm0, %v26920_v30  ;;  %19864 = vmatprep.mubr.msk.bf16.mxu0 %vm695_vm0, %v26920_v30 }
 0x446   : > { %6371 = vmatpush1.bf16.msra.mxu0 %v23803_v33 }
 0x447   : > { %6372 = vmatprep.subr.bf16.mxu0 %v32003_v24 }
 0x44a   : > { %6373 = vmatpush1.bf16.msra.mxu0 %v23804_v34 }
 0x44b   : > { %6374 = vmatprep.subr.bf16.mxu0 %v32003_v24 }
 0x44c   : > { %4514 = vmatmul.mubr.bf16.gmra.mrb[80].mxu1 %v26918_v26  ;;  %6067 = vmatmul.mubr.bf16.gmra.mrb[84].mxu0 %v26918_v26 }
 0x44d   : > { %19621 = vmatprep.mubr.msk.bf16.mxu1 %vm695_vm0, %v26939_v51  ;;  %19865 = vmatprep.mubr.msk.bf16.mxu0 %vm695_vm0, %v26939_v51 }
 0x44e   : > { %6375 = vmatpush1.bf16.msra.mxu0 %v23805_v35 }
 0x44f   : > { %6714 = vmatprep.subr.bf16.mxu0 %v32003_v24 }
 0x454   : > { %4522 = vmatmul.mubr.bf16.gmra.mrb[84].mxu1 %v26937_v47  ;;  %6075 = vmatmul.mubr.bf16.gmra.mrb[88].mxu0 %v26937_v47 }
 0x455   : > { %19622 = vmatprep.mubr.msk.bf16.mxu1 %vm695_vm0, %v26949_v2  ;;  %19866 = vmatprep.mubr.msk.bf16.mxu0 %vm695_vm0, %v26949_v2 }
 0x45c   : > { %4530 = vmatmul.mubr.bf16.gmra.mrb[88].mxu1 %v26947_v0  ;;  %6083 = vmatmul.mubr.bf16.gmra.mrb[92].mxu0 %v26947_v0 }
 0x45d   : > { %19623 = vmatprep.mubr.msk.bf16.mxu1 %vm695_vm0, %v26959_v21  ;;  %19867 = vmatprep.mubr.msk.bf16.mxu0 %vm695_vm0, %v26959_v21 }
 0x464   : > { %4538 = vmatmul.mubr.bf16.gmra.mrb[92].mxu1 %v26957_v20  ;;  %6091 = vmatmul.mubr.bf16.gmra.mrb[96].mxu0 %v26957_v20 }
 0x465   : > { %19919 = vmatprep.mubr.msk.bf16.mxu0 %vm695_vm0, %v26818_v9  ;;  %21983 = vmatprep.mubr.bf16.mxu1 %v23815_v46 }
 0x46c   : > { %6391 = vmatmul.mubr.bf16.vlgmr.msra.gmra.mrb[100].mxu0 %v26816_v7 }
 0x46d   : > { %19920 = vmatprep.mubr.msk.bf16.mxu0 %vm695_vm0, %v26842_v29  ;;  %6715 = vmatpush1.bf16.msra.mxu0 %v23806_v36 }
 0x46e   : > { %6716 = vmatprep.subr.bf16.mxu0 %v32003_v24 }
 0x471   : > { %6717 = vmatpush1.bf16.msra.mxu0 %v23807_v37 }
 0x472   : > { %6718 = vmatprep.subr.bf16.mxu0 %v32003_v24 }
 0x474   : > { %6399 = vmatmul.mubr.bf16.gmra.mrb[104].mxu0 %v26840_v38 }
 0x475   : > { %19921 = vmatprep.mubr.msk.bf16.mxu0 %vm695_vm0, %v26868_v50  ;;  %6719 = vmatpush1.bf16.msra.mxu0 %v23808_v39 }
 0x476   : > { %6720 = vmatprep.subr.bf16.mxu0 %v32003_v24 }
 0x479   : > { %6721 = vmatpush1.bf16.msra.mxu0 %v23809_v40 }
 0x47a   : > { %6722 = vmatprep.subr.bf16.mxu0 %v32003_v24 }
 0x47c   : > { %6407 = vmatmul.mubr.bf16.gmra.mrb[108].mxu0 %v26866_v48 }
 0x47d   : > { %19922 = vmatprep.mubr.msk.bf16.mxu0 %vm695_vm0, %v26894_v5  ;;  %6723 = vmatpush1.bf16.msra.mxu0 %v23810_v41 }
 0x47e   : > { %6724 = vmatprep.subr.bf16.mxu0 %v32003_v24 }
 0x481   : > { %6725 = vmatpush1.bf16.msra.mxu0 %v23811_v42 }
 0x482   : > { %6726 = vmatprep.subr.bf16.mxu0 %v32003_v24 }
 0x484   : > { %6415 = vmatmul.mubr.bf16.gmra.mrb[112].mxu0 %v26892_v3 }
 0x485   : > { %19923 = vmatprep.mubr.msk.bf16.mxu0 %vm695_vm0, %v26920_v30  ;;  %6727 = vmatpush1.bf16.msra.mxu0 %v23812_v43 }
 0x486   : > { %6728 = vmatprep.subr.bf16.mxu0 %v32003_v24 }
 0x489   : > { %6729 = vmatpush1.bf16.msra.mxu0 %v23813_v44 }
 0x48a   : > { %6730 = vmatprep.subr.bf16.mxu0 %v32003_v24 }
 0x48c   : > { %6423 = vmatmul.mubr.bf16.gmra.mrb[116].mxu0 %v26918_v26 }
 0x48d   : > { %19924 = vmatprep.mubr.msk.bf16.mxu0 %vm695_vm0, %v26939_v51  ;;  %6731 = vmatpush1.bf16.msra.mxu0 %v23814_v45 }
 0x494   : > { %6431 = vmatmul.mubr.bf16.gmra.mrb[120].mxu0 %v26937_v47 }
 0x495   : > { %19925 = vmatprep.mubr.msk.bf16.mxu0 %vm695_vm0, %v26949_v2 }
 0x49c   : > { %6439 = vmatmul.mubr.bf16.gmra.mrb[124].mxu0 %v26947_v0 }
 0x49d   : > { %19926 = vmatprep.mubr.msk.bf16.mxu0 %vm695_vm0, %v26959_v21 }
 0x4a4   : > { %6447 = vmatmul.mubr.bf16.gmra.mrb[128].mxu0 %v26957_v20 }
 0x4a5   : > { %19978 = vmatprep.mubr.msk.bf16.mxu0 %vm695_vm0, %v26818_v9 }
 0x4ac   : > { %6747 = vmatmul.mubr.bf16.vlgmr.msra.gmra.mrb[132].mxu0 %v26816_v7 }
 0x4ad   : > { %19979 = vmatprep.mubr.msk.bf16.mxu0 %vm695_vm0, %v26842_v29 }
 0x4b4   : > { %6755 = vmatmul.mubr.bf16.gmra.mrb[136].mxu0 %v26840_v38 }
 0x4b5   : > { %19980 = vmatprep.mubr.msk.bf16.mxu0 %vm695_vm0, %v26868_v50 }
 0x4bc   : > { %6763 = vmatmul.mubr.bf16.gmra.mrb[140].mxu0 %v26866_v48 }
 0x4bd   : > { %19981 = vmatprep.mubr.msk.bf16.mxu0 %vm695_vm0, %v26894_v5 }
 0x4bf   : > { %v4289_v49 = vpop.f32.mrb[32].mxu1  ;;  %v5324_v52 = vpop.f32.mrb[36].mxu0 }
 0x4c0   : > { %v4291_v53 = vpop.f32.mrb[33].mxu1  ;;  %v5326_v54 = vpop.f32.mrb[37].mxu0 }
 0x4c1   : > { %v4292_v28 = vpop.f32.mrb[34].mxu1  ;;  %v5327_v55 = vpop.f32.mrb[38].mxu0 }
 0x4c2   : > { %v27124_v56 = vpack.c.bf16 %v4292_v28, %v4289_v49  ;;  %v27126_v57 = vpack.c.bf16 %v5327_v55, %v5324_v52  ;;  %v4294_v58 = vpop.f32.mrb[35].mxu1  ;;  %v5329_v59 = vpop.f32.mrb[39].mxu0 }
 0x4c4   : > { %6771 = vmatmul.mubr.bf16.gmra.mrb[144].mxu0 %v26892_v3 }
 0x4c5   : > { %19982 = vmatprep.mubr.msk.bf16.mxu0 %vm695_vm0, %v26920_v30 }
 0x4c7   : > { %v4297_v60 = vpop.f32.mrb[36].mxu1  ;;  %v5332_v61 = vpop.f32.mrb[40].mxu0 }
 0x4c8   : > { %v4299_v62 = vpop.f32.mrb[37].mxu1  ;;  %v5334_v63 = vpop.f32.mrb[41].mxu0 }
 0x4c9   : > { %v4300_v1 = vpop.f32.mrb[38].mxu1  ;;  %v5335_v4 = vpop.f32.mrb[42].mxu0 }
 0x4ca   : > { %v27131_v6 = vpack.c.bf16 %v4300_v1, %v4297_v60  ;;  %v27133_v10 = vpack.c.bf16 %v5335_v4, %v5332_v61  ;;  %v4302_v8 = vpop.f32.mrb[39].mxu1  ;;  %v5337_v11 = vpop.f32.mrb[43].mxu0 }
 0x4cc   : > { %6779 = vmatmul.mubr.bf16.gmra.mrb[148].mxu0 %v26918_v26 }
 0x4cd   : > { %19983 = vmatprep.mubr.msk.bf16.mxu0 %vm695_vm0, %v26939_v51 }
 0x4cf   : > { %v4305_v12 = vpop.f32.mrb[40].mxu1  ;;  %v5340_v13 = vpop.f32.mrb[44].mxu0 }
 0x4d0   : > { %v4307_v14 = vpop.f32.mrb[41].mxu1  ;;  %v5342_v15 = vpop.f32.mrb[45].mxu0 }
 0x4d1   : > { %v4308_v16 = vpop.f32.mrb[42].mxu1  ;;  %v5343_v17 = vpop.f32.mrb[46].mxu0 }
 0x4d2   : > { %v27138_v18 = vpack.c.bf16 %v4308_v16, %v4305_v12  ;;  %v27140_v19 = vpack.c.bf16 %v5343_v17, %v5340_v13  ;;  %v4310_v22 = vpop.f32.mrb[43].mxu1  ;;  %v5345_v23 = vpop.f32.mrb[47].mxu0 }
 0x4d4   : > { %6787 = vmatmul.mubr.bf16.gmra.mrb[152].mxu0 %v26937_v47 }
 0x4d5   : > { %19984 = vmatprep.mubr.msk.bf16.mxu0 %vm695_vm0, %v26949_v2 }
 0x4d7   : > { %v4313_v25 = vpop.f32.mrb[44].mxu1  ;;  %v5348_v27 = vpop.f32.mrb[48].mxu0 }
 0x4d8   : > { %v4315_v31 = vpop.f32.mrb[45].mxu1  ;;  %v5350_v32 = vpop.f32.mrb[49].mxu0 }
 0x4d9   : > { %v4316_v33 = vpop.f32.mrb[46].mxu1  ;;  %v5351_v34 = vpop.f32.mrb[50].mxu0 }
 0x4da   : > { %v27145_v35 = vpack.c.bf16 %v4316_v33, %v4313_v25  ;;  %v27147_v36 = vpack.c.bf16 %v5351_v34, %v5348_v27  ;;  %v4318_v37 = vpop.f32.mrb[47].mxu1  ;;  %v5353_v39 = vpop.f32.mrb[51].mxu0 }
 0x4dc   : > { %6795 = vmatmul.mubr.bf16.gmra.mrb[156].mxu0 %v26947_v0 }
 0x4dd   : > { %19985 = vmatprep.mubr.msk.bf16.mxu0 %vm695_vm0, %v26959_v21 }
 0x4df   : > { %v4321_v40 = vpop.f32.mrb[48].mxu1  ;;  %v5356_v41 = vpop.f32.mrb[52].mxu0 }
 0x4e0   : > { %v4323_v42 = vpop.f32.mrb[49].mxu1  ;;  %v5358_v43 = vpop.f32.mrb[53].mxu0 }
 0x4e1   : > { %v4324_v44 = vpop.f32.mrb[50].mxu1  ;;  %v5359_v45 = vpop.f32.mrb[54].mxu0 }
 0x4e2   : > { %v27152_v46 = vpack.c.bf16 %v4324_v44, %v4321_v40  ;;  %v27154_v49 = vpack.c.bf16 %v5359_v45, %v5356_v41  ;;  %v4326_v52 = vpop.f32.mrb[51].mxu1  ;;  %v5361_v53 = vpop.f32.mrb[55].mxu0 }
 0x4e4   : > { %6803 = vmatmul.mubr.bf16.gmra.mrb[160].mxu0 %v26957_v20 }
 0x4e7   : > { %v4329_v54 = vpop.f32.mrb[52].mxu1  ;;  %v5364_v28 = vpop.f32.mrb[56].mxu0 }
 0x4e8   : > { %v4331_v55 = vpop.f32.mrb[53].mxu1  ;;  %v5366_v58 = vpop.f32.mrb[57].mxu0 }
 0x4e9   : > { %v4332_v59 = vpop.f32.mrb[54].mxu1  ;;  %v5367_v60 = vpop.f32.mrb[58].mxu0 }
 0x4ea   : > { %v27157_v61 = vpack.c.bf16 %v4332_v59, %v4329_v54  ;;  %v27159_v62 = vpack.c.bf16 %v5367_v60, %v5364_v28  ;;  %v4334_v63 = vpop.f32.mrb[55].mxu1  ;;  %v5369_v1 = vpop.f32.mrb[59].mxu0 }
 0x4ef   : > { %v4337_v4 = vpop.f32.mrb[56].mxu1  ;;  %v5372_v8 = vpop.f32.mrb[60].mxu0 }
 0x4f0   : > { %v4339_v11 = vpop.f32.mrb[57].mxu1  ;;  %v5374_v12 = vpop.f32.mrb[61].mxu0 }
 0x4f1   : > { %v4340_v13 = vpop.f32.mrb[58].mxu1  ;;  %v5375_v14 = vpop.f32.mrb[62].mxu0 }
 0x4f2   : > { %v27161_v15 = vpack.c.bf16 %v4340_v13, %v4337_v4  ;;  %v27163_v16 = vpack.c.bf16 %v5375_v14, %v5372_v8  ;;  %v4342_v17 = vpop.f32.mrb[59].mxu1  ;;  %v5377_v22 = vpop.f32.mrb[63].mxu0 }
 0x4f7   : > { %v4345_v23 = vpop.f32.mrb[60].mxu1  ;;  %v5380_v25 = vpop.f32.mrb[64].mxu0 }
 0x4f8   : > { %v4347_v27 = vpop.f32.mrb[61].mxu1  ;;  %v5382_v31 = vpop.f32.mrb[65].mxu0 }
 0x4f9   : > { %v4348_v32 = vpop.f32.mrb[62].mxu1  ;;  %v5383_v33 = vpop.f32.mrb[66].mxu0 }
 0x4fa   : > { %v27165_v34 = vpack.c.bf16 %v4348_v32, %v4345_v23  ;;  %v27167_v37 = vpack.c.bf16 %v5383_v33, %v5380_v25  ;;  %v4350_v39 = vpop.f32.mrb[63].mxu1  ;;  %v5385_v40 = vpop.f32.mrb[67].mxu0 }
 0x4ff   : > { %v4483_v41 = vpop.f32.mrb[64].mxu1  ;;  %v6036_v42 = vpop.f32.mrb[68].mxu0 }
 0x500   : > { %v4485_v43 = vpop.f32.mrb[65].mxu1  ;;  %v6038_v44 = vpop.f32.mrb[69].mxu0 }
 0x501   : > { %v4486_v45 = vpop.f32.mrb[66].mxu1  ;;  %v6039_v52 = vpop.f32.mrb[70].mxu0 }
 0x502   : > { %v4546_v53 = vpack.c.bf16 %v4486_v45, %v4483_v41  ;;  %v27169_v54 = vpack.c.bf16 %v6039_v52, %v6036_v42  ;;  %v4488_v28 = vpop.f32.mrb[67].mxu1  ;;  %v6041_v55 = vpop.f32.mrb[71].mxu0 }
 0x504   : > { %21967 = vmatprep.subr.bf16.mxu1 %v4546_v53 }
 0x505   : > { %21968 = vmatpush3.bf16.msra.mxu1 %v4546_v53 }
 0x507   : > { %v4491_v58 = vpop.f32.mrb[68].mxu1  ;;  %v6044_v59 = vpop.f32.mrb[72].mxu0 }
 0x508   : > { %v4493_v60 = vpop.f32.mrb[69].mxu1  ;;  %v6046_v63 = vpop.f32.mrb[73].mxu0 }
 0x509   : > { %v4494_v1 = vpop.f32.mrb[70].mxu1  ;;  %v6047_v4 = vpop.f32.mrb[74].mxu0 }
 0x50a   : > { %v4547_v8 = vpack.c.bf16 %v4494_v1, %v4491_v58  ;;  %v27171_v11 = vpack.c.bf16 %v6047_v4, %v6044_v59  ;;  %v4496_v12 = vpop.f32.mrb[71].mxu1  ;;  %v6049_v13 = vpop.f32.mrb[75].mxu0 }
 0x50c   : > { %21969 = vmatprep.subr.bf16.mxu1 %v4547_v8 }
 0x50d   : > { %21970 = vmatpush3.bf16.msra.mxu1 %v4547_v8 }
 0x50f   : > { %v4499_v14 = vpop.f32.mrb[72].mxu1  ;;  %v6052_v17 = vpop.f32.mrb[76].mxu0 }
 0x510   : > { %v4501_v22 = vpop.f32.mrb[73].mxu1  ;;  %v6054_v23 = vpop.f32.mrb[77].mxu0 }
 0x511   : > { %v4502_v25 = vpop.f32.mrb[74].mxu1  ;;  %v6055_v27 = vpop.f32.mrb[78].mxu0 }
 0x512   : > { %v27173_v31 = vpack.c.bf16 %v6055_v27, %v6052_v17  ;;  %v4504_v32 = vpop.f32.mrb[75].mxu1  ;;  %v6057_v33 = vpop.f32.mrb[79].mxu0  ;;  %v4548_v39 = vpack.c.bf16 %v4502_v25, %v4499_v14 }
 0x514   : > { %21971 = vmatprep.subr.bf16.mxu1 %v4548_v39 }
 0x515   : > { %21972 = vmatpush3.bf16.msra.mxu1 %v4548_v39 }
 0x517   : > { %v4507_v40 = vpop.f32.mrb[76].mxu1  ;;  %v6060_v41 = vpop.f32.mrb[80].mxu0 }
 0x518   : > { %v4509_v42 = vpop.f32.mrb[77].mxu1  ;;  %v6062_v43 = vpop.f32.mrb[81].mxu0 }
 0x519   : > { %v4510_v44 = vpop.f32.mrb[78].mxu1  ;;  %v6063_v45 = vpop.f32.mrb[82].mxu0 }
 0x51a   : > { %v27175_v52 = vpack.c.bf16 %v6063_v45, %v6060_v41  ;;  %v4512_v53 = vpop.f32.mrb[79].mxu1  ;;  %v6065_v28 = vpop.f32.mrb[83].mxu0  ;;  %v4549_v55 = vpack.c.bf16 %v4510_v44, %v4507_v40 }
 0x51c   : > { %21973 = vmatprep.subr.bf16.mxu1 %v4549_v55 }
 0x51d   : > { %21974 = vmatpush3.bf16.msra.mxu1 %v4549_v55 }
 0x51f   : > { %v4515_v58 = vpop.f32.mrb[80].mxu1  ;;  %v6068_v59 = vpop.f32.mrb[84].mxu0 }
 0x520   : > { %v4517_v60 = vpop.f32.mrb[81].mxu1  ;;  %v6070_v63 = vpop.f32.mrb[85].mxu0 }
 0x521   : > { %v4518_v1 = vpop.f32.mrb[82].mxu1  ;;  %v6071_v4 = vpop.f32.mrb[86].mxu0 }
 0x522   : > { %v27177_v8 = vpack.c.bf16 %v6071_v4, %v6068_v59  ;;  %v4520_v12 = vpop.f32.mrb[83].mxu1  ;;  %v6073_v13 = vpop.f32.mrb[87].mxu0  ;;  %v4550_v14 = vpack.c.bf16 %v4518_v1, %v4515_v58 }
 0x524   : > { %21975 = vmatprep.subr.bf16.mxu1 %v4550_v14 }
 0x525   : > { %21976 = vmatpush3.bf16.msra.mxu1 %v4550_v14 }
 0x527   : > { %v4523_v17 = vpop.f32.mrb[84].mxu1  ;;  %v6076_v22 = vpop.f32.mrb[88].mxu0 }
 0x528   : > { %v4525_v23 = vpop.f32.mrb[85].mxu1  ;;  %v6078_v25 = vpop.f32.mrb[89].mxu0 }
 0x529   : > { %v4526_v27 = vpop.f32.mrb[86].mxu1  ;;  %v6079_v32 = vpop.f32.mrb[90].mxu0 }
 0x52a   : > { %v4551_v33 = vpack.c.bf16 %v4526_v27, %v4523_v17  ;;  %v27179_v39 = vpack.c.bf16 %v6079_v32, %v6076_v22  ;;  %v4528_v40 = vpop.f32.mrb[87].mxu1  ;;  %v6081_v41 = vpop.f32.mrb[91].mxu0  ;;  %v23816_v27 = vld [vmem:[%s31986_s5 + $0x48] sm:$0xff]   ;;  %v23817_v32 = vld [vmem:[%s31986_s5 + $0x50] sm:$0xff]  }
 0x52c   : > { %21977 = vmatprep.subr.bf16.mxu1 %v4551_v33 }
 0x52d   : > { %21978 = vmatpush3.bf16.msra.mxu1 %v4551_v33 }
 0x52f   : > { %v4531_v42 = vpop.f32.mrb[88].mxu1  ;;  %v6084_v43 = vpop.f32.mrb[92].mxu0 }
 0x530   : > { %v4533_v44 = vpop.f32.mrb[89].mxu1  ;;  %v6086_v45 = vpop.f32.mrb[93].mxu0 }
 0x531   : > { %v4534_v53 = vpop.f32.mrb[90].mxu1  ;;  %v6087_v28 = vpop.f32.mrb[94].mxu0  ;;  %v23818_v44 = vld [vmem:[%s31986_s5 + $0x58] sm:$0xff]   ;;  %v23819_v45 = vld [vmem:[%s31986_s5 + $0x60] sm:$0xff]  }
 0x532   : > { %v4552_v55 = vpack.c.bf16 %v4534_v53, %v4531_v42  ;;  %v27181_v58 = vpack.c.bf16 %v6087_v28, %v6084_v43  ;;  %v4536_v59 = vpop.f32.mrb[91].mxu1  ;;  %v6089_v60 = vpop.f32.mrb[95].mxu0 }
 0x533   : > { %v23821_v60 = vld [vmem:[%s31986_s5 + $0x70] sm:$0xff]  }
 0x534   : > { %21979 = vmatprep.subr.bf16.mxu1 %v4552_v55 }
 0x535   : > { %21980 = vmatpush3.bf16.msra.mxu1 %v4552_v55 }
 0x537   : > { %v4539_v63 = vpop.f32.mrb[92].mxu1  ;;  %v6092_v1 = vpop.f32.mrb[96].mxu0 }
 0x538   : > { %v4541_v4 = vpop.f32.mrb[93].mxu1  ;;  %v6094_v12 = vpop.f32.mrb[97].mxu0 }
 0x539   : > { %v4542_v13 = vpop.f32.mrb[94].mxu1  ;;  %v6095_v14 = vpop.f32.mrb[98].mxu0 }
 0x53a   : > { %v4553_v17 = vpack.c.bf16 %v4542_v13, %v4539_v63  ;;  %v27183_v22 = vpack.c.bf16 %v6095_v14, %v6092_v1  ;;  %v4544_v23 = vpop.f32.mrb[95].mxu1  ;;  %v6097_v25 = vpop.f32.mrb[99].mxu0  ;;  %v23823_v13 = vld [vmem:[%s31986_s5] sm:$0xff]  }
 0x53c   : > { %21981 = vmatprep.subr.bf16.mxu1 %v4553_v17 }
 0x53d   : > { %21982 = vmatpush3.bf16.msra.mxu1 %v4553_v17 }
 0x53e   : > { %21999 = vmatprep.subr.bf16.mxu1 %v27124_v56 }
 0x53f   : > { %v6392_v33 = vpop.f32.mrb[100].mxu0 }
 0x540   : > { %21984 = vmatmul.mubr.bf16.vlgmr.msra.gmra.mrb[96].mxu1 %v23816_v27  ;;  %v6394_v40 = vpop.f32.mrb[101].mxu0  ;;  %v23825_v27 = vld [vmem:[%s31985_s4 + $0x90] sm:$0xff]  }
 0x541   : > { %22000 = vmatpush3.bf16.msra.mxu1 %v27124_v56  ;;  %v6395_v41 = vpop.f32.mrb[102].mxu0  ;;  %21987 = vmatprep.mubr.bf16.mxu1 %v23817_v32 }
 0x542   : > { %v27193_v42 = vpack.c.bf16 %v6395_v41, %v6392_v33  ;;  %22001 = vmatprep.subr.bf16.mxu1 %v27131_v6  ;;  %v6397_v43 = vpop.f32.mrb[103].mxu0  ;;  %v23826_v41 = vld [vmem:[%s31985_s4 + $0x98] sm:$0xff]  }
 0x545   : > { %22002 = vmatpush3.bf16.msra.mxu1 %v27131_v6  ;;  %v23820_v6 = vld [vmem:[%s31986_s5 + $0x68] sm:$0xff]  }
 0x546   : > { %22003 = vmatprep.subr.bf16.mxu1 %v27138_v18 }
 0x547   : > { %v6400_v56 = vpop.f32.mrb[104].mxu0 }
 0x548   : > { %21988 = vmatmul.mubr.bf16.gmra.mrb[100].mxu1 %v23818_v44  ;;  %v6402_v53 = vpop.f32.mrb[105].mxu0  ;;  %v23828_v44 = vld [vmem:[%s31986_s5 + $0x18] sm:$0xff]  }
 0x549   : > { %22004 = vmatpush3.bf16.msra.mxu1 %v27138_v18  ;;  %v6403_v28 = vpop.f32.mrb[106].mxu0  ;;  %21991 = vmatprep.mubr.bf16.mxu1 %v23819_v45  ;;  %v23829_v45 = vld [vmem:[%s31985_s4 + $0xa0] sm:$0xff]  }
 0x54a   : > { %v27205_v55 = vpack.c.bf16 %v6403_v28, %v6400_v56  ;;  %22005 = vmatprep.subr.bf16.mxu1 %v27145_v35  ;;  %v6405_v59 = vpop.f32.mrb[107].mxu0  ;;  %v23831_v56 = vld [vmem:[%s31986_s5 + $0x20] sm:$0xff]  }
 0x54d   : > { %22006 = vmatpush3.bf16.msra.mxu1 %v27145_v35  ;;  %v23822_v35 = vld [vmem:[%s31986_s5 + $0x78] sm:$0xff]  }
 0x54e   : > { %22007 = vmatprep.subr.bf16.mxu1 %v27152_v46 }
 0x54f   : > { %v6408_v18 = vpop.f32.mrb[108].mxu0 }
 0x550   : > { %21992 = vmatmul.mubr.bf16.gmra.mrb[104].mxu1 %v23820_v6  ;;  %v6410_v63 = vpop.f32.mrb[109].mxu0  ;;  %v23830_v6 = vld [vmem:[%s31985_s4 + $0xa8] sm:$0xff]  }
 0x551   : > { %22008 = vmatpush3.bf16.msra.mxu1 %v27152_v46  ;;  %v6411_v1 = vpop.f32.mrb[110].mxu0  ;;  %21995 = vmatprep.mubr.bf16.mxu1 %v23821_v60  ;;  %v23832_v63 = vld [vmem:[%s31986_s5 + $0x28] sm:$0xff]  }
 0x552   : > { %v27217_v4 = vpack.c.bf16 %v6411_v1, %v6408_v18  ;;  %22009 = vmatprep.subr.bf16.mxu1 %v27157_v61  ;;  %v6413_v12 = vpop.f32.mrb[111].mxu0  ;;  %v23833_v1 = vld [vmem:[%s31985_s4 + $0xb0] sm:$0xff]  }
 0x553   : > { %v23835_v12 = vld [vmem:[%s31986_s5 + $0x30] sm:$0xff]  }
 0x555   : > { %22010 = vmatpush3.bf16.msra.mxu1 %v27157_v61  ;;  %v23824_v61 = vld [vmem:[%s31986_s5 + $0x8] sm:$0xff]  }
 0x556   : > { %22011 = vmatprep.subr.bf16.mxu1 %v27161_v15 }
 0x557   : > { %v6416_v46 = vpop.f32.mrb[112].mxu0 }
 0x558   : > { %21996 = vmatmul.mubr.bf16.gmra.mrb[108].mxu1 %v23822_v35  ;;  %v6418_v14 = vpop.f32.mrb[113].mxu0 }
 0x559   : > { %22012 = vmatpush3.bf16.msra.mxu1 %v27161_v15  ;;  %v6419_v17 = vpop.f32.mrb[114].mxu0  ;;  %22015 = vmatprep.mubr.bf16.mxu1 %v23823_v13  ;;  %v23827_v15 = vld [vmem:[%s31986_s5 + $0x10] sm:$0xff]   ;;  %v23834_v14 = vld [vmem:[%s31985_s4 + $0xb8] sm:$0xff]  }
 0x55a   : > { %v27229_v23 = vpack.c.bf16 %v6419_v17, %v6416_v46  ;;  %22013 = vmatprep.subr.bf16.mxu1 %v27165_v34  ;;  %v6421_v25 = vpop.f32.mrb[115].mxu0 }
 0x55d   : > { %22014 = vmatpush3.bf16.msra.mxu1 %v27165_v34 }
 0x55e   : > { %4934 = vmatprep.subr.bf16.mxu1 %v32003_v24 }
 0x55f   : > { %v6424_v32 = vpop.f32.mrb[116].mxu0 }
 0x560   : > { %22016 = vmatmul.mubr.bf16.vlgmr.msra.gmra.mrb[96].mxu1 %v23824_v61  ;;  %v6426_v33 = vpop.f32.mrb[117].mxu0  ;;  %v23836_v61 = vld [vmem:[%s31986_s5 + $0x38] sm:$0xff]  }
 0x561   : > { %4935 = vmatpush1.bf16.msra.mxu1 %v23825_v27  ;;  %v6427_v40 = vpop.f32.mrb[118].mxu0  ;;  %22019 = vmatprep.mubr.bf16.mxu1 %v23827_v15  ;;  %v23837_v27 = vld [vmem:[%s31985_s4 + $0xc0] sm:$0xff]  }
 0x562   : > { %v27246_v34 = vpack.c.bf16 %v6427_v40, %v6424_v32  ;;  %v6429_v43 = vpop.f32.mrb[119].mxu0  ;;  %4936 = vmatprep.subr.bf16.mxu1 %v32003_v24  ;;  %v23838_v40 = vld [vmem:[%s31985_s4 + $0xc8] sm:$0xff]  }
 0x565   : > { %4937 = vmatpush1.bf16.msra.mxu1 %v23826_v41 }
 0x566   : > { %4938 = vmatprep.subr.bf16.mxu1 %v32003_v24 }
 0x567   : > { %v6432_v53 = vpop.f32.mrb[120].mxu0 }
 0x568   : > { %22020 = vmatmul.mubr.bf16.gmra.mrb[100].mxu1 %v23828_v44  ;;  %v6434_v28 = vpop.f32.mrb[121].mxu0  ;;  %v23839_v44 = vld [vmem:[%s31985_s4 + $0xd0] sm:$0xff]  }
 0x569   : > { %4939 = vmatpush1.bf16.msra.mxu1 %v23829_v45  ;;  %v6435_v59 = vpop.f32.mrb[122].mxu0  ;;  %22023 = vmatprep.mubr.bf16.mxu1 %v23831_v56 }
 0x56a   : > { %v27262_v60 = vpack.c.bf16 %v6435_v59, %v6432_v53  ;;  %v6437_v18 = vpop.f32.mrb[123].mxu0  ;;  %4940 = vmatprep.subr.bf16.mxu1 %v32003_v24 }
 0x56d   : > { %4941 = vmatpush1.bf16.msra.mxu1 %v23830_v6 }
 0x56e   : > { %4942 = vmatprep.subr.bf16.mxu1 %v32003_v24 }
 0x56f   : > { %v6440_v35 = vpop.f32.mrb[124].mxu0 }
 0x570   : > { %22024 = vmatmul.mubr.bf16.gmra.mrb[104].mxu1 %v23832_v63  ;;  %v6442_v13 = vpop.f32.mrb[125].mxu0 }
 0x571   : > { %4943 = vmatpush1.bf16.msra.mxu1 %v23833_v1  ;;  %v6443_v46 = vpop.f32.mrb[126].mxu0  ;;  %22027 = vmatprep.mubr.bf16.mxu1 %v23835_v12 }
 0x572   : > { %v27278_v17 = vpack.c.bf16 %v6443_v46, %v6440_v35  ;;  %v6445_v25 = vpop.f32.mrb[127].mxu0  ;;  %4944 = vmatprep.subr.bf16.mxu1 %v32003_v24 }
 0x575   : > { %4945 = vmatpush1.bf16.msra.mxu1 %v23834_v14 }
 0x576   : > { %4946 = vmatprep.subr.bf16.mxu1 %v32003_v24 }
 0x577   : > { %v6448_v15 = vpop.f32.mrb[128].mxu0 }
 0x578   : > { %22028 = vmatmul.mubr.bf16.gmra.mrb[108].mxu1 %v23836_v61  ;;  %v6450_v32 = vpop.f32.mrb[129].mxu0 }
 0x579   : > { %4947 = vmatpush1.bf16.msra.mxu1 %v23837_v27  ;;  %19683 = vmatprep.mubr.msk.bf16.mxu1 %vm695_vm0, %v26818_v9  ;;  %v6451_v33 = vpop.f32.mrb[130].mxu0 }
 0x57a   : > { %v27293_v41 = vpack.c.bf16 %v6451_v33, %v6448_v15  ;;  %v6453_v43 = vpop.f32.mrb[131].mxu0  ;;  %4948 = vmatprep.subr.bf16.mxu1 %v32003_v24 }
 0x57d   : > { %4949 = vmatpush1.bf16.msra.mxu1 %v23838_v40 }
 0x57e   : > { %4950 = vmatprep.subr.bf16.mxu1 %v32003_v24 }
 0x57f   : > { %v6748_v45 = vpop.f32.mrb[132].mxu0 }
 0x580   : > { %v6750_v56 = vpop.f32.mrb[133].mxu0 }
 0x581   : > { %4951 = vmatpush1.bf16.msra.mxu1 %v23839_v44  ;;  %v6751_v53 = vpop.f32.mrb[134].mxu0 }
 0x582   : > { %v27300_v28 = vpack.c.bf16 %v6751_v53, %v6748_v45  ;;  %v6753_v59 = vpop.f32.mrb[135].mxu0 }
 0x584   : > { %4967 = vmatmul.mubr.bf16.vlgmr.msra.gmra.mrb[112].mxu1 %v26816_v7 }
 0x585   : > { %19684 = vmatprep.mubr.msk.bf16.mxu1 %vm695_vm0, %v26842_v29 }
 0x587   : > { %v6756_v6 = vpop.f32.mrb[136].mxu0 }
 0x588   : > { %v6758_v18 = vpop.f32.mrb[137].mxu0 }
 0x589   : > { %v6759_v63 = vpop.f32.mrb[138].mxu0 }
 0x58a   : > { %v27305_v1 = vpack.c.bf16 %v6759_v63, %v6756_v6  ;;  %v6761_v12 = vpop.f32.mrb[139].mxu0 }
 0x58c   : > { %4975 = vmatmul.mubr.bf16.gmra.mrb[116].mxu1 %v26840_v38 }
 0x58d   : > { %19685 = vmatprep.mubr.msk.bf16.mxu1 %vm695_vm0, %v26868_v50 }
 0x58f   : > { %v6764_v35 = vpop.f32.mrb[140].mxu0 }
 0x590   : > { %v6766_v13 = vpop.f32.mrb[141].mxu0 }
 0x591   : > { %v6767_v46 = vpop.f32.mrb[142].mxu0 }
 0x592   : > { %v27310_v14 = vpack.c.bf16 %v6767_v46, %v6764_v35  ;;  %v6769_v25 = vpop.f32.mrb[143].mxu0 }
 0x594   : > { %4983 = vmatmul.mubr.bf16.gmra.mrb[120].mxu1 %v26866_v48 }
 0x595   : > { %19686 = vmatprep.mubr.msk.bf16.mxu1 %vm695_vm0, %v26894_v5 }
 0x597   : > { %v6772_v61 = vpop.f32.mrb[144].mxu0 }
 0x598   : > { %v6774_v27 = vpop.f32.mrb[145].mxu0 }
 0x599   : > { %v6775_v15 = vpop.f32.mrb[146].mxu0 }
 0x59a   : > { %v27315_v32 = vpack.c.bf16 %v6775_v15, %v6772_v61  ;;  %v6777_v33 = vpop.f32.mrb[147].mxu0 }
 0x59c   : > { %4991 = vmatmul.mubr.bf16.gmra.mrb[124].mxu1 %v26892_v3 }
 0x59d   : > { %19687 = vmatprep.mubr.msk.bf16.mxu1 %vm695_vm0, %v26920_v30 }
 0x59f   : > { %v6780_v40 = vpop.f32.mrb[148].mxu0 }
 0x5a0   : > { %v6782_v43 = vpop.f32.mrb[149].mxu0 }
 0x5a1   : > { %v6783_v44 = vpop.f32.mrb[150].mxu0  ;;  %v23840_v43 = vld [vmem:[%s31986_s5 + $0x80] sm:$0xff]  }
 0x5a2   : > { %v27320_v45 = vpack.c.bf16 %v6783_v44, %v6780_v40  ;;  %v6785_v56 = vpop.f32.mrb[151].mxu0 }
 0x5a4   : > { %4999 = vmatmul.mubr.bf16.gmra.mrb[128].mxu1 %v26918_v26 }
 0x5a5   : > { %19688 = vmatprep.mubr.msk.bf16.mxu1 %vm695_vm0, %v26939_v51 }
 0x5a7   : > { %v6788_v53 = vpop.f32.mrb[152].mxu0 }
 0x5a8   : > { %v6790_v59 = vpop.f32.mrb[153].mxu0 }
 0x5a9   : > { %v6791_v6 = vpop.f32.mrb[154].mxu0 }
 0x5aa   : > { %v27325_v18 = vpack.c.bf16 %v6791_v6, %v6788_v53  ;;  %v6793_v63 = vpop.f32.mrb[155].mxu0 }
 0x5ac   : > { %5007 = vmatmul.mubr.bf16.gmra.mrb[132].mxu1 %v26937_v47 }
 0x5ad   : > { %19689 = vmatprep.mubr.msk.bf16.mxu1 %vm695_vm0, %v26949_v2 }
 0x5af   : > { %v6796_v12 = vpop.f32.mrb[156].mxu0 }
 0x5b0   : > { %v6798_v35 = vpop.f32.mrb[157].mxu0 }
 0x5b1   : > { %v6799_v13 = vpop.f32.mrb[158].mxu0 }
 0x5b2   : > { %v27330_v46 = vpack.c.bf16 %v6799_v13, %v6796_v12  ;;  %v6801_v25 = vpop.f32.mrb[159].mxu0 }
 0x5b4   : > { %5015 = vmatmul.mubr.bf16.gmra.mrb[136].mxu1 %v26947_v0 }
 0x5b5   : > { %19690 = vmatprep.mubr.msk.bf16.mxu1 %vm695_vm0, %v26959_v21 }
 0x5b7   : > { %v6804_v61 = vpop.f32.mrb[160].mxu0 }
 0x5b8   : > { %v6806_v27 = vpop.f32.mrb[161].mxu0 }
 0x5b9   : > { %v6807_v15 = vpop.f32.mrb[162].mxu0 }
 0x5ba   : > { %v27335_v33 = vpack.c.bf16 %v6807_v15, %v6804_v61  ;;  %v6809_v40 = vpop.f32.mrb[163].mxu0 }
 0x5bc   : > { %5023 = vmatmul.mubr.bf16.gmra.mrb[140].mxu1 %v26957_v20 }
 0x5bd   : > { %22047 = vmatprep.mubr.bf16.mxu1 %v23840_v43 }
 0x657   : > { %v4968_v44 = vpop.f32.mrb[112].mxu1 }
 0x658   : > { %v4970_v56 = vpop.f32.mrb[113].mxu1 }
 0x659   : > { %v4971_v53 = vpop.f32.mrb[114].mxu1 }
 0x65a   : > { %v5031_v59 = vpack.c.bf16 %v4971_v53, %v4968_v44  ;;  %v4973_v6 = vpop.f32.mrb[115].mxu1 }
 0x65c   : > { %22031 = vmatprep.subr.bf16.mxu1 %v5031_v59 }
 0x65d   : > { %22032 = vmatpush3.bf16.msra.mxu1 %v5031_v59 }
 0x65f   : > { %v4976_v63 = vpop.f32.mrb[116].mxu1 }
 0x660   : > { %v4978_v12 = vpop.f32.mrb[117].mxu1 }
 0x661   : > { %v4979_v35 = vpop.f32.mrb[118].mxu1 }
 0x662   : > { %v5032_v13 = vpack.c.bf16 %v4979_v35, %v4976_v63  ;;  %v4981_v25 = vpop.f32.mrb[119].mxu1 }
 0x664   : > { %22033 = vmatprep.subr.bf16.mxu1 %v5032_v13 }
 0x665   : > { %22034 = vmatpush3.bf16.msra.mxu1 %v5032_v13 }
 0x667   : > { %v4984_v61 = vpop.f32.mrb[120].mxu1 }
 0x668   : > { %v4986_v27 = vpop.f32.mrb[121].mxu1 }
 0x669   : > { %v4987_v15 = vpop.f32.mrb[122].mxu1 }
 0x66a   : > { %v5033_v40 = vpack.c.bf16 %v4987_v15, %v4984_v61  ;;  %v4989_v24 = vpop.f32.mrb[123].mxu1 }
 0x66c   : > { %22035 = vmatprep.subr.bf16.mxu1 %v5033_v40 }
 0x66d   : > { %22036 = vmatpush3.bf16.msra.mxu1 %v5033_v40 }
 0x66f   : > { %v4992_v43 = vpop.f32.mrb[124].mxu1 }
 0x670   : > { %v4994_v56 = vpop.f32.mrb[125].mxu1 }
 0x671   : > { %v4995_v44 = vpop.f32.mrb[126].mxu1 }
 0x672   : > { %v5034_v53 = vpack.c.bf16 %v4995_v44, %v4992_v43  ;;  %v4997_v6 = vpop.f32.mrb[127].mxu1 }
 0x674   : > { %22037 = vmatprep.subr.bf16.mxu1 %v5034_v53 }
 0x675   : > { %22038 = vmatpush3.bf16.msra.mxu1 %v5034_v53 }
 0x677   : > { %v5000_v59 = vpop.f32.mrb[128].mxu1 }
 0x678   : > { %v5002_v12 = vpop.f32.mrb[129].mxu1 }
 0x679   : > { %v5003_v63 = vpop.f32.mrb[130].mxu1 }
 0x67a   : > { %v5035_v35 = vpack.c.bf16 %v5003_v63, %v5000_v59  ;;  %v5005_v25 = vpop.f32.mrb[131].mxu1 }
 0x67c   : > { %22039 = vmatprep.subr.bf16.mxu1 %v5035_v35 }
 0x67d   : > { %22040 = vmatpush3.bf16.msra.mxu1 %v5035_v35  ;;  %v23841_v35 = vld [vmem:[%s31986_s5 + $0x88] sm:$0xff]  }
 0x67f   : > { %v5008_v13 = vpop.f32.mrb[132].mxu1 }
 0x680   : > { %v5010_v27 = vpop.f32.mrb[133].mxu1 }
 0x681   : > { %v5011_v61 = vpop.f32.mrb[134].mxu1  ;;  %v23843_v27 = vld [vmem:[%s31986_s5 + $0x98] sm:$0xff]  }
 0x682   : > { %v5036_v24 = vpack.c.bf16 %v5011_v61, %v5008_v13  ;;  %v5013_v15 = vpop.f32.mrb[135].mxu1  ;;  %v23842_v13 = vld [vmem:[%s31986_s5 + $0x90] sm:$0xff]   ;;  %v23844_v61 = vld [vmem:[%s31986_s5 + $0xa0] sm:$0xff]  }
 0x683   : > { %v32012_v15 = vmov 0  }
 0x684   : > { %22041 = vmatprep.subr.bf16.mxu1 %v5036_v24 }
 0x685   : > { %22042 = vmatpush3.bf16.msra.mxu1 %v5036_v24  ;;  %v23852_v24 = vld [vmem:[%s31986_s5 + $0xd0] sm:$0xff]  }
 0x687   : > { %v5016_v40 = vpop.f32.mrb[136].mxu1 }
 0x688   : > { %v5018_v56 = vpop.f32.mrb[137].mxu1 }
 0x689   : > { %v5019_v43 = vpop.f32.mrb[138].mxu1  ;;  %v23856_v56 = vld [vmem:[%s31986_s5 + $0xe0] sm:$0xff]  }
 0x68a   : > { %v5037_v44 = vpack.c.bf16 %v5019_v43, %v5016_v40  ;;  %v5021_v6 = vpop.f32.mrb[139].mxu1  ;;  %v23854_v40 = vld [vmem:[%s31985_s4 + $0x130] sm:$0xff]   ;;  %v23855_v43 = vld [vmem:[%s31985_s4 + $0x138] sm:$0xff]  }
 0x68b   : > { %v23858_v6 = vld [vmem:[%s31985_s4 + $0x140] sm:$0xff]  }
 0x68c   : > { %22043 = vmatprep.subr.bf16.mxu1 %v5037_v44 }
 0x68d   : > { %22044 = vmatpush3.bf16.msra.mxu1 %v5037_v44  ;;  %v23857_v44 = vld [vmem:[%s31986_s5 + $0xe8] sm:$0xff]  }
 0x68f   : > { %v5024_v53 = vpop.f32.mrb[140].mxu1 }
 0x690   : > { %v5026_v12 = vpop.f32.mrb[141].mxu1 }
 0x691   : > { %v5027_v59 = vpop.f32.mrb[142].mxu1  ;;  %v23859_v12 = vld [vmem:[%s31985_s4 + $0x148] sm:$0xff]  }
 0x692   : > { %v5038_v63 = vpack.c.bf16 %v5027_v59, %v5024_v53  ;;  %v5029_v25 = vpop.f32.mrb[143].mxu1  ;;  %v23860_v53 = vld [vmem:[%s31986_s5 + $0xf0] sm:$0xff]   ;;  %v23861_v59 = vld [vmem:[%s31986_s5 + $0xf8] sm:$0xff]  }
 0x693   : > { %v23863_v25 = vld [vmem:[%s31985_s4 + $0x158] sm:$0xff]  }
 0x694   : > { %22045 = vmatprep.subr.bf16.mxu1 %v5038_v63 }
 0x695   : > { %22046 = vmatpush3.bf16.msra.mxu1 %v5038_v63  ;;  %v23862_v63 = vld [vmem:[%s31985_s4 + $0x150] sm:$0xff]  }
 0x696   : > { %22063 = vmatprep.subr.bf16.mxu1 %v27126_v57 }
 0x698   : > { %22048 = vmatmul.mubr.bf16.vlgmr.msra.gmra.mrb[96].mxu1 %v23841_v35  ;;  %v23864_v35 = vld [vmem:[%s31985_s4 + $0x160] sm:$0xff]  }
 0x699   : > { %22064 = vmatpush3.bf16.msra.mxu1 %v27126_v57  ;;  %22051 = vmatprep.mubr.bf16.mxu1 %v23842_v13  ;;  %v23845_v57 = vld [vmem:[%s31986_s5 + $0xa8] sm:$0xff]   ;;  %v23865_v13 = vld [vmem:[%s31986_s5 + $0x100] sm:$0xff]  }
 0x69a   : > { %22065 = vmatprep.subr.bf16.mxu1 %v27133_v10 }
 0x69d   : > { %22066 = vmatpush3.bf16.msra.mxu1 %v27133_v10  ;;  %v23846_v10 = vld [vmem:[%s31986_s5 + $0xb0] sm:$0xff]  }
 0x69e   : > { %22067 = vmatprep.subr.bf16.mxu1 %v27140_v19 }
 0x6a0   : > { %22052 = vmatmul.mubr.bf16.gmra.mrb[100].mxu1 %v23843_v27 }
 0x6a1   : > { %22068 = vmatpush3.bf16.msra.mxu1 %v27140_v19  ;;  %22055 = vmatprep.mubr.bf16.mxu1 %v23844_v61  ;;  %v23847_v19 = vld [vmem:[%s31986_s5 + $0xb8] sm:$0xff]  }
 0x6a2   : > { %22069 = vmatprep.subr.bf16.mxu1 %v27147_v36 }
 0x6a5   : > { %22070 = vmatpush3.bf16.msra.mxu1 %v27147_v36  ;;  %v23848_v36 = vld [vmem:[%s31986_s5 + $0xc0] sm:$0xff]  }
 0x6a6   : > { %22071 = vmatprep.subr.bf16.mxu1 %v27154_v49 }
 0x6a8   : > { %22056 = vmatmul.mubr.bf16.gmra.mrb[104].mxu1 %v23845_v57 }
 0x6a9   : > { %22072 = vmatpush3.bf16.msra.mxu1 %v27154_v49  ;;  %22059 = vmatprep.mubr.bf16.mxu1 %v23846_v10  ;;  %v23849_v49 = vld [vmem:[%s31986_s5 + $0xc8] sm:$0xff]  }
 0x6aa   : > { %22073 = vmatprep.subr.bf16.mxu1 %v27159_v62 }
 0x6ad   : > { %22074 = vmatpush3.bf16.msra.mxu1 %v27159_v62  ;;  %v23850_v62 = vld [vmem:[%s31985_s4 + $0x120] sm:$0xff]  }
 0x6ae   : > { %22075 = vmatprep.subr.bf16.mxu1 %v27163_v16 }
 0x6b0   : > { %22060 = vmatmul.mubr.bf16.gmra.mrb[108].mxu1 %v23847_v19 }
 0x6b1   : > { %22076 = vmatpush3.bf16.msra.mxu1 %v27163_v16  ;;  %22079 = vmatprep.mubr.bf16.mxu1 %v23848_v36  ;;  %v23851_v16 = vld [vmem:[%s31985_s4 + $0x128] sm:$0xff]  }
 0x6b2   : > { %22077 = vmatprep.subr.bf16.mxu1 %v27167_v37 }
 0x6b5   : > { %22078 = vmatpush3.bf16.msra.mxu1 %v27167_v37  ;;  %v23853_v37 = vld [vmem:[%s31986_s5 + $0xd8] sm:$0xff]  }
 0x6b6   : > { %5646 = vmatprep.subr.bf16.mxu1 %v32012_v15 }
 0x6b8   : > { %22080 = vmatmul.mubr.bf16.vlgmr.msra.gmra.mrb[96].mxu1 %v23849_v49 }
 0x6b9   : > { %5647 = vmatpush1.bf16.msra.mxu1 %v23850_v62  ;;  %22083 = vmatprep.mubr.bf16.mxu1 %v23852_v24 }
 0x6ba   : > { %5648 = vmatprep.subr.bf16.mxu1 %v32012_v15 }
 0x6bd   : > { %5649 = vmatpush1.bf16.msra.mxu1 %v23851_v16 }
 0x6be   : > { %5650 = vmatprep.subr.bf16.mxu1 %v32012_v15 }
 0x6c0   : > { %22084 = vmatmul.mubr.bf16.gmra.mrb[100].mxu1 %v23853_v37 }
 0x6c1   : > { %5651 = vmatpush1.bf16.msra.mxu1 %v23854_v40  ;;  %22087 = vmatprep.mubr.bf16.mxu1 %v23856_v56 }
 0x6c2   : > { %5652 = vmatprep.subr.bf16.mxu1 %v32012_v15 }
 0x6c5   : > { %5653 = vmatpush1.bf16.msra.mxu1 %v23855_v43 }
 0x6c6   : > { %5654 = vmatprep.subr.bf16.mxu1 %v32012_v15 }
 0x6c8   : > { %22088 = vmatmul.mubr.bf16.gmra.mrb[104].mxu1 %v23857_v44 }
 0x6c9   : > { %5655 = vmatpush1.bf16.msra.mxu1 %v23858_v6  ;;  %22091 = vmatprep.mubr.bf16.mxu1 %v23860_v53 }
 0x6ca   : > { %5656 = vmatprep.subr.bf16.mxu1 %v32012_v15 }
 0x6cd   : > { %5657 = vmatpush1.bf16.msra.mxu1 %v23859_v12 }
 0x6ce   : > { %5658 = vmatprep.subr.bf16.mxu1 %v32012_v15 }
 0x6d0   : > { %22092 = vmatmul.mubr.bf16.gmra.mrb[108].mxu1 %v23861_v59 }
 0x6d1   : > { %5659 = vmatpush1.bf16.msra.mxu1 %v23862_v63  ;;  %19801 = vmatprep.mubr.msk.bf16.mxu1 %vm695_vm0, %v26818_v9 }
 0x6d2   : > { %5660 = vmatprep.subr.bf16.mxu1 %v32012_v15 }
 0x6d5   : > { %5661 = vmatpush1.bf16.msra.mxu1 %v23863_v25 }
 0x6d6   : > { %5662 = vmatprep.subr.bf16.mxu1 %v32012_v15 }
 0x6d9   : > { %5663 = vmatpush1.bf16.msra.mxu1 %v23864_v35 }
 0x6dc   : > { %5679 = vmatmul.mubr.bf16.vlgmr.msra.gmra.mrb[144].mxu1 %v26816_v7 }
 0x6dd   : > { %19802 = vmatprep.mubr.msk.bf16.mxu1 %vm695_vm0, %v26842_v29 }
 0x6e4   : > { %5687 = vmatmul.mubr.bf16.gmra.mrb[148].mxu1 %v26840_v38 }
 0x6e5   : > { %19803 = vmatprep.mubr.msk.bf16.mxu1 %vm695_vm0, %v26868_v50 }
 0x6ec   : > { %5695 = vmatmul.mubr.bf16.gmra.mrb[152].mxu1 %v26866_v48 }
 0x6ed   : > { %19804 = vmatprep.mubr.msk.bf16.mxu1 %vm695_vm0, %v26894_v5 }
 0x6f4   : > { %5703 = vmatmul.mubr.bf16.gmra.mrb[156].mxu1 %v26892_v3 }
 0x6f5   : > { %19805 = vmatprep.mubr.msk.bf16.mxu1 %vm695_vm0, %v26920_v30 }
 0x6fc   : > { %5711 = vmatmul.mubr.bf16.gmra.mrb[160].mxu1 %v26918_v26 }
 0x6fd   : > { %19806 = vmatprep.mubr.msk.bf16.mxu1 %vm695_vm0, %v26939_v51 }
 0x704   : > { %5719 = vmatmul.mubr.bf16.gmra.mrb[164].mxu1 %v26937_v47 }
 0x705   : > { %19807 = vmatprep.mubr.msk.bf16.mxu1 %vm695_vm0, %v26949_v2 }
 0x70c   : > { %5727 = vmatmul.mubr.bf16.gmra.mrb[168].mxu1 %v26947_v0 }
 0x70d   : > { %19808 = vmatprep.mubr.msk.bf16.mxu1 %vm695_vm0, %v26959_v21 }
 0x714   : > { %5735 = vmatmul.mubr.bf16.gmra.mrb[172].mxu1 %v26957_v20 }
 0x715   : > { %22111 = vmatprep.mubr.bf16.mxu1 %v23865_v13 }
 0x7af   : > { %v5680_v27 = vpop.f32.mrb[144].mxu1 }
 0x7b0   : > { %v5682_v61 = vpop.f32.mrb[145].mxu1 }
 0x7b1   : > { %v5683_v57 = vpop.f32.mrb[146].mxu1 }
 0x7b2   : > { %v5743_v10 = vpack.c.bf16 %v5683_v57, %v5680_v27  ;;  %v5685_v19 = vpop.f32.mrb[147].mxu1 }
 0x7b4   : > { %22095 = vmatprep.subr.bf16.mxu1 %v5743_v10 }
 0x7b5   : > { %22096 = vmatpush3.bf16.msra.mxu1 %v5743_v10 }
 0x7b7   : > { %v5688_v36 = vpop.f32.mrb[148].mxu1 }
 0x7b8   : > { %v5690_v49 = vpop.f32.mrb[149].mxu1 }
 0x7b9   : > { %v5691_v62 = vpop.f32.mrb[150].mxu1 }
 0x7ba   : > { %v5744_v24 = vpack.c.bf16 %v5691_v62, %v5688_v36  ;;  %v5693_v16 = vpop.f32.mrb[151].mxu1 }
 0x7bc   : > { %22097 = vmatprep.subr.bf16.mxu1 %v5744_v24 }
 0x7bd   : > { %22098 = vmatpush3.bf16.msra.mxu1 %v5744_v24 }
 0x7bf   : > { %v5696_v37 = vpop.f32.mrb[152].mxu1 }
 0x7c0   : > { %v5698_v40 = vpop.f32.mrb[153].mxu1 }
 0x7c1   : > { %v5699_v56 = vpop.f32.mrb[154].mxu1 }
 0x7c2   : > { %v5745_v43 = vpack.c.bf16 %v5699_v56, %v5696_v37  ;;  %v5701_v44 = vpop.f32.mrb[155].mxu1 }
 0x7c4   : > { %22099 = vmatprep.subr.bf16.mxu1 %v5745_v43 }
 0x7c5   : > { %22100 = vmatpush3.bf16.msra.mxu1 %v5745_v43 }
 0x7c7   : > { %v5704_v6 = vpop.f32.mrb[156].mxu1 }
 0x7c8   : > { %v5706_v53 = vpop.f32.mrb[157].mxu1 }
 0x7c9   : > { %v5707_v12 = vpop.f32.mrb[158].mxu1 }
 0x7ca   : > { %v5746_v59 = vpack.c.bf16 %v5707_v12, %v5704_v6  ;;  %v5709_v63 = vpop.f32.mrb[159].mxu1  ;;  %v23866_v12 = vld [vmem:[%s31986_s5 + $0x108] sm:$0xff]  }
 0x7cb   : > { %v23868_v63 = vld [vmem:[%s31986_s5 + $0x118] sm:$0xff]  }
 0x7cc   : > { %22101 = vmatprep.subr.bf16.mxu1 %v5746_v59 }
 0x7cd   : > { %22102 = vmatpush3.bf16.msra.mxu1 %v5746_v59  ;;  %v23867_v59 = vld [vmem:[%s31986_s5 + $0x110] sm:$0xff]  }
 0x7cf   : > { %v5712_v25 = vpop.f32.mrb[160].mxu1 }
 0x7d0   : > { %v5714_v35 = vpop.f32.mrb[161].mxu1 }
 0x7d1   : > { %v5715_v13 = vpop.f32.mrb[162].mxu1  ;;  %v23893_v35 = vld [vmem:[%s31986_s5 + $0x1d0] sm:$0xff]  }
 0x7d2   : > { %v5747_v27 = vpack.c.bf16 %v5715_v13, %v5712_v25  ;;  %v5717_v61 = vpop.f32.mrb[163].mxu1  ;;  %v23869_v25 = vld [vmem:[%s31986_s5 + $0x120] sm:$0xff]   ;;  %v23895_v13 = vld [vmem:[%s31985_s4 + $0x250] sm:$0xff]  }
 0x7d3   : > { %v23896_v61 = vld [vmem:[%s31985_s4 + $0x258] sm:$0xff]  }
 0x7d4   : > { %22103 = vmatprep.subr.bf16.mxu1 %v5747_v27 }
 0x7d5   : > { %22104 = vmatpush3.bf16.msra.mxu1 %v5747_v27  ;;  %v23897_v27 = vld [vmem:[%s31986_s5 + $0x1e0] sm:$0xff]  }
 0x7d7   : > { %v5720_v57 = vpop.f32.mrb[164].mxu1 }
 0x7d8   : > { %v5722_v10 = vpop.f32.mrb[165].mxu1 }
 0x7d9   : > { %v5723_v19 = vpop.f32.mrb[166].mxu1  ;;  %v23899_v10 = vld [vmem:[%s31985_s4 + $0x260] sm:$0xff]  }
 0x7da   : > { %v5748_v36 = vpack.c.bf16 %v5723_v19, %v5720_v57  ;;  %v5725_v49 = vpop.f32.mrb[167].mxu1  ;;  %v23898_v57 = vld [vmem:[%s31986_s5 + $0x1e8] sm:$0xff]   ;;  %v23901_v19 = vld [vmem:[%s31986_s5 + $0x1f0] sm:$0xff]  }
 0x7db   : > { %v23902_v49 = vld [vmem:[%s31986_s5 + $0x1f8] sm:$0xff]  }
 0x7dc   : > { %22105 = vmatprep.subr.bf16.mxu1 %v5748_v36 }
 0x7dd   : > { %22106 = vmatpush3.bf16.msra.mxu1 %v5748_v36  ;;  %v23900_v36 = vld [vmem:[%s31985_s4 + $0x268] sm:$0xff]  }
 0x7df   : > { %v5728_v62 = vpop.f32.mrb[168].mxu1 }
 0x7e0   : > { %v5730_v24 = vpop.f32.mrb[169].mxu1 }
 0x7e1   : > { %v5731_v16 = vpop.f32.mrb[170].mxu1  ;;  %v23904_v24 = vld [vmem:[%s31985_s4 + $0x278] sm:$0xff]  }
 0x7e2   : > { %v5749_v37 = vpack.c.bf16 %v5731_v16, %v5728_v62  ;;  %v5733_v40 = vpop.f32.mrb[171].mxu1  ;;  %v23903_v62 = vld [vmem:[%s31985_s4 + $0x270] sm:$0xff]   ;;  %v23905_v16 = vld [vmem:[%s31985_s4 + $0x280] sm:$0xff]  }
 0x7e3   : > { %v23914_v40 = vld [vmem:[%s31988_s7] sm:$0xff]  }
 0x7e4   : > { %22107 = vmatprep.subr.bf16.mxu1 %v5749_v37  ;;  %22255 = vmatprep.subr.bf16.mxu0 %v23914_v40 }
 0x7e5   : > { %22108 = vmatpush3.bf16.msra.mxu1 %v5749_v37  ;;  %v23906_v37 = vld [vmem:[%s31986_s5 + $0x200] sm:$0xff]   ;;  %22256 = vmatpush3.bf16.msra.mxu0 %v23914_v40  ;;  %v23909_v40 = vld [vmem:[%s31986_s5 + $0x218] sm:$0xff]  }
 0x7e7   : > { %v5736_v56 = vpop.f32.mrb[172].mxu1 }
 0x7e8   : > { %v5738_v43 = vpop.f32.mrb[173].mxu1 }
 0x7e9   : > { %v5739_v44 = vpop.f32.mrb[174].mxu1  ;;  %v23916_v43 = vld [vmem:[%s31988_s7 + $0x10] ss:$0 sps:$4 sm:$0x33]  }
 0x7ea   : > { %v5750_v6 = vpack.c.bf16 %v5739_v44, %v5736_v56  ;;  %v5741_v53 = vpop.f32.mrb[175].mxu1  ;;  %v23915_v56 = vld [vmem:[%s31988_s7 + $0x8] sm:$0xff]   ;;  %v7536_v44 = vsel %vm7534_vm3, %v23916_v43, 0 }
 0x7eb   : > { %22257 = vmatprep.subr.bf16.mxu0 %v23915_v56 }
 0x7ec   : > { %22109 = vmatprep.subr.bf16.mxu1 %v5750_v6  ;;  %22258 = vmatpush3.bf16.msra.mxu0 %v23915_v56  ;;  %v23910_v56 = vld [vmem:[%s31986_s5 + $0x220] sm:$0xff]  }
 0x7ed   : > { %22110 = vmatpush3.bf16.msra.mxu1 %v5750_v6  ;;  %23401 = vmatprep.subr.msk.bf16.mxu0 %vm7534_vm3, %v23916_v43  ;;  %v23911_v43 = vld [vmem:[%s31986_s5 + $0x228] sm:$0xff]  }
 0x7ee   : > { %22127 = vmatprep.subr.bf16.mxu1 %v27169_v54 }
 0x7f0   : > { %22112 = vmatmul.mubr.bf16.vlgmr.msra.gmra.mrb[96].mxu1 %v23866_v12  ;;  %22260 = vmatpush3.bf16.msra.mxu0 %v7536_v44  ;;  %v23912_v44 = vld [vmem:[%s31986_s5 + $0x230] sm:$0xff]  }
 0x7f1   : > { %22128 = vmatpush3.bf16.msra.mxu1 %v27169_v54  ;;  %22115 = vmatprep.mubr.bf16.mxu1 %v23867_v59  ;;  %v23870_v54 = vld [vmem:[%s31986_s5 + $0x128] sm:$0xff]  }
 0x7f2   : > { %22129 = vmatprep.subr.bf16.mxu1 %v27171_v11 }
 0x7f5   : > { %22130 = vmatpush3.bf16.msra.mxu1 %v27171_v11  ;;  %v23871_v11 = vld [vmem:[%s31986_s5 + $0x130] sm:$0xff]  }
 0x7f6   : > { %22131 = vmatprep.subr.bf16.mxu1 %v27173_v31 }
 0x7f8   : > { %22116 = vmatmul.mubr.bf16.gmra.mrb[100].mxu1 %v23868_v63 }
 0x7f9   : > { %22132 = vmatpush3.bf16.msra.mxu1 %v27173_v31  ;;  %22119 = vmatprep.mubr.bf16.mxu1 %v23869_v25  ;;  %v23872_v31 = vld [vmem:[%s31986_s5 + $0x138] sm:$0xff]  }
 0x7fa   : > { %22133 = vmatprep.subr.bf16.mxu1 %v27175_v52 }
 0x7fd   : > { %22134 = vmatpush3.bf16.msra.mxu1 %v27175_v52  ;;  %v23873_v52 = vld [vmem:[%s31986_s5 + $0x140] sm:$0xff]  }
 0x7fe   : > { %22135 = vmatprep.subr.bf16.mxu1 %v27177_v8 }
 0x800   : > { %22120 = vmatmul.mubr.bf16.gmra.mrb[104].mxu1 %v23870_v54 }
 0x801   : > { %22136 = vmatpush3.bf16.msra.mxu1 %v27177_v8  ;;  %22123 = vmatprep.mubr.bf16.mxu1 %v23871_v11  ;;  %v23874_v8 = vld [vmem:[%s31986_s5 + $0x148] sm:$0xff]  }
 0x802   : > { %22137 = vmatprep.subr.bf16.mxu1 %v27179_v39 }
 0x805   : > { %22138 = vmatpush3.bf16.msra.mxu1 %v27179_v39  ;;  %v23875_v39 = vld [vmem:[%s31986_s5 + $0x150] sm:$0xff]  }
 0x806   : > { %22139 = vmatprep.subr.bf16.mxu1 %v27181_v58 }
 0x808   : > { %22124 = vmatmul.mubr.bf16.gmra.mrb[108].mxu1 %v23872_v31 }
 0x809   : > { %22140 = vmatpush3.bf16.msra.mxu1 %v27181_v58  ;;  %22143 = vmatprep.mubr.bf16.mxu1 %v23873_v52  ;;  %v23876_v58 = vld [vmem:[%s31986_s5 + $0x158] sm:$0xff]  }
 0x80a   : > { %22141 = vmatprep.subr.bf16.mxu1 %v27183_v22 }
 0x80d   : > { %22142 = vmatpush3.bf16.msra.mxu1 %v27183_v22  ;;  %v23877_v22 = vld [vmem:[%s31986_s5 + $0x160] sm:$0xff]  }
 0x80e   : > { %22159 = vmatprep.subr.bf16.mxu1 %v27193_v42 }
 0x810   : > { %22144 = vmatmul.mubr.bf16.vlgmr.msra.gmra.mrb[96].mxu1 %v23874_v8 }
 0x811   : > { %22160 = vmatpush3.bf16.msra.mxu1 %v27193_v42  ;;  %22147 = vmatprep.mubr.bf16.mxu1 %v23875_v39  ;;  %v23878_v42 = vld [vmem:[%s31986_s5 + $0x168] sm:$0xff]  }
 0x812   : > { %22161 = vmatprep.subr.bf16.mxu1 %v27205_v55 }
 0x815   : > { %22162 = vmatpush3.bf16.msra.mxu1 %v27205_v55  ;;  %v23879_v55 = vld [vmem:[%s31986_s5 + $0x170] sm:$0xff]  }
 0x816   : > { %22163 = vmatprep.subr.bf16.mxu1 %v27217_v4 }
 0x818   : > { %22148 = vmatmul.mubr.bf16.gmra.mrb[100].mxu1 %v23876_v58 }
 0x819   : > { %22164 = vmatpush3.bf16.msra.mxu1 %v27217_v4  ;;  %22151 = vmatprep.mubr.bf16.mxu1 %v23877_v22  ;;  %v23880_v4 = vld [vmem:[%s31986_s5 + $0x178] sm:$0xff]  }
 0x81a   : > { %22165 = vmatprep.subr.bf16.mxu1 %v27229_v23 }
 0x81d   : > { %22166 = vmatpush3.bf16.msra.mxu1 %v27229_v23  ;;  %v23881_v23 = vld [vmem:[%s31986_s5 + $0x180] sm:$0xff]  }
 0x81e   : > { %22167 = vmatprep.subr.bf16.mxu1 %v27246_v34 }
 0x820   : > { %22152 = vmatmul.mubr.bf16.gmra.mrb[104].mxu1 %v23878_v42 }
 0x821   : > { %22168 = vmatpush3.bf16.msra.mxu1 %v27246_v34  ;;  %22155 = vmatprep.mubr.bf16.mxu1 %v23879_v55  ;;  %v23882_v34 = vld [vmem:[%s31986_s5 + $0x188] sm:$0xff]  }
 0x822   : > { %22169 = vmatprep.subr.bf16.mxu1 %v27262_v60 }
 0x825   : > { %22170 = vmatpush3.bf16.msra.mxu1 %v27262_v60  ;;  %v23883_v60 = vld [vmem:[%s31986_s5 + $0x190] sm:$0xff]  }
 0x826   : > { %22171 = vmatprep.subr.bf16.mxu1 %v27278_v17 }
 0x828   : > { %22156 = vmatmul.mubr.bf16.gmra.mrb[108].mxu1 %v23880_v4 }
 0x829   : > { %22172 = vmatpush3.bf16.msra.mxu1 %v27278_v17  ;;  %22175 = vmatprep.mubr.bf16.mxu1 %v23881_v23  ;;  %v23884_v17 = vld [vmem:[%s31986_s5 + $0x198] sm:$0xff]  }
 0x82a   : > { %22173 = vmatprep.subr.bf16.mxu1 %v27293_v41 }
 0x82d   : > { %22174 = vmatpush3.bf16.msra.mxu1 %v27293_v41  ;;  %v23885_v41 = vld [vmem:[%s31986_s5 + $0x1a0] sm:$0xff]  }
 0x82e   : > { %22191 = vmatprep.subr.bf16.mxu1 %v27300_v28 }
 0x830   : > { %22176 = vmatmul.mubr.bf16.vlgmr.msra.gmra.mrb[96].mxu1 %v23882_v34 }
 0x831   : > { %22192 = vmatpush3.bf16.msra.mxu1 %v27300_v28  ;;  %22179 = vmatprep.mubr.bf16.mxu1 %v23883_v60  ;;  %v23886_v28 = vld [vmem:[%s31986_s5 + $0x1a8] sm:$0xff]  }
 0x832   : > { %22193 = vmatprep.subr.bf16.mxu1 %v27305_v1 }
 0x835   : > { %22194 = vmatpush3.bf16.msra.mxu1 %v27305_v1  ;;  %v23887_v1 = vld [vmem:[%s31986_s5 + $0x1b0] sm:$0xff]  }
 0x836   : > { %22195 = vmatprep.subr.bf16.mxu1 %v27310_v14 }
 0x838   : > { %22180 = vmatmul.mubr.bf16.gmra.mrb[100].mxu1 %v23884_v17 }
 0x839   : > { %22196 = vmatpush3.bf16.msra.mxu1 %v27310_v14  ;;  %22183 = vmatprep.mubr.bf16.mxu1 %v23885_v41  ;;  %v23888_v14 = vld [vmem:[%s31986_s5 + $0x1b8] sm:$0xff]  }
 0x83a   : > { %22197 = vmatprep.subr.bf16.mxu1 %v27315_v32 }
 0x83d   : > { %22198 = vmatpush3.bf16.msra.mxu1 %v27315_v32  ;;  %v23889_v32 = vld [vmem:[%s31986_s5 + $0x1c0] sm:$0xff]  }
 0x83e   : > { %22199 = vmatprep.subr.bf16.mxu1 %v27320_v45 }
 0x840   : > { %22184 = vmatmul.mubr.bf16.gmra.mrb[104].mxu1 %v23886_v28 }
 0x841   : > { %22200 = vmatpush3.bf16.msra.mxu1 %v27320_v45  ;;  %22187 = vmatprep.mubr.bf16.mxu1 %v23887_v1  ;;  %v23890_v45 = vld [vmem:[%s31986_s5 + $0x1c8] sm:$0xff]  }
 0x842   : > { %22201 = vmatprep.subr.bf16.mxu1 %v27325_v18 }
 0x845   : > { %22202 = vmatpush3.bf16.msra.mxu1 %v27325_v18  ;;  %v23891_v18 = vld [vmem:[%s31985_s4 + $0x240] sm:$0xff]  }
 0x846   : > { %22203 = vmatprep.subr.bf16.mxu1 %v27330_v46 }
 0x848   : > { %22188 = vmatmul.mubr.bf16.gmra.mrb[108].mxu1 %v23888_v14 }
 0x849   : > { %22204 = vmatpush3.bf16.msra.mxu1 %v27330_v46  ;;  %22207 = vmatprep.mubr.bf16.mxu1 %v23889_v32  ;;  %v23892_v46 = vld [vmem:[%s31985_s4 + $0x248] sm:$0xff]  }
 0x84a   : > { %22205 = vmatprep.subr.bf16.mxu1 %v27335_v33 }
 0x84d   : > { %22206 = vmatpush3.bf16.msra.mxu1 %v27335_v33  ;;  %v23894_v33 = vld [vmem:[%s31986_s5 + $0x1d8] sm:$0xff]  }
 0x84e   : > { %7070 = vmatprep.subr.bf16.mxu1 %v32012_v15 }
 0x850   : > { %22208 = vmatmul.mubr.bf16.vlgmr.msra.gmra.mrb[96].mxu1 %v23890_v45 }
 0x851   : > { %7071 = vmatpush1.bf16.msra.mxu1 %v23891_v18  ;;  %22211 = vmatprep.mubr.bf16.mxu1 %v23893_v35 }
 0x852   : > { %7072 = vmatprep.subr.bf16.mxu1 %v32012_v15 }
 0x855   : > { %7073 = vmatpush1.bf16.msra.mxu1 %v23892_v46 }
 0x856   : > { %7074 = vmatprep.subr.bf16.mxu1 %v32012_v15 }
 0x858   : > { %22212 = vmatmul.mubr.bf16.gmra.mrb[100].mxu1 %v23894_v33 }
 0x859   : > { %7075 = vmatpush1.bf16.msra.mxu1 %v23895_v13  ;;  %22215 = vmatprep.mubr.bf16.mxu1 %v23897_v27 }
 0x85a   : > { %7076 = vmatprep.subr.bf16.mxu1 %v32012_v15 }
 0x85d   : > { %7077 = vmatpush1.bf16.msra.mxu1 %v23896_v61 }
 0x85e   : > { %7078 = vmatprep.subr.bf16.mxu1 %v32012_v15 }
 0x860   : > { %22216 = vmatmul.mubr.bf16.gmra.mrb[104].mxu1 %v23898_v57 }
 0x861   : > { %7079 = vmatpush1.bf16.msra.mxu1 %v23899_v10  ;;  %22219 = vmatprep.mubr.bf16.mxu1 %v23901_v19 }
 0x862   : > { %7080 = vmatprep.subr.bf16.mxu1 %v32012_v15 }
 0x865   : > { %7081 = vmatpush1.bf16.msra.mxu1 %v23900_v36 }
 0x866   : > { %7082 = vmatprep.subr.bf16.mxu1 %v32012_v15 }
 0x868   : > { %22220 = vmatmul.mubr.bf16.gmra.mrb[108].mxu1 %v23902_v49 }
 0x869   : > { %7083 = vmatpush1.bf16.msra.mxu1 %v23903_v62  ;;  %20037 = vmatprep.mubr.msk.bf16.mxu1 %vm695_vm0, %v26818_v9 }
 0x86a   : > { %7084 = vmatprep.subr.bf16.mxu1 %v32012_v15 }
 0x86d   : > { %7085 = vmatpush1.bf16.msra.mxu1 %v23904_v24  ;;  %v23917_v24 = vld [vmem:[%s31988_s7 + $0x28] sm:$0xff]  }
 0x86e   : > { %7086 = vmatprep.subr.bf16.mxu1 %v32012_v15 }
 0x871   : > { %7087 = vmatpush1.bf16.msra.mxu1 %v23905_v16  ;;  %v23907_v16 = vld [vmem:[%s31986_s5 + $0x208] sm:$0xff]  }
 0x874   : > { %7103 = vmatmul.mubr.bf16.vlgmr.msra.gmra.mrb[176].mxu1 %v26816_v7 }
 0x875   : > { %20038 = vmatprep.mubr.msk.bf16.mxu1 %vm695_vm0, %v26842_v29 }
 0x87c   : > { %7111 = vmatmul.mubr.bf16.gmra.mrb[180].mxu1 %v26840_v38 }
 0x87d   : > { %20039 = vmatprep.mubr.msk.bf16.mxu1 %vm695_vm0, %v26868_v50 }
 0x884   : > { %7119 = vmatmul.mubr.bf16.gmra.mrb[184].mxu1 %v26866_v48 }
 0x885   : > { %20040 = vmatprep.mubr.msk.bf16.mxu1 %vm695_vm0, %v26894_v5 }
 0x88c   : > { %7127 = vmatmul.mubr.bf16.gmra.mrb[188].mxu1 %v26892_v3 }
 0x88d   : > { %20041 = vmatprep.mubr.msk.bf16.mxu1 %vm695_vm0, %v26920_v30 }
 0x894   : > { %7135 = vmatmul.mubr.bf16.gmra.mrb[192].mxu1 %v26918_v26 }
 0x895   : > { %20042 = vmatprep.mubr.msk.bf16.mxu1 %vm695_vm0, %v26939_v51 }
 0x89c   : > { %7143 = vmatmul.mubr.bf16.gmra.mrb[196].mxu1 %v26937_v47 }
 0x89d   : > { %20043 = vmatprep.mubr.msk.bf16.mxu1 %vm695_vm0, %v26949_v2 }
 0x8a4   : > { %7151 = vmatmul.mubr.bf16.gmra.mrb[200].mxu1 %v26947_v0 }
 0x8a5   : > { %20044 = vmatprep.mubr.msk.bf16.mxu1 %vm695_vm0, %v26959_v21 }
 0x8ac   : > { %7159 = vmatmul.mubr.bf16.gmra.mrb[204].mxu1 %v26957_v20 }
 0x8ad   : > { %22239 = vmatprep.mubr.bf16.mxu1 %v23906_v37  ;;  %v23908_v37 = vld [vmem:[%s31986_s5 + $0x210] sm:$0xff]  }
 0x947   : > { %v7104_v6 = vpop.f32.mrb[176].mxu1 }
 0x948   : > { %v7106_v53 = vpop.f32.mrb[177].mxu1 }
 0x949   : > { %v7107_v12 = vpop.f32.mrb[178].mxu1  ;;  %v23918_v53 = vld [vmem:[%s31988_s7 + $0x30] sm:$0xff]  }
 0x94a   : > { %v7167_v59 = vpack.c.bf16 %v7107_v12, %v7104_v6  ;;  %v7109_v63 = vpop.f32.mrb[179].mxu1  ;;  %v23913_v6 = vld [vmem:[%s31986_s5 + $0x238] sm:$0xff]  }
 0x94b   : > { %v23919_v12 = vld [vmem:[%s31988_s7 + $0x38] ss:$0 sps:$4 sm:$0x33]  }
 0x94c   : > { %22223 = vmatprep.subr.bf16.mxu1 %v7167_v59  ;;  %v23920_v63 = vld [vmem:[%s31988_s7 + $0x14] sm:$0xff]  }
 0x94d   : > { %22224 = vmatpush3.bf16.msra.mxu1 %v7167_v59  ;;  %v8117_v59 = vsel %vm7534_vm3, %v23919_v12, 0  ;;  %22277 = vmatprep.subr.bf16.mxu0 %v23920_v63 }
 0x94f   : > { %v7112_v25 = vpop.f32.mrb[180].mxu1 }
 0x950   : > { %v7114_v54 = vpop.f32.mrb[181].mxu1 }
 0x951   : > { %v7115_v11 = vpop.f32.mrb[182].mxu1  ;;  %v7372_v54 = vpop.permute.xlu0 %7371 }
 0x952   : > { %v7168_v31 = vpack.c.bf16 %v7115_v11, %v7112_v25  ;;  %v7117_v52 = vpop.f32.mrb[183].mxu1  ;;  %v23922_v25 = vld [vmem:[%s31988_s7 + $0x3c] sm:$0xff]   ;;  %v7377_v11 = vpop.permute.xlu1 %7376 }
 0x954   : > { %22225 = vmatprep.subr.bf16.mxu1 %v7168_v31 }
 0x955   : > { %22226 = vmatpush3.bf16.msra.mxu1 %v7168_v31  ;;  %v7382_v31 = vpop.permute.xlu0 %7381 }
 0x956   : > { %v7387_v52 = vpop.permute.xlu1 %7386 }
 0x957   : > { %v7120_v8 = vpop.f32.mrb[184].mxu1 }
 0x958   : > { %v7122_v39 = vpop.f32.mrb[185].mxu1 }
 0x959   : > { %v7123_v58 = vpop.f32.mrb[186].mxu1 }
 0x95a   : > { %v7169_v22 = vpack.c.bf16 %v7123_v58, %v7120_v8  ;;  %v7125_v42 = vpop.f32.mrb[187].mxu1  ;;  %v7392_v8 = vpop.permute.xlu0 %7391 }
 0x95b   : > { %v7397_v39 = vpop.permute.xlu1 %7396 }
 0x95c   : > { %22227 = vmatprep.subr.bf16.mxu1 %v7169_v22 }
 0x95d   : > { %22228 = vmatpush3.bf16.msra.mxu1 %v7169_v22 }
 0x95e   : > { %v7402_v58 = vpop.permute.xlu0 %7401 }
 0x95f   : > { %v7128_v55 = vpop.f32.mrb[188].mxu1 }
 0x960   : > { %v7130_v4 = vpop.f32.mrb[189].mxu1 }
 0x961   : > { %v7131_v23 = vpop.f32.mrb[190].mxu1  ;;  %v7407_v4 = vpop.permute.xlu1 %7406 }
 0x962   : > { %v7170_v34 = vpack.c.bf16 %v7131_v23, %v7128_v55  ;;  %v7133_v60 = vpop.f32.mrb[191].mxu1 }
 0x964   : > { %22229 = vmatprep.subr.bf16.mxu1 %v7170_v34 }
 0x965   : > { %22230 = vmatpush3.bf16.msra.mxu1 %v7170_v34 }
 0x967   : > { %v7136_v17 = vpop.f32.mrb[192].mxu1 }
 0x968   : > { %v7138_v41 = vpop.f32.mrb[193].mxu1 }
 0x969   : > { %v7139_v28 = vpop.f32.mrb[194].mxu1 }
 0x96a   : > { %v7171_v1 = vpack.c.bf16 %v7139_v28, %v7136_v17  ;;  %v7141_v14 = vpop.f32.mrb[195].mxu1 }
 0x96b   : > { %v7412_v14 = vpop.permute.xlu0 %7411 }
 0x96c   : > { %22231 = vmatprep.subr.bf16.mxu1 %v7171_v1 }
 0x96d   : > { %22232 = vmatpush3.bf16.msra.mxu1 %v7171_v1 }
 0x96f   : > { %v7144_v32 = vpop.f32.mrb[196].mxu1 }
 0x970   : > { %v7146_v45 = vpop.f32.mrb[197].mxu1 }
 0x971   : > { %v7147_v18 = vpop.f32.mrb[198].mxu1 }
 0x972   : > { %v7172_v35 = vpack.c.bf16 %v7147_v18, %v7144_v32  ;;  %v7149_v46 = vpop.f32.mrb[199].mxu1 }
 0x974   : > { %22233 = vmatprep.subr.bf16.mxu1 %v7172_v35 }
 0x975   : > { %22234 = vmatpush3.bf16.msra.mxu1 %v7172_v35  ;;  %v7417_v35 = vpop.permute.xlu1 %7416 }
 0x977   : > { %v7152_v33 = vpop.f32.mrb[200].mxu1 }
 0x978   : > { %v7154_v13 = vpop.f32.mrb[201].mxu1 }
 0x979   : > { %v7155_v27 = vpop.f32.mrb[202].mxu1 }
 0x97a   : > { %v7173_v61 = vpack.c.bf16 %v7155_v27, %v7152_v33  ;;  %v7157_v57 = vpop.f32.mrb[203].mxu1 }
 0x97b   : > { %v23923_v57 = vld [vmem:[%s31988_s7 + $0x44] sm:$0xff]  }
 0x97c   : > { %22235 = vmatprep.subr.bf16.mxu1 %v7173_v61 }
 0x97d   : > { %22236 = vmatpush3.bf16.msra.mxu1 %v7173_v61  ;;  %v23921_v61 = vld [vmem:[%s31988_s7 + $0x1c] sm:$0xff]  }
 0x97f   : > { %v7160_v10 = vpop.f32.mrb[204].mxu1 }
 0x980   : > { %v7162_v19 = vpop.f32.mrb[205].mxu1 }
 0x981   : > { %v7163_v36 = vpop.f32.mrb[206].mxu1 }
 0x982   : > { %v7174_v49 = vpack.c.bf16 %v7163_v36, %v7160_v10  ;;  %v7165_v62 = vpop.f32.mrb[207].mxu1 }
 0x983   : > { %v7422_v62 = vpop.permute.xlu0 %7421 }
 0x984   : > { %22237 = vmatprep.subr.bf16.mxu1 %v7174_v49 }
 0x985   : > { %22238 = vmatpush3.bf16.msra.mxu1 %v7174_v49 }
 0x986   : > { %22363 = vmatprep.subr.bf16.mxu1 %v23917_v24 }
 0x988   : > { %22240 = vmatmul.mubr.bf16.vlgmr.msra.gmra.mrb[96].mxu1 %v23907_v16  ;;  %v23924_v16 = vld [vmem:[%s31988_s7 + $0x24] ss:$0 sps:$4 sm:$0x33]  }
 0x989   : > { %22243 = vmatprep.mubr.bf16.mxu1 %v23908_v37  ;;  %22364 = vmatpush3.bf16.msra.mxu1 %v23917_v24 }
 0x98a   : > { %22365 = vmatprep.subr.bf16.mxu1 %v23918_v53 }
 0x98d   : > { %22366 = vmatpush3.bf16.msra.mxu1 %v23918_v53 }
 0x98e   : > { %23403 = vmatprep.subr.msk.bf16.mxu1 %vm7534_vm3, %v23919_v12 }
 0x990   : > { %22244 = vmatmul.mubr.bf16.gmra.mrb[100].mxu1 %v23909_v40 }
 0x991   : > { %22247 = vmatprep.mubr.bf16.mxu1 %v23910_v56  ;;  %22368 = vmatpush3.bf16.msra.mxu1 %v8117_v59  ;;  %v23925_v56 = vld [vmem:[%s31988_s7 + $0x4c] ss:$0 sps:$4 sm:$0x33]  }
 0x992   : > { %22417 = vmatprep.subr.bf16.mxu1 %v23922_v25 }
 0x998   : > { %22248 = vmatmul.mubr.bf16.gmra.mrb[104].mxu1 %v23911_v43  ;;  %v7427_v43 = vpop.permute.xlu1 %7426 }
 0x999   : > { %22251 = vmatprep.mubr.bf16.mxu1 %v23912_v44 }
 0x9a0   : > { %22252 = vmatmul.mubr.bf16.gmra.mrb[108].mxu1 %v23913_v6 }
 0xa5b   : > { %v22241_v22 = vpop.f32.mrb[96].mxu1 }
 0xa5c   : > { %v7451_v42 = vadd.f32 %v22241_v22, %v7382_v31  ;;  %v7274_v55 = vpop.f32.mrb[97].mxu1  ;;  %v23926_v31 = vld [vmem:[%s31988_s7 + $0x50] sm:$0xff]  }
 0xa5d   : > { %v7449_v23 = vadd.f32 %v7372_v54, %v7274_v55  ;;  %v22242_v34 = vpop.f32.mrb[98].mxu1  ;;  %v7681_v54 = vsel %vm7534_vm3, %v23924_v16, 0 }
 0xa5e   : > { %v7452_v60 = vadd.f32 %v22242_v34, %v7387_v52  ;;  %v7277_v17 = vpop.f32.mrb[99].mxu1  ;;  %v7467_v28 = vmax.f32 %v7451_v42, 0.0  ;;  %v7432_v52 = vpop.permute.xlu0 %7431 }
 0xa5f   : > { %v7450_v41 = vadd.f32 %v7377_v11, %v7277_v17  ;;  %v7465_v32 = vmax.f32 %v7449_v23, 0.0  ;;  %v8424_v11 = vsel %vm7534_vm3, %v23925_v56, 0  ;;  %v7437_v42 = vpop.permute.xlu1 %7436 }
 0xa60   : > { %v7468_v1 = vmax.f32 %v7452_v60, 0.0 }
 0xa61   : > { %v7466_v45 = vmax.f32 %v7450_v41, 0.0 }
 0xa62   : > { %v27718_v18 = vpack.c.bf16 %v7468_v1, %v7467_v28  ;;  %v7442_v41 = vpop.permute.xlu0 %7441 }
 0xa63   : > { %v27720_v46 = vpack.c.bf16 %v7466_v45, %v7465_v32  ;;  %v22245_v33 = vpop.f32.mrb[100].mxu1  ;;  %v7447_v45 = vpop.permute.xlu1 %7446 }
 0xa64   : > { %v7455_v13 = vadd.f32 %v22245_v33, %v7402_v58  ;;  %v7290_v27 = vpop.f32.mrb[101].mxu1 }
 0xa65   : > { %v7453_v10 = vadd.f32 %v7392_v8, %v7290_v27  ;;  %v22246_v19 = vpop.f32.mrb[102].mxu1  ;;  %22261 = vmatprep.mubr.msk.bf16.mxu0 %vm7509_vm4, %v27720_v46  ;;  %22369 = vmatprep.mubr.msk.bf16.mxu1 %vm7509_vm4, %v27720_v46 }
 0xa66   : > { %v7456_v36 = vadd.f32 %v22246_v19, %v7407_v4  ;;  %v7293_v49 = vpop.f32.mrb[103].mxu1  ;;  %22262 = vmatmul.mubr.msk.bf16.vlgmr.msra.gmra.mrb[164].mxu0 %vm7509_vm4, %v27718_v18  ;;  %22370 = vmatmul.mubr.msk.bf16.vlgmr.msra.gmra.mrb[208].mxu1 %vm7509_vm4, %v27718_v18  ;;  %v7471_v37 = vmax.f32 %v7455_v13, 0.0 }
 0xa67   : > { %v7454_v24 = vadd.f32 %v7397_v39, %v7293_v49  ;;  %22278 = vmatpush3.bf16.msra.mxu0 %v23920_v63  ;;  %22418 = vmatpush3.bf16.msra.mxu1 %v23922_v25  ;;  %v7469_v44 = vmax.f32 %v7453_v10, 0.0 }
 0xa68   : > { %v7472_v40 = vmax.f32 %v7456_v36, 0.0  ;;  %22279 = vmatprep.subr.bf16.mxu0 %v23921_v61  ;;  %22419 = vmatprep.subr.bf16.mxu1 %v23923_v57 }
 0xa69   : > { %v7470_v6 = vmax.f32 %v7454_v24, 0.0  ;;  %v23927_v24 = vld [vmem:[%s31988_s7 + $0x58] sm:$0xff]  }
 0xa6a   : > { %v27742_v53 = vpack.c.bf16 %v7472_v40, %v7471_v37  ;;  %v23929_v40 = vld [vmem:[%s31988_s7 + $0x64] sm:$0xff]  }
 0xa6b   : > { %v27744_v12 = vpack.c.bf16 %v7470_v6, %v7469_v44  ;;  %v22249_v59 = vpop.f32.mrb[104].mxu1  ;;  %22280 = vmatpush3.bf16.msra.mxu0 %v23921_v61  ;;  %22420 = vmatpush3.bf16.msra.mxu1 %v23923_v57  ;;  %v23932_v6 = vld [vmem:[%s31988_s7 + $0x78] sm:$0xff]  }
 0xa6c   : > { %v7459_v63 = vadd.f32 %v22249_v59, %v7422_v62  ;;  %v7306_v25 = vpop.f32.mrb[105].mxu1  ;;  %23402 = vmatprep.subr.msk.bf16.mxu0 %vm7534_vm3, %v23924_v16  ;;  %23404 = vmatprep.subr.msk.bf16.mxu1 %vm7534_vm3, %v23925_v56  ;;  %v23928_v16 = vld [vmem:[%s31988_s7 + $0x60] ss:$0 sps:$4 sm:$0x33]   ;;  %v23930_v56 = vld [vmem:[%s31988_s7 + $0x6c] sm:$0xff]  }
 0xa6d   : > { %v7457_v8 = vadd.f32 %v7412_v14, %v7306_v25  ;;  %v22250_v39 = vpop.f32.mrb[106].mxu1  ;;  %22265 = vmatprep.mubr.msk.bf16.mxu0 %vm7509_vm4, %v27744_v12  ;;  %22373 = vmatprep.mubr.msk.bf16.mxu1 %vm7509_vm4, %v27744_v12  ;;  %v8731_v37 = vsel %vm7534_vm3, %v23928_v16, 0  ;;  %v23933_v59 = vld [vmem:[%s31988_s7 + $0x80] sm:$0xff]  }
 0xa6e   : > { %v7460_v58 = vadd.f32 %v22250_v39, %v7427_v43  ;;  %v7309_v22 = vpop.f32.mrb[107].mxu1  ;;  %22266 = vmatmul.mubr.msk.bf16.gmra.mrb[168].mxu0 %vm7509_vm4, %v27742_v53  ;;  %22374 = vmatmul.mubr.msk.bf16.gmra.mrb[212].mxu1 %vm7509_vm4, %v27742_v53  ;;  %v7475_v4 = vmax.f32 %v7459_v63, 0.0  ;;  %v23931_v43 = vld [vmem:[%s31988_s7 + $0x74] ss:$0 sps:$4 sm:$0x33]   ;;  %v23941_v39 = vld [vmem:[%s31989_s8 + $0x40] sm:$0xff]  }
 0xa6f   : > { %v7458_v55 = vadd.f32 %v7417_v35, %v7309_v22  ;;  %22282 = vmatpush3.bf16.msra.mxu0 %v7681_v54  ;;  %22422 = vmatpush3.bf16.msra.mxu1 %v8424_v11  ;;  %v7473_v34 = vmax.f32 %v7457_v8, 0.0  ;;  %v9038_v44 = vsel %vm7534_vm3, %v23931_v43, 0  ;;  %v23934_v63 = vld [vmem:[%s31988_s7 + $0x88] ss:$0 sps:$4 sm:$0x33]   ;;  %v23935_v54 = vld [vmem:[%s31988_s7 + $0x8c] sm:$0xff]  }
 0xa70   : > { %v7476_v23 = vmax.f32 %v7460_v58, 0.0  ;;  %22471 = vmatprep.subr.bf16.mxu1 %v23926_v31  ;;  %v9345_v25 = vsel %vm7534_vm3, %v23934_v63, 0  ;;  %v23936_v11 = vld [vmem:[%s31988_s7 + $0x94] sm:$0xff]   ;;  %v23938_v8 = vld [vmem:[%s31988_s7 + $0xa0] sm:$0xff]   ;;  %v23939_v58 = vld [vmem:[%s31988_s7 + $0xa8] sm:$0xff]  }
 0xa71   : > { %v7474_v60 = vmax.f32 %v7458_v55, 0.0  ;;  %v23940_v22 = vld [vmem:[%s31988_s7 + $0xb0] ss:$0 sps:$4 sm:$0x33]  }
 0xa72   : > { %v27761_v17 = vpack.c.bf16 %v7476_v23, %v7475_v4 }
 0xa73   : > { %v27763_v28 = vpack.c.bf16 %v7474_v60, %v7473_v34  ;;  %v22253_v1 = vpop.f32.mrb[108].mxu1 }
 0xa74   : > { %v7463_v14 = vadd.f32 %v22253_v1, %v7442_v41  ;;  %v7322_v32 = vpop.f32.mrb[109].mxu1  ;;  %v10380_v41 = vld [vmem:[%s31991_s10] sm:$0x7] }
 0xa75   : > { %v7461_v33 = vadd.f32 %v7432_v52, %v7322_v32  ;;  %v22254_v13 = vpop.f32.mrb[110].mxu1  ;;  %22269 = vmatprep.mubr.msk.bf16.mxu0 %vm7509_vm4, %v27763_v28  ;;  %22377 = vmatprep.mubr.msk.bf16.mxu1 %vm7509_vm4, %v27763_v28  ;;  %v25544_v32 = vmov 0.0  }
 0xa76   : > { %v7464_v35 = vadd.f32 %v22254_v13, %v7447_v45  ;;  %v7325_v27 = vpop.f32.mrb[111].mxu1  ;;  %22270 = vmatmul.mubr.msk.bf16.gmra.mrb[172].mxu0 %vm7509_vm4, %v27761_v17  ;;  %22378 = vmatmul.mubr.msk.bf16.gmra.mrb[216].mxu1 %vm7509_vm4, %v27761_v17  ;;  %v7479_v57 = vmax.f32 %v7463_v14, 0.0 }
 0xa77   : > { %v7462_v61 = vadd.f32 %v7437_v42, %v7325_v27  ;;  %v7477_v19 = vmax.f32 %v7461_v33, 0.0  ;;  %v9959_v42 = vsel %vm7534_vm3, %v23940_v22, 0 }
 0xa78   : > { %v7480_v10 = vmax.f32 %v7464_v35, 0.0 }
 0xa79   : > { %v7478_v36 = vmax.f32 %v7462_v61, 0.0 }
 0xa7a   : > { %v27773_v49 = vpack.c.bf16 %v7480_v10, %v7479_v57 }
 0xa7b   : > { %v27775_v62 = vpack.c.bf16 %v7478_v36, %v7477_v19 }
 0xa7d   : > { %22273 = vmatprep.mubr.msk.bf16.mxu0 %vm7509_vm4, %v27775_v62  ;;  %22381 = vmatprep.mubr.msk.bf16.mxu1 %vm7509_vm4, %v27775_v62 }
 0xa7e   : > { %22274 = vmatmul.mubr.msk.bf16.gmra.mrb[176].mxu0 %vm7509_vm4, %v27773_v49  ;;  %22382 = vmatmul.mubr.msk.bf16.gmra.mrb[220].mxu1 %vm7509_vm4, %v27773_v49 }
 0xa7f   : > { %22283 = vmatprep.mubr.msk.bf16.mxu0 %vm7509_vm4, %v27720_v46  ;;  %22423 = vmatprep.mubr.msk.bf16.mxu1 %vm7509_vm4, %v27720_v46 }
 0xa86   : > { %22284 = vmatmul.mubr.msk.bf16.vlgmr.msra.gmra.mrb[180].mxu0 %vm7509_vm4, %v27718_v18  ;;  %22424 = vmatmul.mubr.msk.bf16.vlgmr.msra.gmra.mrb[224].mxu1 %vm7509_vm4, %v27718_v18 }
 0xa87   : > { %22287 = vmatprep.mubr.msk.bf16.mxu0 %vm7509_vm4, %v27744_v12  ;;  %22427 = vmatprep.mubr.msk.bf16.mxu1 %vm7509_vm4, %v27744_v12 }
 0xa88   : > { %22472 = vmatpush3.bf16.msra.mxu1 %v23926_v31  ;;  %v23937_v31 = vld [vmem:[%s31988_s7 + $0x9c] ss:$0 sps:$4 sm:$0x33]  }
 0xa89   : > { %22473 = vmatprep.subr.bf16.mxu1 %v23927_v24  ;;  %v9652_v52 = vsel %vm7534_vm3, %v23937_v31, 0 }
 0xa8c   : > { %22474 = vmatpush3.bf16.msra.mxu1 %v23927_v24 }
 0xa8d   : > { %23405 = vmatprep.subr.msk.bf16.mxu1 %vm7534_vm3, %v23928_v16 }
 0xa8e   : > { %22288 = vmatmul.mubr.msk.bf16.gmra.mrb[184].mxu0 %vm7509_vm4, %v27742_v53  ;;  %22428 = vmatmul.mubr.msk.bf16.gmra.mrb[228].mxu1 %vm7509_vm4, %v27742_v53 }
 0xa8f   : > { %22291 = vmatprep.mubr.msk.bf16.mxu0 %vm7509_vm4, %v27763_v28  ;;  %22431 = vmatprep.mubr.msk.bf16.mxu1 %vm7509_vm4, %v27763_v28 }
 0xa90   : > { %22476 = vmatpush3.bf16.msra.mxu1 %v8731_v37 }
 0xa91   : > { %22525 = vmatprep.subr.bf16.mxu1 %v23929_v40 }
 0xa96   : > { %22292 = vmatmul.mubr.msk.bf16.gmra.mrb[188].mxu0 %vm7509_vm4, %v27761_v17  ;;  %22432 = vmatmul.mubr.msk.bf16.gmra.mrb[232].mxu1 %vm7509_vm4, %v27761_v17 }
 0xa97   : > { %22295 = vmatprep.mubr.msk.bf16.mxu0 %vm7509_vm4, %v27775_v62  ;;  %22435 = vmatprep.mubr.msk.bf16.mxu1 %vm7509_vm4, %v27775_v62 }
 0xa9e   : > { %22296 = vmatmul.mubr.msk.bf16.gmra.mrb[192].mxu0 %vm7509_vm4, %v27773_v49  ;;  %22436 = vmatmul.mubr.msk.bf16.gmra.mrb[236].mxu1 %vm7509_vm4, %v27773_v49 }
 0xa9f   : > { %22477 = vmatprep.mubr.msk.bf16.mxu1 %vm7509_vm4, %v27720_v46  ;;  %22315 = vmatprep.mubr.bf16.mxu0 %v23941_v39 }
 0xaa6   : > { %22478 = vmatmul.mubr.msk.bf16.vlgmr.msra.gmra.mrb[240].mxu1 %vm7509_vm4, %v27718_v18 }
 0xaa7   : > { %22481 = vmatprep.mubr.msk.bf16.mxu1 %vm7509_vm4, %v27744_v12  ;;  %22526 = vmatpush3.bf16.msra.mxu1 %v23929_v40 }
 0xaa8   : > { %22527 = vmatprep.subr.bf16.mxu1 %v23930_v56 }
 0xaab   : > { %22528 = vmatpush3.bf16.msra.mxu1 %v23930_v56 }
 0xaac   : > { %23406 = vmatprep.subr.msk.bf16.mxu1 %vm7534_vm3, %v23931_v43 }
 0xaae   : > { %22482 = vmatmul.mubr.msk.bf16.gmra.mrb[244].mxu1 %vm7509_vm4, %v27742_v53 }
 0xaaf   : > { %22485 = vmatprep.mubr.msk.bf16.mxu1 %vm7509_vm4, %v27763_v28  ;;  %22530 = vmatpush3.bf16.msra.mxu1 %v9038_v44 }
 0xab0   : > { %22579 = vmatprep.subr.bf16.mxu1 %v23932_v6 }
 0xab6   : > { %22486 = vmatmul.mubr.msk.bf16.gmra.mrb[248].mxu1 %vm7509_vm4, %v27761_v17 }
 0xab7   : > { %22489 = vmatprep.mubr.msk.bf16.mxu1 %vm7509_vm4, %v27775_v62 }
 0xabe   : > { %22490 = vmatmul.mubr.msk.bf16.gmra.mrb[252].mxu1 %vm7509_vm4, %v27773_v49 }
 0xabf   : > { %22531 = vmatprep.mubr.msk.bf16.mxu1 %vm7509_vm4, %v27720_v46 }
 0xac6   : > { %22532 = vmatmul.mubr.msk.bf16.vlgmr.msra.gmra.mrb[0].mxu1 %vm7509_vm4, %v27718_v18 }
 0xac7   : > { %22535 = vmatprep.mubr.msk.bf16.mxu1 %vm7509_vm4, %v27744_v12  ;;  %22580 = vmatpush3.bf16.msra.mxu1 %v23932_v6 }
 0xac8   : > { %22581 = vmatprep.subr.bf16.mxu1 %v23933_v59 }
 0xacb   : > { %22582 = vmatpush3.bf16.msra.mxu1 %v23933_v59 }
 0xacc   : > { %23407 = vmatprep.subr.msk.bf16.mxu1 %vm7534_vm3, %v23934_v63 }
 0xace   : > { %22536 = vmatmul.mubr.msk.bf16.gmra.mrb[4].mxu1 %vm7509_vm4, %v27742_v53 }
 0xacf   : > { %22539 = vmatprep.mubr.msk.bf16.mxu1 %vm7509_vm4, %v27763_v28  ;;  %22584 = vmatpush3.bf16.msra.mxu1 %v9345_v25 }
 0xad0   : > { %22633 = vmatprep.subr.bf16.mxu1 %v23935_v54 }
 0xad6   : > { %22540 = vmatmul.mubr.msk.bf16.gmra.mrb[8].mxu1 %vm7509_vm4, %v27761_v17 }
 0xad7   : > { %22543 = vmatprep.mubr.msk.bf16.mxu1 %vm7509_vm4, %v27775_v62 }
 0xade   : > { %22544 = vmatmul.mubr.msk.bf16.gmra.mrb[12].mxu1 %vm7509_vm4, %v27773_v49 }
 0xadf   : > { %22585 = vmatprep.mubr.msk.bf16.mxu1 %vm7509_vm4, %v27720_v46 }
 0xae6   : > { %22586 = vmatmul.mubr.msk.bf16.vlgmr.msra.gmra.mrb[16].mxu1 %vm7509_vm4, %v27718_v18 }
 0xae7   : > { %22589 = vmatprep.mubr.msk.bf16.mxu1 %vm7509_vm4, %v27744_v12  ;;  %22634 = vmatpush3.bf16.msra.mxu1 %v23935_v54 }
 0xae8   : > { %22635 = vmatprep.subr.bf16.mxu1 %v23936_v11 }
 0xaeb   : > { %22636 = vmatpush3.bf16.msra.mxu1 %v23936_v11 }
 0xaec   : > { %23408 = vmatprep.subr.msk.bf16.mxu1 %vm7534_vm3, %v23937_v31 }
 0xaee   : > { %22590 = vmatmul.mubr.msk.bf16.gmra.mrb[20].mxu1 %vm7509_vm4, %v27742_v53 }
 0xaef   : > { %22593 = vmatprep.mubr.msk.bf16.mxu1 %vm7509_vm4, %v27763_v28  ;;  %22638 = vmatpush3.bf16.msra.mxu1 %v9652_v52 }
 0xaf0   : > { %22687 = vmatprep.subr.bf16.mxu1 %v23938_v8 }
 0xaf6   : > { %22594 = vmatmul.mubr.msk.bf16.gmra.mrb[24].mxu1 %vm7509_vm4, %v27761_v17 }
 0xaf7   : > { %22597 = vmatprep.mubr.msk.bf16.mxu1 %vm7509_vm4, %v27775_v62 }
 0xafe   : > { %22598 = vmatmul.mubr.msk.bf16.gmra.mrb[28].mxu1 %vm7509_vm4, %v27773_v49 }
 0xaff   : > { %22639 = vmatprep.mubr.msk.bf16.mxu1 %vm7509_vm4, %v27720_v46 }
 0xb06   : > { %22640 = vmatmul.mubr.msk.bf16.vlgmr.msra.gmra.mrb[32].mxu1 %vm7509_vm4, %v27718_v18 }
 0xb07   : > { %22688 = vmatpush3.bf16.msra.mxu1 %v23938_v8  ;;  %22643 = vmatprep.mubr.msk.bf16.mxu1 %vm7509_vm4, %v27744_v12 }
 0xb08   : > { %22689 = vmatprep.subr.bf16.mxu1 %v23939_v58 }
 0xb0b   : > { %22690 = vmatpush3.bf16.msra.mxu1 %v23939_v58 }
 0xb0c   : > { %23409 = vmatprep.subr.msk.bf16.mxu1 %vm7534_vm3, %v23940_v22 }
 0xb0e   : > { %22644 = vmatmul.mubr.msk.bf16.gmra.mrb[36].mxu1 %vm7509_vm4, %v27742_v53 }
 0xb0f   : > { %22692 = vmatpush3.bf16.msra.mxu1 %v9959_v42  ;;  %22647 = vmatprep.mubr.msk.bf16.mxu1 %vm7509_vm4, %v27763_v28 }
 0xb10   : > { %10387 = vmatprep.subr.bf16.mxu1 %v26818_v9 }
 0xb16   : > { %22648 = vmatmul.mubr.msk.bf16.gmra.mrb[40].mxu1 %vm7509_vm4, %v27761_v17 }
 0xb17   : > { %22651 = vmatprep.mubr.msk.bf16.mxu1 %vm7509_vm4, %v27775_v62 }
 0xb1e   : > { %22652 = vmatmul.mubr.msk.bf16.gmra.mrb[44].mxu1 %vm7509_vm4, %v27773_v49 }
 0xb1f   : > { %22693 = vmatprep.mubr.msk.bf16.mxu1 %vm7509_vm4, %v27720_v46 }
 0xb26   : > { %22694 = vmatmul.mubr.msk.bf16.vlgmr.msra.gmra.mrb[48].mxu1 %vm7509_vm4, %v27718_v18 }
 0xb27   : > { %10388 = vmatpush1.bf16.msra.mxu1 %v26816_v7  ;;  %22697 = vmatprep.mubr.msk.bf16.mxu1 %vm7509_vm4, %v27744_v12 }
 0xb28   : > { %10389 = vmatprep.subr.bf16.mxu1 %v26842_v29 }
 0xb2b   : > { %10390 = vmatpush1.bf16.msra.mxu1 %v26840_v38 }
 0xb2c   : > { %10391 = vmatprep.subr.bf16.mxu1 %v26868_v50 }
 0xb2e   : > { %22698 = vmatmul.mubr.msk.bf16.gmra.mrb[52].mxu1 %vm7509_vm4, %v27742_v53 }
 0xb2f   : > { %10392 = vmatpush1.bf16.msra.mxu1 %v26866_v48  ;;  %22701 = vmatprep.mubr.msk.bf16.mxu1 %vm7509_vm4, %v27763_v28 }
 0xb30   : > { %10393 = vmatprep.subr.bf16.mxu1 %v26894_v5 }
 0xb33   : > { %10394 = vmatpush1.bf16.msra.mxu1 %v26892_v3 }
 0xb34   : > { %10395 = vmatprep.subr.bf16.mxu1 %v26920_v30 }
 0xb36   : > { %22702 = vmatmul.mubr.msk.bf16.gmra.mrb[56].mxu1 %vm7509_vm4, %v27761_v17 }
 0xb37   : > { %10396 = vmatpush1.bf16.msra.mxu1 %v26918_v26  ;;  %22705 = vmatprep.mubr.msk.bf16.mxu1 %vm7509_vm4, %v27775_v62 }
 0xb38   : > { %10397 = vmatprep.subr.bf16.mxu1 %v26939_v51 }
 0xb39   : > { %v22263_v7 = vpop.f32.mrb[164].mxu0  ;;  %v22371_v9 = vpop.f32.mrb[208].mxu1 }
 0xb3a   : > { %v7572_v38 = vpop.f32.mrb[165].mxu0  ;;  %v8153_v29 = vpop.f32.mrb[209].mxu1 }
 0xb3b   : > { %10398 = vmatpush1.bf16.msra.mxu1 %v26937_v47  ;;  %v22264_v48 = vpop.f32.mrb[166].mxu0  ;;  %v22372_v50 = vpop.f32.mrb[210].mxu1 }
 0xb3c   : > { %v27962_v3 = vpack.c.bf16 %v22264_v48, %v22263_v7  ;;  %v27964_v5 = vpack.c.bf16 %v22372_v50, %v22371_v9  ;;  %10399 = vmatprep.subr.bf16.mxu1 %v26949_v2  ;;  %v7575_v26 = vpop.f32.mrb[167].mxu0  ;;  %v8156_v30 = vpop.f32.mrb[211].mxu1 }
 0xb3d   : > { %v27967_v55 = vpack.c.bf16 %v7575_v26, %v7572_v38  ;;  %v27969_v4 = vpack.c.bf16 %v8156_v30, %v8153_v29  ;;  %v10532_v26 = vld [vmem:[%s31993_s12] sm:$0x7] }
 0xb3e   : > { %22706 = vmatmul.mubr.msk.bf16.gmra.mrb[60].mxu1 %vm7509_vm4, %v27773_v49 }
 0xb3f   : > { %10400 = vmatpush1.bf16.msra.mxu1 %v26947_v0  ;;  %10419 = vmatprep.mubr.bf16.mxu1 %v32012_v15 }
 0xb40   : > { %10401 = vmatprep.subr.bf16.mxu1 %v26959_v21 }
 0xb41   : > { %v22267_v47 = vpop.f32.mrb[168].mxu0  ;;  %v22375_v51 = vpop.f32.mrb[212].mxu1 }
 0xb42   : > { %v7588_v23 = vpop.f32.mrb[169].mxu0  ;;  %v8169_v34 = vpop.f32.mrb[213].mxu1 }
 0xb43   : > { %10402 = vmatpush1.bf16.msra.mxu1 %v26957_v20  ;;  %v22268_v2 = vpop.f32.mrb[170].mxu0  ;;  %v22376_v60 = vpop.f32.mrb[214].mxu1 }
 0xb44   : > { %v27980_v1 = vpack.c.bf16 %v22268_v2, %v22267_v47  ;;  %v27982_v14 = vpack.c.bf16 %v22376_v60, %v22375_v51  ;;  %v7591_v0 = vpop.f32.mrb[171].mxu0  ;;  %v8172_v15 = vpop.f32.mrb[215].mxu1  ;;  %22741 = vmatprep.subr.bf16.mxu1 %v25544_v32 }
 0xb45   : > { %v27985_v21 = vpack.c.bf16 %v7591_v0, %v7588_v23  ;;  %v27987_v45 = vpack.c.bf16 %v8172_v15, %v8169_v34 }
 0xb46   : > { %10420 = vmatmul.mubr.bf16.vlgmr.msra.gmra.mrb[64].mxu1 %v10380_v41 }
 0xb47   : > { %22742 = vmatpush3.bf16.msra.mxu1 %v27720_v46  ;;  %22757 = vmatprep.mubr.msk.bf16.mxu1 %vm25545_vm5, %v25544_v32 }
 0xb48   : > { %22743 = vmatprep.subr.bf16.mxu1 %v25544_v32 }
 0xb49   : > { %v22271_v20 = vpop.f32.mrb[172].mxu0  ;;  %v22379_v33 = vpop.f32.mrb[216].mxu1 }
 0xb4a   : > { %v7604_v13 = vpop.f32.mrb[173].mxu0  ;;  %v8185_v35 = vpop.f32.mrb[217].mxu1 }
 0xb4b   : > { %22744 = vmatpush3.bf16.msra.mxu1 %v27718_v18  ;;  %v22272_v27 = vpop.f32.mrb[174].mxu0  ;;  %v22380_v61 = vpop.f32.mrb[218].mxu1 }
 0xb4c   : > { %v27994_v57 = vpack.c.bf16 %v22272_v27, %v22271_v20  ;;  %v27996_v10 = vpack.c.bf16 %v22380_v61, %v22379_v33  ;;  %v7607_v19 = vpop.f32.mrb[175].mxu0  ;;  %v8188_v46 = vpop.f32.mrb[219].mxu1  ;;  %22745 = vmatprep.subr.bf16.mxu1 %v25544_v32 }
 0xb4d   : > { %v27999_v36 = vpack.c.bf16 %v7607_v19, %v7604_v13  ;;  %v28001_v24 = vpack.c.bf16 %v8188_v46, %v8185_v35 }
 0xb4f   : > { %22746 = vmatpush3.bf16.msra.mxu1 %v27744_v12 }
 0xb50   : > { %22747 = vmatprep.subr.bf16.mxu1 %v25544_v32 }
 0xb51   : > { %v22275_v16 = vpop.f32.mrb[176].mxu0  ;;  %v22383_v18 = vpop.f32.mrb[220].mxu1 }
 0xb52   : > { %v7620_v37 = vpop.f32.mrb[177].mxu0  ;;  %v8201_v40 = vpop.f32.mrb[221].mxu1 }
 0xb53   : > { %22748 = vmatpush3.bf16.msra.mxu1 %v27742_v53  ;;  %v22276_v56 = vpop.f32.mrb[178].mxu0  ;;  %v22384_v43 = vpop.f32.mrb[222].mxu1 }
 0xb54   : > { %v28006_v44 = vpack.c.bf16 %v22276_v56, %v22275_v16  ;;  %v28008_v6 = vpack.c.bf16 %v22384_v43, %v22383_v18  ;;  %v7623_v59 = vpop.f32.mrb[179].mxu0  ;;  %v8204_v63 = vpop.f32.mrb[223].mxu1  ;;  %22749 = vmatprep.subr.bf16.mxu1 %v25544_v32 }
 0xb55   : > { %v28011_v25 = vpack.c.bf16 %v7623_v59, %v7620_v37  ;;  %v28013_v12 = vpack.c.bf16 %v8204_v63, %v8201_v40 }
 0xb57   : > { %22750 = vmatpush3.bf16.msra.mxu1 %v27763_v28 }
 0xb58   : > { %22751 = vmatprep.subr.bf16.mxu1 %v25544_v32 }
 0xb59   : > { %v22285_v54 = vpop.f32.mrb[180].mxu0  ;;  %v22425_v53 = vpop.f32.mrb[224].mxu1 }
 0xb5a   : > { %v7717_v11 = vpop.f32.mrb[181].mxu0  ;;  %v8460_v31 = vpop.f32.mrb[225].mxu1 }
 0xb5b   : > { %22752 = vmatpush3.bf16.msra.mxu1 %v27761_v17  ;;  %v22286_v52 = vpop.f32.mrb[182].mxu0  ;;  %v22426_v8 = vpop.f32.mrb[226].mxu1 }
 0xb5c   : > { %v7781_v39 = vpack.c.bf16 %v22286_v52, %v22285_v54  ;;  %v28018_v58 = vpack.c.bf16 %v22426_v8, %v22425_v53  ;;  %v7720_v22 = vpop.f32.mrb[183].mxu0  ;;  %v8463_v42 = vpop.f32.mrb[227].mxu1  ;;  %22753 = vmatprep.subr.bf16.mxu1 %v25544_v32  ;;  %v23942_v8 = vld [vmem:[%s31989_s8 + $0x48] sm:$0xff]  }
 0xb5d   : > { %v7780_v7 = vpack.c.bf16 %v7720_v22, %v7717_v11  ;;  %v28021_v9 = vpack.c.bf16 %v8463_v42, %v8460_v31  ;;  %v23943_v42 = vld [vmem:[%s31989_s8 + $0x50] sm:$0xff]  }
 0xb5f   : > { %22754 = vmatpush3.bf16.msra.mxu1 %v27775_v62  ;;  %22299 = vmatprep.subr.bf16.mxu0 %v7780_v7 }
 0xb60   : > { %22300 = vmatpush3.bf16.msra.mxu0 %v7780_v7  ;;  %22755 = vmatprep.subr.bf16.mxu1 %v25544_v32 }
 0xb61   : > { %v22289_v28 = vpop.f32.mrb[184].mxu0  ;;  %22301 = vmatprep.subr.bf16.mxu0 %v7781_v39  ;;  %v22429_v17 = vpop.f32.mrb[228].mxu1 }
 0xb62   : > { %v7733_v38 = vpop.f32.mrb[185].mxu0  ;;  %v8476_v29 = vpop.f32.mrb[229].mxu1 }
 0xb63   : > { %22756 = vmatpush3.bf16.msra.mxu1 %v27773_v49  ;;  %v22290_v48 = vpop.f32.mrb[186].mxu0  ;;  %v22430_v50 = vpop.f32.mrb[230].mxu1 }
 0xb64   : > { %v7783_v30 = vpack.c.bf16 %v22290_v48, %v22289_v28  ;;  %v28029_v47 = vpack.c.bf16 %v22430_v50, %v22429_v17  ;;  %v7736_v62 = vpop.f32.mrb[187].mxu0  ;;  %22302 = vmatpush3.bf16.msra.mxu0 %v7781_v39  ;;  %v8479_v51 = vpop.f32.mrb[231].mxu1 }
 0xb65   : > { %v7782_v23 = vpack.c.bf16 %v7736_v62, %v7733_v38  ;;  %v28031_v34 = vpack.c.bf16 %v8479_v51, %v8476_v29  ;;  %v23944_v29 = vld [vmem:[%s31989_s8 + $0x58] sm:$0xff]  }
 0xb66   : > { %22758 = vmatmul.mubr.bf16.vlgmr.msra.gmra.mrb[68].mxu1 %v10532_v26  ;;  %v23945_v26 = vld [vmem:[%s31989_s8 + $0x60] sm:$0xff]  }
 0xb67   : > { %22303 = vmatprep.subr.bf16.mxu0 %v7782_v23 }
 0xb68   : > { %22304 = vmatpush3.bf16.msra.mxu0 %v7782_v23 }
 0xb69   : > { %v22293_v2 = vpop.f32.mrb[188].mxu0  ;;  %22305 = vmatprep.subr.bf16.mxu0 %v7783_v30  ;;  %v22433_v49 = vpop.f32.mrb[232].mxu1 }
 0xb6a   : > { %v7749_v60 = vpop.f32.mrb[189].mxu0  ;;  %v8492_v41 = vpop.f32.mrb[233].mxu1 }
 0xb6b   : > { %v22294_v0 = vpop.f32.mrb[190].mxu0  ;;  %v22434_v15 = vpop.f32.mrb[234].mxu1 }
 0xb6c   : > { %v7785_v20 = vpack.c.bf16 %v22294_v0, %v22293_v2  ;;  %v28033_v33 = vpack.c.bf16 %v22434_v15, %v22433_v49  ;;  %v7752_v13 = vpop.f32.mrb[191].mxu0  ;;  %22306 = vmatpush3.bf16.msra.mxu0 %v7783_v30  ;;  %v8495_v35 = vpop.f32.mrb[235].mxu1  ;;  %v23947_v49 = vld [vmem:[%s31989_s8 + $0x70] sm:$0xff]  }
 0xb6d   : > { %v7784_v27 = vpack.c.bf16 %v7752_v13, %v7749_v60  ;;  %v28035_v61 = vpack.c.bf16 %v8495_v35, %v8492_v41  ;;  %v23949_v13 = vld [vmem:[%s31989_s8] sm:$0xff]  }
 0xb6f   : > { %22307 = vmatprep.subr.bf16.mxu0 %v7784_v27 }
 0xb70   : > { %22308 = vmatpush3.bf16.msra.mxu0 %v7784_v27 }
 0xb71   : > { %v22297_v19 = vpop.f32.mrb[192].mxu0  ;;  %22309 = vmatprep.subr.bf16.mxu0 %v7785_v20  ;;  %v22437_v46 = vpop.f32.mrb[236].mxu1 }
 0xb72   : > { %v7765_v16 = vpop.f32.mrb[193].mxu0  ;;  %v8508_v18 = vpop.f32.mrb[237].mxu1 }
 0xb73   : > { %v22298_v37 = vpop.f32.mrb[194].mxu0  ;;  %v22438_v40 = vpop.f32.mrb[238].mxu1 }
 0xb74   : > { %v7787_v56 = vpack.c.bf16 %v22298_v37, %v22297_v19  ;;  %v28037_v43 = vpack.c.bf16 %v22438_v40, %v22437_v46  ;;  %v7768_v59 = vpop.f32.mrb[195].mxu0  ;;  %22310 = vmatpush3.bf16.msra.mxu0 %v7785_v20  ;;  %v8511_v63 = vpop.f32.mrb[239].mxu1 }
 0xb75   : > { %v7786_v54 = vpack.c.bf16 %v7768_v59, %v7765_v16  ;;  %v28039_v53 = vpack.c.bf16 %v8511_v63, %v8508_v18  ;;  %v23951_v18 = vld [vmem:[%s31989_s8 + $0x10] sm:$0xff]  }
 0xb77   : > { %22311 = vmatprep.subr.bf16.mxu0 %v7786_v54 }
 0xb78   : > { %22312 = vmatpush3.bf16.msra.mxu0 %v7786_v54  ;;  %v23953_v54 = vld [vmem:[%s31989_s8 + $0x20] sm:$0xff]  }
 0xb79   : > { %22313 = vmatprep.subr.bf16.mxu0 %v7787_v56  ;;  %v22479_v11 = vpop.f32.mrb[240].mxu1 }
 0xb7a   : > { %v8767_v31 = vpop.f32.mrb[241].mxu1 }
 0xb7b   : > { %v22480_v52 = vpop.f32.mrb[242].mxu1 }
 0xb7c   : > { %v28044_v39 = vpack.c.bf16 %v22480_v52, %v22479_v11  ;;  %22314 = vmatpush3.bf16.msra.mxu0 %v7787_v56  ;;  %v8770_v22 = vpop.f32.mrb[243].mxu1 }
 0xb7d   : > { %v28049_v7 = vpack.c.bf16 %v8770_v22, %v8767_v31  ;;  %22331 = vmatprep.subr.bf16.mxu0 %v27967_v55 }
 0xb7f   : > { %22316 = vmatmul.mubr.bf16.vlgmr.msra.gmra.mrb[196].mxu0 %v23942_v8 }
 0xb80   : > { %22332 = vmatpush3.bf16.msra.mxu0 %v27967_v55  ;;  %22319 = vmatprep.mubr.bf16.mxu0 %v23943_v42  ;;  %v23955_v42 = vld [vmem:[%s31989_s8 + $0x30] sm:$0xff]  }
 0xb81   : > { %22333 = vmatprep.subr.bf16.mxu0 %v27962_v3  ;;  %v22483_v28 = vpop.f32.mrb[244].mxu1 }
 0xb82   : > { %v8783_v17 = vpop.f32.mrb[245].mxu1 }
 0xb83   : > { %v22484_v38 = vpop.f32.mrb[246].mxu1 }
 0xb84   : > { %v28057_v48 = vpack.c.bf16 %v22484_v38, %v22483_v28  ;;  %22334 = vmatpush3.bf16.msra.mxu0 %v27962_v3  ;;  %v8786_v50 = vpop.f32.mrb[247].mxu1  ;;  %v23946_v3 = vld [vmem:[%s31989_s8 + $0x68] sm:$0xff]  }
 0xb85   : > { %v28063_v55 = vpack.c.bf16 %v8786_v50, %v8783_v17  ;;  %22335 = vmatprep.subr.bf16.mxu0 %v27985_v21 }
 0xb87   : > { %22320 = vmatmul.mubr.bf16.gmra.mrb[200].mxu0 %v23944_v29 }
 0xb88   : > { %22336 = vmatpush3.bf16.msra.mxu0 %v27985_v21  ;;  %22323 = vmatprep.mubr.bf16.mxu0 %v23945_v26  ;;  %v23957_v26 = vld [vmem:[%s31989_s8 + $0x80] sm:$0xff]  }
 0xb89   : > { %22337 = vmatprep.subr.bf16.mxu0 %v27980_v1  ;;  %v22487_v30 = vpop.f32.mrb[248].mxu1 }
 0xb8a   : > { %v8799_v62 = vpop.f32.mrb[249].mxu1 }
 0xb8b   : > { %v22488_v51 = vpop.f32.mrb[250].mxu1 }
 0xb8c   : > { %v28071_v23 = vpack.c.bf16 %v22488_v51, %v22487_v30  ;;  %22338 = vmatpush3.bf16.msra.mxu0 %v27980_v1  ;;  %v8802_v2 = vpop.f32.mrb[251].mxu1  ;;  %v23948_v1 = vld [vmem:[%s31989_s8 + $0x78] sm:$0xff]  }
 0xb8d   : > { %v28077_v21 = vpack.c.bf16 %v8802_v2, %v8799_v62  ;;  %22339 = vmatprep.subr.bf16.mxu0 %v27999_v36 }
 0xb8f   : > { %22324 = vmatmul.mubr.bf16.gmra.mrb[204].mxu0 %v23946_v3 }
 0xb90   : > { %22340 = vmatpush3.bf16.msra.mxu0 %v27999_v36  ;;  %22327 = vmatprep.mubr.bf16.mxu0 %v23947_v49  ;;  %v23959_v49 = vld [vmem:[%s31989_s8 + $0x90] sm:$0xff]  }
 0xb91   : > { %22341 = vmatprep.subr.bf16.mxu0 %v27994_v57  ;;  %v22491_v60 = vpop.f32.mrb[252].mxu1 }
 0xb92   : > { %v8815_v41 = vpop.f32.mrb[253].mxu1 }
 0xb93   : > { %v22492_v0 = vpop.f32.mrb[254].mxu1 }
 0xb94   : > { %v28085_v15 = vpack.c.bf16 %v22492_v0, %v22491_v60  ;;  %22342 = vmatpush3.bf16.msra.mxu0 %v27994_v57  ;;  %v8818_v20 = vpop.f32.mrb[255].mxu1  ;;  %v23950_v57 = vld [vmem:[%s31989_s8 + $0x8] sm:$0xff]  }
 0xb95   : > { %v28091_v36 = vpack.c.bf16 %v8818_v20, %v8815_v41  ;;  %22343 = vmatprep.subr.bf16.mxu0 %v28011_v25 }
 0xb97   : > { %22328 = vmatmul.mubr.bf16.gmra.mrb[208].mxu0 %v23948_v1 }
 0xb98   : > { %22344 = vmatpush3.bf16.msra.mxu0 %v28011_v25  ;;  %22347 = vmatprep.mubr.bf16.mxu0 %v23949_v13  ;;  %v23961_v13 = vld [vmem:[%s31989_s8 + $0xa0] sm:$0xff]  }
 0xb99   : > { %22345 = vmatprep.subr.bf16.mxu0 %v28006_v44  ;;  %v22533_v35 = vpop.f32.mrb[0].mxu1 }
 0xb9a   : > { %v9074_v27 = vpop.f32.mrb[1].mxu1 }
 0xb9b   : > { %v22534_v19 = vpop.f32.mrb[2].mxu1 }
 0xb9c   : > { %v28099_v46 = vpack.c.bf16 %v22534_v19, %v22533_v35  ;;  %22346 = vmatpush3.bf16.msra.mxu0 %v28006_v44  ;;  %v9077_v16 = vpop.f32.mrb[3].mxu1  ;;  %v23952_v44 = vld [vmem:[%s31989_s8 + $0x18] sm:$0xff]  }
 0xb9d   : > { %v28105_v25 = vpack.c.bf16 %v9077_v16, %v9074_v27  ;;  %22385 = vmatprep.subr.bf16.mxu0 %v27969_v4 }
 0xb9f   : > { %22348 = vmatmul.mubr.bf16.vlgmr.msra.gmra.mrb[196].mxu0 %v23950_v57 }
 0xba0   : > { %22386 = vmatpush3.bf16.msra.mxu0 %v27969_v4  ;;  %22351 = vmatprep.mubr.bf16.mxu0 %v23951_v18  ;;  %v23963_v18 = vld [vmem:[%s31989_s8 + $0xb0] sm:$0xff]  }
 0xba1   : > { %22387 = vmatprep.subr.bf16.mxu0 %v27964_v5  ;;  %v22537_v37 = vpop.f32.mrb[4].mxu1 }
 0xba2   : > { %v9090_v40 = vpop.f32.mrb[5].mxu1 }
 0xba3   : > { %v22538_v56 = vpop.f32.mrb[6].mxu1 }
 0xba4   : > { %v28113_v59 = vpack.c.bf16 %v22538_v56, %v22537_v37  ;;  %22388 = vmatpush3.bf16.msra.mxu0 %v27964_v5  ;;  %v9093_v63 = vpop.f32.mrb[7].mxu1  ;;  %v23954_v5 = vld [vmem:[%s31989_s8 + $0x28] sm:$0xff]  }
 0xba5   : > { %v28119_v4 = vpack.c.bf16 %v9093_v63, %v9090_v40  ;;  %22389 = vmatprep.subr.bf16.mxu0 %v27987_v45 }
 0xba7   : > { %22352 = vmatmul.mubr.bf16.gmra.mrb[200].mxu0 %v23952_v44 }
 0xba8   : > { %22390 = vmatpush3.bf16.msra.mxu0 %v27987_v45  ;;  %22355 = vmatprep.mubr.bf16.mxu0 %v23953_v54  ;;  %v23965_v54 = vld [vmem:[%s31989_s8 + $0xc0] sm:$0xff]  }
 0xba9   : > { %22391 = vmatprep.subr.bf16.mxu0 %v27982_v14  ;;  %v22541_v11 = vpop.f32.mrb[8].mxu1 }
 0xbaa   : > { %v9106_v31 = vpop.f32.mrb[9].mxu1 }
 0xbab   : > { %v22542_v52 = vpop.f32.mrb[10].mxu1 }
 0xbac   : > { %v28127_v8 = vpack.c.bf16 %v22542_v52, %v22541_v11  ;;  %22392 = vmatpush3.bf16.msra.mxu0 %v27982_v14  ;;  %v9109_v22 = vpop.f32.mrb[11].mxu1  ;;  %v23956_v14 = vld [vmem:[%s31989_s8 + $0x38] sm:$0xff]  }
 0xbad   : > { %v28133_v45 = vpack.c.bf16 %v9109_v22, %v9106_v31  ;;  %22393 = vmatprep.subr.bf16.mxu0 %v28001_v24 }
 0xbaf   : > { %22356 = vmatmul.mubr.bf16.gmra.mrb[204].mxu0 %v23954_v5 }
 0xbb0   : > { %22394 = vmatpush3.bf16.msra.mxu0 %v28001_v24  ;;  %22359 = vmatprep.mubr.bf16.mxu0 %v23955_v42  ;;  %v23967_v42 = vld [vmem:[%s31989_s8 + $0xd0] sm:$0xff]  }
 0xbb1   : > { %22395 = vmatprep.subr.bf16.mxu0 %v27996_v10  ;;  %v22545_v28 = vpop.f32.mrb[12].mxu1 }
 0xbb2   : > { %v9122_v17 = vpop.f32.mrb[13].mxu1 }
 0xbb3   : > { %v22546_v38 = vpop.f32.mrb[14].mxu1 }
 0xbb4   : > { %v28141_v29 = vpack.c.bf16 %v22546_v38, %v22545_v28  ;;  %22396 = vmatpush3.bf16.msra.mxu0 %v27996_v10  ;;  %v9125_v50 = vpop.f32.mrb[15].mxu1  ;;  %v23958_v10 = vld [vmem:[%s31989_s8 + $0x88] sm:$0xff]  }
 0xbb5   : > { %v28147_v24 = vpack.c.bf16 %v9125_v50, %v9122_v17  ;;  %22397 = vmatprep.subr.bf16.mxu0 %v28013_v12 }
 0xbb7   : > { %22360 = vmatmul.mubr.bf16.gmra.mrb[208].mxu0 %v23956_v14 }
 0xbb8   : > { %22398 = vmatpush3.bf16.msra.mxu0 %v28013_v12  ;;  %22401 = vmatprep.mubr.bf16.mxu0 %v23957_v26  ;;  %v23969_v26 = vld [vmem:[%s31989_s8 + $0xe0] sm:$0xff]  }
 0xbb9   : > { %22399 = vmatprep.subr.bf16.mxu0 %v28008_v6  ;;  %v22587_v30 = vpop.f32.mrb[16].mxu1 }
 0xbba   : > { %v9381_v62 = vpop.f32.mrb[17].mxu1 }
 0xbbb   : > { %v22588_v51 = vpop.f32.mrb[18].mxu1 }
 0xbbc   : > { %v28155_v3 = vpack.c.bf16 %v22588_v51, %v22587_v30  ;;  %22400 = vmatpush3.bf16.msra.mxu0 %v28008_v6  ;;  %v9384_v2 = vpop.f32.mrb[19].mxu1  ;;  %v23960_v6 = vld [vmem:[%s31989_s8 + $0x98] sm:$0xff]  }
 0xbbd   : > { %v28161_v12 = vpack.c.bf16 %v9384_v2, %v9381_v62  ;;  %22439 = vmatprep.subr.bf16.mxu0 %v28021_v9 }
 0xbbf   : > { %22402 = vmatmul.mubr.bf16.vlgmr.msra.gmra.mrb[196].mxu0 %v23958_v10 }
 0xbc0   : > { %22440 = vmatpush3.bf16.msra.mxu0 %v28021_v9  ;;  %22405 = vmatprep.mubr.bf16.mxu0 %v23959_v49  ;;  %v23971_v49 = vld [vmem:[%s31989_s8 + $0xf0] sm:$0xff]  }
 0xbc1   : > { %22441 = vmatprep.subr.bf16.mxu0 %v28018_v58  ;;  %v22591_v60 = vpop.f32.mrb[20].mxu1 }
 0xbc2   : > { %v9397_v41 = vpop.f32.mrb[21].mxu1 }
 0xbc3   : > { %v22592_v0 = vpop.f32.mrb[22].mxu1 }
 0xbc4   : > { %v28169_v1 = vpack.c.bf16 %v22592_v0, %v22591_v60  ;;  %22442 = vmatpush3.bf16.msra.mxu0 %v28018_v58  ;;  %v9400_v20 = vpop.f32.mrb[23].mxu1  ;;  %v23962_v58 = vld [vmem:[%s31989_s8 + $0xa8] sm:$0xff]  }
 0xbc5   : > { %v28175_v9 = vpack.c.bf16 %v9400_v20, %v9397_v41  ;;  %22443 = vmatprep.subr.bf16.mxu0 %v28031_v34 }
 0xbc7   : > { %22406 = vmatmul.mubr.bf16.gmra.mrb[200].mxu0 %v23960_v6 }
 0xbc8   : > { %22444 = vmatpush3.bf16.msra.mxu0 %v28031_v34  ;;  %22409 = vmatprep.mubr.bf16.mxu0 %v23961_v13  ;;  %v23973_v13 = vld [vmem:[%s31989_s8 + $0x100] sm:$0xff]  }
 0xbc9   : > { %22445 = vmatprep.subr.bf16.mxu0 %v28029_v47  ;;  %v22595_v35 = vpop.f32.mrb[24].mxu1 }
 0xbca   : > { %v9413_v27 = vpop.f32.mrb[25].mxu1 }
 0xbcb   : > { %v22596_v19 = vpop.f32.mrb[26].mxu1 }
 0xbcc   : > { %v28183_v57 = vpack.c.bf16 %v22596_v19, %v22595_v35  ;;  %22446 = vmatpush3.bf16.msra.mxu0 %v28029_v47  ;;  %v9416_v16 = vpop.f32.mrb[27].mxu1  ;;  %v23964_v47 = vld [vmem:[%s31989_s8 + $0xb8] sm:$0xff]  }
 0xbcd   : > { %v28189_v34 = vpack.c.bf16 %v9416_v16, %v9413_v27  ;;  %22447 = vmatprep.subr.bf16.mxu0 %v28035_v61 }
 0xbcf   : > { %22410 = vmatmul.mubr.bf16.gmra.mrb[204].mxu0 %v23962_v58 }
 0xbd0   : > { %22448 = vmatpush3.bf16.msra.mxu0 %v28035_v61  ;;  %22413 = vmatprep.mubr.bf16.mxu0 %v23963_v18  ;;  %v23975_v18 = vld [vmem:[%s31989_s8 + $0x110] sm:$0xff]  }
 0xbd1   : > { %22449 = vmatprep.subr.bf16.mxu0 %v28033_v33  ;;  %v22599_v37 = vpop.f32.mrb[28].mxu1 }
 0xbd2   : > { %v9429_v40 = vpop.f32.mrb[29].mxu1 }
 0xbd3   : > { %v22600_v56 = vpop.f32.mrb[30].mxu1 }
 0xbd4   : > { %v28197_v44 = vpack.c.bf16 %v22600_v56, %v22599_v37  ;;  %22450 = vmatpush3.bf16.msra.mxu0 %v28033_v33  ;;  %v9432_v63 = vpop.f32.mrb[31].mxu1  ;;  %v23966_v33 = vld [vmem:[%s31989_s8 + $0xc8] sm:$0xff]  }
 0xbd5   : > { %v28203_v61 = vpack.c.bf16 %v9432_v63, %v9429_v40  ;;  %22451 = vmatprep.subr.bf16.mxu0 %v28039_v53 }
 0xbd7   : > { %22414 = vmatmul.mubr.bf16.gmra.mrb[208].mxu0 %v23964_v47 }
 0xbd8   : > { %22452 = vmatpush3.bf16.msra.mxu0 %v28039_v53  ;;  %22455 = vmatprep.mubr.bf16.mxu0 %v23965_v54  ;;  %v23977_v54 = vld [vmem:[%s31989_s8 + $0x120] sm:$0xff]  }
 0xbd9   : > { %22453 = vmatprep.subr.bf16.mxu0 %v28037_v43  ;;  %v22641_v11 = vpop.f32.mrb[32].mxu1 }
 0xbda   : > { %v9688_v31 = vpop.f32.mrb[33].mxu1 }
 0xbdb   : > { %v22642_v52 = vpop.f32.mrb[34].mxu1 }
 0xbdc   : > { %v28211_v5 = vpack.c.bf16 %v22642_v52, %v22641_v11  ;;  %22454 = vmatpush3.bf16.msra.mxu0 %v28037_v43  ;;  %v9691_v22 = vpop.f32.mrb[35].mxu1  ;;  %v23968_v43 = vld [vmem:[%s31989_s8 + $0xd8] sm:$0xff]   ;;  %v24009_v11 = vld [vmem:[%s31997_s16] ss:$52 sps:$4 sm:$0xff]  }
 0xbdd   : > { %v28217_v53 = vpack.c.bf16 %v9691_v22, %v9688_v31  ;;  %22493 = vmatprep.subr.bf16.mxu0 %v28049_v7  ;;  %v24011_v31 = vld [vmem:[%s31997_s16 + $0x4] ss:$52 sps:$4 sm:$0xff]   ;;  %v24012_v22 = vld [vmem:[%s31997_s16 + $0x68] ss:$52 sps:$4 sm:$0xff]  }
 0xbde   : > { %17377 = vmatprep.subr.bf16.mxu1 %v24011_v31 }
 0xbdf   : > { %22456 = vmatmul.mubr.bf16.vlgmr.msra.gmra.mrb[196].mxu0 %v23966_v33  ;;  %17378 = vmatpush1.bf16.msra.mxu1 %v24009_v11  ;;  %v24028_v11 = vld [vmem:[%s31997_s16 + $0x208] ss:$52 sps:$4 sm:$0xff]  }
 0xbe0   : > { %22494 = vmatpush3.bf16.msra.mxu0 %v28049_v7  ;;  %22459 = vmatprep.mubr.bf16.mxu0 %v23967_v42 }
 0xbe1   : > { %22495 = vmatprep.subr.bf16.mxu0 %v28044_v39  ;;  %v22645_v28 = vpop.f32.mrb[36].mxu1 }
 0xbe2   : > { %v9704_v17 = vpop.f32.mrb[37].mxu1 }
 0xbe3   : > { %v22646_v38 = vpop.f32.mrb[38].mxu1 }
 0xbe4   : > { %v28225_v14 = vpack.c.bf16 %v22646_v38, %v22645_v28  ;;  %22496 = vmatpush3.bf16.msra.mxu0 %v28044_v39  ;;  %v9707_v50 = vpop.f32.mrb[39].mxu1  ;;  %v23970_v39 = vld [vmem:[%s31989_s8 + $0xe8] sm:$0xff]   ;;  %v23979_v38 = vld [vmem:[%s31989_s8 + $0x130] sm:$0xff]  }
 0xbe5   : > { %v28231_v7 = vpack.c.bf16 %v9707_v50, %v9704_v17  ;;  %22497 = vmatprep.subr.bf16.mxu0 %v28063_v55  ;;  %v24017_v50 = vld [vmem:[%s31997_s16 + $0xd0] ss:$52 sps:$4 sm:$0xff]  }
 0xbe7   : > { %22460 = vmatmul.mubr.bf16.gmra.mrb[200].mxu0 %v23968_v43 }
 0xbe8   : > { %22498 = vmatpush3.bf16.msra.mxu0 %v28063_v55  ;;  %22463 = vmatprep.mubr.bf16.mxu0 %v23969_v26  ;;  %v24019_v26 = vld [vmem:[%s31997_s16 + $0xd4] ss:$52 sps:$4 sm:$0xff]  }
 0xbe9   : > { %22499 = vmatprep.subr.bf16.mxu0 %v28057_v48  ;;  %v22649_v30 = vpop.f32.mrb[40].mxu1 }
 0xbea   : > { %v9720_v62 = vpop.f32.mrb[41].mxu1 }
 0xbeb   : > { %v22650_v51 = vpop.f32.mrb[42].mxu1 }
 0xbec   : > { %v28239_v10 = vpack.c.bf16 %v22650_v51, %v22649_v30  ;;  %22500 = vmatpush3.bf16.msra.mxu0 %v28057_v48  ;;  %v9723_v2 = vpop.f32.mrb[43].mxu1  ;;  %v23972_v48 = vld [vmem:[%s31989_s8 + $0xf8] sm:$0xff]  }
 0xbed   : > { %v28245_v55 = vpack.c.bf16 %v9723_v2, %v9720_v62  ;;  %22501 = vmatprep.subr.bf16.mxu0 %v28077_v21  ;;  %v24020_v51 = vld [vmem:[%s31997_s16 + $0x138] ss:$52 sps:$4 sm:$0xff]   ;;  %v575_v2 = vlaneseq }
 0xbef   : > { %22464 = vmatmul.mubr.bf16.gmra.mrb[204].mxu0 %v23970_v39  ;;  %vm10447_vm6 = vcmp.lt.s32.totalorder %v575_v2, 144  ;;  %vm10463_vm7 = vcmp.ge.s32.totalorder %v575_v2, 16  ;;  %vm10464_vm8 = vcmp.lt.s32.totalorder %v575_v2, 160  ;;  %vm10474_vm9 = vcmp.ge.s32.totalorder %v575_v2, 32 }
 0xbf0   : > { %22502 = vmatpush3.bf16.msra.mxu0 %v28077_v21  ;;  %22467 = vmatprep.mubr.bf16.mxu0 %v23971_v49  ;;  %v25546_v49 = vmov 1966171168   ;;  %vm10475_vm10 = vcmp.lt.s32.totalorder %v575_v2, 176  ;;  %vm10465_vm11 = vmand %vm10463_vm7, %vm10464_vm8  ;;  %vm28627_vm14 = vcmp.ge.s32.totalorder %v575_v2, 48  ;;  %vm28632_vm15 = vcmp.lt.s32.totalorder %v575_v2, 192 }
 0xbf1   : > { %22503 = vmatprep.subr.bf16.mxu0 %v28071_v23  ;;  %v22653_v60 = vpop.f32.mrb[44].mxu1  ;;  %vm10476_vm13 = vmand %vm10474_vm9, %vm10475_vm10  ;;  %vm28637_vm1 = vcmp.ge.s32.totalorder %v575_v2, 64  ;;  %vm10528_vm3 = vcmp.ge.s32.totalorder %v575_v2, 80  ;;  %vm10529_vm4 = vcmp.lt.s32.totalorder %v575_v2, 224  ;;  %vm10525_vm7 = vcmask 654336  }
 0xbf2   : > { %v9736_v41 = vpop.f32.mrb[45].mxu1  ;;  %vm10530_vm9 = vmand %vm10528_vm3, %vm10529_vm4  ;;  %vm28657_vm10 = vcmp.ge.s32.totalorder %v575_v2, 96  ;;  %vm28689_vm3 = vcmp.ge.s32.totalorder %v575_v2, 76  ;;  %vm28694_vm4 = vcmp.lt.s32.totalorder %v575_v2, 112 }
 0xbf3   : > { %v22654_v0 = vpop.f32.mrb[46].mxu1 }
 0xbf4   : > { %v28253_v6 = vpack.c.bf16 %v22654_v0, %v22653_v60  ;;  %22504 = vmatpush3.bf16.msra.mxu0 %v28071_v23  ;;  %v9739_v20 = vpop.f32.mrb[47].mxu1  ;;  %v23974_v23 = vld [vmem:[%s31989_s8 + $0x108] sm:$0xff]   ;;  %v10432_v60 = vunpack.c.l.s4 %v25546_v49 }
 0xbf5   : > { %v28259_v21 = vpack.c.bf16 %v9739_v20, %v9736_v41  ;;  %22505 = vmatprep.subr.bf16.mxu0 %v28091_v36  ;;  %v23986_v49 = vld [vmem:[%s31989_s8 + $0x168] sm:$0xff]  }
 0xbf7   : > { %22468 = vmatmul.mubr.bf16.gmra.mrb[208].mxu0 %v23972_v48  ;;  %v23981_v48 = vld [vmem:[%s31989_s8 + $0x140] sm:$0xff]  }
 0xbf8   : > { %22506 = vmatpush3.bf16.msra.mxu0 %v28091_v36  ;;  %22509 = vmatprep.mubr.bf16.mxu0 %v23973_v13  ;;  %v10433_v13 = vunpack.c.0.s8 %v10432_v60  ;;  %v23987_v60 = vld [vmem:[%s31989_s8 + $0x170] sm:$0xff]  }
 0xbf9   : > { %22507 = vmatprep.subr.bf16.mxu0 %v28085_v15  ;;  %v22695_v35 = vpop.f32.mrb[48].mxu1 }
 0xbfa   : > { %v9995_v27 = vpop.f32.mrb[49].mxu1 }
 0xbfb   : > { %v22696_v19 = vpop.f32.mrb[50].mxu1 }
 0xbfc   : > { %v28267_v58 = vpack.c.bf16 %v22696_v19, %v22695_v35  ;;  %22508 = vmatpush3.bf16.msra.mxu0 %v28085_v15  ;;  %v9998_v16 = vpop.f32.mrb[51].mxu1  ;;  %v23976_v15 = vld [vmem:[%s31989_s8 + $0x118] sm:$0xff]   ;;  %v28343_v35 = vshrl.u32 %v575_v2, 7  ;;  %v10385_v19 = vpop.permute.xlu0 %10384 }
 0xbfd   : > { %v28273_v36 = vpack.c.bf16 %v9998_v16, %v9995_v27  ;;  %22547 = vmatprep.subr.bf16.mxu0 %v28105_v25  ;;  %v24026_v27 = vld [vmem:[%s31997_s16 + $0x1a4] ss:$52 sps:$4 sm:$0xff]  }
 0xbff   : > { %22510 = vmatmul.mubr.bf16.vlgmr.msra.gmra.mrb[196].mxu0 %v23974_v23 }
 0xc00   : > { %22548 = vmatpush3.bf16.msra.mxu0 %v28105_v25  ;;  %22513 = vmatprep.mubr.bf16.mxu0 %v23975_v18 }
 0xc01   : > { %22549 = vmatprep.subr.bf16.mxu0 %v28099_v46  ;;  %v22699_v37 = vpop.f32.mrb[52].mxu1 }
 0xc02   : > { %v10011_v40 = vpop.f32.mrb[53].mxu1 }
 0xc03   : > { %v22700_v56 = vpop.f32.mrb[54].mxu1 }
 0xc04   : > { %v28281_v47 = vpack.c.bf16 %v22700_v56, %v22699_v37  ;;  %22550 = vmatpush3.bf16.msra.mxu0 %v28099_v46  ;;  %v10014_v63 = vpop.f32.mrb[55].mxu1  ;;  %v24014_v46 = vld [vmem:[%s31997_s16 + $0x6c] ss:$52 sps:$4 sm:$0xff]  }
 0xc05   : > { %v28287_v25 = vpack.c.bf16 %v10014_v63, %v10011_v40  ;;  %22551 = vmatprep.subr.bf16.mxu0 %v28119_v4  ;;  %17379 = vmatprep.subr.bf16.mxu1 %v24014_v46  ;;  %v28354_v40 = vsub.s32 %v10433_v13, %v28343_v35  ;;  %v23983_v63 = vld [vmem:[%s31989_s8 + $0x150] sm:$0xff]   ;;  %v23988_v13 = vld [vmem:[%s31989_s8 + $0x178] sm:$0xff]  }
 0xc06   : > { %17380 = vmatpush1.bf16.msra.mxu1 %v24012_v22  ;;  %v24031_v22 = vld [vmem:[%s31997_s16 + $0x270] ss:$52 sps:$4 sm:$0xff]  }
 0xc07   : > { %22514 = vmatmul.mubr.bf16.gmra.mrb[200].mxu0 %v23976_v15  ;;  %17381 = vmatprep.subr.bf16.mxu1 %v24019_v26  ;;  %v24030_v15 = vld [vmem:[%s31997_s16 + $0x20c] ss:$52 sps:$4 sm:$0xff]   ;;  %v24036_v26 = vld [vmem:[%s31997_s16 + $0x2dc] ss:$52 sps:$4 sm:$0xff]  }
 0xc08   : > { %22552 = vmatpush3.bf16.msra.mxu0 %v28119_v4  ;;  %22517 = vmatprep.mubr.bf16.mxu0 %v23977_v54  ;;  %v23978_v4 = vld [vmem:[%s31989_s8 + $0x128] sm:$0xff]  }
 0xc09   : > { %22553 = vmatprep.subr.bf16.mxu0 %v28113_v59  ;;  %v22703_v52 = vpop.f32.mrb[56].mxu1 }
 0xc0a   : > { %v10027_v33 = vpop.f32.mrb[57].mxu1  ;;  %17382 = vmatpush1.bf16.msra.mxu1 %v24017_v50  ;;  %v23984_v50 = vld [vmem:[%s31989_s8 + $0x158] sm:$0xff]  }
 0xc0b   : > { %v22704_v42 = vpop.f32.mrb[58].mxu1 }
 0xc0c   : > { %v28307_v28 = vpack.c.bf16 %v22704_v42, %v22703_v52  ;;  %22554 = vmatpush3.bf16.msra.mxu0 %v28113_v59  ;;  %v10030_v17 = vpop.f32.mrb[59].mxu1  ;;  %v24022_v59 = vld [vmem:[%s31997_s16 + $0x13c] ss:$52 sps:$4 sm:$0xff]   ;;  %v24033_v52 = vld [vmem:[%s31997_s16 + $0x274] ss:$52 sps:$4 sm:$0xff]  }
 0xc0d   : > { %v28313_v43 = vpack.c.bf16 %v10030_v17, %v10027_v33  ;;  %22555 = vmatprep.subr.bf16.mxu0 %v28133_v45  ;;  %17383 = vmatprep.subr.bf16.mxu1 %v24022_v59  ;;  %v23985_v59 = vld [vmem:[%s31989_s8 + $0x160] sm:$0xff]  }
 0xc0e   : > { %17384 = vmatpush1.bf16.msra.mxu1 %v24020_v51 }
 0xc0f   : > { %22518 = vmatmul.mubr.bf16.gmra.mrb[204].mxu0 %v23978_v4  ;;  %17385 = vmatprep.subr.bf16.mxu1 %v24026_v27  ;;  %v24048_v27 = vld [vmem:[%s31997_s16 + $0x47c] ss:$52 sps:$4 sm:$0xff]  }
 0xc10   : > { %22556 = vmatpush3.bf16.msra.mxu0 %v28133_v45  ;;  %22521 = vmatprep.mubr.bf16.mxu0 %v23979_v38  ;;  %v23980_v45 = vld [vmem:[%s31989_s8 + $0x138] sm:$0xff]  }
 0xc11   : > { %22557 = vmatprep.subr.bf16.mxu0 %v28127_v8  ;;  %v22707_v30 = vpop.f32.mrb[60].mxu1 }
 0xc12   : > { %v10043_v62 = vpop.f32.mrb[61].mxu1 }
 0xc13   : > { %v22708_v39 = vpop.f32.mrb[62].mxu1 }
 0xc14   : > { %v28333_v41 = vpack.c.bf16 %v22708_v39, %v22707_v30  ;;  %22558 = vmatpush3.bf16.msra.mxu0 %v28127_v8  ;;  %v10046_v0 = vpop.f32.mrb[63].mxu1  ;;  %v24024_v8 = vld [vmem:[%s31997_s16 + $0x1a0] ss:$52 sps:$4 sm:$0xff]  }
 0xc15   : > { %v28339_v20 = vpack.c.bf16 %v10046_v0, %v10043_v62  ;;  %22559 = vmatprep.subr.bf16.mxu0 %v28147_v24  ;;  %17386 = vmatpush1.bf16.msra.mxu1 %v24024_v8  ;;  %v24034_v62 = vld [vmem:[%s31997_s16 + $0x2d8] ss:$52 sps:$4 sm:$0xff]   ;;  %v24037_v39 = vld [vmem:[%s31997_s16 + $0x340] ss:$52 sps:$4 sm:$0xff]   ;;  %v24040_v0 = vld [vmem:[%s31997_s16 + $0x3a8] ss:$52 sps:$4 sm:$0xff]  }
 0xc16   : > { %17387 = vmatprep.subr.bf16.mxu1 %v24030_v15  ;;  %v24046_v8 = vld [vmem:[%s31997_s16 + $0x478] ss:$52 sps:$4 sm:$0xff]  }
 0xc17   : > { %22522 = vmatmul.mubr.bf16.gmra.mrb[208].mxu0 %v23980_v45 }
 0xc18   : > { %22560 = vmatpush3.bf16.msra.mxu0 %v28147_v24  ;;  %22563 = vmatprep.mubr.bf16.mxu0 %v23981_v48  ;;  %v23982_v24 = vld [vmem:[%s31989_s8 + $0x148] sm:$0xff]  }
 0xc19   : > { %22561 = vmatprep.subr.bf16.mxu0 %v28141_v29  ;;  %v10421_v23 = vpop.f32.mrb[64].mxu1  ;;  %17388 = vmatpush1.bf16.msra.mxu1 %v24028_v11  ;;  %v24045_v48 = vld [vmem:[%s31997_s16 + $0x414] ss:$52 sps:$4 sm:$0xff]  }
 0xc1a   : > { %v10422_v16 = vadd.f32 %v10421_v23, %v10385_v19  ;;  %v10423_v18 = vpop.f32.mrb[65].mxu1  ;;  %17389 = vmatprep.subr.bf16.mxu1 %v24033_v52  ;;  %v23991_v11 = vld [vmem:[%s31989_s8 + $0x190] sm:$0xff]  }
 0xc1b   : > { %v10424_v37 = vadd.f32 %v10423_v18, %v10385_v19  ;;  %v10425_v56 = vpop.f32.mrb[66].mxu1  ;;  %v24051_v19 = vld [vmem:[%s31997_s16 + $0x4e4] ss:$52 sps:$4 sm:$0xff]   ;;  %v24049_v18 = vld [vmem:[%s31997_s16 + $0x4e0] ss:$52 sps:$4 sm:$0xff]  }
 0xc1c   : > { %22562 = vmatpush3.bf16.msra.mxu0 %v28141_v29  ;;  %v10426_v54 = vpop.f32.mrb[67].mxu1 }
 0xc1d   : > { %v10430_v31 = vcombine.low %v10422_v16, %v10424_v37  ;;  %v10489_v46 = vcombine.high %v10422_v16, %v10424_v37  ;;  %22601 = vmatprep.subr.bf16.mxu0 %v28161_v12  ;;  %17390 = vmatpush1.bf16.msra.mxu1 %v24031_v22 }
 0xc1e   : > { %17391 = vmatprep.subr.bf16.mxu1 %v24036_v26  ;;  %v24063_v26 = vld [vmem:[%s31997_s16 + $0x684] ss:$52 sps:$4 sm:$0xff]  }
 0xc1f   : > { %v10437_v29 = vrot.slane %v10430_v31, %v28354_v40  ;;  %v10496_v33 = vrot.slane %v10489_v46, %v28354_v40  ;;  %22564 = vmatmul.mubr.bf16.vlgmr.msra.gmra.mrb[196].mxu0 %v23982_v24  ;;  %v23990_v24 = vld [vmem:[%s31989_s8 + $0x188] sm:$0xff]  }
 0xc20   : > { %22602 = vmatpush3.bf16.msra.mxu0 %v28161_v12  ;;  %22567 = vmatprep.mubr.bf16.mxu0 %v23983_v63 }
 0xc21   : > { %22603 = vmatprep.subr.bf16.mxu0 %v28155_v3  ;;  %v10503_v42 = vrot.slane %v10496_v33, %v28354_v40  ;;  %v10450_v4 = vcombine.high %v10437_v29, %v10437_v29  ;;  %v10444_v17 = vrot.slane %v10437_v29, %v28354_v40  ;;  %v10514_v12 = vcombine.high %v10496_v33, %v10496_v33  ;;  %v24052_v29 = vld [vmem:[%s31997_s16 + $0x548] ss:$52 sps:$4 sm:$0xff]  }
 0xc22   : > { %17392 = vmatpush1.bf16.msra.mxu1 %v24034_v62  ;;  %v23994_v62 = vld [vmem:[%s31989_s8 + $0x1a8] sm:$0xff]  }
 0xc23   : > { %10504 = vrot.lane.b32.xlu1 %v10503_v42, %s25547_s1  ;;  %v10457_v38 = vrot.slane %v10450_v4, %v28354_v40  ;;  %10449 = vst.msk [vmem:[#allocation2] sm:$0x3] %vm10447_vm6, %v10444_v17  ;;  %v10467_v30 = vcombine.high %v10444_v17, %v10444_v17  ;;  %v10521_v51 = vrot.slane %v10514_v12, %v28354_v40  ;;  %v24055_v42 = vld [vmem:[%s31997_s16 + $0x5b0] ss:$52 sps:$4 sm:$0xff]   ;;  %v23992_v4 = vld [vmem:[%s31989_s8 + $0x198] sm:$0xff]   ;;  %vm10487_vm6 = vmand %vm28627_vm14, %vm28632_vm15  ;;  %vm10597_vm14 = vcmask 785408  }
 0xc24   : > { %22604 = vmatpush3.bf16.msra.mxu0 %v28155_v3  ;;  %v24039_v3 = vld [vmem:[%s31997_s16 + $0x344] ss:$52 sps:$4 sm:$0xff]  }
 0xc25   : > { %10458 = vrot.lane.b32.xlu0 %v10457_v38, %s25548_s27  ;;  %22605 = vmatprep.subr.bf16.mxu0 %v28175_v9  ;;  %v10478_v45 = vcombine.high %v10457_v38, %v10457_v38  ;;  %v23993_v38 = vld [vmem:[%s31989_s8 + $0x1a0] sm:$0xff]   ;;  %v24058_v12 = vld [vmem:[%s31997_s16 + $0x618] ss:$52 sps:$4 sm:$0xff]  }
 0xc26   : > { %17393 = vmatprep.subr.bf16.mxu1 %v24039_v3  ;;  %v23997_v3 = vld [vmem:[%s31989_s8 + $0x1c0] sm:$0xff]  }
 0xc27   : > { %10468 = vrot.lane.b32.xlu1 %v10467_v30, %s25549_s29  ;;  %22568 = vmatmul.mubr.bf16.gmra.mrb[200].mxu0 %v23984_v50  ;;  %s25551_s29 = smov 48   ;;  %v10678_v30 = vld [vmem:[%s31996_s15 + $0x8] sm:$0x1] }
 0xc28   : > { %22606 = vmatpush3.bf16.msra.mxu0 %v28175_v9  ;;  %22571 = vmatprep.mubr.bf16.mxu0 %v23985_v59  ;;  %v24042_v9 = vld [vmem:[%s31997_s16 + $0x3ac] ss:$52 sps:$4 sm:$0xff]  }
 0xc29   : > { %10522 = vrot.lane.b32.xlu0 %v10521_v51, %s25550_s21  ;;  %22607 = vmatprep.subr.bf16.mxu0 %v28169_v1  ;;  %v23995_v51 = vld [vmem:[%s31989_s8 + $0x1b0] sm:$0xff]   ;;  %s25562_s21 = smov 92  }
 0xc2a   : > { %17394 = vmatpush1.bf16.msra.mxu1 %v24037_v39 }
 0xc2b   : > { %17395 = vmatprep.subr.bf16.mxu1 %v24042_v9 }
 0xc2c   : > { %22608 = vmatpush3.bf16.msra.mxu0 %v28169_v1  ;;  %v24043_v1 = vld [vmem:[%s31997_s16 + $0x410] ss:$52 sps:$4 sm:$0xff]  }
 0xc2d   : > { %10479 = vrot.lane.b32.xlu0 %v10478_v45, %s25551_s29  ;;  %22609 = vmatprep.subr.bf16.mxu0 %v28189_v34  ;;  %v24003_v45 = vld [vmem:[%s31989_s8 + $0x1f0] sm:$0xff]   ;;  %s25559_s29 = smov 65  }
 0xc2e   : > { %17396 = vmatpush1.bf16.msra.mxu1 %v24040_v0 }
 0xc2f   : > { %22572 = vmatmul.mubr.bf16.gmra.mrb[204].mxu0 %v23986_v49  ;;  %17397 = vmatprep.subr.bf16.mxu1 %v24045_v48 }
 0xc30   : > { %22610 = vmatpush3.bf16.msra.mxu0 %v28189_v34  ;;  %22575 = vmatprep.mubr.bf16.mxu0 %v23987_v60  ;;  %v23989_v34 = vld [vmem:[%s31989_s8 + $0x180] sm:$0xff]  }
 0xc31   : > { %22611 = vmatprep.subr.bf16.mxu0 %v28183_v57  ;;  %v24005_v60 = vld [vmem:[%s31989_s8 + $0x200] sm:$0xff]  }
 0xc32   : > { %17398 = vmatpush1.bf16.msra.mxu1 %v24043_v1  ;;  %v24007_v1 = vld [vmem:[%s31989_s8 + $0x210] sm:$0xff]  }
 0xc33   : > { %17399 = vmatprep.subr.bf16.mxu1 %v24048_v27  ;;  %v24008_v27 = vld [vmem:[%s31989_s8 + $0x218] sm:$0xff]  }
 0xc34   : > { %22612 = vmatpush3.bf16.msra.mxu0 %v28183_v57  ;;  %v10537_v57 = vpop.permute.xlu1 %10536 }
 0xc35   : > { %22613 = vmatprep.subr.bf16.mxu0 %v28203_v61 }
 0xc36   : > { %17400 = vmatpush1.bf16.msra.mxu1 %v24046_v8 }
 0xc37   : > { %22576 = vmatmul.mubr.bf16.gmra.mrb[208].mxu0 %v23988_v13  ;;  %17401 = vmatprep.subr.bf16.mxu1 %v24051_v19 }
 0xc38   : > { %22614 = vmatpush3.bf16.msra.mxu0 %v28203_v61  ;;  %22617 = vmatprep.mubr.bf16.mxu0 %v23989_v34  ;;  %v24054_v61 = vld [vmem:[%s31997_s16 + $0x54c] ss:$52 sps:$4 sm:$0xff]   ;;  %v28542_v39 = vpop.permute.xlu1 %10267 }
 0xc39   : > { %v10573_v23 = vpop.f32.mrb[68].mxu1  ;;  %22615 = vmatprep.subr.bf16.mxu0 %v28197_v44 }
 0xc3a   : > { %v10574_v16 = vadd.f32 %v10573_v23, %v10537_v57  ;;  %v22759_v37 = vpop.f32.mrb[69].mxu1  ;;  %17402 = vmatpush1.bf16.msra.mxu1 %v24049_v18  ;;  %v24016_v57 = vld [vmem:[%s31989_s8 + $0x228] sm:$0xff]   ;;  %v24023_v23 = vld [vmem:[%s31989_s8 + $0x230] sm:$0xff]  }
 0xc3b   : > { %v10576_v56 = vpop.f32.mrb[70].mxu1  ;;  %17403 = vmatprep.subr.bf16.mxu1 %v24054_v61 }
 0xc3c   : > { %v10586_v15 = vrot.slane %v10574_v16, %v28354_v40  ;;  %v10635_v63 = vcombine.high %v10574_v16, %v10574_v16  ;;  %22616 = vmatpush3.bf16.msra.mxu0 %v28197_v44  ;;  %v22760_v54 = vpop.f32.mrb[71].mxu1  ;;  %v24057_v44 = vld [vmem:[%s31997_s16 + $0x5b4] ss:$52 sps:$4 sm:$0xff]   ;;  %v28555_v49 = vpop.permute.xlu1 %10277 }
 0xc3d   : > { %22655 = vmatprep.subr.bf16.mxu0 %v28217_v53 }
 0xc3e   : > { %v10604_v31 = vcombine.high %v10586_v15, %v10586_v15  ;;  %v10642_v46 = vrot.slane %v10635_v63, %v28354_v40  ;;  %v10593_v52 = vrot.slane %v10586_v15, %v28354_v40  ;;  %17404 = vmatpush1.bf16.msra.mxu1 %v24052_v29  ;;  %v24070_v29 = vld [vmem:[%s31997_s16 + $0x7b8] ss:$52 sps:$4 sm:$0xff]  }
 0xc3f   : > { %22618 = vmatmul.mubr.bf16.vlgmr.msra.gmra.mrb[196].mxu0 %v23990_v24  ;;  %17405 = vmatprep.subr.bf16.mxu1 %v24057_v44  ;;  %v24027_v24 = vld [vmem:[%s31989_s8 + $0x238] sm:$0xff]  }
 0xc40   : > { %10594 = vrot.lane.b32.xlu1 %v10593_v52, %s25552_s2  ;;  %22656 = vmatpush3.bf16.msra.mxu0 %v28217_v53  ;;  %v10611_v33 = vrot.slane %v10604_v31, %v28354_v40  ;;  %v10649_v22 = vrot.slane %v10642_v46, %v28354_v40  ;;  %v24060_v53 = vld [vmem:[%s31997_s16 + $0x61c] ss:$52 sps:$4 sm:$0xff]   ;;  %v10619_v17 = vcombine.high %v10593_v52, %v10593_v52  ;;  %v28562_v9 = vpop.permute.xlu1 %10287  ;;  %v24075_v44 = vld [vmem:[%s31997_s16 + $0x824] ss:$52 sps:$4 sm:$0xff]   ;;  %s25558_s2 = smov 56  }
 0xc41   : > { %22657 = vmatprep.subr.bf16.mxu0 %v28211_v5  ;;  %22621 = vmatprep.mubr.bf16.mxu0 %v23991_v11  ;;  %v10660_v59 = vcombine.high %v10642_v46, %v10642_v46  ;;  %v24072_v52 = vld [vmem:[%s31997_s16 + $0x7bc] ss:$52 sps:$4 sm:$0xff]  }
 0xc42   : > { %10612 = vrot.lane.b32.xlu0 %v10611_v33, %s25553_s23  ;;  %v10627_v50 = vcombine.high %v10611_v33, %v10611_v33  ;;  %17406 = vmatpush1.bf16.msra.mxu1 %v24055_v42  ;;  %s25557_s23 = smov 20   ;;  %v24073_v33 = vld [vmem:[%s31997_s16 + $0x820] ss:$52 sps:$4 sm:$0xff]  }
 0xc43   : > { %17407 = vmatprep.subr.bf16.mxu1 %v24060_v53 }
 0xc44   : > { %10650 = vrot.lane.b32.xlu1 %v10649_v22, %s25554_s30  ;;  %22658 = vmatpush3.bf16.msra.mxu0 %v28211_v5  ;;  %v10677_v5 = vld [vmem:[%s31996_s15] sm:$0xff] }
 0xc45   : > { %22659 = vmatprep.subr.bf16.mxu0 %v28231_v7 }
 0xc46   : > { %10620 = vrot.lane.b32.xlu0 %v10619_v17, %s25555_s22  ;;  %17408 = vmatpush1.bf16.msra.mxu1 %v24058_v12  ;;  %v24085_v12 = vld [vmem:[%s31997_s16 + $0x9c0] ss:$52 sps:$4 sm:$0xff]   ;;  %s25565_s22 = smov 119  }
 0xc47   : > { %22622 = vmatmul.mubr.bf16.gmra.mrb[200].mxu0 %v23992_v4  ;;  %17418 = vmatprep.subr.bf16.mxu1 %v24063_v26  ;;  %v24088_v26 = vld [vmem:[%s31997_s16 + $0xa28] ss:$52 sps:$4 sm:$0xff]  }
 0xc48   : > { %10628 = vrot.lane.b32.xlu1 %v10627_v50, %s25556_s26  ;;  %22660 = vmatpush3.bf16.msra.mxu0 %v28231_v7  ;;  %v10667_v7 = vrot.slane %v10660_v59, %v28354_v40  ;;  %s25564_s26 = smov 110  }
 0xc49   : > { %22661 = vmatprep.subr.bf16.mxu0 %v28225_v14  ;;  %22625 = vmatprep.mubr.bf16.mxu0 %v23993_v38 }
 0xc4a   : > { %10681 = vperm.xlu0 %23442, %v10677_v5   ;;  %v24090_v5 = vld [vmem:[%s31997_s16 + $0xa2c] ss:$52 sps:$4 sm:$0xff]  }
 0xc4c   : > { %10686 = vperm.xlu1 %23443, %v10678_v30   ;;  %22662 = vmatpush3.bf16.msra.mxu0 %v28225_v14  ;;  %v23996_v14 = vld [vmem:[%s31989_s8 + $0x1b8] sm:$0xff]  }
 0xc4d   : > { %22663 = vmatprep.subr.bf16.mxu0 %v28245_v55 }
 0xc4e   : > { %10668 = vrot.lane.b32.xlu0 %v10667_v7, %s25557_s23  ;;  %v24094_v7 = vld [vmem:[%s31997_s16 + $0xaf8] ss:$52 sps:$4 sm:$0xff]  }
 0xc4f   : > { %22626 = vmatmul.mubr.bf16.gmra.mrb[204].mxu0 %v23994_v62  ;;  %v24096_v62 = vld [vmem:[%s31997_s16 + $0xafc] ss:$52 sps:$4 sm:$0xff]  }
 0xc50   : > { %22664 = vmatpush3.bf16.msra.mxu0 %v28245_v55  ;;  %22629 = vmatprep.mubr.bf16.mxu0 %v23995_v51  ;;  %v23998_v55 = vld [vmem:[%s31989_s8 + $0x1c8] sm:$0xff]  }
 0xc51   : > { %22665 = vmatprep.subr.bf16.mxu0 %v28239_v10 }
 0xc54   : > { %22666 = vmatpush3.bf16.msra.mxu0 %v28239_v10  ;;  %v23999_v10 = vld [vmem:[%s31989_s8 + $0x1d0] sm:$0xff]  }
 0xc55   : > { %22667 = vmatprep.subr.bf16.mxu0 %v28259_v21 }
 0xc57   : > { %22630 = vmatmul.mubr.bf16.gmra.mrb[208].mxu0 %v23996_v14 }
 0xc58   : > { %22668 = vmatpush3.bf16.msra.mxu0 %v28259_v21  ;;  %22671 = vmatprep.mubr.bf16.mxu0 %v23997_v3  ;;  %v24000_v21 = vld [vmem:[%s31989_s8 + $0x1d8] sm:$0xff]   ;;  %v24102_v3 = vld [vmem:[%s31997_s16 + $0xbcc] ss:$52 sps:$4 sm:$0xff]  }
 0xc59   : > { %22669 = vmatprep.subr.bf16.mxu0 %v28253_v6 }
 0xc5c   : > { %22670 = vmatpush3.bf16.msra.mxu0 %v28253_v6  ;;  %v24001_v6 = vld [vmem:[%s31989_s8 + $0x1e0] sm:$0xff]  }
 0xc5d   : > { %22709 = vmatprep.subr.bf16.mxu0 %v28273_v36 }
 0xc5f   : > { %22672 = vmatmul.mubr.bf16.vlgmr.msra.gmra.mrb[196].mxu0 %v23998_v55  ;;  %v24100_v55 = vld [vmem:[%s31997_s16 + $0xbc8] ss:$52 sps:$4 sm:$0xff]  }
 0xc60   : > { %22710 = vmatpush3.bf16.msra.mxu0 %v28273_v36  ;;  %22675 = vmatprep.mubr.bf16.mxu0 %v23999_v10  ;;  %v28545_v36 = vpop.permute.xlu0 %10262 }
 0xc61   : > { %22711 = vmatprep.subr.bf16.mxu0 %v28267_v58 }
 0xc64   : > { %22712 = vmatpush3.bf16.msra.mxu0 %v28267_v58  ;;  %v24002_v58 = vld [vmem:[%s31989_s8 + $0x1e8] sm:$0xff]  }
 0xc65   : > { %22713 = vmatprep.subr.bf16.mxu0 %v28287_v25 }
 0xc67   : > { %22676 = vmatmul.mubr.bf16.gmra.mrb[200].mxu0 %v24000_v21 }
 0xc68   : > { %22714 = vmatpush3.bf16.msra.mxu0 %v28287_v25  ;;  %22679 = vmatprep.mubr.bf16.mxu0 %v24001_v6  ;;  %v28558_v25 = vpop.permute.xlu0 %10272 }
 0xc69   : > { %22715 = vmatprep.subr.bf16.mxu0 %v28281_v47 }
 0xc6c   : > { %22716 = vmatpush3.bf16.msra.mxu0 %v28281_v47  ;;  %v24004_v47 = vld [vmem:[%s31989_s8 + $0x1f8] sm:$0xff]   ;;  %v28571_v0 = vpop.permute.xlu0 %10282 }
 0xc6d   : > { %22717 = vmatprep.subr.bf16.mxu0 %v28313_v43 }
 0xc6f   : > { %22680 = vmatmul.mubr.bf16.gmra.mrb[204].mxu0 %v24002_v58 }
 0xc70   : > { %22718 = vmatpush3.bf16.msra.mxu0 %v28313_v43  ;;  %22683 = vmatprep.mubr.bf16.mxu0 %v24003_v45  ;;  %v28575_v43 = vpop.permute.xlu1 %10297  ;;  %v28578_v48 = vpop.permute.xlu0 %10292 }
 0xc71   : > { %22719 = vmatprep.subr.bf16.mxu0 %v28307_v28 }
 0xc74   : > { %22720 = vmatpush3.bf16.msra.mxu0 %v28307_v28  ;;  %v24006_v28 = vld [vmem:[%s31989_s8 + $0x208] sm:$0xff]   ;;  %v28590_v13 = vpop.permute.xlu0 %10302 }
 0xc75   : > { %22721 = vmatprep.subr.bf16.mxu0 %v28339_v20 }
 0xc77   : > { %22684 = vmatmul.mubr.bf16.gmra.mrb[208].mxu0 %v24004_v47  ;;  %v28709_v47 = vsub.s32 1, %v28343_v35 }
 0xc78   : > { %22722 = vmatpush3.bf16.msra.mxu0 %v28339_v20  ;;  %22725 = vmatprep.mubr.bf16.mxu0 %v24005_v60  ;;  %v28588_v20 = vpop.permute.xlu1 %10307  ;;  %v28600_v8 = vpop.permute.xlu0 %10312  ;;  %v28712_v60 = vsub.s32 0, %v28343_v35 }
 0xc79   : > { %22723 = vmatprep.subr.bf16.mxu0 %v28333_v41 }
 0xc7c   : > { %22724 = vmatpush3.bf16.msra.mxu0 %v28333_v41  ;;  %v24015_v41 = vld [vmem:[%s31989_s8 + $0x220] sm:$0xff]   ;;  %v28598_v34 = vpop.permute.xlu1 %10317  ;;  %v28610_v16 = vpop.permute.xlu0 %10322 }
 0xc7d   : > { %22761 = vmatprep.subr.bf16.mxu0 %v25544_v32 }
 0xc7f   : > { %22726 = vmatmul.mubr.bf16.vlgmr.msra.gmra.mrb[196].mxu0 %v24006_v28  ;;  %v28715_v28 = vsub.s32 3, %v28343_v35 }
 0xc80   : > { %22729 = vmatprep.mubr.bf16.mxu0 %v24007_v1  ;;  %v28602_v19 = vpop.permute.xlu1 %10327  ;;  %v28614_v37 = vpop.permute.xlu0 %10332 }
 0xc84   : > { %v28612_v18 = vpop.permute.xlu1 %10337 }
 0xc87   : > { %22730 = vmatmul.mubr.bf16.gmra.mrb[200].mxu0 %v24008_v27 }
 0xc88   : > { %22733 = vmatprep.mubr.bf16.mxu0 %v24015_v41 }
 0xc8f   : > { %22734 = vmatmul.mubr.bf16.gmra.mrb[204].mxu0 %v24016_v57 }
 0xc90   : > { %22737 = vmatprep.mubr.bf16.mxu0 %v24023_v23 }
 0xc95   : > { %v10505_v61 = vpop.permute.xlu1 %10504 }
 0xc96   : > { %v10506_v22 = vrot.slane %v10505_v61, 7 }
 0xc97   : > { %v10459_v56 = vpop.permute.xlu0 %10458  ;;  %22738 = vmatmul.mubr.bf16.gmra.mrb[208].mxu0 %v24027_v24  ;;  %v24061_v24 = vld [vmem:[%s31997_s16 + $0x680] ss:$52 sps:$4 sm:$0xff]  }
 0xc98   : > { %v10460_v15 = vrot.slane %v10459_v56, 7  ;;  %22777 = vmatprep.mubr.msk.bf16.mxu0 %vm25545_vm5, %v25544_v32  ;;  %vm10507_vm5 = vcmask 523264  }
 0xc99   : > { %v10469_v63 = vpop.permute.xlu1 %10468  ;;  %v10508_v38 = vsel %vm10507_vm5, %v10506_v22, %v10505_v61  ;;  %v24078_v22 = vld [vmem:[%s31997_s16 + $0x88c] ss:$52 sps:$4 sm:$0xff]  }
 0xc9a   : > { %v10461_v54 = vsel %vm695_vm0, %v10460_v15, %v10459_v56  ;;  %v10470_v11 = vrot.slane %v10469_v63, 7  ;;  %vm28642_vm0 = vcmp.lt.s32.totalorder %v575_v2, 208  ;;  %v24066_v56 = vld [vmem:[%s31997_s16 + $0x6ec] ss:$52 sps:$4 sm:$0xff]  }
 0xc9b   : > { %10466 = vst.msk [vmem:[#allocation2 + $0x1] sm:$0x3] %vm10465_vm11, %v10461_v54  ;;  %v10523_v31 = vpop.permute.xlu0 %10522  ;;  %vm10512_vm8 = vmand %vm28637_vm1, %vm28642_vm0  ;;  %vm10601_vm11 = vcmp.lt.s32.totalorder %v575_v2, 132  ;;  %vm28675_vm1 = vcmp.ge.s32.totalorder %v575_v2, 40  ;;  %vm28680_vm0 = vcmp.lt.s32.totalorder %v575_v2, 76 }
 0xc9c   : > { %v10472_v46 = vsel %vm10471_vm12, %v10470_v11, %v10469_v63  ;;  %v10524_v4 = vrot.slane %v10523_v31, 7  ;;  %vm28663_vm12 = vcmp.ge.s32.totalorder %v575_v2, 4  ;;  %vm10602_vm15 = vmand %vm28657_vm10, %vm10601_vm11  ;;  %vm10671_vm11 = vcmp.ge.s32.totalorder %v575_v2, 20  ;;  %v24064_v54 = vld [vmem:[%s31997_s16 + $0x6e8] ss:$52 sps:$4 sm:$0xff]  }
 0xc9d   : > { %10477 = vst.msk [vmem:[#allocation2 + $0x2] sm:$0x3] %vm10476_vm13, %v10472_v46  ;;  %vm28668_vm13 = vcmp.lt.s32.totalorder %v575_v2, 40  ;;  %vm10625_vm5 = vmand %vm28675_vm1, %vm28680_vm0  ;;  %v24069_v11 = vld [vmem:[%s31997_s16 + $0x754] ss:$52 sps:$4 sm:$0xff]   ;;  %vm10841_vm0 = vcmp.lt.s32.totalorder %v575_v2, 9 }
 0xc9e   : > { %v10526_v50 = vsel %vm10525_vm7, %v10524_v4, %v10523_v31  ;;  %vm10657_vm7 = vcmp.lt.s32.totalorder %v575_v2, 148  ;;  %v24067_v46 = vld [vmem:[%s31997_s16 + $0x750] ss:$52 sps:$4 sm:$0xff]   ;;  %v24081_v4 = vld [vmem:[%s31997_s16 + $0x8f4] ss:$52 sps:$4 sm:$0xff]  }
 0xc9f   : > { %v10480_v42 = vpop.permute.xlu0 %10479 }
 0xca0   : > { %v10481_v53 = vrot.slane %v10480_v42, 7 }
 0xca2   : > { %v10483_v17 = vsel %vm10482_vm2, %v10481_v53, %v10480_v42  ;;  %vm10617_vm2 = vmand %vm28663_vm12, %vm28668_vm13  ;;  %vm10672_vm12 = vcmp.lt.s32.totalorder %v575_v2, 56  ;;  %v24076_v42 = vld [vmem:[%s31997_s16 + $0x888] ss:$52 sps:$4 sm:$0xff]   ;;  %v24079_v53 = vld [vmem:[%s31997_s16 + $0x8f0] ss:$52 sps:$4 sm:$0xff]  }
 0xca3   : > { %10488 = vst.msk [vmem:[#allocation2 + $0x3] sm:$0x3] %vm10487_vm6, %v10483_v17  ;;  %vm10656_vm6 = vcmp.ge.s32.totalorder %v575_v2, 112  ;;  %vm10673_vm13 = vmand %vm10671_vm11, %vm10672_vm12  ;;  %v24084_v17 = vld [vmem:[%s31997_s16 + $0x95c] ss:$52 sps:$4 sm:$0xff]   ;;  %vm10786_vm11 = vcmp.lt.s32.totalorder %v575_v2, 92 }
 0xca4   : > { %10513 = vst.msk [vmem:[#allocation2 + $0x4] sm:$0x3] %vm10512_vm8, %v10508_v38  ;;  %vm10653_vm8 = vcmask 916480   ;;  %vm10658_vm10 = vmand %vm10656_vm6, %vm10657_vm7  ;;  %v24082_v38 = vld [vmem:[%s31997_s16 + $0x958] ss:$52 sps:$4 sm:$0xff]   ;;  %vm10777_vm7 = vcmp.ge.s32.totalorder %v575_v2, 74 }
 0xca5   : > { %10531 = vst.msk [vmem:[#allocation2 + $0x5] sm:$0x3] %vm10530_vm9, %v10526_v50  ;;  %vm10633_vm9 = vmand %vm28689_vm3, %vm28694_vm4  ;;  %v24087_v50 = vld [vmem:[%s31997_s16 + $0x9c4] ss:$52 sps:$4 sm:$0xff]   ;;  %vm10755_vm3 = vcmp.lt.s32.totalorder %v575_v2, 65  ;;  %vm10769_vm4 = vcmp.ge.s32.totalorder %v575_v2, 65 }
 0xcb2   : > { %v10595_v59 = vpop.permute.xlu1 %10594 }
 0xcb3   : > { %v10596_v30 = vrot.slane %v10595_v59, 7 }
 0xcb4   : > { %v10613_v51 = vpop.permute.xlu0 %10612 }
 0xcb5   : > { %v10598_v14 = vsel %vm10597_vm14, %v10596_v30, %v10595_v59  ;;  %v24093_v59 = vld [vmem:[%s31997_s16 + $0xa94] ss:$52 sps:$4 sm:$0xff]   ;;  %v24091_v30 = vld [vmem:[%s31997_s16 + $0xa90] ss:$52 sps:$4 sm:$0xff]   ;;  %vm576_vm14 = vcmp.ge.s32.totalorder %v575_v2, 9 }
 0xcb6   : > { %10603 = vst.msk [vmem:[#allocation2 + $0x6] sm:$0x3] %vm10602_vm15, %v10598_v14  ;;  %v10651_v10 = vpop.permute.xlu1 %10650  ;;  %v24097_v14 = vld [vmem:[%s31997_s16 + $0xb60] ss:$52 sps:$4 sm:$0xff]   ;;  %vm29232_vm15 = vcmp.lt.s32.totalorder %v575_v2, 128 }
 0xcb7   : > { %10618 = vst.msk [vmem:[#allocation2 + $0x7] sm:$0x1] %vm10617_vm2, %v10613_v51  ;;  %v10652_v21 = vrot.slane %v10651_v10, 7  ;;  %v24099_v51 = vld [vmem:[%s31997_s16 + $0xb64] ss:$52 sps:$4 sm:$0xff]   ;;  %vm578_vm1 = vmand %vm576_vm14, %vm29232_vm15  ;;  %vm10754_vm2 = vcmp.ge.s32.totalorder %v575_v2, 56 }
 0xcb8   : > { %v10621_v6 = vpop.permute.xlu0 %10620  ;;  %579 = vst.msk [vmem:[#allocation2 + $0x9] sm:$0x1] %vm578_vm1, %v25544_v32  ;;  %vm10756_vm6 = vmand %vm10754_vm2, %vm10755_vm3  ;;  %vm10808_vm14 = vcmp.lt.s32.totalorder %v575_v2, 101  ;;  %vm10823_vm2 = vcmp.lt.s32.totalorder %v575_v2, 110 }
 0xcb9   : > { %10626 = vst.msk [vmem:[#allocation2 + $0x7] sm:$0x1] %vm10625_vm5, %v10621_v6  ;;  %v10654_v45 = vsel %vm10653_vm8, %v10652_v21, %v10651_v10  ;;  %v24105_v10 = vld [vmem:[%s31997_s16 + $0xc34] ss:$52 sps:$4 sm:$0xff]   ;;  %v24103_v21 = vld [vmem:[%s31997_s16 + $0xc30] ss:$52 sps:$4 sm:$0xff]  }
 0xcba   : > { %v10629_v58 = vpop.permute.xlu1 %10628  ;;  %v24108_v6 = vld [vmem:[%s31997_s16 + $0xc9c] ss:$52 sps:$4 sm:$0xff]   ;;  %vm10770_vm5 = vcmp.lt.s32.totalorder %v575_v2, 74  ;;  %vm10778_vm8 = vcmp.lt.s32.totalorder %v575_v2, 83 }
 0xcbb   : > { %10634 = vst.msk [vmem:[#allocation2 + $0x7] sm:$0x1] %vm10633_vm9, %v10629_v58  ;;  %v28829_v58 = vsub.s32 2, %v28343_v35  ;;  %vm10771_vm9 = vmand %vm10769_vm4, %vm10770_vm5  ;;  %vm10830_vm4 = vcmp.ge.s32.totalorder %v575_v2, 110  ;;  %vm10831_vm5 = vcmp.lt.s32.totalorder %v575_v2, 119 }
 0xcbc   : > { %10659 = vst.msk [vmem:[#allocation2 + $0x7] sm:$0x3] %vm10658_vm10, %v10654_v45  ;;  %v10870_v45 = vsub.s32 5, %v28343_v35  ;;  %vm10785_vm10 = vcmp.ge.s32.totalorder %v575_v2, 83  ;;  %vm10779_vm12 = vmand %vm10777_vm7, %vm10778_vm8  ;;  %vm10838_vm7 = vcmp.ge.s32.totalorder %v575_v2, 119 }
 0xcbd   : > { %vm10787_vm1 = vmand %vm10785_vm10, %vm10786_vm11 }
 0xcbe   : > { %vm10832_vm8 = vmand %vm10830_vm4, %vm10831_vm5 }
 0xcc3   : > { %v28717_v1 = vld [vmem:[#allocation2] sm:$0xff] }
 0xcc4   : > { %v10855_v27 = vrot.slane %v28717_v1, %v28709_v47  ;;  %v10851_v41 = vrot.slane %v28717_v1, %v28712_v60  ;;  %v10863_v57 = vrot.slane %v28717_v1, %v28715_v28 }
 0xcc6   : > { %v28725_v23 = vpack.c.bf16 %v10855_v27, %v10855_v27  ;;  %v28730_v61 = vpack.c.bf16 %v10851_v41, %v10851_v41  ;;  %v28736_v15 = vpack.c.bf16 %v10863_v57, %v10863_v57  ;;  %v24106_v27 = vld [vmem:[%s31997_s16 + $0xc98] ss:$52 sps:$4 sm:$0xff]   ;;  %v10859_v41 = vrot.slane %v28717_v1, %v28829_v58 }
 0xcc7   : > { %v24111_v57 = vld [vmem:[%s31997_s16 + $0xd04] ss:$52 sps:$4 sm:$0xff]  }
 0xcc8   : > { %17409 = vmatprep.mubr.bf16.mxu1 %v28725_v23 }
 0xcc9   : > { %v28740_v63 = vpop.permute.xlu0 %10681  ;;  %17410 = vmatmul.mubr.bf16.vlgmr.msra.gmra.mrb[72].mxu1 %v28730_v61 }
 0xcca   : > { %17419 = vmatpush1.bf16.msra.mxu1 %v24061_v24  ;;  %17450 = vmatprep.mubr.bf16.mxu1 %v28736_v15  ;;  %v10871_v24 = vrot.slane %v28717_v1, %v10870_v45 }
 0xccb   : > { %17420 = vmatprep.subr.bf16.mxu1 %v24066_v56  ;;  %v24109_v56 = vld [vmem:[%s31997_s16 + $0xd00] ss:$52 sps:$4 sm:$0xff]  }
 0xccd   : > { %v10669_v31 = vpop.permute.xlu0 %10668 }
 0xcce   : > { %10674 = vst.msk [vmem:[#allocation2 + $0x8] sm:$0x1] %vm10673_vm13, %v10669_v31  ;;  %17421 = vmatpush1.bf16.msra.mxu1 %v24064_v54  ;;  %v28846_v54 = vpack.c.bf16 %v10859_v41, %v10859_v41  ;;  %v28851_v31 = vpack.c.bf16 %v10871_v24, %v10871_v24  ;;  %v24156_v41 = vld [vmem:[%s31997_s16 + $0x131c] ss:$52 sps:$4 sm:$0xff]   ;;  %v10878_v24 = vsub.s32 7, %v28343_v35  ;;  %vm10807_vm13 = vcmp.ge.s32.totalorder %v575_v2, 92 }
 0xccf   : > { %17422 = vmatprep.subr.bf16.mxu1 %v24069_v11  ;;  %v24114_v11 = vld [vmem:[%s31997_s16 + $0xd6c] ss:$52 sps:$4 sm:$0xff]   ;;  %vm10809_vm3 = vmand %vm10807_vm13, %vm10808_vm14 }
 0xcd2   : > { %17423 = vmatpush1.bf16.msra.mxu1 %v24067_v46  ;;  %v24112_v46 = vld [vmem:[%s31997_s16 + $0xd68] ss:$52 sps:$4 sm:$0xff]  }
 0xcd3   : > { %17424 = vmatprep.subr.bf16.mxu1 %v24072_v52  ;;  %v24117_v52 = vld [vmem:[%s31997_s16 + $0xdd4] ss:$52 sps:$4 sm:$0xff]  }
 0xcd6   : > { %17425 = vmatpush1.bf16.msra.mxu1 %v24070_v29  ;;  %v24115_v29 = vld [vmem:[%s31997_s16 + $0xdd0] ss:$52 sps:$4 sm:$0xff]  }
 0xcd7   : > { %17426 = vmatprep.subr.bf16.mxu1 %v24075_v44  ;;  %v24120_v44 = vld [vmem:[%s31997_s16 + $0xe3c] ss:$52 sps:$4 sm:$0xff]  }
 0xcda   : > { %17427 = vmatpush1.bf16.msra.mxu1 %v24073_v33  ;;  %v24118_v33 = vld [vmem:[%s31997_s16 + $0xe38] ss:$52 sps:$4 sm:$0xff]  }
 0xcdb   : > { %17428 = vmatprep.subr.bf16.mxu1 %v24078_v22  ;;  %v24123_v22 = vld [vmem:[%s31997_s16 + $0xea4] ss:$52 sps:$4 sm:$0xff]  }
 0xcde   : > { %17429 = vmatpush1.bf16.msra.mxu1 %v24076_v42  ;;  %v24121_v42 = vld [vmem:[%s31997_s16 + $0xea0] ss:$52 sps:$4 sm:$0xff]  }
 0xcdf   : > { %17430 = vmatprep.subr.bf16.mxu1 %v24081_v4  ;;  %v24126_v4 = vld [vmem:[%s31997_s16 + $0xf0c] ss:$52 sps:$4 sm:$0xff]  }
 0xce2   : > { %17431 = vmatpush1.bf16.msra.mxu1 %v24079_v53  ;;  %v24124_v53 = vld [vmem:[%s31997_s16 + $0xf08] ss:$52 sps:$4 sm:$0xff]  }
 0xce3   : > { %17432 = vmatprep.subr.bf16.mxu1 %v24084_v17  ;;  %v24129_v17 = vld [vmem:[%s31997_s16 + $0xf74] ss:$52 sps:$4 sm:$0xff]  }
 0xce6   : > { %17433 = vmatpush1.bf16.msra.mxu1 %v24082_v38  ;;  %v24127_v38 = vld [vmem:[%s31997_s16 + $0xf70] ss:$52 sps:$4 sm:$0xff]  }
 0xce7   : > { %17434 = vmatprep.subr.bf16.mxu1 %v24087_v50  ;;  %v24132_v50 = vld [vmem:[%s31997_s16 + $0xfdc] ss:$52 sps:$4 sm:$0xff]  }
 0xcea   : > { %17435 = vmatpush1.bf16.msra.mxu1 %v24085_v12  ;;  %v24130_v12 = vld [vmem:[%s31997_s16 + $0xfd8] ss:$52 sps:$4 sm:$0xff]  }
 0xceb   : > { %17436 = vmatprep.subr.bf16.mxu1 %v24090_v5  ;;  %v24135_v5 = vld [vmem:[%s31997_s16 + $0x1044] ss:$52 sps:$4 sm:$0xff]  }
 0xcee   : > { %17437 = vmatpush1.bf16.msra.mxu1 %v24088_v26  ;;  %v24133_v26 = vld [vmem:[%s31997_s16 + $0x1040] ss:$52 sps:$4 sm:$0xff]  }
 0xcef   : > { %17438 = vmatprep.subr.bf16.mxu1 %v24093_v59  ;;  %v24138_v59 = vld [vmem:[%s31997_s16 + $0x10ac] ss:$52 sps:$4 sm:$0xff]  }
 0xcf2   : > { %17439 = vmatpush1.bf16.msra.mxu1 %v24091_v30  ;;  %v24136_v30 = vld [vmem:[%s31997_s16 + $0x10a8] ss:$52 sps:$4 sm:$0xff]  }
 0xcf3   : > { %17440 = vmatprep.subr.bf16.mxu1 %v24096_v62  ;;  %v24141_v62 = vld [vmem:[%s31997_s16 + $0x1114] ss:$52 sps:$4 sm:$0xff]  }
 0xcf6   : > { %17441 = vmatpush1.bf16.msra.mxu1 %v24094_v7  ;;  %v24139_v7 = vld [vmem:[%s31997_s16 + $0x1110] ss:$52 sps:$4 sm:$0xff]  }
 0xcf7   : > { %17442 = vmatprep.subr.bf16.mxu1 %v24099_v51  ;;  %v24144_v51 = vld [vmem:[%s31997_s16 + $0x117c] ss:$52 sps:$4 sm:$0xff]  }
 0xcfa   : > { %17443 = vmatpush1.bf16.msra.mxu1 %v24097_v14  ;;  %v24142_v14 = vld [vmem:[%s31997_s16 + $0x1178] ss:$52 sps:$4 sm:$0xff]  }
 0xcfb   : > { %17444 = vmatprep.subr.bf16.mxu1 %v24102_v3  ;;  %v24147_v3 = vld [vmem:[%s31997_s16 + $0x11e4] ss:$52 sps:$4 sm:$0xff]  }
 0xcfe   : > { %17445 = vmatpush1.bf16.msra.mxu1 %v24100_v55  ;;  %v24145_v55 = vld [vmem:[%s31997_s16 + $0x11e0] ss:$52 sps:$4 sm:$0xff]  }
 0xcff   : > { %17446 = vmatprep.subr.bf16.mxu1 %v24105_v10  ;;  %v24150_v10 = vld [vmem:[%s31997_s16 + $0x124c] ss:$52 sps:$4 sm:$0xff]  }
 0xd02   : > { %17447 = vmatpush1.bf16.msra.mxu1 %v24103_v21  ;;  %v24148_v21 = vld [vmem:[%s31997_s16 + $0x1248] ss:$52 sps:$4 sm:$0xff]  }
 0xd03   : > { %17448 = vmatprep.subr.bf16.mxu1 %v24108_v6  ;;  %v24153_v6 = vld [vmem:[%s31997_s16 + $0x12b4] ss:$52 sps:$4 sm:$0xff]  }
 0xd06   : > { %17449 = vmatpush1.bf16.msra.mxu1 %v24106_v27  ;;  %v24151_v27 = vld [vmem:[%s31997_s16 + $0x12b0] ss:$52 sps:$4 sm:$0xff]  }
 0xd07   : > { %17459 = vmatprep.subr.bf16.mxu1 %v24111_v57  ;;  %v28940_v57 = vsub.s32 4, %v28343_v35 }
 0xd09   : > { %17451 = vmatmul.mubr.bf16.vlgmr.msra.gmra.mrb[72].mxu1 %v28846_v54 }
 0xd0a   : > { %17460 = vmatpush1.bf16.msra.mxu1 %v24109_v56  ;;  %17491 = vmatprep.mubr.bf16.mxu1 %v28851_v31  ;;  %v24154_v56 = vld [vmem:[%s31997_s16 + $0x1318] ss:$52 sps:$4 sm:$0xff]  }
 0xd0b   : > { %17461 = vmatprep.subr.bf16.mxu1 %v24114_v11  ;;  %v10867_v11 = vrot.slane %v28717_v1, %v28940_v57 }
 0xd0e   : > { %17462 = vmatpush1.bf16.msra.mxu1 %v24112_v46  ;;  %v24159_v46 = vld [vmem:[%s31997_s16 + $0x1384] ss:$52 sps:$4 sm:$0xff]  }
 0xd0f   : > { %17463 = vmatprep.subr.bf16.mxu1 %v24117_v52  ;;  %v10879_v52 = vrot.slane %v28717_v1, %v10878_v24 }
 0xd12   : > { %17464 = vmatpush1.bf16.msra.mxu1 %v24115_v29  ;;  %v24157_v29 = vld [vmem:[%s31997_s16 + $0x1380] ss:$52 sps:$4 sm:$0xff]  }
 0xd13   : > { %17465 = vmatprep.subr.bf16.mxu1 %v24120_v44  ;;  %v28957_v44 = vpack.c.bf16 %v10867_v11, %v10867_v11 }
 0xd16   : > { %17466 = vmatpush1.bf16.msra.mxu1 %v24118_v33  ;;  %v24162_v33 = vld [vmem:[%s31997_s16 + $0x13ec] ss:$52 sps:$4 sm:$0xff]  }
 0xd17   : > { %17467 = vmatprep.subr.bf16.mxu1 %v24123_v22  ;;  %v28962_v22 = vpack.c.bf16 %v10879_v52, %v10879_v52 }
 0xd1a   : > { %17468 = vmatpush1.bf16.msra.mxu1 %v24121_v42  ;;  %v24160_v42 = vld [vmem:[%s31997_s16 + $0x13e8] ss:$52 sps:$4 sm:$0xff]  }
 0xd1b   : > { %17469 = vmatprep.subr.bf16.mxu1 %v24126_v4  ;;  %v24165_v4 = vld [vmem:[%s31997_s16 + $0x1454] ss:$52 sps:$4 sm:$0xff]  }
 0xd1e   : > { %17470 = vmatpush1.bf16.msra.mxu1 %v24124_v53  ;;  %v24163_v53 = vld [vmem:[%s31997_s16 + $0x1450] ss:$52 sps:$4 sm:$0xff]  }
 0xd1f   : > { %17471 = vmatprep.subr.bf16.mxu1 %v24129_v17  ;;  %v24168_v17 = vld [vmem:[%s31997_s16 + $0x14bc] ss:$52 sps:$4 sm:$0xff]  }
 0xd22   : > { %17472 = vmatpush1.bf16.msra.mxu1 %v24127_v38 }
 0xd23   : > { %17473 = vmatprep.subr.bf16.mxu1 %v24132_v50  ;;  %v24166_v50 = vld [vmem:[%s31997_s16 + $0x14b8] ss:$52 sps:$4 sm:$0xff]  }
 0xd26   : > { %17474 = vmatpush1.bf16.msra.mxu1 %v24130_v12 }
 0xd27   : > { %17475 = vmatprep.subr.bf16.mxu1 %v24135_v5 }
 0xd2a   : > { %17476 = vmatpush1.bf16.msra.mxu1 %v24133_v26  ;;  %v24171_v26 = vld [vmem:[%s31997_s16 + $0x1524] ss:$52 sps:$4 sm:$0xff]  }
 0xd2b   : > { %17477 = vmatprep.subr.bf16.mxu1 %v24138_v59 }
 0xd2e   : > { %17478 = vmatpush1.bf16.msra.mxu1 %v24136_v30 }
 0xd2f   : > { %17479 = vmatprep.subr.bf16.mxu1 %v24141_v62 }
 0xd32   : > { %17480 = vmatpush1.bf16.msra.mxu1 %v24139_v7 }
 0xd33   : > { %17481 = vmatprep.subr.bf16.mxu1 %v24144_v51 }
 0xd36   : > { %17482 = vmatpush1.bf16.msra.mxu1 %v24142_v14  ;;  %v24169_v14 = vld [vmem:[%s31997_s16 + $0x1520] ss:$52 sps:$4 sm:$0xff]  }
 0xd37   : > { %17483 = vmatprep.subr.bf16.mxu1 %v24147_v3 }
 0xd3a   : > { %17484 = vmatpush1.bf16.msra.mxu1 %v24145_v55  ;;  %v24174_v55 = vld [vmem:[%s31997_s16 + $0x158c] ss:$52 sps:$4 sm:$0xff]  }
 0xd3b   : > { %17485 = vmatprep.subr.bf16.mxu1 %v24150_v10 }
 0xd3e   : > { %17486 = vmatpush1.bf16.msra.mxu1 %v24148_v21 }
 0xd3f   : > { %17487 = vmatprep.subr.bf16.mxu1 %v24153_v6 }
 0xd42   : > { %17488 = vmatpush1.bf16.msra.mxu1 %v24151_v27 }
 0xd43   : > { %17489 = vmatprep.subr.bf16.mxu1 %v24156_v41 }
 0xd46   : > { %17490 = vmatpush1.bf16.msra.mxu1 %v24154_v56  ;;  %v24177_v56 = vld [vmem:[%s31997_s16 + $0x15f4] ss:$52 sps:$4 sm:$0xff]  }
 0xd47   : > { %17500 = vmatprep.subr.bf16.mxu1 %v24159_v46 }
 0xd49   : > { %17492 = vmatmul.mubr.bf16.vlgmr.msra.gmra.mrb[72].mxu1 %v28957_v44 }
 0xd4a   : > { %17501 = vmatpush1.bf16.msra.mxu1 %v24157_v29  ;;  %17532 = vmatprep.mubr.bf16.mxu1 %v28962_v22 }
 0xd4b   : > { %17502 = vmatprep.subr.bf16.mxu1 %v24162_v33 }
 0xd4e   : > { %17503 = vmatpush1.bf16.msra.mxu1 %v24160_v42 }
 0xd4f   : > { %17504 = vmatprep.subr.bf16.mxu1 %v24165_v4 }
 0xd52   : > { %17505 = vmatpush1.bf16.msra.mxu1 %v24163_v53  ;;  %v22727_v38 = vpop.f32.mrb[196].mxu0 }
 0xd53   : > { %v10342_v12 = vadd.f32 %v22727_v38, %v28558_v25  ;;  %v10165_v5 = vpop.f32.mrb[197].mxu0  ;;  %17506 = vmatprep.subr.bf16.mxu1 %v24168_v17 }
 0xd54   : > { %v10340_v59 = vadd.f32 %v28545_v36, %v10165_v5  ;;  %v22728_v30 = vpop.f32.mrb[198].mxu0 }
 0xd55   : > { %v10343_v62 = vadd.f32 %v22728_v30, %v28555_v49  ;;  %v10168_v7 = vpop.f32.mrb[199].mxu0  ;;  %v10358_v25 = vmax.f32 %v10342_v12, 0.0 }
 0xd56   : > { %17507 = vmatpush1.bf16.msra.mxu1 %v24166_v50  ;;  %v10341_v51 = vadd.f32 %v28542_v39, %v10168_v7  ;;  %v10356_v10 = vmax.f32 %v10340_v59, 0.0  ;;  %v24172_v39 = vld [vmem:[%s31997_s16 + $0x1588] ss:$52 sps:$4 sm:$0xff]   ;;  %v24178_v50 = vld [vmem:[%s31997_s16 + $0x1658] ss:$52 sps:$4 sm:$0xff]  }
 0xd57   : > { %v10359_v3 = vmax.f32 %v10343_v62, 0.0  ;;  %17508 = vmatprep.subr.bf16.mxu1 %v24171_v26  ;;  %v24183_v26 = vld [vmem:[%s31997_s16 + $0x16c4] ss:$52 sps:$4 sm:$0xff]  }
 0xd58   : > { %v10357_v36 = vmax.f32 %v10341_v51, 0.0 }
 0xd59   : > { %v10373_v21 = vpack.c.bf16 %v10359_v3, %v10358_v25 }
 0xd5a   : > { %v10372_v6 = vpack.c.bf16 %v10357_v36, %v10356_v10  ;;  %17509 = vmatpush1.bf16.msra.mxu1 %v24169_v14  ;;  %v22731_v49 = vpop.f32.mrb[200].mxu0  ;;  %v24184_v36 = vld [vmem:[%s31997_s16 + $0x1728] ss:$52 sps:$4 sm:$0xff]  }
 0xd5b   : > { %v10346_v27 = vadd.f32 %v22731_v49, %v28578_v48  ;;  %v10181_v41 = vpop.f32.mrb[201].mxu0  ;;  %17510 = vmatprep.subr.bf16.mxu1 %v24174_v55  ;;  %v24175_v48 = vld [vmem:[%s31997_s16 + $0x15f0] ss:$52 sps:$4 sm:$0xff]   ;;  %v24189_v49 = vld [vmem:[%s31997_s16 + $0x1794] ss:$52 sps:$4 sm:$0xff]  }
 0xd5c   : > { %v10344_v11 = vadd.f32 %v28571_v0, %v10181_v41  ;;  %v22732_v46 = vpop.f32.mrb[202].mxu0  ;;  %22762 = vmatpush3.bf16.msra.mxu0 %v10372_v6  ;;  %v24180_v0 = vld [vmem:[%s31997_s16 + $0x165c] ss:$52 sps:$4 sm:$0xff]  }
 0xd5d   : > { %v10347_v52 = vadd.f32 %v22732_v46, %v28575_v43  ;;  %v10184_v29 = vpop.f32.mrb[203].mxu0  ;;  %22763 = vmatprep.subr.bf16.mxu0 %v25544_v32  ;;  %v10362_v42 = vmax.f32 %v10346_v27, 0.0 }
 0xd5e   : > { %17511 = vmatpush1.bf16.msra.mxu1 %v24172_v39  ;;  %v10345_v33 = vadd.f32 %v28562_v9, %v10184_v29  ;;  %v10360_v53 = vmax.f32 %v10344_v11, 0.0 }
 0xd5f   : > { %v10363_v4 = vmax.f32 %v10347_v52, 0.0  ;;  %17512 = vmatprep.subr.bf16.mxu1 %v24177_v56 }
 0xd60   : > { %v10361_v17 = vmax.f32 %v10345_v33, 0.0  ;;  %22764 = vmatpush3.bf16.msra.mxu0 %v10373_v21 }
 0xd61   : > { %v10375_v43 = vpack.c.bf16 %v10363_v4, %v10362_v42  ;;  %22765 = vmatprep.subr.bf16.mxu0 %v25544_v32  ;;  %v24195_v42 = vld [vmem:[%s31997_s16 + $0x1864] ss:$52 sps:$4 sm:$0xff]   ;;  %v24202_v4 = vld [vmem:[%s31997_s16 + $0xc] ss:$52 sps:$4 sm:$0xff]  }
 0xd62   : > { %v10374_v38 = vpack.c.bf16 %v10361_v17, %v10360_v53  ;;  %17513 = vmatpush1.bf16.msra.mxu1 %v24175_v48  ;;  %v22735_v9 = vpop.f32.mrb[204].mxu0  ;;  %v24196_v53 = vld [vmem:[%s31995_s14] sm:$0x1f]  }
 0xd63   : > { %v10350_v12 = vadd.f32 %v22735_v9, %v28600_v8  ;;  %v10197_v5 = vpop.f32.mrb[205].mxu0  ;;  %17514 = vmatprep.subr.bf16.mxu1 %v24180_v0  ;;  %v24181_v8 = vld [vmem:[%s31997_s16 + $0x16c0] ss:$52 sps:$4 sm:$0xff]   ;;  %v24197_v9 = vld [vmem:[%s31997_s16 + $0x18c8] ss:$52 sps:$4 sm:$0xff]  }
 0xd64   : > { %v10348_v59 = vadd.f32 %v28590_v13, %v10197_v5  ;;  %v22736_v30 = vpop.f32.mrb[206].mxu0  ;;  %22766 = vmatpush3.bf16.msra.mxu0 %v10374_v38  ;;  %v24186_v13 = vld [vmem:[%s31997_s16 + $0x172c] ss:$52 sps:$4 sm:$0xff]   ;;  %v24208_v38 = vld [vmem:[%s31997_s16 + $0x74] ss:$52 sps:$4 sm:$0xff]  }
 0xd65   : > { %v10351_v62 = vadd.f32 %v22736_v30, %v28598_v34  ;;  %v10200_v7 = vpop.f32.mrb[207].mxu0  ;;  %22767 = vmatprep.subr.bf16.mxu0 %v25544_v32  ;;  %v10366_v14 = vmax.f32 %v10350_v12, 0.0  ;;  %v24193_v0 = vld [vmem:[%s31997_s16 + $0x1860] ss:$52 sps:$4 sm:$0xff]   ;;  %v24206_v12 = vld [vmem:[%s31997_s16 + $0x70] ss:$52 sps:$4 sm:$0xff]  }
 0xd66   : > { %17515 = vmatpush1.bf16.msra.mxu1 %v24178_v50  ;;  %v10349_v51 = vadd.f32 %v28588_v20, %v10200_v7  ;;  %v10364_v3 = vmax.f32 %v10348_v59, 0.0  ;;  %v24199_v17 = vld [vmem:[%s31997_s16 + $0x18cc] ss:$52 sps:$4 sm:$0xff]   ;;  %v24205_v50 = vld [vmem:[%s31997_s16 + $0x1934] ss:$52 sps:$4 sm:$0xff]   ;;  %v10874_v30 = vsub.s32 6, %v28343_v35 }
 0xd67   : > { %v10367_v25 = vmax.f32 %v10351_v62, 0.0  ;;  %17516 = vmatprep.subr.bf16.mxu1 %v24183_v26  ;;  %v24214_v5 = vld [vmem:[%s31997_s16 + $0xdc] ss:$52 sps:$4 sm:$0xff]   ;;  %v24212_v62 = vld [vmem:[%s31997_s16 + $0xd8] ss:$52 sps:$4 sm:$0xff]  }
 0xd68   : > { %v10365_v55 = vmax.f32 %v10349_v51, 0.0  ;;  %22768 = vmatpush3.bf16.msra.mxu0 %v10375_v43  ;;  %v24200_v43 = vld [vmem:[%s31997_s16 + $0x8] ss:$52 sps:$4 sm:$0xff]   ;;  %v24203_v26 = vld [vmem:[%s31997_s16 + $0x1930] ss:$52 sps:$4 sm:$0xff]  }
 0xd69   : > { %v10377_v34 = vpack.c.bf16 %v10367_v25, %v10366_v14  ;;  %22769 = vmatprep.subr.bf16.mxu0 %v25544_v32  ;;  %v24211_v59 = vld [vmem:[%s31997_s16 + $0x199c] ss:$52 sps:$4 sm:$0xff]   ;;  %v24217_v7 = vld [vmem:[%s31997_s16 + $0x144] ss:$52 sps:$4 sm:$0xff]   ;;  %v24215_v14 = vld [vmem:[%s31997_s16 + $0x140] ss:$52 sps:$4 sm:$0xff]  }
 0xd6a   : > { %v10376_v10 = vpack.c.bf16 %v10365_v55, %v10364_v3  ;;  %17517 = vmatpush1.bf16.msra.mxu1 %v24181_v8  ;;  %v22739_v20 = vpop.f32.mrb[208].mxu0  ;;  %v24209_v51 = vld [vmem:[%s31997_s16 + $0x1998] ss:$52 sps:$4 sm:$0xff]   ;;  %v10875_v8 = vrot.slane %v28717_v1, %v10874_v30  ;;  %v24218_v3 = vld [vmem:[%s31997_s16 + $0x1a8] ss:$52 sps:$4 sm:$0xff]  }
 0xd6b   : > { %v10354_v21 = vadd.f32 %v22739_v20, %v28614_v37  ;;  %v10213_v6 = vpop.f32.mrb[209].mxu0  ;;  %17518 = vmatprep.subr.bf16.mxu1 %v24186_v13  ;;  %v24187_v37 = vld [vmem:[%s31997_s16 + $0x1790] ss:$52 sps:$4 sm:$0xff]   ;;  %v24220_v25 = vld [vmem:[%s31997_s16 + $0x1ac] ss:$52 sps:$4 sm:$0xff]  }
 0xd6c   : > { %v10352_v39 = vadd.f32 %v28610_v16, %v10213_v6  ;;  %v22740_v27 = vpop.f32.mrb[210].mxu0  ;;  %22770 = vmatpush3.bf16.msra.mxu0 %v10376_v10  ;;  %v24192_v16 = vld [vmem:[%s31997_s16 + $0x17fc] ss:$52 sps:$4 sm:$0xff]   ;;  %v29111_v13 = vpack.c.bf16 %v10875_v8, %v10875_v8  ;;  %v24223_v1 = vld [vmem:[%s31997_s16 + $0x214] ss:$52 sps:$4 sm:$0xff]  }
 0xd6d   : > { %v10355_v41 = vadd.f32 %v22740_v27, %v28612_v18  ;;  %v10216_v56 = vpop.f32.mrb[211].mxu0  ;;  %22771 = vmatprep.subr.bf16.mxu0 %v25544_v32  ;;  %v10370_v46 = vmax.f32 %v10354_v21, 0.0  ;;  %v24221_v55 = vld [vmem:[%s31997_s16 + $0x210] ss:$52 sps:$4 sm:$0xff]   ;;  %v24224_v10 = vld [vmem:[%s31997_s16 + $0x278] ss:$52 sps:$4 sm:$0xff]  }
 0xd6e   : > { %17519 = vmatpush1.bf16.msra.mxu1 %v24184_v36  ;;  %v10353_v11 = vadd.f32 %v28602_v19, %v10216_v56  ;;  %v10368_v29 = vmax.f32 %v10352_v39, 0.0  ;;  %v24190_v19 = vld [vmem:[%s31997_s16 + $0x17f8] ss:$52 sps:$4 sm:$0xff]   ;;  %v24227_v36 = vld [vmem:[%s31997_s16 + $0x2e0] ss:$52 sps:$4 sm:$0xff]  }
 0xd6f   : > { %v10371_v52 = vmax.f32 %v10355_v41, 0.0  ;;  %17520 = vmatprep.subr.bf16.mxu1 %v24189_v49  ;;  %v24229_v20 = vld [vmem:[%s31997_s16 + $0x2e4] ss:$52 sps:$4 sm:$0xff]   ;;  %v24232_v21 = vld [vmem:[%s31997_s16 + $0x34c] ss:$52 sps:$4 sm:$0xff]  }
 0xd70   : > { %v10369_v33 = vmax.f32 %v10353_v11, 0.0  ;;  %22772 = vmatpush3.bf16.msra.mxu0 %v10377_v34  ;;  %v24226_v34 = vld [vmem:[%s31997_s16 + $0x27c] ss:$52 sps:$4 sm:$0xff]   ;;  %v24235_v49 = vld [vmem:[%s31997_s16 + $0x3b4] ss:$52 sps:$4 sm:$0xff]  }
 0xd71   : > { %v10379_v18 = vpack.c.bf16 %v10371_v52, %v10370_v46  ;;  %22773 = vmatprep.subr.bf16.mxu0 %v25544_v32  ;;  %v24230_v6 = vld [vmem:[%s31997_s16 + $0x348] ss:$52 sps:$4 sm:$0xff]   ;;  %v24233_v39 = vld [vmem:[%s31997_s16 + $0x3b0] ss:$52 sps:$4 sm:$0xff]   ;;  %v24236_v41 = vld [vmem:[%s31997_s16 + $0x418] ss:$52 sps:$4 sm:$0xff]  }
 0xd72   : > { %v10378_v48 = vpack.c.bf16 %v10369_v33, %v10368_v29  ;;  %17521 = vmatpush1.bf16.msra.mxu1 %v24187_v37  ;;  %v24238_v27 = vld [vmem:[%s31997_s16 + $0x41c] ss:$52 sps:$4 sm:$0xff]   ;;  %v24241_v56 = vld [vmem:[%s31997_s16 + $0x484] ss:$52 sps:$4 sm:$0xff]   ;;  %v24239_v11 = vld [vmem:[%s31997_s16 + $0x480] ss:$52 sps:$4 sm:$0xff]  }
 0xd73   : > { %17522 = vmatprep.subr.bf16.mxu1 %v24192_v16  ;;  %v24244_v37 = vld [vmem:[%s31997_s16 + $0x4ec] ss:$52 sps:$4 sm:$0xff]   ;;  %v24242_v46 = vld [vmem:[%s31997_s16 + $0x4e8] ss:$52 sps:$4 sm:$0xff]   ;;  %v24245_v16 = vld [vmem:[%s31997_s16 + $0x550] ss:$52 sps:$4 sm:$0xff]  }
 0xd74   : > { %22774 = vmatpush3.bf16.msra.mxu0 %v10378_v48  ;;  %v24247_v52 = vld [vmem:[%s31997_s16 + $0x554] ss:$52 sps:$4 sm:$0xff]   ;;  %v24250_v29 = vld [vmem:[%s31997_s16 + $0x5bc] ss:$52 sps:$4 sm:$0xff]   ;;  %v24248_v33 = vld [vmem:[%s31997_s16 + $0x5b8] ss:$52 sps:$4 sm:$0xff]  }
 0xd75   : > { %22775 = vmatprep.subr.bf16.mxu0 %v25544_v32  ;;  %v24251_v48 = vld [vmem:[%s31997_s16 + $0x620] ss:$52 sps:$4 sm:$0xff]   ;;  %v24281_v32 = vld [vmem:[%s31997_s16 + $0xa30] ss:$52 sps:$4 sm:$0xff]  }
 0xd76   : > { %17523 = vmatpush1.bf16.msra.mxu1 %v24190_v19  ;;  %v24256_v19 = vld [vmem:[%s31997_s16 + $0x68c] ss:$52 sps:$4 sm:$0xff]  }
 0xd77   : > { %17524 = vmatprep.subr.bf16.mxu1 %v24195_v42  ;;  %v24254_v42 = vld [vmem:[%s31997_s16 + $0x688] ss:$52 sps:$4 sm:$0xff]   ;;  %v24280_v8 = vld [vmem:[%s31997_s16 + $0x9cc] ss:$52 sps:$4 sm:$0xff]  }
 0xd78   : > { %22776 = vmatpush3.bf16.msra.mxu0 %v10379_v18  ;;  %v24253_v18 = vld [vmem:[%s31997_s16 + $0x624] ss:$52 sps:$4 sm:$0xff]  }
 0xd79   : > { %17582 = vmatprep.subr.bf16.mxu0 %v24202_v4  ;;  %v24259_v4 = vld [vmem:[%s31997_s16 + $0x6f4] ss:$52 sps:$4 sm:$0xff]  }
 0xd7a   : > { %17525 = vmatpush1.bf16.msra.mxu1 %v24193_v0  ;;  %v24257_v0 = vld [vmem:[%s31997_s16 + $0x6f0] ss:$52 sps:$4 sm:$0xff]  }
 0xd7b   : > { %22778 = vmatmul.mubr.bf16.vlgmr.msra.gmra.mrb[212].mxu0 %v24196_v53  ;;  %17526 = vmatprep.subr.bf16.mxu1 %v24199_v17  ;;  %v24262_v53 = vld [vmem:[%s31997_s16 + $0x75c] ss:$52 sps:$4 sm:$0xff]   ;;  %v24260_v17 = vld [vmem:[%s31997_s16 + $0x758] ss:$52 sps:$4 sm:$0xff]  }
 0xd7c   : > { %17583 = vmatpush1.bf16.msra.mxu0 %v24200_v43  ;;  %17614 = vmatprep.mubr.bf16.mxu0 %v28725_v23  ;;  %v24265_v43 = vld [vmem:[%s31997_s16 + $0x7c4] ss:$52 sps:$4 sm:$0xff]  }
 0xd7d   : > { %17584 = vmatprep.subr.bf16.mxu0 %v24208_v38  ;;  %v24263_v38 = vld [vmem:[%s31997_s16 + $0x7c0] ss:$52 sps:$4 sm:$0xff]  }
 0xd7e   : > { %17527 = vmatpush1.bf16.msra.mxu1 %v24197_v9  ;;  %v24268_v9 = vld [vmem:[%s31997_s16 + $0x82c] ss:$52 sps:$4 sm:$0xff]  }
 0xd7f   : > { %17528 = vmatprep.subr.bf16.mxu1 %v24205_v50  ;;  %v24266_v50 = vld [vmem:[%s31997_s16 + $0x828] ss:$52 sps:$4 sm:$0xff]  }
 0xd80   : > { %17585 = vmatpush1.bf16.msra.mxu0 %v24206_v12  ;;  %v24271_v12 = vld [vmem:[%s31997_s16 + $0x894] ss:$52 sps:$4 sm:$0xff]  }
 0xd81   : > { %17586 = vmatprep.subr.bf16.mxu0 %v24214_v5  ;;  %v24269_v5 = vld [vmem:[%s31997_s16 + $0x890] ss:$52 sps:$4 sm:$0xff]  }
 0xd82   : > { %17529 = vmatpush1.bf16.msra.mxu1 %v24203_v26  ;;  %v24274_v26 = vld [vmem:[%s31997_s16 + $0x8fc] ss:$52 sps:$4 sm:$0xff]  }
 0xd83   : > { %17530 = vmatprep.subr.bf16.mxu1 %v24211_v59  ;;  %v24272_v59 = vld [vmem:[%s31997_s16 + $0x8f8] ss:$52 sps:$4 sm:$0xff]  }
 0xd84   : > { %17587 = vmatpush1.bf16.msra.mxu0 %v24212_v62  ;;  %v24277_v62 = vld [vmem:[%s31997_s16 + $0x964] ss:$52 sps:$4 sm:$0xff]  }
 0xd85   : > { %17588 = vmatprep.subr.bf16.mxu0 %v24217_v7  ;;  %v24497_v7 = vld [vmem:[%s31997_s16 + $0x18] ss:$52 sps:$4 sm:$0xff]  }
 0xd86   : > { %17531 = vmatpush1.bf16.msra.mxu1 %v24209_v51  ;;  %v24275_v51 = vld [vmem:[%s31997_s16 + $0x960] ss:$52 sps:$4 sm:$0xff]  }
 0xd88   : > { %17589 = vmatpush1.bf16.msra.mxu0 %v24215_v14  ;;  %v24278_v14 = vld [vmem:[%s31997_s16 + $0x9c8] ss:$52 sps:$4 sm:$0xff]  }
 0xd89   : > { %17533 = vmatmul.mubr.bf16.vlgmr.msra.gmra.mrb[72].mxu1 %v29111_v13  ;;  %17590 = vmatprep.subr.bf16.mxu0 %v24220_v25  ;;  %v24283_v25 = vld [vmem:[%s31997_s16 + $0xa34] ss:$52 sps:$4 sm:$0xff]  }
 0xd8c   : > { %17591 = vmatpush1.bf16.msra.mxu0 %v24218_v3  ;;  %v24286_v3 = vld [vmem:[%s31997_s16 + $0xa9c] ss:$52 sps:$4 sm:$0xff]  }
 0xd8d   : > { %17592 = vmatprep.subr.bf16.mxu0 %v24223_v1  ;;  %v24284_v1 = vld [vmem:[%s31997_s16 + $0xa98] ss:$52 sps:$4 sm:$0xff]  }
 0xd90   : > { %17593 = vmatpush1.bf16.msra.mxu0 %v24221_v55  ;;  %v24289_v55 = vld [vmem:[%s31997_s16 + $0xb04] ss:$52 sps:$4 sm:$0xff]  }
 0xd91   : > { %17594 = vmatprep.subr.bf16.mxu0 %v24226_v34  ;;  %v24287_v34 = vld [vmem:[%s31997_s16 + $0xb00] ss:$52 sps:$4 sm:$0xff]  }
 0xd94   : > { %17595 = vmatpush1.bf16.msra.mxu0 %v24224_v10  ;;  %v24292_v10 = vld [vmem:[%s31997_s16 + $0xb6c] ss:$52 sps:$4 sm:$0xff]  }
 0xd95   : > { %17596 = vmatprep.subr.bf16.mxu0 %v24229_v20  ;;  %v24290_v20 = vld [vmem:[%s31997_s16 + $0xb68] ss:$52 sps:$4 sm:$0xff]  }
 0xd98   : > { %17597 = vmatpush1.bf16.msra.mxu0 %v24227_v36  ;;  %v24295_v36 = vld [vmem:[%s31997_s16 + $0xbd4] ss:$52 sps:$4 sm:$0xff]  }
 0xd99   : > { %17598 = vmatprep.subr.bf16.mxu0 %v24232_v21  ;;  %v24293_v21 = vld [vmem:[%s31997_s16 + $0xbd0] ss:$52 sps:$4 sm:$0xff]  }
 0xd9c   : > { %17599 = vmatpush1.bf16.msra.mxu0 %v24230_v6  ;;  %v24298_v6 = vld [vmem:[%s31997_s16 + $0xc3c] ss:$52 sps:$4 sm:$0xff]  }
 0xd9d   : > { %17600 = vmatprep.subr.bf16.mxu0 %v24235_v49  ;;  %v24296_v49 = vld [vmem:[%s31997_s16 + $0xc38] ss:$52 sps:$4 sm:$0xff]  }
 0xda0   : > { %17601 = vmatpush1.bf16.msra.mxu0 %v24233_v39  ;;  %v24301_v39 = vld [vmem:[%s31997_s16 + $0xca4] ss:$52 sps:$4 sm:$0xff]  }
 0xda1   : > { %17602 = vmatprep.subr.bf16.mxu0 %v24238_v27  ;;  %v24299_v27 = vld [vmem:[%s31997_s16 + $0xca0] ss:$52 sps:$4 sm:$0xff]  }
 0xda4   : > { %17603 = vmatpush1.bf16.msra.mxu0 %v24236_v41  ;;  %v24304_v41 = vld [vmem:[%s31997_s16 + $0xd0c] ss:$52 sps:$4 sm:$0xff]  }
 0xda5   : > { %17604 = vmatprep.subr.bf16.mxu0 %v24241_v56  ;;  %v24302_v56 = vld [vmem:[%s31997_s16 + $0xd08] ss:$52 sps:$4 sm:$0xff]  }
 0xda8   : > { %17605 = vmatpush1.bf16.msra.mxu0 %v24239_v11  ;;  %v24307_v11 = vld [vmem:[%s31997_s16 + $0xd74] ss:$52 sps:$4 sm:$0xff]  }
 0xda9   : > { %17606 = vmatprep.subr.bf16.mxu0 %v24244_v37  ;;  %v24398_v37 = vld [vmem:[%s31997_s16 + $0x1a00] ss:$52 sps:$4 sm:$0xff]  }
 0xdac   : > { %17607 = vmatpush1.bf16.msra.mxu0 %v24242_v46  ;;  %v24400_v46 = vld [vmem:[%s31997_s16 + $0x1a04] ss:$52 sps:$4 sm:$0xff]  }
 0xdad   : > { %17608 = vmatprep.subr.bf16.mxu0 %v24247_v52  ;;  %v24305_v52 = vld [vmem:[%s31997_s16 + $0xd70] ss:$52 sps:$4 sm:$0xff]   ;;  %17541 = vmatprep.subr.bf16.mxu1 %v24400_v46 }
 0xdae   : > { %17542 = vmatpush1.bf16.msra.mxu1 %v24398_v37  ;;  %v24343_v37 = vld [vmem:[%s31997_s16 + $0x1254] ss:$52 sps:$4 sm:$0xff]   ;;  %v24341_v46 = vld [vmem:[%s31997_s16 + $0x1250] ss:$52 sps:$4 sm:$0xff]  }
 0xdb0   : > { %17609 = vmatpush1.bf16.msra.mxu0 %v24245_v16  ;;  %v24406_v16 = vld [vmem:[%s31997_s16 + $0x1a6c] ss:$52 sps:$4 sm:$0xff]  }
 0xdb1   : > { %17610 = vmatprep.subr.bf16.mxu0 %v24250_v29  ;;  %v24310_v29 = vld [vmem:[%s31997_s16 + $0xddc] ss:$52 sps:$4 sm:$0xff]   ;;  %17543 = vmatprep.subr.bf16.mxu1 %v24406_v16  ;;  %v24344_v16 = vld [vmem:[%s31997_s16 + $0x12b8] ss:$52 sps:$4 sm:$0xff]  }
 0xdb4   : > { %17611 = vmatpush1.bf16.msra.mxu0 %v24248_v33  ;;  %v24404_v33 = vld [vmem:[%s31997_s16 + $0x1a68] ss:$52 sps:$4 sm:$0xff]  }
 0xdb5   : > { %17612 = vmatprep.subr.bf16.mxu0 %v24253_v18  ;;  %v24308_v18 = vld [vmem:[%s31997_s16 + $0xdd8] ss:$52 sps:$4 sm:$0xff]   ;;  %17544 = vmatpush1.bf16.msra.mxu1 %v24404_v33  ;;  %v24347_v33 = vld [vmem:[%s31997_s16 + $0x1320] ss:$52 sps:$4 sm:$0xff]  }
 0xdb8   : > { %17613 = vmatpush1.bf16.msra.mxu0 %v24251_v48  ;;  %v24412_v48 = vld [vmem:[%s31997_s16 + $0x1ad4] ss:$52 sps:$4 sm:$0xff]  }
 0xdb9   : > { %17623 = vmatprep.subr.bf16.mxu0 %v24256_v19  ;;  %v24313_v19 = vld [vmem:[%s31997_s16 + $0xe44] ss:$52 sps:$4 sm:$0xff]   ;;  %17545 = vmatprep.subr.bf16.mxu1 %v24412_v48  ;;  %v24350_v48 = vld [vmem:[%s31997_s16 + $0x1388] ss:$52 sps:$4 sm:$0xff]  }
 0xdbb   : > { %17615 = vmatmul.mubr.bf16.vlgmr.msra.gmra.mrb[216].mxu0 %v28730_v61 }
 0xdbc   : > { %17624 = vmatpush1.bf16.msra.mxu0 %v24254_v42  ;;  %17655 = vmatprep.mubr.bf16.mxu0 %v28736_v15  ;;  %v24410_v42 = vld [vmem:[%s31997_s16 + $0x1ad0] ss:$52 sps:$4 sm:$0xff]  }
 0xdbd   : > { %17625 = vmatprep.subr.bf16.mxu0 %v24259_v4  ;;  %v24311_v4 = vld [vmem:[%s31997_s16 + $0xe40] ss:$52 sps:$4 sm:$0xff]   ;;  %17546 = vmatpush1.bf16.msra.mxu1 %v24410_v42  ;;  %v24353_v42 = vld [vmem:[%s31997_s16 + $0x13f0] ss:$52 sps:$4 sm:$0xff]  }
 0xdc0   : > { %17626 = vmatpush1.bf16.msra.mxu0 %v24257_v0  ;;  %v24418_v0 = vld [vmem:[%s31997_s16 + $0x1b3c] ss:$52 sps:$4 sm:$0xff]  }
 0xdc1   : > { %17627 = vmatprep.subr.bf16.mxu0 %v24262_v53  ;;  %v24316_v53 = vld [vmem:[%s31997_s16 + $0xeac] ss:$52 sps:$4 sm:$0xff]   ;;  %17547 = vmatprep.subr.bf16.mxu1 %v24418_v0 }
 0xdc2   : > { %v24356_v0 = vld [vmem:[%s31997_s16 + $0x1458] ss:$52 sps:$4 sm:$0xff]  }
 0xdc4   : > { %17628 = vmatpush1.bf16.msra.mxu0 %v24260_v17  ;;  %v24416_v17 = vld [vmem:[%s31997_s16 + $0x1b38] ss:$52 sps:$4 sm:$0xff]  }
 0xdc5   : > { %17629 = vmatprep.subr.bf16.mxu0 %v24265_v43  ;;  %v24314_v43 = vld [vmem:[%s31997_s16 + $0xea8] ss:$52 sps:$4 sm:$0xff]   ;;  %17548 = vmatpush1.bf16.msra.mxu1 %v24416_v17  ;;  %v24359_v17 = vld [vmem:[%s31997_s16 + $0x14c0] ss:$52 sps:$4 sm:$0xff]  }
 0xdc8   : > { %17630 = vmatpush1.bf16.msra.mxu0 %v24263_v38  ;;  %v24424_v38 = vld [vmem:[%s31997_s16 + $0x1ba4] ss:$52 sps:$4 sm:$0xff]  }
 0xdc9   : > { %17631 = vmatprep.subr.bf16.mxu0 %v24268_v9  ;;  %v24319_v9 = vld [vmem:[%s31997_s16 + $0xf14] ss:$52 sps:$4 sm:$0xff]   ;;  %17549 = vmatprep.subr.bf16.mxu1 %v24424_v38 }
 0xdca   : > { %v24362_v38 = vld [vmem:[%s31997_s16 + $0x1528] ss:$52 sps:$4 sm:$0xff]  }
 0xdcc   : > { %17632 = vmatpush1.bf16.msra.mxu0 %v24266_v50  ;;  %v24422_v50 = vld [vmem:[%s31997_s16 + $0x1ba0] ss:$52 sps:$4 sm:$0xff]  }
 0xdcd   : > { %17633 = vmatprep.subr.bf16.mxu0 %v24271_v12  ;;  %v24317_v12 = vld [vmem:[%s31997_s16 + $0xf10] ss:$52 sps:$4 sm:$0xff]   ;;  %17550 = vmatpush1.bf16.msra.mxu1 %v24422_v50 }
 0xdce   : > { %v24458_v50 = vld [vmem:[%s31997_s16 + $0x1e10] ss:$52 sps:$4 sm:$0xff]  }
 0xdd0   : > { %17634 = vmatpush1.bf16.msra.mxu0 %v24269_v5  ;;  %v24430_v5 = vld [vmem:[%s31997_s16 + $0x1c0c] ss:$52 sps:$4 sm:$0xff]  }
 0xdd1   : > { %17635 = vmatprep.subr.bf16.mxu0 %v24274_v26  ;;  %v24322_v26 = vld [vmem:[%s31997_s16 + $0xf7c] ss:$52 sps:$4 sm:$0xff]   ;;  %17551 = vmatprep.subr.bf16.mxu1 %v24430_v5 }
 0xdd2   : > { %v24365_v5 = vld [vmem:[%s31997_s16 + $0x1590] ss:$52 sps:$4 sm:$0xff]  }
 0xdd4   : > { %17636 = vmatpush1.bf16.msra.mxu0 %v24272_v59  ;;  %v24428_v59 = vld [vmem:[%s31997_s16 + $0x1c08] ss:$52 sps:$4 sm:$0xff]  }
 0xdd5   : > { %17637 = vmatprep.subr.bf16.mxu0 %v24277_v62  ;;  %v24320_v62 = vld [vmem:[%s31997_s16 + $0xf78] ss:$52 sps:$4 sm:$0xff]   ;;  %17552 = vmatpush1.bf16.msra.mxu1 %v24428_v59 }
 0xdd8   : > { %17638 = vmatpush1.bf16.msra.mxu0 %v24275_v51  ;;  %v24436_v51 = vld [vmem:[%s31997_s16 + $0x1c74] ss:$52 sps:$4 sm:$0xff]  }
 0xdd9   : > { %17639 = vmatprep.subr.bf16.mxu0 %v24280_v8  ;;  %v24325_v8 = vld [vmem:[%s31997_s16 + $0xfe4] ss:$52 sps:$4 sm:$0xff]   ;;  %17553 = vmatprep.subr.bf16.mxu1 %v24436_v51  ;;  %v24466_v51 = vld [vmem:[%s31997_s16 + $0x1e7c] ss:$52 sps:$4 sm:$0xff]  }
 0xddc   : > { %17640 = vmatpush1.bf16.msra.mxu0 %v24278_v14  ;;  %v24434_v14 = vld [vmem:[%s31997_s16 + $0x1c70] ss:$52 sps:$4 sm:$0xff]  }
 0xddd   : > { %17641 = vmatprep.subr.bf16.mxu0 %v24283_v25  ;;  %v24323_v25 = vld [vmem:[%s31997_s16 + $0xfe0] ss:$52 sps:$4 sm:$0xff]   ;;  %17554 = vmatpush1.bf16.msra.mxu1 %v24434_v14 }
 0xde0   : > { %17642 = vmatpush1.bf16.msra.mxu0 %v24281_v32  ;;  %v24442_v32 = vld [vmem:[%s31997_s16 + $0x1cdc] ss:$52 sps:$4 sm:$0xff]  }
 0xde1   : > { %17643 = vmatprep.subr.bf16.mxu0 %v24286_v3  ;;  %v24328_v3 = vld [vmem:[%s31997_s16 + $0x104c] ss:$52 sps:$4 sm:$0xff]   ;;  %17555 = vmatprep.subr.bf16.mxu1 %v24442_v32 }
 0xde4   : > { %17644 = vmatpush1.bf16.msra.mxu0 %v24284_v1  ;;  %v24440_v1 = vld [vmem:[%s31997_s16 + $0x1cd8] ss:$52 sps:$4 sm:$0xff]  }
 0xde5   : > { %17645 = vmatprep.subr.bf16.mxu0 %v24289_v55  ;;  %v24326_v55 = vld [vmem:[%s31997_s16 + $0x1048] ss:$52 sps:$4 sm:$0xff]   ;;  %17556 = vmatpush1.bf16.msra.mxu1 %v24440_v1 }
 0xde8   : > { %17646 = vmatpush1.bf16.msra.mxu0 %v24287_v34  ;;  %v24448_v34 = vld [vmem:[%s31997_s16 + $0x1d44] ss:$52 sps:$4 sm:$0xff]  }
 0xde9   : > { %17647 = vmatprep.subr.bf16.mxu0 %v24292_v10  ;;  %v24331_v10 = vld [vmem:[%s31997_s16 + $0x10b4] ss:$52 sps:$4 sm:$0xff]   ;;  %17557 = vmatprep.subr.bf16.mxu1 %v24448_v34 }
 0xdec   : > { %17648 = vmatpush1.bf16.msra.mxu0 %v24290_v20  ;;  %v24446_v20 = vld [vmem:[%s31997_s16 + $0x1d40] ss:$52 sps:$4 sm:$0xff]  }
 0xded   : > { %17649 = vmatprep.subr.bf16.mxu0 %v24295_v36  ;;  %v24329_v36 = vld [vmem:[%s31997_s16 + $0x10b0] ss:$52 sps:$4 sm:$0xff]   ;;  %17558 = vmatpush1.bf16.msra.mxu1 %v24446_v20  ;;  %v24470_v20 = vld [vmem:[%s31997_s16 + $0x1ee0] ss:$52 sps:$4 sm:$0xff]  }
 0xdf0   : > { %17650 = vmatpush1.bf16.msra.mxu0 %v24293_v21  ;;  %v24454_v21 = vld [vmem:[%s31997_s16 + $0x1dac] ss:$52 sps:$4 sm:$0xff]  }
 0xdf1   : > { %17651 = vmatprep.subr.bf16.mxu0 %v24298_v6  ;;  %v24334_v6 = vld [vmem:[%s31997_s16 + $0x111c] ss:$52 sps:$4 sm:$0xff]   ;;  %17559 = vmatprep.subr.bf16.mxu1 %v24454_v21 }
 0xdf4   : > { %17652 = vmatpush1.bf16.msra.mxu0 %v24296_v49  ;;  %v24452_v49 = vld [vmem:[%s31997_s16 + $0x1da8] ss:$52 sps:$4 sm:$0xff]  }
 0xdf5   : > { %17653 = vmatprep.subr.bf16.mxu0 %v24301_v39  ;;  %v24332_v39 = vld [vmem:[%s31997_s16 + $0x1118] ss:$52 sps:$4 sm:$0xff]   ;;  %17560 = vmatpush1.bf16.msra.mxu1 %v24452_v49  ;;  %v24371_v49 = vld [vmem:[%s31997_s16 + $0x1660] ss:$52 sps:$4 sm:$0xff]  }
 0xdf8   : > { %17654 = vmatpush1.bf16.msra.mxu0 %v24299_v27  ;;  %v24337_v27 = vld [vmem:[%s31997_s16 + $0x1184] ss:$52 sps:$4 sm:$0xff]  }
 0xdf9   : > { %17664 = vmatprep.subr.bf16.mxu0 %v24304_v41  ;;  %v24335_v41 = vld [vmem:[%s31997_s16 + $0x1180] ss:$52 sps:$4 sm:$0xff]  }
 0xdfb   : > { %17656 = vmatmul.mubr.bf16.vlgmr.msra.gmra.mrb[216].mxu0 %v28846_v54 }
 0xdfc   : > { %17665 = vmatpush1.bf16.msra.mxu0 %v24302_v56  ;;  %17696 = vmatprep.mubr.bf16.mxu0 %v28851_v31  ;;  %v24340_v56 = vld [vmem:[%s31997_s16 + $0x11ec] ss:$52 sps:$4 sm:$0xff]  }
 0xdfd   : > { %17666 = vmatprep.subr.bf16.mxu0 %v24307_v11  ;;  %v24338_v11 = vld [vmem:[%s31997_s16 + $0x11e8] ss:$52 sps:$4 sm:$0xff]  }
 0xe00   : > { %17667 = vmatpush1.bf16.msra.mxu0 %v24305_v52  ;;  %v24346_v52 = vld [vmem:[%s31997_s16 + $0x12bc] ss:$52 sps:$4 sm:$0xff]  }
 0xe01   : > { %17668 = vmatprep.subr.bf16.mxu0 %v24310_v29  ;;  %v24349_v29 = vld [vmem:[%s31997_s16 + $0x1324] ss:$52 sps:$4 sm:$0xff]  }
 0xe04   : > { %17669 = vmatpush1.bf16.msra.mxu0 %v24308_v18  ;;  %v24352_v18 = vld [vmem:[%s31997_s16 + $0x138c] ss:$52 sps:$4 sm:$0xff]  }
 0xe05   : > { %17670 = vmatprep.subr.bf16.mxu0 %v24313_v19  ;;  %v24355_v19 = vld [vmem:[%s31997_s16 + $0x13f4] ss:$52 sps:$4 sm:$0xff]  }
 0xe08   : > { %17671 = vmatpush1.bf16.msra.mxu0 %v24311_v4  ;;  %v24358_v4 = vld [vmem:[%s31997_s16 + $0x145c] ss:$52 sps:$4 sm:$0xff]  }
 0xe09   : > { %17672 = vmatprep.subr.bf16.mxu0 %v24316_v53  ;;  %v24361_v53 = vld [vmem:[%s31997_s16 + $0x14c4] ss:$52 sps:$4 sm:$0xff]  }
 0xe0c   : > { %17673 = vmatpush1.bf16.msra.mxu0 %v24314_v43  ;;  %v24364_v43 = vld [vmem:[%s31997_s16 + $0x152c] ss:$52 sps:$4 sm:$0xff]  }
 0xe0d   : > { %17674 = vmatprep.subr.bf16.mxu0 %v24319_v9  ;;  %v24367_v9 = vld [vmem:[%s31997_s16 + $0x1594] ss:$52 sps:$4 sm:$0xff]  }
 0xe10   : > { %17675 = vmatpush1.bf16.msra.mxu0 %v24317_v12  ;;  %v24460_v12 = vld [vmem:[%s31997_s16 + $0x1e14] ss:$52 sps:$4 sm:$0xff]  }
 0xe11   : > { %17676 = vmatprep.subr.bf16.mxu0 %v24322_v26  ;;  %17561 = vmatprep.subr.bf16.mxu1 %v24460_v12  ;;  %v24370_v26 = vld [vmem:[%s31997_s16 + $0x15fc] ss:$52 sps:$4 sm:$0xff]   ;;  %v24383_v12 = vld [vmem:[%s31997_s16 + $0x1800] ss:$52 sps:$4 sm:$0xff]  }
 0xe12   : > { %17562 = vmatpush1.bf16.msra.mxu1 %v24458_v50  ;;  %v24496_v50 = vld [vmem:[%s31997_s16 + $0x14] ss:$52 sps:$4 sm:$0xff]  }
 0xe13   : > { %17563 = vmatprep.subr.bf16.mxu1 %v24466_v51  ;;  %v24394_v51 = vld [vmem:[%s31997_s16 + $0x193c] ss:$52 sps:$4 sm:$0xff]  }
 0xe14   : > { %17677 = vmatpush1.bf16.msra.mxu0 %v24320_v62  ;;  %v24464_v62 = vld [vmem:[%s31997_s16 + $0x1e78] ss:$52 sps:$4 sm:$0xff]  }
 0xe15   : > { %17678 = vmatprep.subr.bf16.mxu0 %v24325_v8 }
 0xe16   : > { %17564 = vmatpush1.bf16.msra.mxu1 %v24464_v62  ;;  %v24389_v62 = vld [vmem:[%s31997_s16 + $0x18d0] ss:$52 sps:$4 sm:$0xff]  }
 0xe18   : > { %17679 = vmatpush1.bf16.msra.mxu0 %v24323_v25  ;;  %v10687_v25 = vpop.permute.xlu1 %10686 }
 0xe19   : > { %17680 = vmatprep.subr.bf16.mxu0 %v24328_v3  ;;  %v24368_v3 = vld [vmem:[%s31997_s16 + $0x15f8] ss:$52 sps:$4 sm:$0xff]  }
 0xe1c   : > { %17681 = vmatpush1.bf16.msra.mxu0 %v24326_v55 }
 0xe1d   : > { %17682 = vmatprep.subr.bf16.mxu0 %v24331_v10 }
 0xe20   : > { %17683 = vmatpush1.bf16.msra.mxu0 %v24329_v36  ;;  %v24472_v36 = vld [vmem:[%s31997_s16 + $0x1ee4] ss:$52 sps:$4 sm:$0xff]  }
 0xe21   : > { %17684 = vmatprep.subr.bf16.mxu0 %v24334_v6  ;;  %17565 = vmatprep.subr.bf16.mxu1 %v24472_v36  ;;  %v24427_v36 = vld [vmem:[%s31997_s16 + $0x1bac] ss:$52 sps:$4 sm:$0xff]  }
 0xe22   : > { %17566 = vmatpush1.bf16.msra.mxu1 %v24470_v20  ;;  %v24419_v20 = vld [vmem:[%s31997_s16 + $0x1b40] ss:$52 sps:$4 sm:$0xff]  }
 0xe24   : > { %17685 = vmatpush1.bf16.msra.mxu0 %v24332_v39 }
 0xe25   : > { %17686 = vmatprep.subr.bf16.mxu0 %v24337_v27 }
 0xe28   : > { %17687 = vmatpush1.bf16.msra.mxu0 %v24335_v41  ;;  %v24376_v41 = vld [vmem:[%s31997_s16 + $0x16cc] ss:$52 sps:$4 sm:$0xff]  }
 0xe29   : > { %17688 = vmatprep.subr.bf16.mxu0 %v24340_v56  ;;  %v24476_v56 = vld [vmem:[%s31997_s16 + $0x1f48] ss:$52 sps:$4 sm:$0xff]  }
 0xe2c   : > { %17689 = vmatpush1.bf16.msra.mxu0 %v24338_v11  ;;  %v24478_v11 = vld [vmem:[%s31997_s16 + $0x1f4c] ss:$52 sps:$4 sm:$0xff]  }
 0xe2d   : > { %17690 = vmatprep.subr.bf16.mxu0 %v24343_v37  ;;  %17567 = vmatprep.subr.bf16.mxu1 %v24478_v11  ;;  %v24451_v11 = vld [vmem:[%s31997_s16 + $0x1d4c] ss:$52 sps:$4 sm:$0xff]  }
 0xe2e   : > { %17568 = vmatpush1.bf16.msra.mxu1 %v24476_v56  ;;  %v24443_v56 = vld [vmem:[%s31997_s16 + $0x1ce0] ss:$52 sps:$4 sm:$0xff]  }
 0xe30   : > { %17691 = vmatpush1.bf16.msra.mxu0 %v24341_v46  ;;  %v24374_v46 = vld [vmem:[%s31997_s16 + $0x16c8] ss:$52 sps:$4 sm:$0xff]  }
 0xe31   : > { %17692 = vmatprep.subr.bf16.mxu0 %v24346_v52  ;;  %v24484_v52 = vld [vmem:[%s31997_s16 + $0x1fb4] ss:$52 sps:$4 sm:$0xff]  }
 0xe32   : > { %17569 = vmatprep.subr.bf16.mxu1 %v24484_v52  ;;  %v24455_v52 = vld [vmem:[%s31997_s16 + $0x1db0] ss:$52 sps:$4 sm:$0xff]  }
 0xe34   : > { %17693 = vmatpush1.bf16.msra.mxu0 %v24344_v16 }
 0xe35   : > { %17694 = vmatprep.subr.bf16.mxu0 %v24349_v29  ;;  %v24379_v29 = vld [vmem:[%s31997_s16 + $0x1734] ss:$52 sps:$4 sm:$0xff]  }
 0xe38   : > { %17695 = vmatpush1.bf16.msra.mxu0 %v24347_v33 }
 0xe39   : > { %17705 = vmatprep.subr.bf16.mxu0 %v24352_v18  ;;  %v24482_v18 = vld [vmem:[%s31997_s16 + $0x1fb0] ss:$52 sps:$4 sm:$0xff]  }
 0xe3a   : > { %17570 = vmatpush1.bf16.msra.mxu1 %v24482_v18  ;;  %v24467_v18 = vld [vmem:[%s31997_s16 + $0x1e80] ss:$52 sps:$4 sm:$0xff]  }
 0xe3b   : > { %17697 = vmatmul.mubr.bf16.vlgmr.msra.gmra.mrb[216].mxu0 %v28957_v44 }
 0xe3c   : > { %17706 = vmatpush1.bf16.msra.mxu0 %v24350_v48  ;;  %17737 = vmatprep.mubr.bf16.mxu0 %v28962_v22 }
 0xe3d   : > { %17707 = vmatprep.subr.bf16.mxu0 %v24355_v19  ;;  %v24490_v19 = vld [vmem:[%s31997_s16 + $0x201c] ss:$52 sps:$4 sm:$0xff]  }
 0xe3e   : > { %17571 = vmatprep.subr.bf16.mxu1 %v24490_v19  ;;  %v24473_v19 = vld [vmem:[%s31997_s16 + $0x1ee8] ss:$52 sps:$4 sm:$0xff]  }
 0xe40   : > { %17708 = vmatpush1.bf16.msra.mxu0 %v24353_v42  ;;  %v24377_v42 = vld [vmem:[%s31997_s16 + $0x1730] ss:$52 sps:$4 sm:$0xff]  }
 0xe41   : > { %17709 = vmatprep.subr.bf16.mxu0 %v24358_v4 }
 0xe44   : > { %17710 = vmatpush1.bf16.msra.mxu0 %v24356_v0  ;;  %v24382_v0 = vld [vmem:[%s31997_s16 + $0x179c] ss:$52 sps:$4 sm:$0xff]  }
 0xe45   : > { %17711 = vmatprep.subr.bf16.mxu0 %v24361_v53  ;;  %v24488_v53 = vld [vmem:[%s31997_s16 + $0x2018] ss:$52 sps:$4 sm:$0xff]  }
 0xe46   : > { %17572 = vmatpush1.bf16.msra.mxu1 %v24488_v53  ;;  %v24485_v53 = vld [vmem:[%s31997_s16 + $0x1fb8] ss:$52 sps:$4 sm:$0xff]  }
 0xe47   : > { %17787 = vmatprep.subr.bf16.mxu1 %v24496_v50 }
 0xe48   : > { %17712 = vmatpush1.bf16.msra.mxu0 %v24359_v17 }
 0xe49   : > { %17713 = vmatprep.subr.bf16.mxu0 %v24364_v43  ;;  %v24380_v43 = vld [vmem:[%s31997_s16 + $0x1798] ss:$52 sps:$4 sm:$0xff]  }
 0xe4c   : > { %17714 = vmatpush1.bf16.msra.mxu0 %v24362_v38 }
 0xe4d   : > { %17715 = vmatprep.subr.bf16.mxu0 %v24367_v9  ;;  %v24385_v9 = vld [vmem:[%s31997_s16 + $0x1804] ss:$52 sps:$4 sm:$0xff]  }
 0xe4e   : > { %v10729_v59 = vpop.f32.mrb[212].mxu0 }
 0xe4f   : > { %v10730_v8 = vadd.f32 %v10729_v59, %v28740_v63  ;;  %v22779_v14 = vpop.f32.mrb[213].mxu0  ;;  %v24373_v63 = vld [vmem:[%s31997_s16 + $0x1664] ss:$52 sps:$4 sm:$0xff]   ;;  %v24391_v59 = vld [vmem:[%s31997_s16 + $0x18d4] ss:$52 sps:$4 sm:$0xff]  }
 0xe50   : > { %v10732_v32 = vpop.f32.mrb[214].mxu0  ;;  %17716 = vmatpush1.bf16.msra.mxu0 %v24365_v5  ;;  %v24388_v5 = vld [vmem:[%s31997_s16 + $0x186c] ss:$52 sps:$4 sm:$0xff]   ;;  %v24397_v14 = vld [vmem:[%s31997_s16 + $0x19a4] ss:$52 sps:$4 sm:$0xff]  }
 0xe51   : > { %v10743_v1 = vrot.slane %v10730_v8, %v28354_v40  ;;  %v10789_v55 = vcombine.high %v10730_v8, %v10730_v8  ;;  %v10733_v34 = vadd.f32 %v10732_v32, %v10687_v25  ;;  %v22780_v10 = vpop.f32.mrb[215].mxu0  ;;  %17717 = vmatprep.subr.bf16.mxu0 %v24370_v26  ;;  %v24386_v26 = vld [vmem:[%s31997_s16 + $0x1868] ss:$52 sps:$4 sm:$0xff]   ;;  %v24392_v8 = vld [vmem:[%s31997_s16 + $0x1938] ss:$52 sps:$4 sm:$0xff]  }
 0xe52   : > { %v24395_v25 = vld [vmem:[%s31997_s16 + $0x19a0] ss:$52 sps:$4 sm:$0xff]   ;;  %v24413_v10 = vld [vmem:[%s31997_s16 + $0x1ad8] ss:$52 sps:$4 sm:$0xff]  }
 0xe53   : > { %v10758_v21 = vcombine.high %v10743_v1, %v10743_v1  ;;  %10843 = vst.msk [vmem:[#allocation2 + $0x9] sm:$0x1] %vm10841_vm0, %v10733_v34  ;;  %v10750_v6 = vrot.slane %v10743_v1, %v28354_v40  ;;  %v10796_v39 = vrot.slane %v10789_v55, %v28354_v40  ;;  %v24403_v32 = vld [vmem:[%s31997_s16 + $0x1a0c] ss:$52 sps:$4 sm:$0xff]   ;;  %v24409_v1 = vld [vmem:[%s31997_s16 + $0x1a74] ss:$52 sps:$4 sm:$0xff]  }
 0xe54   : > { %17718 = vmatpush1.bf16.msra.mxu0 %v24368_v3  ;;  %v24401_v3 = vld [vmem:[%s31997_s16 + $0x1a08] ss:$52 sps:$4 sm:$0xff]   ;;  %v24407_v55 = vld [vmem:[%s31997_s16 + $0x1a70] ss:$52 sps:$4 sm:$0xff]   ;;  %vm10822_vm0 = vcmp.ge.s32.totalorder %v575_v2, 101 }
 0xe55   : > { %10751 = vrot.lane.b32.xlu1 %v10750_v6, %s25558_s2  ;;  %17719 = vmatprep.subr.bf16.mxu0 %v24373_v63  ;;  %v10765_v27 = vrot.slane %v10758_v21, %v28354_v40  ;;  %v10773_v37 = vcombine.high %v10750_v6, %v10750_v6  ;;  %s25560_s2 = smov 74   ;;  %v10811_v33 = vcombine.high %v10796_v39, %v10796_v39  ;;  %v24415_v34 = vld [vmem:[%s31997_s16 + $0x1adc] ss:$52 sps:$4 sm:$0xff]   ;;  %v24421_v63 = vld [vmem:[%s31997_s16 + $0x1b44] ss:$52 sps:$4 sm:$0xff]  }
 0xe56   : > { %v10803_v48 = vrot.slane %v10796_v39, %v28354_v40  ;;  %v24425_v21 = vld [vmem:[%s31997_s16 + $0x1ba8] ss:$52 sps:$4 sm:$0xff]  }
 0xe57   : > { %10766 = vrot.lane.b32.xlu0 %v10765_v27, %s25559_s29  ;;  %v10781_v16 = vcombine.high %v10765_v27, %v10765_v27  ;;  %v10818_v4 = vrot.slane %v10811_v33, %v28354_v40  ;;  %v24433_v6 = vld [vmem:[%s31997_s16 + $0x1c14] ss:$52 sps:$4 sm:$0xff]   ;;  %v24439_v39 = vld [vmem:[%s31997_s16 + $0x1c7c] ss:$52 sps:$4 sm:$0xff]   ;;  %v24437_v27 = vld [vmem:[%s31997_s16 + $0x1c78] ss:$52 sps:$4 sm:$0xff]  }
 0xe58   : > { %17720 = vmatpush1.bf16.msra.mxu0 %v24371_v49  ;;  %v10826_v17 = vcombine.high %v10803_v48, %v10803_v48  ;;  %v24431_v49 = vld [vmem:[%s31997_s16 + $0x1c10] ss:$52 sps:$4 sm:$0xff]  }
 0xe59   : > { %10774 = vrot.lane.b32.xlu1 %v10773_v37, %s25560_s2  ;;  %17721 = vmatprep.subr.bf16.mxu0 %v24376_v41  ;;  %v10834_v38 = vcombine.high %v10818_v4, %v10818_v4  ;;  %v24445_v41 = vld [vmem:[%s31997_s16 + $0x1ce4] ss:$52 sps:$4 sm:$0xff]   ;;  %v24449_v37 = vld [vmem:[%s31997_s16 + $0x1d48] ss:$52 sps:$4 sm:$0xff]  }
 0xe5a   : > { %v24469_v33 = vld [vmem:[%s31997_s16 + $0x1e84] ss:$52 sps:$4 sm:$0xff]  }
 0xe5b   : > { %10782 = vrot.lane.b32.xlu0 %v10781_v16, %s25561_s25  ;;  %v24463_v16 = vld [vmem:[%s31997_s16 + $0x1e1c] ss:$52 sps:$4 sm:$0xff]  }
 0xe5c   : > { %17722 = vmatpush1.bf16.msra.mxu0 %v24374_v46  ;;  %v24457_v46 = vld [vmem:[%s31997_s16 + $0x1db4] ss:$52 sps:$4 sm:$0xff]  }
 0xe5d   : > { %10804 = vrot.lane.b32.xlu1 %v10803_v48, %s25562_s21  ;;  %17723 = vmatprep.subr.bf16.mxu0 %v24379_v29  ;;  %v24461_v29 = vld [vmem:[%s31997_s16 + $0x1e18] ss:$52 sps:$4 sm:$0xff]   ;;  %s23410_s21 = smul.u32 13, %s32039_s28 }
 0xe5e   : > { %v24475_v48 = vld [vmem:[%s31997_s16 + $0x1eec] ss:$52 sps:$4 sm:$0xff]  }
 0xe5f   : > { %10819 = vrot.lane.b32.xlu0 %v10818_v4, %s25563_s20  ;;  %v24479_v4 = vld [vmem:[%s31997_s16 + $0x1f50] ss:$52 sps:$4 sm:$0xff]   ;;  %s31431_s30 = scalar_lea.vmem %s31999_s18, %s23410_s21 }
 0xe60   : > { %17724 = vmatpush1.bf16.msra.mxu0 %v24377_v42  ;;  %v24481_v42 = vld [vmem:[%s31997_s16 + $0x1f54] ss:$52 sps:$4 sm:$0xff]  }
 0xe61   : > { %10827 = vrot.lane.b32.xlu1 %v10826_v17, %s25564_s26  ;;  %17725 = vmatprep.subr.bf16.mxu0 %v24382_v0  ;;  %v24487_v0 = vld [vmem:[%s31997_s16 + $0x1fbc] ss:$52 sps:$4 sm:$0xff]   ;;  %v24493_v17 = vld [vmem:[%s31997_s16 + $0x2024] ss:$52 sps:$4 sm:$0xff]  }
 0xe63   : > { %10835 = vrot.lane.b32.xlu0 %v10834_v38, %s25565_s22  ;;  %v24499_v38 = vld [vmem:[%s31997_s16 + $0x1c] ss:$52 sps:$4 sm:$0xff]  }
 0xe64   : > { %17726 = vmatpush1.bf16.msra.mxu0 %v24380_v43  ;;  %v24491_v43 = vld [vmem:[%s31997_s16 + $0x2020] ss:$52 sps:$4 sm:$0xff]  }
 0xe65   : > { %17727 = vmatprep.subr.bf16.mxu0 %v24385_v9 }
 0xe68   : > { %17728 = vmatpush1.bf16.msra.mxu0 %v24383_v12 }
 0xe69   : > { %17729 = vmatprep.subr.bf16.mxu0 %v24388_v5 }
 0xe6c   : > { %17730 = vmatpush1.bf16.msra.mxu0 %v24386_v26 }
 0xe6d   : > { %17731 = vmatprep.subr.bf16.mxu0 %v24391_v59 }
 0xe70   : > { %17732 = vmatpush1.bf16.msra.mxu0 %v24389_v62 }
 0xe71   : > { %17733 = vmatprep.subr.bf16.mxu0 %v24394_v51 }
 0xe74   : > { %17734 = vmatpush1.bf16.msra.mxu0 %v24392_v8 }
 0xe75   : > { %17735 = vmatprep.subr.bf16.mxu0 %v24397_v14 }
 0xe78   : > { %17736 = vmatpush1.bf16.msra.mxu0 %v24395_v25 }
 0xe79   : > { %17746 = vmatprep.subr.bf16.mxu0 %v24403_v32 }
 0xe7b   : > { %17738 = vmatmul.mubr.bf16.vlgmr.msra.gmra.mrb[216].mxu0 %v29111_v13 }
 0xe7c   : > { %17747 = vmatpush1.bf16.msra.mxu0 %v24401_v3 }
 0xe7d   : > { %17748 = vmatprep.subr.bf16.mxu0 %v24409_v1  ;;  %v24494_v1 = vld [vmem:[%s31997_s16 + $0x10] ss:$52 sps:$4 sm:$0xff]  }
 0xe80   : > { %17749 = vmatpush1.bf16.msra.mxu0 %v24407_v55  ;;  %v24502_v55 = vld [vmem:[%s31997_s16 + $0x7c] ss:$52 sps:$4 sm:$0xff]  }
 0xe81   : > { %17750 = vmatprep.subr.bf16.mxu0 %v24415_v34  ;;  %v24505_v34 = vld [vmem:[%s31997_s16 + $0x84] ss:$52 sps:$4 sm:$0xff]  }
 0xe84   : > { %17751 = vmatpush1.bf16.msra.mxu0 %v24413_v10  ;;  %v24500_v10 = vld [vmem:[%s31997_s16 + $0x78] ss:$52 sps:$4 sm:$0xff]  }
 0xe85   : > { %17752 = vmatprep.subr.bf16.mxu0 %v24421_v63  ;;  %v24503_v63 = vld [vmem:[%s31997_s16 + $0x80] ss:$52 sps:$4 sm:$0xff]  }
 0xe88   : > { %17753 = vmatpush1.bf16.msra.mxu0 %v24419_v20  ;;  %v24508_v20 = vld [vmem:[%s31997_s16 + $0xe4] ss:$52 sps:$4 sm:$0xff]  }
 0xe89   : > { %17754 = vmatprep.subr.bf16.mxu0 %v24427_v36  ;;  %v24511_v36 = vld [vmem:[%s31997_s16 + $0xec] ss:$52 sps:$4 sm:$0xff]  }
 0xe8c   : > { %17755 = vmatpush1.bf16.msra.mxu0 %v24425_v21  ;;  %v24506_v21 = vld [vmem:[%s31997_s16 + $0xe0] ss:$52 sps:$4 sm:$0xff]  }
 0xe8d   : > { %17756 = vmatprep.subr.bf16.mxu0 %v24433_v6  ;;  %v24509_v6 = vld [vmem:[%s31997_s16 + $0xe8] ss:$52 sps:$4 sm:$0xff]  }
 0xe90   : > { %17757 = vmatpush1.bf16.msra.mxu0 %v24431_v49  ;;  %v24514_v49 = vld [vmem:[%s31997_s16 + $0x14c] ss:$52 sps:$4 sm:$0xff]  }
 0xe91   : > { %17758 = vmatprep.subr.bf16.mxu0 %v24439_v39  ;;  %v24517_v39 = vld [vmem:[%s31997_s16 + $0x154] ss:$52 sps:$4 sm:$0xff]  }
 0xe94   : > { %17759 = vmatpush1.bf16.msra.mxu0 %v24437_v27  ;;  %v24512_v27 = vld [vmem:[%s31997_s16 + $0x148] ss:$52 sps:$4 sm:$0xff]  }
 0xe95   : > { %17760 = vmatprep.subr.bf16.mxu0 %v24445_v41  ;;  %v24515_v41 = vld [vmem:[%s31997_s16 + $0x150] ss:$52 sps:$4 sm:$0xff]  }
 0xe98   : > { %17761 = vmatpush1.bf16.msra.mxu0 %v24443_v56  ;;  %v24520_v56 = vld [vmem:[%s31997_s16 + $0x1b4] ss:$52 sps:$4 sm:$0xff]  }
 0xe99   : > { %17762 = vmatprep.subr.bf16.mxu0 %v24451_v11  ;;  %v24523_v11 = vld [vmem:[%s31997_s16 + $0x1bc] ss:$52 sps:$4 sm:$0xff]  }
 0xe9c   : > { %17763 = vmatpush1.bf16.msra.mxu0 %v24449_v37  ;;  %v24518_v37 = vld [vmem:[%s31997_s16 + $0x1b0] ss:$52 sps:$4 sm:$0xff]  }
 0xe9d   : > { %17764 = vmatprep.subr.bf16.mxu0 %v24457_v46  ;;  %v24521_v46 = vld [vmem:[%s31997_s16 + $0x1b8] ss:$52 sps:$4 sm:$0xff]  }
 0xea0   : > { %17765 = vmatpush1.bf16.msra.mxu0 %v24455_v52  ;;  %v24526_v52 = vld [vmem:[%s31997_s16 + $0x21c] ss:$52 sps:$4 sm:$0xff]  }
 0xea1   : > { %17766 = vmatprep.subr.bf16.mxu0 %v24463_v16  ;;  %v24529_v16 = vld [vmem:[%s31997_s16 + $0x224] ss:$52 sps:$4 sm:$0xff]  }
 0xea4   : > { %17767 = vmatpush1.bf16.msra.mxu0 %v24461_v29  ;;  %v24524_v29 = vld [vmem:[%s31997_s16 + $0x218] ss:$52 sps:$4 sm:$0xff]  }
 0xea5   : > { %17768 = vmatprep.subr.bf16.mxu0 %v24469_v33  ;;  %v24527_v33 = vld [vmem:[%s31997_s16 + $0x220] ss:$52 sps:$4 sm:$0xff]  }
 0xea8   : > { %17769 = vmatpush1.bf16.msra.mxu0 %v24467_v18  ;;  %v24532_v18 = vld [vmem:[%s31997_s16 + $0x284] ss:$52 sps:$4 sm:$0xff]  }
 0xea9   : > { %17770 = vmatprep.subr.bf16.mxu0 %v24475_v48  ;;  %v24535_v48 = vld [vmem:[%s31997_s16 + $0x28c] ss:$52 sps:$4 sm:$0xff]  }
 0xeac   : > { %17771 = vmatpush1.bf16.msra.mxu0 %v24473_v19  ;;  %v24530_v19 = vld [vmem:[%s31997_s16 + $0x280] ss:$52 sps:$4 sm:$0xff]  }
 0xead   : > { %17772 = vmatprep.subr.bf16.mxu0 %v24481_v42  ;;  %v24533_v42 = vld [vmem:[%s31997_s16 + $0x288] ss:$52 sps:$4 sm:$0xff]  }
 0xeb0   : > { %17773 = vmatpush1.bf16.msra.mxu0 %v24479_v4  ;;  %v24538_v4 = vld [vmem:[%s31997_s16 + $0x2ec] ss:$52 sps:$4 sm:$0xff]  }
 0xeb1   : > { %17774 = vmatprep.subr.bf16.mxu0 %v24487_v0  ;;  %v24541_v0 = vld [vmem:[%s31997_s16 + $0x2f4] ss:$52 sps:$4 sm:$0xff]  }
 0xeb4   : > { %17775 = vmatpush1.bf16.msra.mxu0 %v24485_v53  ;;  %v24536_v53 = vld [vmem:[%s31997_s16 + $0x2e8] ss:$52 sps:$4 sm:$0xff]  }
 0xeb5   : > { %17776 = vmatprep.subr.bf16.mxu0 %v24493_v17  ;;  %v24539_v17 = vld [vmem:[%s31997_s16 + $0x2f0] ss:$52 sps:$4 sm:$0xff]  }
 0xeb8   : > { %17777 = vmatpush1.bf16.msra.mxu0 %v24491_v43  ;;  %v24544_v43 = vld [vmem:[%s31997_s16 + $0x354] ss:$52 sps:$4 sm:$0xff]  }
 0xeb9   : > { %17992 = vmatprep.subr.bf16.mxu0 %v24499_v38  ;;  %v24547_v38 = vld [vmem:[%s31997_s16 + $0x35c] ss:$52 sps:$4 sm:$0xff]  }
 0xec7   : > { %v10752_v9 = vpop.permute.xlu1 %10751 }
 0xec8   : > { %10757 = vst.msk [vmem:[#allocation2 + $0x8] sm:$0x1] %vm10756_vm6, %v10752_v9  ;;  %vm10824_vm6 = vmand %vm10822_vm0, %vm10823_vm2  ;;  %v24542_v9 = vld [vmem:[%s31997_s16 + $0x350] ss:$52 sps:$4 sm:$0xff]  }
 0xec9   : > { %v10767_v50 = vpop.permute.xlu0 %10766 }
 0xeca   : > { %10772 = vst.msk [vmem:[#allocation2 + $0x8] sm:$0x1] %vm10771_vm9, %v10767_v50  ;;  %vm10839_vm9 = vmand %vm10838_vm7, %vm29232_vm15  ;;  %v24545_v50 = vld [vmem:[%s31997_s16 + $0x358] ss:$52 sps:$4 sm:$0xff]   ;;  %vm18911_vm15 = vcmp.lt.s32.totalorder %v575_v2, 640 }
 0xecb   : > { %v10775_v12 = vpop.permute.xlu1 %10774 }
 0xecc   : > { %10780 = vst.msk [vmem:[#allocation2 + $0x8] sm:$0x1] %vm10779_vm12, %v10775_v12  ;;  %v24550_v12 = vld [vmem:[%s31997_s16 + $0x3bc] ss:$52 sps:$4 sm:$0xff]  }
 0xecd   : > { %v10783_v5 = vpop.permute.xlu0 %10782 }
 0xece   : > { %10788 = vst.msk [vmem:[#allocation2 + $0x8] sm:$0x1] %vm10787_vm1, %v10783_v5  ;;  %v24553_v5 = vld [vmem:[%s31997_s16 + $0x3c4] ss:$52 sps:$4 sm:$0xff]  }
 0xecf   : > { %v10805_v26 = vpop.permute.xlu1 %10804 }
 0xed0   : > { %10810 = vst.msk [vmem:[#allocation2 + $0x8] sm:$0x1] %vm10809_vm3, %v10805_v26  ;;  %v24548_v26 = vld [vmem:[%s31997_s16 + $0x3b8] ss:$52 sps:$4 sm:$0xff]  }
 0xed1   : > { %v10820_v59 = vpop.permute.xlu0 %10819 }
 0xed2   : > { %10825 = vst.msk [vmem:[#allocation2 + $0x8] sm:$0x1] %vm10824_vm6, %v10820_v59  ;;  %v24551_v59 = vld [vmem:[%s31997_s16 + $0x3c0] ss:$52 sps:$4 sm:$0xff]  }
 0xed3   : > { %v10828_v62 = vpop.permute.xlu1 %10827 }
 0xed4   : > { %10833 = vst.msk [vmem:[#allocation2 + $0x8] sm:$0x1] %vm10832_vm8, %v10828_v62  ;;  %v24556_v62 = vld [vmem:[%s31997_s16 + $0x424] ss:$52 sps:$4 sm:$0xff]  }
 0xed5   : > { %v10836_v51 = vpop.permute.xlu0 %10835 }
 0xed6   : > { %10840 = vst.msk [vmem:[#allocation2 + $0x8] sm:$0x1] %vm10839_vm9, %v10836_v51  ;;  %v24559_v51 = vld [vmem:[%s31997_s16 + $0x42c] ss:$52 sps:$4 sm:$0xff]  }
 0xedd   : > { %v10845_v8 = vld [vmem:[#allocation2 + $0x8] sm:$0x3] }
 0xede   : > { %v10883_v14 = vrot.slane %v10845_v8, %v28712_v60  ;;  %v10887_v25 = vrot.slane %v10845_v8, %v28709_v47  ;;  %v24554_v8 = vld [vmem:[%s31997_s16 + $0x420] ss:$52 sps:$4 sm:$0xff]  }
 0xee0   : > { %v29712_v32 = vpack.c.bf16 %v10883_v14, %v10883_v14  ;;  %v29714_v3 = vpack.c.bf16 %v10887_v25, %v10887_v25  ;;  %v24557_v14 = vld [vmem:[%s31997_s16 + $0x428] ss:$52 sps:$4 sm:$0xff]   ;;  %v24562_v25 = vld [vmem:[%s31997_s16 + $0x48c] ss:$52 sps:$4 sm:$0xff]  }
 0xee2   : > { %17573 = vmatprep.mubr.bf16.mxu1 %v29714_v3  ;;  %17778 = vmatprep.mubr.bf16.mxu0 %v29714_v3 }
 0xee3   : > { %17574 = vmatmul.mubr.bf16.vlgmr.msra.gmra.mrb[72].mxu1 %v29712_v32  ;;  %17779 = vmatmul.mubr.bf16.vlgmr.msra.gmra.mrb[216].mxu0 %v29712_v32 }
 0xee4   : > { %17788 = vmatpush1.bf16.msra.mxu1 %v24494_v1  ;;  %17993 = vmatpush1.bf16.msra.mxu0 %v24497_v7  ;;  %v24565_v1 = vld [vmem:[%s31997_s16 + $0x494] ss:$52 sps:$4 sm:$0xff]  }
 0xee5   : > { %17819 = vmatprep.mubr.bf16.mxu1 %v28725_v23  ;;  %18024 = vmatprep.mubr.bf16.mxu0 %v28725_v23  ;;  %v24560_v7 = vld [vmem:[%s31997_s16 + $0x488] ss:$52 sps:$4 sm:$0xff]  }
 0xee6   : > { %17789 = vmatprep.subr.bf16.mxu1 %v24502_v55  ;;  %17994 = vmatprep.subr.bf16.mxu0 %v24505_v34  ;;  %v24563_v55 = vld [vmem:[%s31997_s16 + $0x490] ss:$52 sps:$4 sm:$0xff]   ;;  %v24568_v34 = vld [vmem:[%s31997_s16 + $0x4f4] ss:$52 sps:$4 sm:$0xff]  }
 0xee8   : > { %17790 = vmatpush1.bf16.msra.mxu1 %v24500_v10  ;;  %17995 = vmatpush1.bf16.msra.mxu0 %v24503_v63  ;;  %v24571_v10 = vld [vmem:[%s31997_s16 + $0x4fc] ss:$52 sps:$4 sm:$0xff]  }
 0xee9   : > { %17791 = vmatprep.subr.bf16.mxu1 %v24508_v20  ;;  %17996 = vmatprep.subr.bf16.mxu0 %v24511_v36  ;;  %v24566_v63 = vld [vmem:[%s31997_s16 + $0x4f0] ss:$52 sps:$4 sm:$0xff]   ;;  %v24569_v20 = vld [vmem:[%s31997_s16 + $0x4f8] ss:$52 sps:$4 sm:$0xff]  }
 0xeea   : > { %v24574_v36 = vld [vmem:[%s31997_s16 + $0x55c] ss:$52 sps:$4 sm:$0xff]  }
 0xeec   : > { %17792 = vmatpush1.bf16.msra.mxu1 %v24506_v21  ;;  %17997 = vmatpush1.bf16.msra.mxu0 %v24509_v6  ;;  %v24577_v21 = vld [vmem:[%s31997_s16 + $0x564] ss:$52 sps:$4 sm:$0xff]  }
 0xeed   : > { %17793 = vmatprep.subr.bf16.mxu1 %v24514_v49  ;;  %17998 = vmatprep.subr.bf16.mxu0 %v24517_v39  ;;  %v24572_v6 = vld [vmem:[%s31997_s16 + $0x558] ss:$52 sps:$4 sm:$0xff]   ;;  %v24575_v49 = vld [vmem:[%s31997_s16 + $0x560] ss:$52 sps:$4 sm:$0xff]  }
 0xeee   : > { %v24580_v39 = vld [vmem:[%s31997_s16 + $0x5c4] ss:$52 sps:$4 sm:$0xff]  }
 0xef0   : > { %17794 = vmatpush1.bf16.msra.mxu1 %v24512_v27  ;;  %17999 = vmatpush1.bf16.msra.mxu0 %v24515_v41  ;;  %v24583_v27 = vld [vmem:[%s31997_s16 + $0x5cc] ss:$52 sps:$4 sm:$0xff]  }
 0xef1   : > { %17795 = vmatprep.subr.bf16.mxu1 %v24520_v56  ;;  %18000 = vmatprep.subr.bf16.mxu0 %v24523_v11  ;;  %v24578_v41 = vld [vmem:[%s31997_s16 + $0x5c0] ss:$52 sps:$4 sm:$0xff]   ;;  %v24581_v56 = vld [vmem:[%s31997_s16 + $0x5c8] ss:$52 sps:$4 sm:$0xff]  }
 0xef2   : > { %v24586_v11 = vld [vmem:[%s31997_s16 + $0x62c] ss:$52 sps:$4 sm:$0xff]  }
 0xef4   : > { %17796 = vmatpush1.bf16.msra.mxu1 %v24518_v37  ;;  %18001 = vmatpush1.bf16.msra.mxu0 %v24521_v46  ;;  %v24589_v37 = vld [vmem:[%s31997_s16 + $0x634] ss:$52 sps:$4 sm:$0xff]  }
 0xef5   : > { %17797 = vmatprep.subr.bf16.mxu1 %v24526_v52  ;;  %18002 = vmatprep.subr.bf16.mxu0 %v24529_v16  ;;  %v24584_v46 = vld [vmem:[%s31997_s16 + $0x628] ss:$52 sps:$4 sm:$0xff]   ;;  %v24587_v52 = vld [vmem:[%s31997_s16 + $0x630] ss:$52 sps:$4 sm:$0xff]  }
 0xef6   : > { %v24592_v16 = vld [vmem:[%s31997_s16 + $0x694] ss:$52 sps:$4 sm:$0xff]  }
 0xef8   : > { %17798 = vmatpush1.bf16.msra.mxu1 %v24524_v29  ;;  %18003 = vmatpush1.bf16.msra.mxu0 %v24527_v33  ;;  %v24595_v29 = vld [vmem:[%s31997_s16 + $0x69c] ss:$52 sps:$4 sm:$0xff]  }
 0xef9   : > { %17799 = vmatprep.subr.bf16.mxu1 %v24532_v18  ;;  %18004 = vmatprep.subr.bf16.mxu0 %v24535_v48  ;;  %v24590_v33 = vld [vmem:[%s31997_s16 + $0x690] ss:$52 sps:$4 sm:$0xff]   ;;  %v24593_v18 = vld [vmem:[%s31997_s16 + $0x698] ss:$52 sps:$4 sm:$0xff]  }
 0xefa   : > { %v24598_v48 = vld [vmem:[%s31997_s16 + $0x6fc] ss:$52 sps:$4 sm:$0xff]  }
 0xefc   : > { %17800 = vmatpush1.bf16.msra.mxu1 %v24530_v19  ;;  %18005 = vmatpush1.bf16.msra.mxu0 %v24533_v42  ;;  %v24601_v19 = vld [vmem:[%s31997_s16 + $0x704] ss:$52 sps:$4 sm:$0xff]  }
 0xefd   : > { %17801 = vmatprep.subr.bf16.mxu1 %v24538_v4  ;;  %18006 = vmatprep.subr.bf16.mxu0 %v24541_v0  ;;  %v24596_v42 = vld [vmem:[%s31997_s16 + $0x6f8] ss:$52 sps:$4 sm:$0xff]   ;;  %v24599_v4 = vld [vmem:[%s31997_s16 + $0x700] ss:$52 sps:$4 sm:$0xff]  }
 0xefe   : > { %v24604_v0 = vld [vmem:[%s31997_s16 + $0x764] ss:$52 sps:$4 sm:$0xff]  }
 0xf00   : > { %17802 = vmatpush1.bf16.msra.mxu1 %v24536_v53  ;;  %18007 = vmatpush1.bf16.msra.mxu0 %v24539_v17  ;;  %v24607_v53 = vld [vmem:[%s31997_s16 + $0x76c] ss:$52 sps:$4 sm:$0xff]  }
 0xf01   : > { %17803 = vmatprep.subr.bf16.mxu1 %v24544_v43  ;;  %18008 = vmatprep.subr.bf16.mxu0 %v24547_v38  ;;  %v24602_v17 = vld [vmem:[%s31997_s16 + $0x760] ss:$52 sps:$4 sm:$0xff]   ;;  %v24605_v43 = vld [vmem:[%s31997_s16 + $0x768] ss:$52 sps:$4 sm:$0xff]  }
 0xf02   : > { %v24610_v38 = vld [vmem:[%s31997_s16 + $0x7cc] ss:$52 sps:$4 sm:$0xff]  }
 0xf04   : > { %17804 = vmatpush1.bf16.msra.mxu1 %v24542_v9  ;;  %18009 = vmatpush1.bf16.msra.mxu0 %v24545_v50  ;;  %v24613_v9 = vld [vmem:[%s31997_s16 + $0x7d4] ss:$52 sps:$4 sm:$0xff]  }
 0xf05   : > { %17805 = vmatprep.subr.bf16.mxu1 %v24550_v12  ;;  %18010 = vmatprep.subr.bf16.mxu0 %v24553_v5  ;;  %v24608_v50 = vld [vmem:[%s31997_s16 + $0x7c8] ss:$52 sps:$4 sm:$0xff]   ;;  %v24611_v12 = vld [vmem:[%s31997_s16 + $0x7d0] ss:$52 sps:$4 sm:$0xff]  }
 0xf06   : > { %v24616_v5 = vld [vmem:[%s31997_s16 + $0x834] ss:$52 sps:$4 sm:$0xff]  }
 0xf08   : > { %17806 = vmatpush1.bf16.msra.mxu1 %v24548_v26  ;;  %18011 = vmatpush1.bf16.msra.mxu0 %v24551_v59  ;;  %v24619_v26 = vld [vmem:[%s31997_s16 + $0x83c] ss:$52 sps:$4 sm:$0xff]  }
 0xf09   : > { %17807 = vmatprep.subr.bf16.mxu1 %v24556_v62  ;;  %18012 = vmatprep.subr.bf16.mxu0 %v24559_v51  ;;  %v24614_v59 = vld [vmem:[%s31997_s16 + $0x830] ss:$52 sps:$4 sm:$0xff]   ;;  %v24617_v62 = vld [vmem:[%s31997_s16 + $0x838] ss:$52 sps:$4 sm:$0xff]  }
 0xf0a   : > { %v24622_v51 = vld [vmem:[%s31997_s16 + $0x89c] ss:$52 sps:$4 sm:$0xff]  }
 0xf0c   : > { %17808 = vmatpush1.bf16.msra.mxu1 %v24554_v8  ;;  %18013 = vmatpush1.bf16.msra.mxu0 %v24557_v14  ;;  %v24625_v8 = vld [vmem:[%s31997_s16 + $0x8a4] ss:$52 sps:$4 sm:$0xff]  }
 0xf0d   : > { %17809 = vmatprep.subr.bf16.mxu1 %v24562_v25  ;;  %18014 = vmatprep.subr.bf16.mxu0 %v24565_v1  ;;  %v24620_v14 = vld [vmem:[%s31997_s16 + $0x898] ss:$52 sps:$4 sm:$0xff]   ;;  %v24623_v25 = vld [vmem:[%s31997_s16 + $0x8a0] ss:$52 sps:$4 sm:$0xff]  }
 0xf0e   : > { %v24628_v1 = vld [vmem:[%s31997_s16 + $0x904] ss:$52 sps:$4 sm:$0xff]  }
 0xf10   : > { %17810 = vmatpush1.bf16.msra.mxu1 %v24560_v7  ;;  %18015 = vmatpush1.bf16.msra.mxu0 %v24563_v55  ;;  %v24631_v7 = vld [vmem:[%s31997_s16 + $0x90c] ss:$52 sps:$4 sm:$0xff]  }
 0xf11   : > { %17811 = vmatprep.subr.bf16.mxu1 %v24568_v34  ;;  %18016 = vmatprep.subr.bf16.mxu0 %v24571_v10  ;;  %v24626_v55 = vld [vmem:[%s31997_s16 + $0x900] ss:$52 sps:$4 sm:$0xff]   ;;  %v24629_v34 = vld [vmem:[%s31997_s16 + $0x908] ss:$52 sps:$4 sm:$0xff]  }
 0xf12   : > { %v24634_v10 = vld [vmem:[%s31997_s16 + $0x96c] ss:$52 sps:$4 sm:$0xff]  }
 0xf14   : > { %17812 = vmatpush1.bf16.msra.mxu1 %v24566_v63  ;;  %18017 = vmatpush1.bf16.msra.mxu0 %v24569_v20  ;;  %v24637_v63 = vld [vmem:[%s31997_s16 + $0x974] ss:$52 sps:$4 sm:$0xff]  }
 0xf15   : > { %17813 = vmatprep.subr.bf16.mxu1 %v24574_v36  ;;  %18018 = vmatprep.subr.bf16.mxu0 %v24577_v21  ;;  %v24632_v20 = vld [vmem:[%s31997_s16 + $0x968] ss:$52 sps:$4 sm:$0xff]   ;;  %v24635_v36 = vld [vmem:[%s31997_s16 + $0x970] ss:$52 sps:$4 sm:$0xff]  }
 0xf16   : > { %v24640_v21 = vld [vmem:[%s31997_s16 + $0x9d4] ss:$52 sps:$4 sm:$0xff]  }
 0xf18   : > { %17814 = vmatpush1.bf16.msra.mxu1 %v24572_v6  ;;  %18019 = vmatpush1.bf16.msra.mxu0 %v24575_v49  ;;  %v24643_v6 = vld [vmem:[%s31997_s16 + $0x9dc] ss:$52 sps:$4 sm:$0xff]  }
 0xf19   : > { %17815 = vmatprep.subr.bf16.mxu1 %v24580_v39  ;;  %18020 = vmatprep.subr.bf16.mxu0 %v24583_v27  ;;  %v24638_v49 = vld [vmem:[%s31997_s16 + $0x9d0] ss:$52 sps:$4 sm:$0xff]   ;;  %v24641_v39 = vld [vmem:[%s31997_s16 + $0x9d8] ss:$52 sps:$4 sm:$0xff]  }
 0xf1a   : > { %v24646_v27 = vld [vmem:[%s31997_s16 + $0xa3c] ss:$52 sps:$4 sm:$0xff]  }
 0xf1c   : > { %17816 = vmatpush1.bf16.msra.mxu1 %v24578_v41  ;;  %18021 = vmatpush1.bf16.msra.mxu0 %v24581_v56  ;;  %v24649_v41 = vld [vmem:[%s31997_s16 + $0xa44] ss:$52 sps:$4 sm:$0xff]  }
 0xf1d   : > { %17817 = vmatprep.subr.bf16.mxu1 %v24586_v11  ;;  %18022 = vmatprep.subr.bf16.mxu0 %v24589_v37  ;;  %v24644_v56 = vld [vmem:[%s31997_s16 + $0xa38] ss:$52 sps:$4 sm:$0xff]   ;;  %v24647_v11 = vld [vmem:[%s31997_s16 + $0xa40] ss:$52 sps:$4 sm:$0xff]  }
 0xf1e   : > { %v24652_v37 = vld [vmem:[%s31997_s16 + $0xaa4] ss:$52 sps:$4 sm:$0xff]  }
 0xf20   : > { %17818 = vmatpush1.bf16.msra.mxu1 %v24584_v46  ;;  %18023 = vmatpush1.bf16.msra.mxu0 %v24587_v52  ;;  %v24655_v46 = vld [vmem:[%s31997_s16 + $0xaac] ss:$52 sps:$4 sm:$0xff]  }
 0xf21   : > { %17828 = vmatprep.subr.bf16.mxu1 %v24592_v16  ;;  %18033 = vmatprep.subr.bf16.mxu0 %v24595_v29  ;;  %v24650_v52 = vld [vmem:[%s31997_s16 + $0xaa0] ss:$52 sps:$4 sm:$0xff]   ;;  %v24653_v16 = vld [vmem:[%s31997_s16 + $0xaa8] ss:$52 sps:$4 sm:$0xff]  }
 0xf22   : > { %v24658_v29 = vld [vmem:[%s31997_s16 + $0xb0c] ss:$52 sps:$4 sm:$0xff]  }
 0xf23   : > { %17820 = vmatmul.mubr.bf16.vlgmr.msra.gmra.mrb[76].mxu1 %v28730_v61  ;;  %18025 = vmatmul.mubr.bf16.vlgmr.msra.gmra.mrb[220].mxu0 %v28730_v61 }
 0xf24   : > { %17829 = vmatpush1.bf16.msra.mxu1 %v24590_v33  ;;  %17860 = vmatprep.mubr.bf16.mxu1 %v28736_v15  ;;  %v24661_v33 = vld [vmem:[%s31997_s16 + $0xb14] ss:$52 sps:$4 sm:$0xff]  }
 0xf25   : > { %18034 = vmatpush1.bf16.msra.mxu0 %v24593_v18  ;;  %18065 = vmatprep.mubr.bf16.mxu0 %v28736_v15  ;;  %v24656_v18 = vld [vmem:[%s31997_s16 + $0xb08] ss:$52 sps:$4 sm:$0xff]  }
 0xf26   : > { %17830 = vmatprep.subr.bf16.mxu1 %v24598_v48  ;;  %18035 = vmatprep.subr.bf16.mxu0 %v24601_v19  ;;  %v24659_v48 = vld [vmem:[%s31997_s16 + $0xb10] ss:$52 sps:$4 sm:$0xff]   ;;  %v24664_v19 = vld [vmem:[%s31997_s16 + $0xb74] ss:$52 sps:$4 sm:$0xff]  }
 0xf28   : > { %17831 = vmatpush1.bf16.msra.mxu1 %v24596_v42  ;;  %v24667_v42 = vld [vmem:[%s31997_s16 + $0xb7c] ss:$52 sps:$4 sm:$0xff]  }
 0xf29   : > { %18036 = vmatpush1.bf16.msra.mxu0 %v24599_v4  ;;  %17832 = vmatprep.subr.bf16.mxu1 %v24604_v0  ;;  %v24662_v4 = vld [vmem:[%s31997_s16 + $0xb70] ss:$52 sps:$4 sm:$0xff]   ;;  %v24665_v0 = vld [vmem:[%s31997_s16 + $0xb78] ss:$52 sps:$4 sm:$0xff]  }
 0xf2a   : > { %18037 = vmatprep.subr.bf16.mxu0 %v24607_v53  ;;  %v24670_v53 = vld [vmem:[%s31997_s16 + $0xbdc] ss:$52 sps:$4 sm:$0xff]  }
 0xf2c   : > { %17833 = vmatpush1.bf16.msra.mxu1 %v24602_v17  ;;  %v24673_v17 = vld [vmem:[%s31997_s16 + $0xbe4] ss:$52 sps:$4 sm:$0xff]  }
 0xf2d   : > { %18038 = vmatpush1.bf16.msra.mxu0 %v24605_v43  ;;  %17834 = vmatprep.subr.bf16.mxu1 %v24610_v38  ;;  %v24668_v43 = vld [vmem:[%s31997_s16 + $0xbd8] ss:$52 sps:$4 sm:$0xff]   ;;  %v24671_v38 = vld [vmem:[%s31997_s16 + $0xbe0] ss:$52 sps:$4 sm:$0xff]  }
 0xf2e   : > { %18039 = vmatprep.subr.bf16.mxu0 %v24613_v9  ;;  %v24676_v9 = vld [vmem:[%s31997_s16 + $0xc44] ss:$52 sps:$4 sm:$0xff]  }
 0xf30   : > { %17835 = vmatpush1.bf16.msra.mxu1 %v24608_v50  ;;  %v24679_v50 = vld [vmem:[%s31997_s16 + $0xc4c] ss:$52 sps:$4 sm:$0xff]  }
 0xf31   : > { %18040 = vmatpush1.bf16.msra.mxu0 %v24611_v12  ;;  %17836 = vmatprep.subr.bf16.mxu1 %v24616_v5  ;;  %v24674_v12 = vld [vmem:[%s31997_s16 + $0xc40] ss:$52 sps:$4 sm:$0xff]   ;;  %v24677_v5 = vld [vmem:[%s31997_s16 + $0xc48] ss:$52 sps:$4 sm:$0xff]  }
 0xf32   : > { %18041 = vmatprep.subr.bf16.mxu0 %v24619_v26  ;;  %v24682_v26 = vld [vmem:[%s31997_s16 + $0xcac] ss:$52 sps:$4 sm:$0xff]  }
 0xf34   : > { %17837 = vmatpush1.bf16.msra.mxu1 %v24614_v59  ;;  %v24685_v59 = vld [vmem:[%s31997_s16 + $0xcb4] ss:$52 sps:$4 sm:$0xff]  }
 0xf35   : > { %18042 = vmatpush1.bf16.msra.mxu0 %v24617_v62  ;;  %17838 = vmatprep.subr.bf16.mxu1 %v24622_v51  ;;  %v24680_v62 = vld [vmem:[%s31997_s16 + $0xca8] ss:$52 sps:$4 sm:$0xff]   ;;  %v24683_v51 = vld [vmem:[%s31997_s16 + $0xcb0] ss:$52 sps:$4 sm:$0xff]  }
 0xf36   : > { %18043 = vmatprep.subr.bf16.mxu0 %v24625_v8  ;;  %v24688_v8 = vld [vmem:[%s31997_s16 + $0xd14] ss:$52 sps:$4 sm:$0xff]  }
 0xf38   : > { %17839 = vmatpush1.bf16.msra.mxu1 %v24620_v14  ;;  %v24691_v14 = vld [vmem:[%s31997_s16 + $0xd1c] ss:$52 sps:$4 sm:$0xff]  }
 0xf39   : > { %18044 = vmatpush1.bf16.msra.mxu0 %v24623_v25  ;;  %17840 = vmatprep.subr.bf16.mxu1 %v24628_v1  ;;  %v24686_v25 = vld [vmem:[%s31997_s16 + $0xd10] ss:$52 sps:$4 sm:$0xff]   ;;  %v24689_v1 = vld [vmem:[%s31997_s16 + $0xd18] ss:$52 sps:$4 sm:$0xff]  }
 0xf3a   : > { %18045 = vmatprep.subr.bf16.mxu0 %v24631_v7  ;;  %v24694_v7 = vld [vmem:[%s31997_s16 + $0xd7c] ss:$52 sps:$4 sm:$0xff]  }
 0xf3c   : > { %17841 = vmatpush1.bf16.msra.mxu1 %v24626_v55  ;;  %v24697_v55 = vld [vmem:[%s31997_s16 + $0xd84] ss:$52 sps:$4 sm:$0xff]  }
 0xf3d   : > { %18046 = vmatpush1.bf16.msra.mxu0 %v24629_v34  ;;  %17842 = vmatprep.subr.bf16.mxu1 %v24634_v10  ;;  %v24692_v34 = vld [vmem:[%s31997_s16 + $0xd78] ss:$52 sps:$4 sm:$0xff]   ;;  %v24695_v10 = vld [vmem:[%s31997_s16 + $0xd80] ss:$52 sps:$4 sm:$0xff]  }
 0xf3e   : > { %18047 = vmatprep.subr.bf16.mxu0 %v24637_v63  ;;  %v24700_v63 = vld [vmem:[%s31997_s16 + $0xde4] ss:$52 sps:$4 sm:$0xff]  }
 0xf40   : > { %17843 = vmatpush1.bf16.msra.mxu1 %v24632_v20  ;;  %v24703_v20 = vld [vmem:[%s31997_s16 + $0xdec] ss:$52 sps:$4 sm:$0xff]  }
 0xf41   : > { %18048 = vmatpush1.bf16.msra.mxu0 %v24635_v36  ;;  %17844 = vmatprep.subr.bf16.mxu1 %v24640_v21  ;;  %v24698_v36 = vld [vmem:[%s31997_s16 + $0xde0] ss:$52 sps:$4 sm:$0xff]   ;;  %v24701_v21 = vld [vmem:[%s31997_s16 + $0xde8] ss:$52 sps:$4 sm:$0xff]  }
 0xf42   : > { %18049 = vmatprep.subr.bf16.mxu0 %v24643_v6  ;;  %v24706_v6 = vld [vmem:[%s31997_s16 + $0xe4c] ss:$52 sps:$4 sm:$0xff]  }
 0xf44   : > { %17845 = vmatpush1.bf16.msra.mxu1 %v24638_v49  ;;  %v24709_v49 = vld [vmem:[%s31997_s16 + $0xe54] ss:$52 sps:$4 sm:$0xff]  }
 0xf45   : > { %18050 = vmatpush1.bf16.msra.mxu0 %v24641_v39  ;;  %17846 = vmatprep.subr.bf16.mxu1 %v24646_v27  ;;  %v24704_v39 = vld [vmem:[%s31997_s16 + $0xe48] ss:$52 sps:$4 sm:$0xff]   ;;  %v24707_v27 = vld [vmem:[%s31997_s16 + $0xe50] ss:$52 sps:$4 sm:$0xff]  }
 0xf46   : > { %18051 = vmatprep.subr.bf16.mxu0 %v24649_v41  ;;  %v24712_v41 = vld [vmem:[%s31997_s16 + $0xeb4] ss:$52 sps:$4 sm:$0xff]  }
 0xf48   : > { %17847 = vmatpush1.bf16.msra.mxu1 %v24644_v56  ;;  %v24715_v56 = vld [vmem:[%s31997_s16 + $0xebc] ss:$52 sps:$4 sm:$0xff]  }
 0xf49   : > { %18052 = vmatpush1.bf16.msra.mxu0 %v24647_v11  ;;  %17848 = vmatprep.subr.bf16.mxu1 %v24652_v37  ;;  %v24710_v11 = vld [vmem:[%s31997_s16 + $0xeb0] ss:$52 sps:$4 sm:$0xff]   ;;  %v24713_v37 = vld [vmem:[%s31997_s16 + $0xeb8] ss:$52 sps:$4 sm:$0xff]  }
 0xf4a   : > { %18053 = vmatprep.subr.bf16.mxu0 %v24655_v46  ;;  %v24718_v46 = vld [vmem:[%s31997_s16 + $0xf1c] ss:$52 sps:$4 sm:$0xff]  }
 0xf4c   : > { %17849 = vmatpush1.bf16.msra.mxu1 %v24650_v52  ;;  %v24721_v52 = vld [vmem:[%s31997_s16 + $0xf24] ss:$52 sps:$4 sm:$0xff]  }
 0xf4d   : > { %18054 = vmatpush1.bf16.msra.mxu0 %v24653_v16  ;;  %17850 = vmatprep.subr.bf16.mxu1 %v24658_v29  ;;  %v24716_v16 = vld [vmem:[%s31997_s16 + $0xf18] ss:$52 sps:$4 sm:$0xff]   ;;  %v24719_v29 = vld [vmem:[%s31997_s16 + $0xf20] ss:$52 sps:$4 sm:$0xff]  }
 0xf4e   : > { %18055 = vmatprep.subr.bf16.mxu0 %v24661_v33  ;;  %v24724_v33 = vld [vmem:[%s31997_s16 + $0xf84] ss:$52 sps:$4 sm:$0xff]  }
 0xf50   : > { %17851 = vmatpush1.bf16.msra.mxu1 %v24656_v18  ;;  %v24727_v18 = vld [vmem:[%s31997_s16 + $0xf8c] ss:$52 sps:$4 sm:$0xff]  }
 0xf51   : > { %18056 = vmatpush1.bf16.msra.mxu0 %v24659_v48  ;;  %17852 = vmatprep.subr.bf16.mxu1 %v24664_v19  ;;  %v24722_v48 = vld [vmem:[%s31997_s16 + $0xf80] ss:$52 sps:$4 sm:$0xff]   ;;  %v24725_v19 = vld [vmem:[%s31997_s16 + $0xf88] ss:$52 sps:$4 sm:$0xff]  }
 0xf52   : > { %18057 = vmatprep.subr.bf16.mxu0 %v24667_v42  ;;  %v24730_v42 = vld [vmem:[%s31997_s16 + $0xfec] ss:$52 sps:$4 sm:$0xff]  }
 0xf54   : > { %17853 = vmatpush1.bf16.msra.mxu1 %v24662_v4  ;;  %v24733_v4 = vld [vmem:[%s31997_s16 + $0xff4] ss:$52 sps:$4 sm:$0xff]  }
 0xf55   : > { %18058 = vmatpush1.bf16.msra.mxu0 %v24665_v0  ;;  %17854 = vmatprep.subr.bf16.mxu1 %v24670_v53  ;;  %v24728_v0 = vld [vmem:[%s31997_s16 + $0xfe8] ss:$52 sps:$4 sm:$0xff]   ;;  %v24731_v53 = vld [vmem:[%s31997_s16 + $0xff0] ss:$52 sps:$4 sm:$0xff]  }
 0xf56   : > { %18059 = vmatprep.subr.bf16.mxu0 %v24673_v17  ;;  %v24736_v17 = vld [vmem:[%s31997_s16 + $0x1054] ss:$52 sps:$4 sm:$0xff]  }
 0xf58   : > { %17855 = vmatpush1.bf16.msra.mxu1 %v24668_v43  ;;  %v24739_v43 = vld [vmem:[%s31997_s16 + $0x105c] ss:$52 sps:$4 sm:$0xff]  }
 0xf59   : > { %18060 = vmatpush1.bf16.msra.mxu0 %v24671_v38  ;;  %17856 = vmatprep.subr.bf16.mxu1 %v24676_v9  ;;  %v24734_v38 = vld [vmem:[%s31997_s16 + $0x1050] ss:$52 sps:$4 sm:$0xff]   ;;  %v24737_v9 = vld [vmem:[%s31997_s16 + $0x1058] ss:$52 sps:$4 sm:$0xff]  }
 0xf5a   : > { %18061 = vmatprep.subr.bf16.mxu0 %v24679_v50  ;;  %v24742_v50 = vld [vmem:[%s31997_s16 + $0x10bc] ss:$52 sps:$4 sm:$0xff]  }
 0xf5c   : > { %17857 = vmatpush1.bf16.msra.mxu1 %v24674_v12  ;;  %v24745_v12 = vld [vmem:[%s31997_s16 + $0x10c4] ss:$52 sps:$4 sm:$0xff]  }
 0xf5d   : > { %18062 = vmatpush1.bf16.msra.mxu0 %v24677_v5  ;;  %17858 = vmatprep.subr.bf16.mxu1 %v24682_v26  ;;  %v24740_v5 = vld [vmem:[%s31997_s16 + $0x10b8] ss:$52 sps:$4 sm:$0xff]   ;;  %v24743_v26 = vld [vmem:[%s31997_s16 + $0x10c0] ss:$52 sps:$4 sm:$0xff]  }
 0xf5e   : > { %18063 = vmatprep.subr.bf16.mxu0 %v24685_v59  ;;  %v24748_v59 = vld [vmem:[%s31997_s16 + $0x1124] ss:$52 sps:$4 sm:$0xff]  }
 0xf60   : > { %17859 = vmatpush1.bf16.msra.mxu1 %v24680_v62  ;;  %v24751_v62 = vld [vmem:[%s31997_s16 + $0x112c] ss:$52 sps:$4 sm:$0xff]  }
 0xf61   : > { %18064 = vmatpush1.bf16.msra.mxu0 %v24683_v51  ;;  %17869 = vmatprep.subr.bf16.mxu1 %v24688_v8  ;;  %v24746_v51 = vld [vmem:[%s31997_s16 + $0x1120] ss:$52 sps:$4 sm:$0xff]   ;;  %v24749_v8 = vld [vmem:[%s31997_s16 + $0x1128] ss:$52 sps:$4 sm:$0xff]  }
 0xf62   : > { %18074 = vmatprep.subr.bf16.mxu0 %v24691_v14  ;;  %v24754_v14 = vld [vmem:[%s31997_s16 + $0x118c] ss:$52 sps:$4 sm:$0xff]  }
 0xf63   : > { %17861 = vmatmul.mubr.bf16.vlgmr.msra.gmra.mrb[76].mxu1 %v28846_v54 }
 0xf64   : > { %18066 = vmatmul.mubr.bf16.vlgmr.msra.gmra.mrb[220].mxu0 %v28846_v54  ;;  %17870 = vmatpush1.bf16.msra.mxu1 %v24686_v25  ;;  %v24757_v25 = vld [vmem:[%s31997_s16 + $0x1194] ss:$52 sps:$4 sm:$0xff]  }
 0xf65   : > { %17901 = vmatprep.mubr.bf16.mxu1 %v28851_v31  ;;  %18075 = vmatpush1.bf16.msra.mxu0 %v24689_v1  ;;  %v24752_v1 = vld [vmem:[%s31997_s16 + $0x1188] ss:$52 sps:$4 sm:$0xff]  }
 0xf66   : > { %18106 = vmatprep.mubr.bf16.mxu0 %v28851_v31  ;;  %17871 = vmatprep.subr.bf16.mxu1 %v24694_v7  ;;  %v24755_v7 = vld [vmem:[%s31997_s16 + $0x1190] ss:$52 sps:$4 sm:$0xff]  }
 0xf67   : > { %18076 = vmatprep.subr.bf16.mxu0 %v24697_v55  ;;  %v24760_v55 = vld [vmem:[%s31997_s16 + $0x11f4] ss:$52 sps:$4 sm:$0xff]  }
 0xf68   : > { %17872 = vmatpush1.bf16.msra.mxu1 %v24692_v34  ;;  %v24763_v34 = vld [vmem:[%s31997_s16 + $0x11fc] ss:$52 sps:$4 sm:$0xff]  }
 0xf69   : > { %18077 = vmatpush1.bf16.msra.mxu0 %v24695_v10  ;;  %17873 = vmatprep.subr.bf16.mxu1 %v24700_v63  ;;  %v24758_v10 = vld [vmem:[%s31997_s16 + $0x11f0] ss:$52 sps:$4 sm:$0xff]   ;;  %v24761_v63 = vld [vmem:[%s31997_s16 + $0x11f8] ss:$52 sps:$4 sm:$0xff]  }
 0xf6a   : > { %18078 = vmatprep.subr.bf16.mxu0 %v24703_v20  ;;  %v24766_v20 = vld [vmem:[%s31997_s16 + $0x125c] ss:$52 sps:$4 sm:$0xff]  }
 0xf6c   : > { %17874 = vmatpush1.bf16.msra.mxu1 %v24698_v36  ;;  %v24769_v36 = vld [vmem:[%s31997_s16 + $0x1264] ss:$52 sps:$4 sm:$0xff]  }
 0xf6d   : > { %18079 = vmatpush1.bf16.msra.mxu0 %v24701_v21  ;;  %17875 = vmatprep.subr.bf16.mxu1 %v24706_v6  ;;  %v24764_v21 = vld [vmem:[%s31997_s16 + $0x1258] ss:$52 sps:$4 sm:$0xff]   ;;  %v24767_v6 = vld [vmem:[%s31997_s16 + $0x1260] ss:$52 sps:$4 sm:$0xff]  }
 0xf6e   : > { %18080 = vmatprep.subr.bf16.mxu0 %v24709_v49  ;;  %v24772_v49 = vld [vmem:[%s31997_s16 + $0x12c4] ss:$52 sps:$4 sm:$0xff]  }
 0xf70   : > { %17876 = vmatpush1.bf16.msra.mxu1 %v24704_v39  ;;  %v24775_v39 = vld [vmem:[%s31997_s16 + $0x12cc] ss:$52 sps:$4 sm:$0xff]  }
 0xf71   : > { %18081 = vmatpush1.bf16.msra.mxu0 %v24707_v27  ;;  %17877 = vmatprep.subr.bf16.mxu1 %v24712_v41  ;;  %v24770_v27 = vld [vmem:[%s31997_s16 + $0x12c0] ss:$52 sps:$4 sm:$0xff]   ;;  %v24773_v41 = vld [vmem:[%s31997_s16 + $0x12c8] ss:$52 sps:$4 sm:$0xff]  }
 0xf72   : > { %18082 = vmatprep.subr.bf16.mxu0 %v24715_v56  ;;  %v24778_v56 = vld [vmem:[%s31997_s16 + $0x132c] ss:$52 sps:$4 sm:$0xff]  }
 0xf74   : > { %17878 = vmatpush1.bf16.msra.mxu1 %v24710_v11  ;;  %v24781_v11 = vld [vmem:[%s31997_s16 + $0x1334] ss:$52 sps:$4 sm:$0xff]  }
 0xf75   : > { %18083 = vmatpush1.bf16.msra.mxu0 %v24713_v37  ;;  %17879 = vmatprep.subr.bf16.mxu1 %v24718_v46  ;;  %v24776_v37 = vld [vmem:[%s31997_s16 + $0x1328] ss:$52 sps:$4 sm:$0xff]   ;;  %v24779_v46 = vld [vmem:[%s31997_s16 + $0x1330] ss:$52 sps:$4 sm:$0xff]  }
 0xf76   : > { %18084 = vmatprep.subr.bf16.mxu0 %v24721_v52  ;;  %v24784_v52 = vld [vmem:[%s31997_s16 + $0x1394] ss:$52 sps:$4 sm:$0xff]  }
 0xf78   : > { %17880 = vmatpush1.bf16.msra.mxu1 %v24716_v16  ;;  %v24787_v16 = vld [vmem:[%s31997_s16 + $0x139c] ss:$52 sps:$4 sm:$0xff]  }
 0xf79   : > { %18085 = vmatpush1.bf16.msra.mxu0 %v24719_v29  ;;  %17881 = vmatprep.subr.bf16.mxu1 %v24724_v33  ;;  %v24782_v29 = vld [vmem:[%s31997_s16 + $0x1390] ss:$52 sps:$4 sm:$0xff]   ;;  %v24785_v33 = vld [vmem:[%s31997_s16 + $0x1398] ss:$52 sps:$4 sm:$0xff]  }
 0xf7a   : > { %18086 = vmatprep.subr.bf16.mxu0 %v24727_v18  ;;  %v24790_v18 = vld [vmem:[%s31997_s16 + $0x13fc] ss:$52 sps:$4 sm:$0xff]  }
 0xf7c   : > { %17882 = vmatpush1.bf16.msra.mxu1 %v24722_v48  ;;  %v24793_v48 = vld [vmem:[%s31997_s16 + $0x1404] ss:$52 sps:$4 sm:$0xff]  }
 0xf7d   : > { %18087 = vmatpush1.bf16.msra.mxu0 %v24725_v19  ;;  %17883 = vmatprep.subr.bf16.mxu1 %v24730_v42  ;;  %v24788_v19 = vld [vmem:[%s31997_s16 + $0x13f8] ss:$52 sps:$4 sm:$0xff]   ;;  %v24791_v42 = vld [vmem:[%s31997_s16 + $0x1400] ss:$52 sps:$4 sm:$0xff]  }
 0xf7e   : > { %18088 = vmatprep.subr.bf16.mxu0 %v24733_v4  ;;  %v24796_v4 = vld [vmem:[%s31997_s16 + $0x1464] ss:$52 sps:$4 sm:$0xff]  }
 0xf80   : > { %17884 = vmatpush1.bf16.msra.mxu1 %v24728_v0  ;;  %v24799_v0 = vld [vmem:[%s31997_s16 + $0x146c] ss:$52 sps:$4 sm:$0xff]  }
 0xf81   : > { %18089 = vmatpush1.bf16.msra.mxu0 %v24731_v53  ;;  %17885 = vmatprep.subr.bf16.mxu1 %v24736_v17  ;;  %v24794_v53 = vld [vmem:[%s31997_s16 + $0x1460] ss:$52 sps:$4 sm:$0xff]   ;;  %v24797_v17 = vld [vmem:[%s31997_s16 + $0x1468] ss:$52 sps:$4 sm:$0xff]  }
 0xf82   : > { %18090 = vmatprep.subr.bf16.mxu0 %v24739_v43  ;;  %v24802_v43 = vld [vmem:[%s31997_s16 + $0x14cc] ss:$52 sps:$4 sm:$0xff]  }
 0xf84   : > { %17886 = vmatpush1.bf16.msra.mxu1 %v24734_v38  ;;  %v24805_v38 = vld [vmem:[%s31997_s16 + $0x14d4] ss:$52 sps:$4 sm:$0xff]  }
 0xf85   : > { %18091 = vmatpush1.bf16.msra.mxu0 %v24737_v9  ;;  %17887 = vmatprep.subr.bf16.mxu1 %v24742_v50  ;;  %v24800_v9 = vld [vmem:[%s31997_s16 + $0x14c8] ss:$52 sps:$4 sm:$0xff]   ;;  %v24803_v50 = vld [vmem:[%s31997_s16 + $0x14d0] ss:$52 sps:$4 sm:$0xff]  }
 0xf86   : > { %18092 = vmatprep.subr.bf16.mxu0 %v24745_v12  ;;  %v24808_v12 = vld [vmem:[%s31997_s16 + $0x1534] ss:$52 sps:$4 sm:$0xff]  }
 0xf88   : > { %17888 = vmatpush1.bf16.msra.mxu1 %v24740_v5  ;;  %v24811_v5 = vld [vmem:[%s31997_s16 + $0x153c] ss:$52 sps:$4 sm:$0xff]  }
 0xf89   : > { %18093 = vmatpush1.bf16.msra.mxu0 %v24743_v26  ;;  %17889 = vmatprep.subr.bf16.mxu1 %v24748_v59  ;;  %v24806_v26 = vld [vmem:[%s31997_s16 + $0x1530] ss:$52 sps:$4 sm:$0xff]  }
 0xf8a   : > { %18094 = vmatprep.subr.bf16.mxu0 %v24751_v62  ;;  %v12028_v59 = vld [vmem:[%s31998_s17] sm:$0xff]  ;;  %v24809_v62 = vld [vmem:[%s31997_s16 + $0x1538] ss:$52 sps:$4 sm:$0xff]  }
 0xf8c   : > { %17890 = vmatpush1.bf16.msra.mxu1 %v24746_v51  ;;  %v24814_v51 = vld [vmem:[%s31997_s16 + $0x159c] ss:$52 sps:$4 sm:$0xff]  }
 0xf8d   : > { %18095 = vmatpush1.bf16.msra.mxu0 %v24749_v8  ;;  %17891 = vmatprep.subr.bf16.mxu1 %v24754_v14  ;;  %v24817_v8 = vld [vmem:[%s31997_s16 + $0x15a4] ss:$52 sps:$4 sm:$0xff]   ;;  %v17315_v14 = vrot.slane %v12028_v59, %v28712_v60 }
 0xf8e   : > { %18096 = vmatprep.subr.bf16.mxu0 %v24757_v25  ;;  %v17323_v25 = vrot.slane %v12028_v59, %v28829_v58 }
 0xf90   : > { %17892 = vmatpush1.bf16.msra.mxu1 %v24752_v1  ;;  %v24812_v1 = vld [vmem:[%s31997_s16 + $0x1598] ss:$52 sps:$4 sm:$0xff]  }
 0xf91   : > { %18097 = vmatpush1.bf16.msra.mxu0 %v24755_v7  ;;  %17893 = vmatprep.subr.bf16.mxu1 %v24760_v55  ;;  %v17319_v7 = vrot.slane %v12028_v59, %v28709_v47  ;;  %v17327_v55 = vrot.slane %v12028_v59, %v28715_v28  ;;  %v24844_v59 = vld [vmem:[%s31997_s16 + $0x17a4] ss:$52 sps:$4 sm:$0xff]  }
 0xf92   : > { %18098 = vmatprep.subr.bf16.mxu0 %v24763_v34  ;;  %v24815_v34 = vld [vmem:[%s31997_s16 + $0x15a0] ss:$52 sps:$4 sm:$0xff]  }
 0xf94   : > { %17894 = vmatpush1.bf16.msra.mxu1 %v24758_v10  ;;  %v24820_v10 = vld [vmem:[%s31997_s16 + $0x1604] ss:$52 sps:$4 sm:$0xff]  }
 0xf95   : > { %18099 = vmatpush1.bf16.msra.mxu0 %v24761_v63  ;;  %17895 = vmatprep.subr.bf16.mxu1 %v24766_v20 }
 0xf96   : > { %18100 = vmatprep.subr.bf16.mxu0 %v24769_v36  ;;  %v24823_v36 = vld [vmem:[%s31997_s16 + $0x160c] ss:$52 sps:$4 sm:$0xff]  }
 0xf98   : > { %17896 = vmatpush1.bf16.msra.mxu1 %v24764_v21 }
 0xf99   : > { %18101 = vmatpush1.bf16.msra.mxu0 %v24767_v6  ;;  %17897 = vmatprep.subr.bf16.mxu1 %v24772_v49 }
 0xf9a   : > { %18102 = vmatprep.subr.bf16.mxu0 %v24775_v39 }
 0xf9c   : > { %17898 = vmatpush1.bf16.msra.mxu1 %v24770_v27 }
 0xf9d   : > { %18103 = vmatpush1.bf16.msra.mxu0 %v24773_v41  ;;  %17899 = vmatprep.subr.bf16.mxu1 %v24778_v56 }
 0xf9e   : > { %18104 = vmatprep.subr.bf16.mxu0 %v24781_v11 }
 0xfa0   : > { %17900 = vmatpush1.bf16.msra.mxu1 %v24776_v37  ;;  %v24818_v37 = vld [vmem:[%s31997_s16 + $0x1600] ss:$52 sps:$4 sm:$0xff]  }
 0xfa1   : > { %18105 = vmatpush1.bf16.msra.mxu0 %v24779_v46  ;;  %17910 = vmatprep.subr.bf16.mxu1 %v24784_v52 }
 0xfa2   : > { %18115 = vmatprep.subr.bf16.mxu0 %v24787_v16  ;;  %v24821_v16 = vld [vmem:[%s31997_s16 + $0x1608] ss:$52 sps:$4 sm:$0xff]  }
 0xfa3   : > { %17902 = vmatmul.mubr.bf16.vlgmr.msra.gmra.mrb[76].mxu1 %v28957_v44 }
 0xfa4   : > { %18107 = vmatmul.mubr.bf16.vlgmr.msra.gmra.mrb[220].mxu0 %v28957_v44  ;;  %17911 = vmatpush1.bf16.msra.mxu1 %v24782_v29  ;;  %v24826_v29 = vld [vmem:[%s31997_s16 + $0x166c] ss:$52 sps:$4 sm:$0xff]  }
 0xfa5   : > { %17942 = vmatprep.mubr.bf16.mxu1 %v28962_v22  ;;  %18116 = vmatpush1.bf16.msra.mxu0 %v24785_v33 }
 0xfa6   : > { %18147 = vmatprep.mubr.bf16.mxu0 %v28962_v22  ;;  %17912 = vmatprep.subr.bf16.mxu1 %v24790_v18 }
 0xfa7   : > { %18117 = vmatprep.subr.bf16.mxu0 %v24793_v48  ;;  %v24829_v48 = vld [vmem:[%s31997_s16 + $0x1674] ss:$52 sps:$4 sm:$0xff]  }
 0xfa8   : > { %17913 = vmatpush1.bf16.msra.mxu1 %v24788_v19 }
 0xfa9   : > { %18118 = vmatpush1.bf16.msra.mxu0 %v24791_v42  ;;  %17914 = vmatprep.subr.bf16.mxu1 %v24796_v4  ;;  %v24824_v4 = vld [vmem:[%s31997_s16 + $0x1668] ss:$52 sps:$4 sm:$0xff]  }
 0xfaa   : > { %18119 = vmatprep.subr.bf16.mxu0 %v24799_v0  ;;  %v24827_v0 = vld [vmem:[%s31997_s16 + $0x1670] ss:$52 sps:$4 sm:$0xff]  }
 0xfac   : > { %17915 = vmatpush1.bf16.msra.mxu1 %v24794_v53  ;;  %v24832_v53 = vld [vmem:[%s31997_s16 + $0x16d4] ss:$52 sps:$4 sm:$0xff]  }
 0xfad   : > { %18120 = vmatpush1.bf16.msra.mxu0 %v24797_v17  ;;  %17916 = vmatprep.subr.bf16.mxu1 %v24802_v43  ;;  %v24835_v43 = vld [vmem:[%s31997_s16 + $0x16dc] ss:$52 sps:$4 sm:$0xff]  }
 0xfae   : > { %18121 = vmatprep.subr.bf16.mxu0 %v24805_v38  ;;  %v24830_v38 = vld [vmem:[%s31997_s16 + $0x16d0] ss:$52 sps:$4 sm:$0xff]  }
 0xfb0   : > { %17917 = vmatpush1.bf16.msra.mxu1 %v24800_v9  ;;  %v24833_v9 = vld [vmem:[%s31997_s16 + $0x16d8] ss:$52 sps:$4 sm:$0xff]  }
 0xfb1   : > { %18122 = vmatpush1.bf16.msra.mxu0 %v24803_v50  ;;  %17918 = vmatprep.subr.bf16.mxu1 %v24808_v12  ;;  %v24838_v50 = vld [vmem:[%s31997_s16 + $0x173c] ss:$52 sps:$4 sm:$0xff]   ;;  %v24841_v12 = vld [vmem:[%s31997_s16 + $0x1744] ss:$52 sps:$4 sm:$0xff]  }
 0xfb2   : > { %18123 = vmatprep.subr.bf16.mxu0 %v24811_v5  ;;  %v24836_v5 = vld [vmem:[%s31997_s16 + $0x1738] ss:$52 sps:$4 sm:$0xff]  }
 0xfb4   : > { %17919 = vmatpush1.bf16.msra.mxu1 %v24806_v26  ;;  %v24839_v26 = vld [vmem:[%s31997_s16 + $0x1740] ss:$52 sps:$4 sm:$0xff]  }
 0xfb5   : > { %18124 = vmatpush1.bf16.msra.mxu0 %v24809_v62  ;;  %17920 = vmatprep.subr.bf16.mxu1 %v24814_v51  ;;  %v24847_v62 = vld [vmem:[%s31997_s16 + $0x17ac] ss:$52 sps:$4 sm:$0xff]  }
 0xfb6   : > { %v17575_v63 = vpop.f32.mrb[72].mxu1  ;;  %v17780_v20 = vpop.f32.mrb[216].mxu0  ;;  %18125 = vmatprep.subr.bf16.mxu0 %v24817_v8  ;;  %v24842_v51 = vld [vmem:[%s31997_s16 + $0x17a0] ss:$52 sps:$4 sm:$0xff]   ;;  %v24845_v8 = vld [vmem:[%s31997_s16 + $0x17a8] ss:$52 sps:$4 sm:$0xff]  }
 0xfb7   : > { %v22781_v21 = vadd.f32 %v17575_v63, %v17315_v14  ;;  %v22783_v6 = vadd.f32 %v17780_v20, %v17323_v25  ;;  %v17577_v49 = vpop.f32.mrb[73].mxu1  ;;  %v17782_v39 = vpop.f32.mrb[217].mxu0  ;;  %v24850_v14 = vld [vmem:[%s31997_s16 + $0x180c] ss:$52 sps:$4 sm:$0xff]   ;;  %v24853_v25 = vld [vmem:[%s31997_s16 + $0x1814] ss:$52 sps:$4 sm:$0xff]  }
 0xfb8   : > { %v22782_v27 = vadd.f32 %v17577_v49, %v17319_v7  ;;  %v22784_v41 = vadd.f32 %v17782_v39, %v17327_v55  ;;  %17921 = vmatpush1.bf16.msra.mxu1 %v24812_v1  ;;  %v17579_v56 = vpop.f32.mrb[74].mxu1  ;;  %v17784_v11 = vpop.f32.mrb[218].mxu0  ;;  %v24848_v1 = vld [vmem:[%s31997_s16 + $0x1808] ss:$52 sps:$4 sm:$0xff]   ;;  %v24851_v7 = vld [vmem:[%s31997_s16 + $0x1810] ss:$52 sps:$4 sm:$0xff]  }
 0xfb9   : > { %18126 = vmatpush1.bf16.msra.mxu0 %v24815_v34  ;;  %v17580_v46 = vpop.f32.mrb[75].mxu1  ;;  %v17785_v52 = vpop.f32.mrb[219].mxu0  ;;  %17922 = vmatprep.subr.bf16.mxu1 %v24820_v10  ;;  %v24856_v55 = vld [vmem:[%s31997_s16 + $0x1874] ss:$52 sps:$4 sm:$0xff]   ;;  %v24859_v34 = vld [vmem:[%s31997_s16 + $0x187c] ss:$52 sps:$4 sm:$0xff]  }
 0xfba   : > { %v18820_v33 = vcombine.low %v22781_v21, %v22782_v27  ;;  %v18821_v18 = vcombine.low %v22783_v6, %v22784_v41  ;;  %18127 = vmatprep.subr.bf16.mxu0 %v24823_v36  ;;  %v24854_v10 = vld [vmem:[%s31997_s16 + $0x1870] ss:$52 sps:$4 sm:$0xff]   ;;  %v24857_v63 = vld [vmem:[%s31997_s16 + $0x1878] ss:$52 sps:$4 sm:$0xff]   ;;  %v24863_v6 = vld [vmem:[%s31997_s16 + $0x18e0] ss:$52 sps:$4 sm:$0xff]  }
 0xfbb   : > { %v24862_v20 = vld [vmem:[%s31997_s16 + $0x18dc] ss:$52 sps:$4 sm:$0xff]   ;;  %v24865_v36 = vld [vmem:[%s31997_s16 + $0x18e4] ss:$52 sps:$4 sm:$0xff]   ;;  %v24871_v39 = vld [vmem:[%s31997_s16 + $0x194c] ss:$52 sps:$4 sm:$0xff]  }
 0xfbc   : > { %v30402_v19 = vrot.slane %v18820_v33, %v28354_v40  ;;  %v30405_v42 = vrot.slane %v18821_v18, %v28354_v40  ;;  %17923 = vmatpush1.bf16.msra.mxu1 %v24818_v37  ;;  %v24860_v21 = vld [vmem:[%s31997_s16 + $0x18d8] ss:$52 sps:$4 sm:$0xff]   ;;  %v24866_v27 = vld [vmem:[%s31997_s16 + $0x1940] ss:$52 sps:$4 sm:$0xff]   ;;  %v24869_v41 = vld [vmem:[%s31997_s16 + $0x1948] ss:$52 sps:$4 sm:$0xff]  }
 0xfbd   : > { %18128 = vmatpush1.bf16.msra.mxu0 %v24821_v16  ;;  %17924 = vmatprep.subr.bf16.mxu1 %v24826_v29  ;;  %v24868_v49 = vld [vmem:[%s31997_s16 + $0x1944] ss:$52 sps:$4 sm:$0xff]   ;;  %v24874_v56 = vld [vmem:[%s31997_s16 + $0x19ac] ss:$52 sps:$4 sm:$0xff]   ;;  %v24877_v11 = vld [vmem:[%s31997_s16 + $0x19b4] ss:$52 sps:$4 sm:$0xff]  }
 0xfbe   : > { %v18852_v17 = vcombine.low %v30402_v19, %v30405_v42  ;;  %18129 = vmatprep.subr.bf16.mxu0 %v24829_v48  ;;  %v24872_v37 = vld [vmem:[%s31997_s16 + $0x19a8] ss:$52 sps:$4 sm:$0xff]   ;;  %v24875_v46 = vld [vmem:[%s31997_s16 + $0x19b0] ss:$52 sps:$4 sm:$0xff]   ;;  %v24881_v33 = vld [vmem:[%s31997_s16 + $0x1a18] ss:$52 sps:$4 sm:$0xff]  }
 0xfbf   : > { %v24880_v52 = vld [vmem:[%s31997_s16 + $0x1a14] ss:$52 sps:$4 sm:$0xff]   ;;  %v24883_v16 = vld [vmem:[%s31997_s16 + $0x1a1c] ss:$52 sps:$4 sm:$0xff]   ;;  %v24889_v48 = vld [vmem:[%s31997_s16 + $0x1a84] ss:$52 sps:$4 sm:$0xff]  }
 0xfc0   : > { %17925 = vmatpush1.bf16.msra.mxu1 %v24824_v4  ;;  %v24878_v29 = vld [vmem:[%s31997_s16 + $0x1a10] ss:$52 sps:$4 sm:$0xff]   ;;  %v24884_v4 = vld [vmem:[%s31997_s16 + $0x1a78] ss:$52 sps:$4 sm:$0xff]   ;;  %v25321_v19 = vld [vmem:[%s31997_s16 + $0x1754] ss:$52 sps:$4 sm:$0xff]  }
 0xfc1   : > { %18130 = vmatpush1.bf16.msra.mxu0 %v24827_v0  ;;  %17926 = vmatprep.subr.bf16.mxu1 %v24832_v53  ;;  %v24886_v18 = vld [vmem:[%s31997_s16 + $0x1a7c] ss:$52 sps:$4 sm:$0xff]   ;;  %v24887_v0 = vld [vmem:[%s31997_s16 + $0x1a80] ss:$52 sps:$4 sm:$0xff]   ;;  %v24892_v53 = vld [vmem:[%s31997_s16 + $0x1ae4] ss:$52 sps:$4 sm:$0xff]  }
 0xfc2   : > { %18131 = vmatprep.subr.bf16.mxu0 %v24835_v43  ;;  %v24895_v43 = vld [vmem:[%s31997_s16 + $0x1aec] ss:$52 sps:$4 sm:$0xff]  }
 0xfc4   : > { %17927 = vmatpush1.bf16.msra.mxu1 %v24830_v38  ;;  %v24890_v38 = vld [vmem:[%s31997_s16 + $0x1ae0] ss:$52 sps:$4 sm:$0xff]  }
 0xfc5   : > { %18132 = vmatpush1.bf16.msra.mxu0 %v24833_v9  ;;  %17928 = vmatprep.subr.bf16.mxu1 %v24838_v50  ;;  %v24893_v9 = vld [vmem:[%s31997_s16 + $0x1ae8] ss:$52 sps:$4 sm:$0xff]   ;;  %v24898_v50 = vld [vmem:[%s31997_s16 + $0x1b4c] ss:$52 sps:$4 sm:$0xff]  }
 0xfc6   : > { %18133 = vmatprep.subr.bf16.mxu0 %v24841_v12  ;;  %v24901_v12 = vld [vmem:[%s31997_s16 + $0x1b54] ss:$52 sps:$4 sm:$0xff]  }
 0xfc8   : > { %17929 = vmatpush1.bf16.msra.mxu1 %v24836_v5  ;;  %v24896_v5 = vld [vmem:[%s31997_s16 + $0x1b48] ss:$52 sps:$4 sm:$0xff]  }
 0xfc9   : > { %18134 = vmatpush1.bf16.msra.mxu0 %v24839_v26  ;;  %17930 = vmatprep.subr.bf16.mxu1 %v24844_v59  ;;  %v24899_v26 = vld [vmem:[%s31997_s16 + $0x1b50] ss:$52 sps:$4 sm:$0xff]   ;;  %v24904_v59 = vld [vmem:[%s31997_s16 + $0x1bb4] ss:$52 sps:$4 sm:$0xff]  }
 0xfca   : > { %18135 = vmatprep.subr.bf16.mxu0 %v24847_v62  ;;  %v24907_v62 = vld [vmem:[%s31997_s16 + $0x1bbc] ss:$52 sps:$4 sm:$0xff]  }
 0xfcc   : > { %17931 = vmatpush1.bf16.msra.mxu1 %v24842_v51  ;;  %v24902_v51 = vld [vmem:[%s31997_s16 + $0x1bb0] ss:$52 sps:$4 sm:$0xff]  }
 0xfcd   : > { %18136 = vmatpush1.bf16.msra.mxu0 %v24845_v8  ;;  %17932 = vmatprep.subr.bf16.mxu1 %v24850_v14  ;;  %v24905_v8 = vld [vmem:[%s31997_s16 + $0x1bb8] ss:$52 sps:$4 sm:$0xff]   ;;  %v24910_v14 = vld [vmem:[%s31997_s16 + $0x1c1c] ss:$52 sps:$4 sm:$0xff]  }
 0xfce   : > { %18137 = vmatprep.subr.bf16.mxu0 %v24853_v25  ;;  %v24913_v25 = vld [vmem:[%s31997_s16 + $0x1c24] ss:$52 sps:$4 sm:$0xff]  }
 0xfd0   : > { %17933 = vmatpush1.bf16.msra.mxu1 %v24848_v1  ;;  %v24908_v1 = vld [vmem:[%s31997_s16 + $0x1c18] ss:$52 sps:$4 sm:$0xff]  }
 0xfd1   : > { %18138 = vmatpush1.bf16.msra.mxu0 %v24851_v7  ;;  %17934 = vmatprep.subr.bf16.mxu1 %v24856_v55  ;;  %v24911_v7 = vld [vmem:[%s31997_s16 + $0x1c20] ss:$52 sps:$4 sm:$0xff]   ;;  %v24916_v55 = vld [vmem:[%s31997_s16 + $0x1c84] ss:$52 sps:$4 sm:$0xff]  }
 0xfd2   : > { %18139 = vmatprep.subr.bf16.mxu0 %v24859_v34  ;;  %v24919_v34 = vld [vmem:[%s31997_s16 + $0x1c8c] ss:$52 sps:$4 sm:$0xff]  }
 0xfd4   : > { %17935 = vmatpush1.bf16.msra.mxu1 %v24854_v10  ;;  %v24914_v10 = vld [vmem:[%s31997_s16 + $0x1c80] ss:$52 sps:$4 sm:$0xff]  }
 0xfd5   : > { %18140 = vmatpush1.bf16.msra.mxu0 %v24857_v63  ;;  %17936 = vmatprep.subr.bf16.mxu1 %v24862_v20  ;;  %v24917_v63 = vld [vmem:[%s31997_s16 + $0x1c88] ss:$52 sps:$4 sm:$0xff]   ;;  %v24922_v20 = vld [vmem:[%s31997_s16 + $0x1cec] ss:$52 sps:$4 sm:$0xff]  }
 0xfd6   : > { %18141 = vmatprep.subr.bf16.mxu0 %v24865_v36  ;;  %v24925_v36 = vld [vmem:[%s31997_s16 + $0x1cf4] ss:$52 sps:$4 sm:$0xff]  }
 0xfd8   : > { %17937 = vmatpush1.bf16.msra.mxu1 %v24860_v21  ;;  %v24920_v21 = vld [vmem:[%s31997_s16 + $0x1ce8] ss:$52 sps:$4 sm:$0xff]  }
 0xfd9   : > { %18142 = vmatpush1.bf16.msra.mxu0 %v24863_v6  ;;  %17938 = vmatprep.subr.bf16.mxu1 %v24868_v49  ;;  %v24923_v6 = vld [vmem:[%s31997_s16 + $0x1cf0] ss:$52 sps:$4 sm:$0xff]   ;;  %v24928_v49 = vld [vmem:[%s31997_s16 + $0x1d54] ss:$52 sps:$4 sm:$0xff]  }
 0xfda   : > { %18143 = vmatprep.subr.bf16.mxu0 %v24871_v39  ;;  %v24931_v39 = vld [vmem:[%s31997_s16 + $0x1d5c] ss:$52 sps:$4 sm:$0xff]  }
 0xfdc   : > { %17939 = vmatpush1.bf16.msra.mxu1 %v24866_v27  ;;  %v24926_v27 = vld [vmem:[%s31997_s16 + $0x1d50] ss:$52 sps:$4 sm:$0xff]  }
 0xfdd   : > { %18144 = vmatpush1.bf16.msra.mxu0 %v24869_v41  ;;  %17940 = vmatprep.subr.bf16.mxu1 %v24874_v56  ;;  %v24929_v41 = vld [vmem:[%s31997_s16 + $0x1d58] ss:$52 sps:$4 sm:$0xff]   ;;  %v24934_v56 = vld [vmem:[%s31997_s16 + $0x1dbc] ss:$52 sps:$4 sm:$0xff]  }
 0xfde   : > { %18145 = vmatprep.subr.bf16.mxu0 %v24877_v11  ;;  %v24937_v11 = vld [vmem:[%s31997_s16 + $0x1dc4] ss:$52 sps:$4 sm:$0xff]  }
 0xfe0   : > { %17941 = vmatpush1.bf16.msra.mxu1 %v24872_v37  ;;  %v24932_v37 = vld [vmem:[%s31997_s16 + $0x1db8] ss:$52 sps:$4 sm:$0xff]  }
 0xfe1   : > { %18146 = vmatpush1.bf16.msra.mxu0 %v24875_v46  ;;  %17951 = vmatprep.subr.bf16.mxu1 %v24880_v52  ;;  %v24935_v46 = vld [vmem:[%s31997_s16 + $0x1dc0] ss:$52 sps:$4 sm:$0xff]   ;;  %v24940_v52 = vld [vmem:[%s31997_s16 + $0x1e24] ss:$52 sps:$4 sm:$0xff]  }
 0xfe2   : > { %18156 = vmatprep.subr.bf16.mxu0 %v24883_v16  ;;  %v24943_v16 = vld [vmem:[%s31997_s16 + $0x1e2c] ss:$52 sps:$4 sm:$0xff]  }
 0xfe3   : > { %17943 = vmatmul.mubr.bf16.vlgmr.msra.gmra.mrb[76].mxu1 %v29111_v13 }
 0xfe4   : > { %18148 = vmatmul.mubr.bf16.vlgmr.msra.gmra.mrb[220].mxu0 %v29111_v13  ;;  %17952 = vmatpush1.bf16.msra.mxu1 %v24878_v29  ;;  %v24938_v29 = vld [vmem:[%s31997_s16 + $0x1e20] ss:$52 sps:$4 sm:$0xff]  }
 0xfe5   : > { %17983 = vmatprep.mubr.bf16.mxu1 %v29714_v3  ;;  %18157 = vmatpush1.bf16.msra.mxu0 %v24881_v33  ;;  %v24941_v33 = vld [vmem:[%s31997_s16 + $0x1e28] ss:$52 sps:$4 sm:$0xff]  }
 0xfe6   : > { %18188 = vmatprep.mubr.bf16.mxu0 %v29714_v3  ;;  %17953 = vmatprep.subr.bf16.mxu1 %v24886_v18  ;;  %v24946_v18 = vld [vmem:[%s31997_s16 + $0x1e8c] ss:$52 sps:$4 sm:$0xff]  }
 0xfe7   : > { %18158 = vmatprep.subr.bf16.mxu0 %v24889_v48  ;;  %v24949_v48 = vld [vmem:[%s31997_s16 + $0x1e94] ss:$52 sps:$4 sm:$0xff]  }
 0xfe8   : > { %17954 = vmatpush1.bf16.msra.mxu1 %v24884_v4  ;;  %v24944_v4 = vld [vmem:[%s31997_s16 + $0x1e88] ss:$52 sps:$4 sm:$0xff]  }
 0xfe9   : > { %18159 = vmatpush1.bf16.msra.mxu0 %v24887_v0  ;;  %17955 = vmatprep.subr.bf16.mxu1 %v24892_v53  ;;  %v24947_v0 = vld [vmem:[%s31997_s16 + $0x1e90] ss:$52 sps:$4 sm:$0xff]   ;;  %v24952_v53 = vld [vmem:[%s31997_s16 + $0x1ef4] ss:$52 sps:$4 sm:$0xff]  }
 0xfea   : > { %18160 = vmatprep.subr.bf16.mxu0 %v24895_v43  ;;  %v24955_v43 = vld [vmem:[%s31997_s16 + $0x1efc] ss:$52 sps:$4 sm:$0xff]  }
 0xfec   : > { %17956 = vmatpush1.bf16.msra.mxu1 %v24890_v38  ;;  %v24950_v38 = vld [vmem:[%s31997_s16 + $0x1ef0] ss:$52 sps:$4 sm:$0xff]  }
 0xfed   : > { %18161 = vmatpush1.bf16.msra.mxu0 %v24893_v9  ;;  %17957 = vmatprep.subr.bf16.mxu1 %v24898_v50  ;;  %v24953_v9 = vld [vmem:[%s31997_s16 + $0x1ef8] ss:$52 sps:$4 sm:$0xff]   ;;  %v24958_v50 = vld [vmem:[%s31997_s16 + $0x1f5c] ss:$52 sps:$4 sm:$0xff]  }
 0xfee   : > { %18162 = vmatprep.subr.bf16.mxu0 %v24901_v12  ;;  %v24961_v12 = vld [vmem:[%s31997_s16 + $0x1f64] ss:$52 sps:$4 sm:$0xff]  }
 0xff0   : > { %17958 = vmatpush1.bf16.msra.mxu1 %v24896_v5  ;;  %v24956_v5 = vld [vmem:[%s31997_s16 + $0x1f58] ss:$52 sps:$4 sm:$0xff]  }
 0xff1   : > { %18163 = vmatpush1.bf16.msra.mxu0 %v24899_v26  ;;  %17959 = vmatprep.subr.bf16.mxu1 %v24904_v59  ;;  %v24959_v26 = vld [vmem:[%s31997_s16 + $0x1f60] ss:$52 sps:$4 sm:$0xff]   ;;  %v24964_v59 = vld [vmem:[%s31997_s16 + $0x1fc4] ss:$52 sps:$4 sm:$0xff]  }
 0xff2   : > { %18164 = vmatprep.subr.bf16.mxu0 %v24907_v62  ;;  %v24967_v62 = vld [vmem:[%s31997_s16 + $0x1fcc] ss:$52 sps:$4 sm:$0xff]  }
 0xff4   : > { %17960 = vmatpush1.bf16.msra.mxu1 %v24902_v51  ;;  %v24962_v51 = vld [vmem:[%s31997_s16 + $0x1fc0] ss:$52 sps:$4 sm:$0xff]  }
 0xff5   : > { %18165 = vmatpush1.bf16.msra.mxu0 %v24905_v8  ;;  %17961 = vmatprep.subr.bf16.mxu1 %v24910_v14  ;;  %v24965_v8 = vld [vmem:[%s31997_s16 + $0x1fc8] ss:$52 sps:$4 sm:$0xff]   ;;  %v24970_v14 = vld [vmem:[%s31997_s16 + $0x202c] ss:$52 sps:$4 sm:$0xff]  }
 0xff6   : > { %18166 = vmatprep.subr.bf16.mxu0 %v24913_v25  ;;  %v24973_v25 = vld [vmem:[%s31997_s16 + $0x2034] ss:$52 sps:$4 sm:$0xff]  }
 0xff8   : > { %17962 = vmatpush1.bf16.msra.mxu1 %v24908_v1  ;;  %v24968_v1 = vld [vmem:[%s31997_s16 + $0x2028] ss:$52 sps:$4 sm:$0xff]  }
 0xff9   : > { %18167 = vmatpush1.bf16.msra.mxu0 %v24911_v7  ;;  %17963 = vmatprep.subr.bf16.mxu1 %v24916_v55  ;;  %v24971_v7 = vld [vmem:[%s31997_s16 + $0x2030] ss:$52 sps:$4 sm:$0xff]  }
 0xffa   : > { %18168 = vmatprep.subr.bf16.mxu0 %v24919_v34  ;;  %v24976_v55 = vld [vmem:[%s31997_s16 + $0x24] ss:$52 sps:$4 sm:$0xff]   ;;  %v24979_v34 = vld [vmem:[%s31997_s16 + $0x2c] ss:$52 sps:$4 sm:$0xff]  }
 0xffc   : > { %17964 = vmatpush1.bf16.msra.mxu1 %v24914_v10  ;;  %v24974_v10 = vld [vmem:[%s31997_s16 + $0x20] ss:$52 sps:$4 sm:$0xff]  }
 0xffd   : > { %18169 = vmatpush1.bf16.msra.mxu0 %v24917_v63  ;;  %17965 = vmatprep.subr.bf16.mxu1 %v24922_v20  ;;  %v24977_v63 = vld [vmem:[%s31997_s16 + $0x28] ss:$52 sps:$4 sm:$0xff]   ;;  %v24982_v20 = vld [vmem:[%s31997_s16 + $0x8c] ss:$52 sps:$4 sm:$0xff]  }
 0xffe   : > { %18170 = vmatprep.subr.bf16.mxu0 %v24925_v36  ;;  %v24985_v36 = vld [vmem:[%s31997_s16 + $0x94] ss:$52 sps:$4 sm:$0xff]  }
0x1000   : > { %17966 = vmatpush1.bf16.msra.mxu1 %v24920_v21  ;;  %v24980_v21 = vld [vmem:[%s31997_s16 + $0x88] ss:$52 sps:$4 sm:$0xff]  }
0x1001   : > { %18171 = vmatpush1.bf16.msra.mxu0 %v24923_v6  ;;  %17967 = vmatprep.subr.bf16.mxu1 %v24928_v49  ;;  %v24983_v6 = vld [vmem:[%s31997_s16 + $0x90] ss:$52 sps:$4 sm:$0xff]   ;;  %v24988_v49 = vld [vmem:[%s31997_s16 + $0xf4] ss:$52 sps:$4 sm:$0xff]  }
0x1002   : > { %18172 = vmatprep.subr.bf16.mxu0 %v24931_v39  ;;  %v24991_v39 = vld [vmem:[%s31997_s16 + $0xfc] ss:$52 sps:$4 sm:$0xff]  }
0x1004   : > { %17968 = vmatpush1.bf16.msra.mxu1 %v24926_v27  ;;  %v24986_v27 = vld [vmem:[%s31997_s16 + $0xf0] ss:$52 sps:$4 sm:$0xff]  }
0x1005   : > { %18173 = vmatpush1.bf16.msra.mxu0 %v24929_v41  ;;  %17969 = vmatprep.subr.bf16.mxu1 %v24934_v56  ;;  %v24989_v41 = vld [vmem:[%s31997_s16 + $0xf8] ss:$52 sps:$4 sm:$0xff]   ;;  %v24994_v56 = vld [vmem:[%s31997_s16 + $0x15c] ss:$52 sps:$4 sm:$0xff]  }
0x1006   : > { %18174 = vmatprep.subr.bf16.mxu0 %v24937_v11  ;;  %v24997_v11 = vld [vmem:[%s31997_s16 + $0x164] ss:$52 sps:$4 sm:$0xff]  }
0x1008   : > { %17970 = vmatpush1.bf16.msra.mxu1 %v24932_v37  ;;  %v24992_v37 = vld [vmem:[%s31997_s16 + $0x158] ss:$52 sps:$4 sm:$0xff]  }
0x1009   : > { %18175 = vmatpush1.bf16.msra.mxu0 %v24935_v46  ;;  %17971 = vmatprep.subr.bf16.mxu1 %v24940_v52  ;;  %v24995_v46 = vld [vmem:[%s31997_s16 + $0x160] ss:$52 sps:$4 sm:$0xff]   ;;  %v25000_v52 = vld [vmem:[%s31997_s16 + $0x1c4] ss:$52 sps:$4 sm:$0xff]  }
0x100a   : > { %18176 = vmatprep.subr.bf16.mxu0 %v24943_v16  ;;  %v25003_v16 = vld [vmem:[%s31997_s16 + $0x1cc] ss:$52 sps:$4 sm:$0xff]  }
0x100c   : > { %17972 = vmatpush1.bf16.msra.mxu1 %v24938_v29  ;;  %v24998_v29 = vld [vmem:[%s31997_s16 + $0x1c0] ss:$52 sps:$4 sm:$0xff]  }
0x100d   : > { %18177 = vmatpush1.bf16.msra.mxu0 %v24941_v33  ;;  %17973 = vmatprep.subr.bf16.mxu1 %v24946_v18  ;;  %v25001_v33 = vld [vmem:[%s31997_s16 + $0x1c8] ss:$52 sps:$4 sm:$0xff]   ;;  %v25006_v18 = vld [vmem:[%s31997_s16 + $0x22c] ss:$52 sps:$4 sm:$0xff]  }
0x100e   : > { %18178 = vmatprep.subr.bf16.mxu0 %v24949_v48  ;;  %v25009_v48 = vld [vmem:[%s31997_s16 + $0x234] ss:$52 sps:$4 sm:$0xff]  }
0x1010   : > { %17974 = vmatpush1.bf16.msra.mxu1 %v24944_v4  ;;  %v25004_v4 = vld [vmem:[%s31997_s16 + $0x228] ss:$52 sps:$4 sm:$0xff]  }
0x1011   : > { %18179 = vmatpush1.bf16.msra.mxu0 %v24947_v0  ;;  %17975 = vmatprep.subr.bf16.mxu1 %v24952_v53  ;;  %v25007_v0 = vld [vmem:[%s31997_s16 + $0x230] ss:$52 sps:$4 sm:$0xff]   ;;  %v25012_v53 = vld [vmem:[%s31997_s16 + $0x294] ss:$52 sps:$4 sm:$0xff]  }
0x1012   : > { %18180 = vmatprep.subr.bf16.mxu0 %v24955_v43  ;;  %v25015_v43 = vld [vmem:[%s31997_s16 + $0x29c] ss:$52 sps:$4 sm:$0xff]  }
0x1014   : > { %17976 = vmatpush1.bf16.msra.mxu1 %v24950_v38  ;;  %v25010_v38 = vld [vmem:[%s31997_s16 + $0x290] ss:$52 sps:$4 sm:$0xff]  }
0x1015   : > { %18181 = vmatpush1.bf16.msra.mxu0 %v24953_v9  ;;  %17977 = vmatprep.subr.bf16.mxu1 %v24958_v50  ;;  %v25013_v9 = vld [vmem:[%s31997_s16 + $0x298] ss:$52 sps:$4 sm:$0xff]   ;;  %v25018_v50 = vld [vmem:[%s31997_s16 + $0x2fc] ss:$52 sps:$4 sm:$0xff]  }
0x1016   : > { %18182 = vmatprep.subr.bf16.mxu0 %v24961_v12  ;;  %v25021_v12 = vld [vmem:[%s31997_s16 + $0x304] ss:$52 sps:$4 sm:$0xff]  }
0x1018   : > { %17978 = vmatpush1.bf16.msra.mxu1 %v24956_v5  ;;  %v25016_v5 = vld [vmem:[%s31997_s16 + $0x2f8] ss:$52 sps:$4 sm:$0xff]  }
0x1019   : > { %18183 = vmatpush1.bf16.msra.mxu0 %v24959_v26  ;;  %17979 = vmatprep.subr.bf16.mxu1 %v24964_v59  ;;  %v25019_v26 = vld [vmem:[%s31997_s16 + $0x300] ss:$52 sps:$4 sm:$0xff]   ;;  %v25024_v59 = vld [vmem:[%s31997_s16 + $0x364] ss:$52 sps:$4 sm:$0xff]  }
0x101a   : > { %18184 = vmatprep.subr.bf16.mxu0 %v24967_v62  ;;  %v25027_v62 = vld [vmem:[%s31997_s16 + $0x36c] ss:$52 sps:$4 sm:$0xff]  }
0x101c   : > { %17980 = vmatpush1.bf16.msra.mxu1 %v24962_v51  ;;  %v25022_v51 = vld [vmem:[%s31997_s16 + $0x360] ss:$52 sps:$4 sm:$0xff]  }
0x101d   : > { %18185 = vmatpush1.bf16.msra.mxu0 %v24965_v8  ;;  %17981 = vmatprep.subr.bf16.mxu1 %v24970_v14  ;;  %v25025_v8 = vld [vmem:[%s31997_s16 + $0x368] ss:$52 sps:$4 sm:$0xff]   ;;  %v25030_v14 = vld [vmem:[%s31997_s16 + $0x3cc] ss:$52 sps:$4 sm:$0xff]  }
0x101e   : > { %18186 = vmatprep.subr.bf16.mxu0 %v24973_v25  ;;  %v25033_v25 = vld [vmem:[%s31997_s16 + $0x3d4] ss:$52 sps:$4 sm:$0xff]  }
0x1020   : > { %17982 = vmatpush1.bf16.msra.mxu1 %v24968_v1  ;;  %v25028_v1 = vld [vmem:[%s31997_s16 + $0x3c8] ss:$52 sps:$4 sm:$0xff]  }
0x1021   : > { %18187 = vmatpush1.bf16.msra.mxu0 %v24971_v7  ;;  %18197 = vmatprep.subr.bf16.mxu1 %v24976_v55  ;;  %v25031_v7 = vld [vmem:[%s31997_s16 + $0x3d0] ss:$52 sps:$4 sm:$0xff]   ;;  %v25036_v55 = vld [vmem:[%s31997_s16 + $0x434] ss:$52 sps:$4 sm:$0xff]  }
0x1022   : > { %18402 = vmatprep.subr.bf16.mxu0 %v24979_v34  ;;  %v25039_v34 = vld [vmem:[%s31997_s16 + $0x43c] ss:$52 sps:$4 sm:$0xff]  }
0x1023   : > { %17984 = vmatmul.mubr.bf16.vlgmr.msra.gmra.mrb[76].mxu1 %v29712_v32 }
0x1024   : > { %18189 = vmatmul.mubr.bf16.vlgmr.msra.gmra.mrb[220].mxu0 %v29712_v32  ;;  %18198 = vmatpush1.bf16.msra.mxu1 %v24974_v10  ;;  %v25034_v10 = vld [vmem:[%s31997_s16 + $0x430] ss:$52 sps:$4 sm:$0xff]  }
0x1025   : > { %18229 = vmatprep.mubr.bf16.mxu1 %v28725_v23  ;;  %18403 = vmatpush1.bf16.msra.mxu0 %v24977_v63  ;;  %v25037_v63 = vld [vmem:[%s31997_s16 + $0x438] ss:$52 sps:$4 sm:$0xff]  }
0x1026   : > { %18434 = vmatprep.mubr.bf16.mxu0 %v28725_v23  ;;  %18199 = vmatprep.subr.bf16.mxu1 %v24982_v20  ;;  %v25042_v20 = vld [vmem:[%s31997_s16 + $0x49c] ss:$52 sps:$4 sm:$0xff]  }
0x1027   : > { %18404 = vmatprep.subr.bf16.mxu0 %v24985_v36  ;;  %v25045_v36 = vld [vmem:[%s31997_s16 + $0x4a4] ss:$52 sps:$4 sm:$0xff]  }
0x1028   : > { %18200 = vmatpush1.bf16.msra.mxu1 %v24980_v21  ;;  %v25040_v21 = vld [vmem:[%s31997_s16 + $0x498] ss:$52 sps:$4 sm:$0xff]  }
0x1029   : > { %18405 = vmatpush1.bf16.msra.mxu0 %v24983_v6  ;;  %18201 = vmatprep.subr.bf16.mxu1 %v24988_v49  ;;  %v25043_v6 = vld [vmem:[%s31997_s16 + $0x4a0] ss:$52 sps:$4 sm:$0xff]   ;;  %v25048_v49 = vld [vmem:[%s31997_s16 + $0x504] ss:$52 sps:$4 sm:$0xff]  }
0x102a   : > { %18406 = vmatprep.subr.bf16.mxu0 %v24991_v39  ;;  %v25051_v39 = vld [vmem:[%s31997_s16 + $0x50c] ss:$52 sps:$4 sm:$0xff]  }
0x102c   : > { %18202 = vmatpush1.bf16.msra.mxu1 %v24986_v27  ;;  %v25046_v27 = vld [vmem:[%s31997_s16 + $0x500] ss:$52 sps:$4 sm:$0xff]  }
0x102d   : > { %18407 = vmatpush1.bf16.msra.mxu0 %v24989_v41  ;;  %18203 = vmatprep.subr.bf16.mxu1 %v24994_v56  ;;  %v25049_v41 = vld [vmem:[%s31997_s16 + $0x508] ss:$52 sps:$4 sm:$0xff]   ;;  %v25054_v56 = vld [vmem:[%s31997_s16 + $0x56c] ss:$52 sps:$4 sm:$0xff]  }
0x102e   : > { %18408 = vmatprep.subr.bf16.mxu0 %v24997_v11  ;;  %v25057_v11 = vld [vmem:[%s31997_s16 + $0x574] ss:$52 sps:$4 sm:$0xff]  }
0x1030   : > { %18204 = vmatpush1.bf16.msra.mxu1 %v24992_v37  ;;  %v25052_v37 = vld [vmem:[%s31997_s16 + $0x568] ss:$52 sps:$4 sm:$0xff]  }
0x1031   : > { %18409 = vmatpush1.bf16.msra.mxu0 %v24995_v46  ;;  %18205 = vmatprep.subr.bf16.mxu1 %v25000_v52  ;;  %v25055_v46 = vld [vmem:[%s31997_s16 + $0x570] ss:$52 sps:$4 sm:$0xff]   ;;  %v25060_v52 = vld [vmem:[%s31997_s16 + $0x5d4] ss:$52 sps:$4 sm:$0xff]  }
0x1032   : > { %18410 = vmatprep.subr.bf16.mxu0 %v25003_v16  ;;  %v25063_v16 = vld [vmem:[%s31997_s16 + $0x5dc] ss:$52 sps:$4 sm:$0xff]  }
0x1034   : > { %18206 = vmatpush1.bf16.msra.mxu1 %v24998_v29  ;;  %v25058_v29 = vld [vmem:[%s31997_s16 + $0x5d0] ss:$52 sps:$4 sm:$0xff]  }
0x1035   : > { %18411 = vmatpush1.bf16.msra.mxu0 %v25001_v33  ;;  %18207 = vmatprep.subr.bf16.mxu1 %v25006_v18  ;;  %v25061_v33 = vld [vmem:[%s31997_s16 + $0x5d8] ss:$52 sps:$4 sm:$0xff]   ;;  %v25066_v18 = vld [vmem:[%s31997_s16 + $0x63c] ss:$52 sps:$4 sm:$0xff]  }
0x1036   : > { %18412 = vmatprep.subr.bf16.mxu0 %v25009_v48  ;;  %v25069_v48 = vld [vmem:[%s31997_s16 + $0x644] ss:$52 sps:$4 sm:$0xff]  }
0x1038   : > { %18208 = vmatpush1.bf16.msra.mxu1 %v25004_v4  ;;  %v25064_v4 = vld [vmem:[%s31997_s16 + $0x638] ss:$52 sps:$4 sm:$0xff]  }
0x1039   : > { %18413 = vmatpush1.bf16.msra.mxu0 %v25007_v0  ;;  %18209 = vmatprep.subr.bf16.mxu1 %v25012_v53  ;;  %v25067_v0 = vld [vmem:[%s31997_s16 + $0x640] ss:$52 sps:$4 sm:$0xff]   ;;  %v25072_v53 = vld [vmem:[%s31997_s16 + $0x6a4] ss:$52 sps:$4 sm:$0xff]  }
0x103a   : > { %18414 = vmatprep.subr.bf16.mxu0 %v25015_v43  ;;  %v25075_v43 = vld [vmem:[%s31997_s16 + $0x6ac] ss:$52 sps:$4 sm:$0xff]  }
0x103c   : > { %18210 = vmatpush1.bf16.msra.mxu1 %v25010_v38  ;;  %v25070_v38 = vld [vmem:[%s31997_s16 + $0x6a0] ss:$52 sps:$4 sm:$0xff]  }
0x103d   : > { %18415 = vmatpush1.bf16.msra.mxu0 %v25013_v9  ;;  %18211 = vmatprep.subr.bf16.mxu1 %v25018_v50  ;;  %v25073_v9 = vld [vmem:[%s31997_s16 + $0x6a8] ss:$52 sps:$4 sm:$0xff]   ;;  %v25078_v50 = vld [vmem:[%s31997_s16 + $0x70c] ss:$52 sps:$4 sm:$0xff]  }
0x103e   : > { %18416 = vmatprep.subr.bf16.mxu0 %v25021_v12  ;;  %v25081_v12 = vld [vmem:[%s31997_s16 + $0x714] ss:$52 sps:$4 sm:$0xff]  }
0x1040   : > { %18212 = vmatpush1.bf16.msra.mxu1 %v25016_v5  ;;  %v25076_v5 = vld [vmem:[%s31997_s16 + $0x708] ss:$52 sps:$4 sm:$0xff]  }
0x1041   : > { %18417 = vmatpush1.bf16.msra.mxu0 %v25019_v26  ;;  %18213 = vmatprep.subr.bf16.mxu1 %v25024_v59  ;;  %v25079_v26 = vld [vmem:[%s31997_s16 + $0x710] ss:$52 sps:$4 sm:$0xff]   ;;  %v25084_v59 = vld [vmem:[%s31997_s16 + $0x774] ss:$52 sps:$4 sm:$0xff]  }
0x1042   : > { %18418 = vmatprep.subr.bf16.mxu0 %v25027_v62  ;;  %v25087_v62 = vld [vmem:[%s31997_s16 + $0x77c] ss:$52 sps:$4 sm:$0xff]  }
0x1044   : > { %18214 = vmatpush1.bf16.msra.mxu1 %v25022_v51  ;;  %v25082_v51 = vld [vmem:[%s31997_s16 + $0x770] ss:$52 sps:$4 sm:$0xff]  }
0x1045   : > { %18419 = vmatpush1.bf16.msra.mxu0 %v25025_v8  ;;  %18215 = vmatprep.subr.bf16.mxu1 %v25030_v14  ;;  %v25085_v8 = vld [vmem:[%s31997_s16 + $0x778] ss:$52 sps:$4 sm:$0xff]   ;;  %v25090_v14 = vld [vmem:[%s31997_s16 + $0x7dc] ss:$52 sps:$4 sm:$0xff]  }
0x1046   : > { %18420 = vmatprep.subr.bf16.mxu0 %v25033_v25  ;;  %v25093_v25 = vld [vmem:[%s31997_s16 + $0x7e4] ss:$52 sps:$4 sm:$0xff]  }
0x1048   : > { %18216 = vmatpush1.bf16.msra.mxu1 %v25028_v1  ;;  %v25088_v1 = vld [vmem:[%s31997_s16 + $0x7d8] ss:$52 sps:$4 sm:$0xff]  }
0x1049   : > { %18421 = vmatpush1.bf16.msra.mxu0 %v25031_v7  ;;  %18217 = vmatprep.subr.bf16.mxu1 %v25036_v55  ;;  %v25091_v7 = vld [vmem:[%s31997_s16 + $0x7e0] ss:$52 sps:$4 sm:$0xff]   ;;  %v25096_v55 = vld [vmem:[%s31997_s16 + $0x844] ss:$52 sps:$4 sm:$0xff]  }
0x104a   : > { %18422 = vmatprep.subr.bf16.mxu0 %v25039_v34  ;;  %v25099_v34 = vld [vmem:[%s31997_s16 + $0x84c] ss:$52 sps:$4 sm:$0xff]  }
0x104c   : > { %18218 = vmatpush1.bf16.msra.mxu1 %v25034_v10  ;;  %v25094_v10 = vld [vmem:[%s31997_s16 + $0x840] ss:$52 sps:$4 sm:$0xff]  }
0x104d   : > { %18423 = vmatpush1.bf16.msra.mxu0 %v25037_v63  ;;  %18219 = vmatprep.subr.bf16.mxu1 %v25042_v20  ;;  %v25097_v63 = vld [vmem:[%s31997_s16 + $0x848] ss:$52 sps:$4 sm:$0xff]   ;;  %v25102_v20 = vld [vmem:[%s31997_s16 + $0x8ac] ss:$52 sps:$4 sm:$0xff]  }
0x104e   : > { %18424 = vmatprep.subr.bf16.mxu0 %v25045_v36  ;;  %v25105_v36 = vld [vmem:[%s31997_s16 + $0x8b4] ss:$52 sps:$4 sm:$0xff]  }
0x1050   : > { %18220 = vmatpush1.bf16.msra.mxu1 %v25040_v21  ;;  %v25100_v21 = vld [vmem:[%s31997_s16 + $0x8a8] ss:$52 sps:$4 sm:$0xff]  }
0x1051   : > { %18425 = vmatpush1.bf16.msra.mxu0 %v25043_v6  ;;  %18221 = vmatprep.subr.bf16.mxu1 %v25048_v49  ;;  %v25103_v6 = vld [vmem:[%s31997_s16 + $0x8b0] ss:$52 sps:$4 sm:$0xff]   ;;  %v25108_v49 = vld [vmem:[%s31997_s16 + $0x914] ss:$52 sps:$4 sm:$0xff]  }
0x1052   : > { %18426 = vmatprep.subr.bf16.mxu0 %v25051_v39  ;;  %v25111_v39 = vld [vmem:[%s31997_s16 + $0x91c] ss:$52 sps:$4 sm:$0xff]  }
0x1054   : > { %18222 = vmatpush1.bf16.msra.mxu1 %v25046_v27  ;;  %v25106_v27 = vld [vmem:[%s31997_s16 + $0x910] ss:$52 sps:$4 sm:$0xff]  }
0x1055   : > { %18427 = vmatpush1.bf16.msra.mxu0 %v25049_v41  ;;  %18223 = vmatprep.subr.bf16.mxu1 %v25054_v56  ;;  %v25109_v41 = vld [vmem:[%s31997_s16 + $0x918] ss:$52 sps:$4 sm:$0xff]   ;;  %v25114_v56 = vld [vmem:[%s31997_s16 + $0x97c] ss:$52 sps:$4 sm:$0xff]  }
0x1056   : > { %18428 = vmatprep.subr.bf16.mxu0 %v25057_v11  ;;  %v25117_v11 = vld [vmem:[%s31997_s16 + $0x984] ss:$52 sps:$4 sm:$0xff]  }
0x1058   : > { %18224 = vmatpush1.bf16.msra.mxu1 %v25052_v37  ;;  %v25112_v37 = vld [vmem:[%s31997_s16 + $0x978] ss:$52 sps:$4 sm:$0xff]  }
0x1059   : > { %18429 = vmatpush1.bf16.msra.mxu0 %v25055_v46  ;;  %18225 = vmatprep.subr.bf16.mxu1 %v25060_v52  ;;  %v25115_v46 = vld [vmem:[%s31997_s16 + $0x980] ss:$52 sps:$4 sm:$0xff]   ;;  %v25120_v52 = vld [vmem:[%s31997_s16 + $0x9e4] ss:$52 sps:$4 sm:$0xff]  }
0x105a   : > { %18430 = vmatprep.subr.bf16.mxu0 %v25063_v16  ;;  %v25123_v16 = vld [vmem:[%s31997_s16 + $0x9ec] ss:$52 sps:$4 sm:$0xff]  }
0x105c   : > { %18226 = vmatpush1.bf16.msra.mxu1 %v25058_v29  ;;  %v25118_v29 = vld [vmem:[%s31997_s16 + $0x9e0] ss:$52 sps:$4 sm:$0xff]  }
0x105d   : > { %18431 = vmatpush1.bf16.msra.mxu0 %v25061_v33  ;;  %18227 = vmatprep.subr.bf16.mxu1 %v25066_v18  ;;  %v25121_v33 = vld [vmem:[%s31997_s16 + $0x9e8] ss:$52 sps:$4 sm:$0xff]   ;;  %v25126_v18 = vld [vmem:[%s31997_s16 + $0xa4c] ss:$52 sps:$4 sm:$0xff]  }
0x105e   : > { %18432 = vmatprep.subr.bf16.mxu0 %v25069_v48  ;;  %v25129_v48 = vld [vmem:[%s31997_s16 + $0xa54] ss:$52 sps:$4 sm:$0xff]  }
0x1060   : > { %18228 = vmatpush1.bf16.msra.mxu1 %v25064_v4  ;;  %v25124_v4 = vld [vmem:[%s31997_s16 + $0xa48] ss:$52 sps:$4 sm:$0xff]  }
0x1061   : > { %18433 = vmatpush1.bf16.msra.mxu0 %v25067_v0  ;;  %18238 = vmatprep.subr.bf16.mxu1 %v25072_v53  ;;  %v25127_v0 = vld [vmem:[%s31997_s16 + $0xa50] ss:$52 sps:$4 sm:$0xff]   ;;  %v25132_v53 = vld [vmem:[%s31997_s16 + $0xab4] ss:$52 sps:$4 sm:$0xff]  }
0x1062   : > { %18443 = vmatprep.subr.bf16.mxu0 %v25075_v43  ;;  %v25135_v43 = vld [vmem:[%s31997_s16 + $0xabc] ss:$52 sps:$4 sm:$0xff]  }
0x1063   : > { %18230 = vmatmul.mubr.bf16.vlgmr.msra.gmra.mrb[80].mxu1 %v28730_v61 }
0x1064   : > { %18435 = vmatmul.mubr.bf16.vlgmr.msra.gmra.mrb[224].mxu0 %v28730_v61  ;;  %18239 = vmatpush1.bf16.msra.mxu1 %v25070_v38  ;;  %v25130_v38 = vld [vmem:[%s31997_s16 + $0xab0] ss:$52 sps:$4 sm:$0xff]  }
0x1065   : > { %18270 = vmatprep.mubr.bf16.mxu1 %v28736_v15  ;;  %18444 = vmatpush1.bf16.msra.mxu0 %v25073_v9  ;;  %v25133_v9 = vld [vmem:[%s31997_s16 + $0xab8] ss:$52 sps:$4 sm:$0xff]  }
0x1066   : > { %18475 = vmatprep.mubr.bf16.mxu0 %v28736_v15  ;;  %18240 = vmatprep.subr.bf16.mxu1 %v25078_v50  ;;  %v25138_v50 = vld [vmem:[%s31997_s16 + $0xb1c] ss:$52 sps:$4 sm:$0xff]  }
0x1067   : > { %18445 = vmatprep.subr.bf16.mxu0 %v25081_v12  ;;  %v25141_v12 = vld [vmem:[%s31997_s16 + $0xb24] ss:$52 sps:$4 sm:$0xff]  }
0x1068   : > { %18241 = vmatpush1.bf16.msra.mxu1 %v25076_v5  ;;  %v25136_v5 = vld [vmem:[%s31997_s16 + $0xb18] ss:$52 sps:$4 sm:$0xff]  }
0x1069   : > { %18446 = vmatpush1.bf16.msra.mxu0 %v25079_v26  ;;  %18242 = vmatprep.subr.bf16.mxu1 %v25084_v59  ;;  %v25139_v26 = vld [vmem:[%s31997_s16 + $0xb20] ss:$52 sps:$4 sm:$0xff]   ;;  %v25144_v59 = vld [vmem:[%s31997_s16 + $0xb84] ss:$52 sps:$4 sm:$0xff]  }
0x106a   : > { %18447 = vmatprep.subr.bf16.mxu0 %v25087_v62  ;;  %v25147_v62 = vld [vmem:[%s31997_s16 + $0xb8c] ss:$52 sps:$4 sm:$0xff]  }
0x106c   : > { %18243 = vmatpush1.bf16.msra.mxu1 %v25082_v51  ;;  %v25142_v51 = vld [vmem:[%s31997_s16 + $0xb80] ss:$52 sps:$4 sm:$0xff]  }
0x106d   : > { %18448 = vmatpush1.bf16.msra.mxu0 %v25085_v8  ;;  %18244 = vmatprep.subr.bf16.mxu1 %v25090_v14  ;;  %v25145_v8 = vld [vmem:[%s31997_s16 + $0xb88] ss:$52 sps:$4 sm:$0xff]   ;;  %v25150_v14 = vld [vmem:[%s31997_s16 + $0xbec] ss:$52 sps:$4 sm:$0xff]  }
0x106e   : > { %18449 = vmatprep.subr.bf16.mxu0 %v25093_v25  ;;  %v25153_v25 = vld [vmem:[%s31997_s16 + $0xbf4] ss:$52 sps:$4 sm:$0xff]  }
0x1070   : > { %18245 = vmatpush1.bf16.msra.mxu1 %v25088_v1  ;;  %v25148_v1 = vld [vmem:[%s31997_s16 + $0xbe8] ss:$52 sps:$4 sm:$0xff]  }
0x1071   : > { %18450 = vmatpush1.bf16.msra.mxu0 %v25091_v7  ;;  %18246 = vmatprep.subr.bf16.mxu1 %v25096_v55  ;;  %v25151_v7 = vld [vmem:[%s31997_s16 + $0xbf0] ss:$52 sps:$4 sm:$0xff]   ;;  %v25156_v55 = vld [vmem:[%s31997_s16 + $0xc54] ss:$52 sps:$4 sm:$0xff]  }
0x1072   : > { %18451 = vmatprep.subr.bf16.mxu0 %v25099_v34  ;;  %v25159_v34 = vld [vmem:[%s31997_s16 + $0xc5c] ss:$52 sps:$4 sm:$0xff]  }
0x1074   : > { %18247 = vmatpush1.bf16.msra.mxu1 %v25094_v10  ;;  %v25154_v10 = vld [vmem:[%s31997_s16 + $0xc50] ss:$52 sps:$4 sm:$0xff]  }
0x1075   : > { %18452 = vmatpush1.bf16.msra.mxu0 %v25097_v63  ;;  %18248 = vmatprep.subr.bf16.mxu1 %v25102_v20  ;;  %v25157_v63 = vld [vmem:[%s31997_s16 + $0xc58] ss:$52 sps:$4 sm:$0xff]   ;;  %v25162_v20 = vld [vmem:[%s31997_s16 + $0xcbc] ss:$52 sps:$4 sm:$0xff]  }
0x1076   : > { %18453 = vmatprep.subr.bf16.mxu0 %v25105_v36  ;;  %v25165_v36 = vld [vmem:[%s31997_s16 + $0xcc4] ss:$52 sps:$4 sm:$0xff]  }
0x1078   : > { %18249 = vmatpush1.bf16.msra.mxu1 %v25100_v21  ;;  %v25160_v21 = vld [vmem:[%s31997_s16 + $0xcb8] ss:$52 sps:$4 sm:$0xff]  }
0x1079   : > { %18454 = vmatpush1.bf16.msra.mxu0 %v25103_v6  ;;  %18250 = vmatprep.subr.bf16.mxu1 %v25108_v49  ;;  %v25163_v6 = vld [vmem:[%s31997_s16 + $0xcc0] ss:$52 sps:$4 sm:$0xff]   ;;  %v25168_v49 = vld [vmem:[%s31997_s16 + $0xd24] ss:$52 sps:$4 sm:$0xff]  }
0x107a   : > { %18455 = vmatprep.subr.bf16.mxu0 %v25111_v39  ;;  %v25171_v39 = vld [vmem:[%s31997_s16 + $0xd2c] ss:$52 sps:$4 sm:$0xff]  }
0x107c   : > { %18251 = vmatpush1.bf16.msra.mxu1 %v25106_v27  ;;  %v25166_v27 = vld [vmem:[%s31997_s16 + $0xd20] ss:$52 sps:$4 sm:$0xff]  }
0x107d   : > { %18456 = vmatpush1.bf16.msra.mxu0 %v25109_v41  ;;  %18252 = vmatprep.subr.bf16.mxu1 %v25114_v56  ;;  %v25169_v41 = vld [vmem:[%s31997_s16 + $0xd28] ss:$52 sps:$4 sm:$0xff]   ;;  %v25174_v56 = vld [vmem:[%s31997_s16 + $0xd8c] ss:$52 sps:$4 sm:$0xff]  }
0x107e   : > { %18457 = vmatprep.subr.bf16.mxu0 %v25117_v11  ;;  %v25177_v11 = vld [vmem:[%s31997_s16 + $0xd94] ss:$52 sps:$4 sm:$0xff]  }
0x1080   : > { %18253 = vmatpush1.bf16.msra.mxu1 %v25112_v37  ;;  %v25172_v37 = vld [vmem:[%s31997_s16 + $0xd88] ss:$52 sps:$4 sm:$0xff]  }
0x1081   : > { %18458 = vmatpush1.bf16.msra.mxu0 %v25115_v46  ;;  %18254 = vmatprep.subr.bf16.mxu1 %v25120_v52  ;;  %v25175_v46 = vld [vmem:[%s31997_s16 + $0xd90] ss:$52 sps:$4 sm:$0xff]   ;;  %v25180_v52 = vld [vmem:[%s31997_s16 + $0xdf4] ss:$52 sps:$4 sm:$0xff]  }
0x1082   : > { %18459 = vmatprep.subr.bf16.mxu0 %v25123_v16  ;;  %v25183_v16 = vld [vmem:[%s31997_s16 + $0xdfc] ss:$52 sps:$4 sm:$0xff]  }
0x1084   : > { %18255 = vmatpush1.bf16.msra.mxu1 %v25118_v29  ;;  %v25178_v29 = vld [vmem:[%s31997_s16 + $0xdf0] ss:$52 sps:$4 sm:$0xff]  }
0x1085   : > { %18460 = vmatpush1.bf16.msra.mxu0 %v25121_v33  ;;  %18256 = vmatprep.subr.bf16.mxu1 %v25126_v18  ;;  %v25181_v33 = vld [vmem:[%s31997_s16 + $0xdf8] ss:$52 sps:$4 sm:$0xff]   ;;  %v25186_v18 = vld [vmem:[%s31997_s16 + $0xe5c] ss:$52 sps:$4 sm:$0xff]  }
0x1086   : > { %18461 = vmatprep.subr.bf16.mxu0 %v25129_v48  ;;  %v25189_v48 = vld [vmem:[%s31997_s16 + $0xe64] ss:$52 sps:$4 sm:$0xff]  }
0x1088   : > { %18257 = vmatpush1.bf16.msra.mxu1 %v25124_v4  ;;  %v25184_v4 = vld [vmem:[%s31997_s16 + $0xe58] ss:$52 sps:$4 sm:$0xff]  }
0x1089   : > { %18462 = vmatpush1.bf16.msra.mxu0 %v25127_v0  ;;  %18258 = vmatprep.subr.bf16.mxu1 %v25132_v53  ;;  %v25187_v0 = vld [vmem:[%s31997_s16 + $0xe60] ss:$52 sps:$4 sm:$0xff]   ;;  %v25192_v53 = vld [vmem:[%s31997_s16 + $0xec4] ss:$52 sps:$4 sm:$0xff]  }
0x108a   : > { %18463 = vmatprep.subr.bf16.mxu0 %v25135_v43  ;;  %v25195_v43 = vld [vmem:[%s31997_s16 + $0xecc] ss:$52 sps:$4 sm:$0xff]  }
0x108c   : > { %18259 = vmatpush1.bf16.msra.mxu1 %v25130_v38  ;;  %v25190_v38 = vld [vmem:[%s31997_s16 + $0xec0] ss:$52 sps:$4 sm:$0xff]  }
0x108d   : > { %18464 = vmatpush1.bf16.msra.mxu0 %v25133_v9  ;;  %18260 = vmatprep.subr.bf16.mxu1 %v25138_v50  ;;  %v25193_v9 = vld [vmem:[%s31997_s16 + $0xec8] ss:$52 sps:$4 sm:$0xff]   ;;  %v25198_v50 = vld [vmem:[%s31997_s16 + $0xf2c] ss:$52 sps:$4 sm:$0xff]  }
0x108e   : > { %18465 = vmatprep.subr.bf16.mxu0 %v25141_v12  ;;  %v25201_v12 = vld [vmem:[%s31997_s16 + $0xf34] ss:$52 sps:$4 sm:$0xff]  }
0x1090   : > { %18261 = vmatpush1.bf16.msra.mxu1 %v25136_v5  ;;  %v25196_v5 = vld [vmem:[%s31997_s16 + $0xf28] ss:$52 sps:$4 sm:$0xff]  }
0x1091   : > { %18466 = vmatpush1.bf16.msra.mxu0 %v25139_v26  ;;  %18262 = vmatprep.subr.bf16.mxu1 %v25144_v59  ;;  %v25199_v26 = vld [vmem:[%s31997_s16 + $0xf30] ss:$52 sps:$4 sm:$0xff]   ;;  %v25204_v59 = vld [vmem:[%s31997_s16 + $0xf94] ss:$52 sps:$4 sm:$0xff]  }
0x1092   : > { %18467 = vmatprep.subr.bf16.mxu0 %v25147_v62  ;;  %v25207_v62 = vld [vmem:[%s31997_s16 + $0xf9c] ss:$52 sps:$4 sm:$0xff]  }
0x1094   : > { %18263 = vmatpush1.bf16.msra.mxu1 %v25142_v51  ;;  %v25202_v51 = vld [vmem:[%s31997_s16 + $0xf90] ss:$52 sps:$4 sm:$0xff]  }
0x1095   : > { %18468 = vmatpush1.bf16.msra.mxu0 %v25145_v8  ;;  %18264 = vmatprep.subr.bf16.mxu1 %v25150_v14  ;;  %v25205_v8 = vld [vmem:[%s31997_s16 + $0xf98] ss:$52 sps:$4 sm:$0xff]   ;;  %v25210_v14 = vld [vmem:[%s31997_s16 + $0xffc] ss:$52 sps:$4 sm:$0xff]  }
0x1096   : > { %18469 = vmatprep.subr.bf16.mxu0 %v25153_v25  ;;  %v25213_v25 = vld [vmem:[%s31997_s16 + $0x1004] ss:$52 sps:$4 sm:$0xff]  }
0x1098   : > { %18265 = vmatpush1.bf16.msra.mxu1 %v25148_v1  ;;  %v25208_v1 = vld [vmem:[%s31997_s16 + $0xff8] ss:$52 sps:$4 sm:$0xff]  }
0x1099   : > { %18470 = vmatpush1.bf16.msra.mxu0 %v25151_v7  ;;  %18266 = vmatprep.subr.bf16.mxu1 %v25156_v55  ;;  %v25211_v7 = vld [vmem:[%s31997_s16 + $0x1000] ss:$52 sps:$4 sm:$0xff]   ;;  %v25216_v55 = vld [vmem:[%s31997_s16 + $0x1064] ss:$52 sps:$4 sm:$0xff]  }
0x109a   : > { %18471 = vmatprep.subr.bf16.mxu0 %v25159_v34  ;;  %v25219_v34 = vld [vmem:[%s31997_s16 + $0x106c] ss:$52 sps:$4 sm:$0xff]  }
0x109c   : > { %18267 = vmatpush1.bf16.msra.mxu1 %v25154_v10  ;;  %v25214_v10 = vld [vmem:[%s31997_s16 + $0x1060] ss:$52 sps:$4 sm:$0xff]  }
0x109d   : > { %18472 = vmatpush1.bf16.msra.mxu0 %v25157_v63  ;;  %18268 = vmatprep.subr.bf16.mxu1 %v25162_v20  ;;  %v25217_v63 = vld [vmem:[%s31997_s16 + $0x1068] ss:$52 sps:$4 sm:$0xff]   ;;  %v25222_v20 = vld [vmem:[%s31997_s16 + $0x10cc] ss:$52 sps:$4 sm:$0xff]  }
0x109e   : > { %18473 = vmatprep.subr.bf16.mxu0 %v25165_v36  ;;  %v25225_v36 = vld [vmem:[%s31997_s16 + $0x10d4] ss:$52 sps:$4 sm:$0xff]  }
0x10a0   : > { %18269 = vmatpush1.bf16.msra.mxu1 %v25160_v21  ;;  %v25220_v21 = vld [vmem:[%s31997_s16 + $0x10c8] ss:$52 sps:$4 sm:$0xff]  }
0x10a1   : > { %18474 = vmatpush1.bf16.msra.mxu0 %v25163_v6  ;;  %18279 = vmatprep.subr.bf16.mxu1 %v25168_v49  ;;  %v25223_v6 = vld [vmem:[%s31997_s16 + $0x10d0] ss:$52 sps:$4 sm:$0xff]   ;;  %v25228_v49 = vld [vmem:[%s31997_s16 + $0x1134] ss:$52 sps:$4 sm:$0xff]  }
0x10a2   : > { %18484 = vmatprep.subr.bf16.mxu0 %v25171_v39  ;;  %v25231_v39 = vld [vmem:[%s31997_s16 + $0x113c] ss:$52 sps:$4 sm:$0xff]  }
0x10a3   : > { %18271 = vmatmul.mubr.bf16.vlgmr.msra.gmra.mrb[80].mxu1 %v28846_v54 }
0x10a4   : > { %18476 = vmatmul.mubr.bf16.vlgmr.msra.gmra.mrb[224].mxu0 %v28846_v54  ;;  %18280 = vmatpush1.bf16.msra.mxu1 %v25166_v27  ;;  %v25226_v27 = vld [vmem:[%s31997_s16 + $0x1130] ss:$52 sps:$4 sm:$0xff]  }
0x10a5   : > { %18311 = vmatprep.mubr.bf16.mxu1 %v28851_v31  ;;  %18485 = vmatpush1.bf16.msra.mxu0 %v25169_v41  ;;  %v25229_v41 = vld [vmem:[%s31997_s16 + $0x1138] ss:$52 sps:$4 sm:$0xff]  }
0x10a6   : > { %18516 = vmatprep.mubr.bf16.mxu0 %v28851_v31  ;;  %18281 = vmatprep.subr.bf16.mxu1 %v25174_v56  ;;  %v25234_v56 = vld [vmem:[%s31997_s16 + $0x119c] ss:$52 sps:$4 sm:$0xff]  }
0x10a7   : > { %18486 = vmatprep.subr.bf16.mxu0 %v25177_v11  ;;  %v25237_v11 = vld [vmem:[%s31997_s16 + $0x11a4] ss:$52 sps:$4 sm:$0xff]  }
0x10a8   : > { %18282 = vmatpush1.bf16.msra.mxu1 %v25172_v37  ;;  %v25232_v37 = vld [vmem:[%s31997_s16 + $0x1198] ss:$52 sps:$4 sm:$0xff]  }
0x10a9   : > { %18487 = vmatpush1.bf16.msra.mxu0 %v25175_v46  ;;  %18283 = vmatprep.subr.bf16.mxu1 %v25180_v52  ;;  %v25235_v46 = vld [vmem:[%s31997_s16 + $0x11a0] ss:$52 sps:$4 sm:$0xff]   ;;  %v25240_v52 = vld [vmem:[%s31997_s16 + $0x1204] ss:$52 sps:$4 sm:$0xff]  }
0x10aa   : > { %18488 = vmatprep.subr.bf16.mxu0 %v25183_v16  ;;  %v25243_v16 = vld [vmem:[%s31997_s16 + $0x120c] ss:$52 sps:$4 sm:$0xff]  }
0x10ac   : > { %18284 = vmatpush1.bf16.msra.mxu1 %v25178_v29  ;;  %v25238_v29 = vld [vmem:[%s31997_s16 + $0x1200] ss:$52 sps:$4 sm:$0xff]  }
0x10ad   : > { %18489 = vmatpush1.bf16.msra.mxu0 %v25181_v33  ;;  %18285 = vmatprep.subr.bf16.mxu1 %v25186_v18  ;;  %v25241_v33 = vld [vmem:[%s31997_s16 + $0x1208] ss:$52 sps:$4 sm:$0xff]   ;;  %v25246_v18 = vld [vmem:[%s31997_s16 + $0x126c] ss:$52 sps:$4 sm:$0xff]  }
0x10ae   : > { %18490 = vmatprep.subr.bf16.mxu0 %v25189_v48  ;;  %v25249_v48 = vld [vmem:[%s31997_s16 + $0x1274] ss:$52 sps:$4 sm:$0xff]  }
0x10b0   : > { %18286 = vmatpush1.bf16.msra.mxu1 %v25184_v4  ;;  %v25244_v4 = vld [vmem:[%s31997_s16 + $0x1268] ss:$52 sps:$4 sm:$0xff]  }
0x10b1   : > { %18491 = vmatpush1.bf16.msra.mxu0 %v25187_v0  ;;  %18287 = vmatprep.subr.bf16.mxu1 %v25192_v53  ;;  %v25247_v0 = vld [vmem:[%s31997_s16 + $0x1270] ss:$52 sps:$4 sm:$0xff]   ;;  %v25252_v53 = vld [vmem:[%s31997_s16 + $0x12d4] ss:$52 sps:$4 sm:$0xff]  }
0x10b2   : > { %18492 = vmatprep.subr.bf16.mxu0 %v25195_v43  ;;  %v25255_v43 = vld [vmem:[%s31997_s16 + $0x12dc] ss:$52 sps:$4 sm:$0xff]  }
0x10b4   : > { %18288 = vmatpush1.bf16.msra.mxu1 %v25190_v38  ;;  %v25250_v38 = vld [vmem:[%s31997_s16 + $0x12d0] ss:$52 sps:$4 sm:$0xff]  }
0x10b5   : > { %18493 = vmatpush1.bf16.msra.mxu0 %v25193_v9  ;;  %18289 = vmatprep.subr.bf16.mxu1 %v25198_v50  ;;  %v25253_v9 = vld [vmem:[%s31997_s16 + $0x12d8] ss:$52 sps:$4 sm:$0xff]   ;;  %v25258_v50 = vld [vmem:[%s31997_s16 + $0x133c] ss:$52 sps:$4 sm:$0xff]  }
0x10b6   : > { %18494 = vmatprep.subr.bf16.mxu0 %v25201_v12  ;;  %v25261_v12 = vld [vmem:[%s31997_s16 + $0x1344] ss:$52 sps:$4 sm:$0xff]  }
0x10b8   : > { %18290 = vmatpush1.bf16.msra.mxu1 %v25196_v5  ;;  %v25256_v5 = vld [vmem:[%s31997_s16 + $0x1338] ss:$52 sps:$4 sm:$0xff]  }
0x10b9   : > { %18495 = vmatpush1.bf16.msra.mxu0 %v25199_v26  ;;  %18291 = vmatprep.subr.bf16.mxu1 %v25204_v59  ;;  %v25259_v26 = vld [vmem:[%s31997_s16 + $0x1340] ss:$52 sps:$4 sm:$0xff]   ;;  %v25264_v59 = vld [vmem:[%s31997_s16 + $0x13a4] ss:$52 sps:$4 sm:$0xff]  }
0x10ba   : > { %18496 = vmatprep.subr.bf16.mxu0 %v25207_v62  ;;  %v25267_v62 = vld [vmem:[%s31997_s16 + $0x13ac] ss:$52 sps:$4 sm:$0xff]  }
0x10bc   : > { %18292 = vmatpush1.bf16.msra.mxu1 %v25202_v51  ;;  %v25262_v51 = vld [vmem:[%s31997_s16 + $0x13a0] ss:$52 sps:$4 sm:$0xff]  }
0x10bd   : > { %18497 = vmatpush1.bf16.msra.mxu0 %v25205_v8  ;;  %18293 = vmatprep.subr.bf16.mxu1 %v25210_v14  ;;  %v25265_v8 = vld [vmem:[%s31997_s16 + $0x13a8] ss:$52 sps:$4 sm:$0xff]   ;;  %v25270_v14 = vld [vmem:[%s31997_s16 + $0x140c] ss:$52 sps:$4 sm:$0xff]  }
0x10be   : > { %18498 = vmatprep.subr.bf16.mxu0 %v25213_v25  ;;  %v25273_v25 = vld [vmem:[%s31997_s16 + $0x1414] ss:$52 sps:$4 sm:$0xff]  }
0x10c0   : > { %18294 = vmatpush1.bf16.msra.mxu1 %v25208_v1  ;;  %v25268_v1 = vld [vmem:[%s31997_s16 + $0x1408] ss:$52 sps:$4 sm:$0xff]  }
0x10c1   : > { %18499 = vmatpush1.bf16.msra.mxu0 %v25211_v7  ;;  %18295 = vmatprep.subr.bf16.mxu1 %v25216_v55  ;;  %v25271_v7 = vld [vmem:[%s31997_s16 + $0x1410] ss:$52 sps:$4 sm:$0xff]   ;;  %v25276_v55 = vld [vmem:[%s31997_s16 + $0x1474] ss:$52 sps:$4 sm:$0xff]  }
0x10c2   : > { %18500 = vmatprep.subr.bf16.mxu0 %v25219_v34  ;;  %v25279_v34 = vld [vmem:[%s31997_s16 + $0x147c] ss:$52 sps:$4 sm:$0xff]  }
0x10c4   : > { %18296 = vmatpush1.bf16.msra.mxu1 %v25214_v10  ;;  %v25274_v10 = vld [vmem:[%s31997_s16 + $0x1470] ss:$52 sps:$4 sm:$0xff]  }
0x10c5   : > { %18501 = vmatpush1.bf16.msra.mxu0 %v25217_v63  ;;  %18297 = vmatprep.subr.bf16.mxu1 %v25222_v20  ;;  %v25277_v63 = vld [vmem:[%s31997_s16 + $0x1478] ss:$52 sps:$4 sm:$0xff]   ;;  %v25282_v20 = vld [vmem:[%s31997_s16 + $0x14dc] ss:$52 sps:$4 sm:$0xff]  }
0x10c6   : > { %18502 = vmatprep.subr.bf16.mxu0 %v25225_v36  ;;  %v25285_v36 = vld [vmem:[%s31997_s16 + $0x14e4] ss:$52 sps:$4 sm:$0xff]  }
0x10c8   : > { %18298 = vmatpush1.bf16.msra.mxu1 %v25220_v21  ;;  %v25280_v21 = vld [vmem:[%s31997_s16 + $0x14d8] ss:$52 sps:$4 sm:$0xff]  }
0x10c9   : > { %18503 = vmatpush1.bf16.msra.mxu0 %v25223_v6  ;;  %18299 = vmatprep.subr.bf16.mxu1 %v25228_v49  ;;  %v25283_v6 = vld [vmem:[%s31997_s16 + $0x14e0] ss:$52 sps:$4 sm:$0xff]   ;;  %v25288_v49 = vld [vmem:[%s31997_s16 + $0x1544] ss:$52 sps:$4 sm:$0xff]  }
0x10ca   : > { %18504 = vmatprep.subr.bf16.mxu0 %v25231_v39  ;;  %v25291_v39 = vld [vmem:[%s31997_s16 + $0x154c] ss:$52 sps:$4 sm:$0xff]  }
0x10cc   : > { %18300 = vmatpush1.bf16.msra.mxu1 %v25226_v27  ;;  %v25286_v27 = vld [vmem:[%s31997_s16 + $0x1540] ss:$52 sps:$4 sm:$0xff]  }
0x10cd   : > { %18505 = vmatpush1.bf16.msra.mxu0 %v25229_v41  ;;  %18301 = vmatprep.subr.bf16.mxu1 %v25234_v56  ;;  %v25289_v41 = vld [vmem:[%s31997_s16 + $0x1548] ss:$52 sps:$4 sm:$0xff]   ;;  %v25294_v56 = vld [vmem:[%s31997_s16 + $0x15ac] ss:$52 sps:$4 sm:$0xff]  }
0x10ce   : > { %18506 = vmatprep.subr.bf16.mxu0 %v25237_v11  ;;  %v25297_v11 = vld [vmem:[%s31997_s16 + $0x15b4] ss:$52 sps:$4 sm:$0xff]  }
0x10d0   : > { %18302 = vmatpush1.bf16.msra.mxu1 %v25232_v37  ;;  %v25534_v37 = vld [vmem:[%s31998_s17] sm:$0xff] }
0x10d1   : > { %18507 = vmatpush1.bf16.msra.mxu0 %v25235_v46  ;;  %18303 = vmatprep.subr.bf16.mxu1 %v25240_v52  ;;  %v17331_v46 = vrot.slane %v25534_v37, %v28940_v57  ;;  %v17339_v52 = vrot.slane %v25534_v37, %v10874_v30  ;;  %v25300_v30 = vld [vmem:[%s31997_s16 + $0x1614] ss:$52 sps:$4 sm:$0xff]  }
0x10d2   : > { %18508 = vmatprep.subr.bf16.mxu0 %v25243_v16  ;;  %v17335_v16 = vrot.slane %v25534_v37, %v10870_v45  ;;  %v25303_v45 = vld [vmem:[%s31997_s16 + $0x161c] ss:$52 sps:$4 sm:$0xff]  }
0x10d4   : > { %18304 = vmatpush1.bf16.msra.mxu1 %v25238_v29  ;;  %v25292_v29 = vld [vmem:[%s31997_s16 + $0x15a8] ss:$52 sps:$4 sm:$0xff]  }
0x10d5   : > { %18509 = vmatpush1.bf16.msra.mxu0 %v25241_v33  ;;  %18305 = vmatprep.subr.bf16.mxu1 %v25246_v18  ;;  %v17343_v33 = vrot.slane %v25534_v37, %v10878_v24  ;;  %v25295_v18 = vld [vmem:[%s31997_s16 + $0x15b0] ss:$52 sps:$4 sm:$0xff]  }
0x10d6   : > { %18510 = vmatprep.subr.bf16.mxu0 %v25249_v48  ;;  %v25330_v37 = vld [vmem:[%s31997_s16 + $0x181c] ss:$52 sps:$4 sm:$0xff]  }
0x10d8   : > { %18306 = vmatpush1.bf16.msra.mxu1 %v25244_v4 }
0x10d9   : > { %18511 = vmatpush1.bf16.msra.mxu0 %v25247_v0  ;;  %18307 = vmatprep.subr.bf16.mxu1 %v25252_v53 }
0x10da   : > { %18512 = vmatprep.subr.bf16.mxu0 %v25255_v43 }
0x10dc   : > { %18308 = vmatpush1.bf16.msra.mxu1 %v25250_v38 }
0x10dd   : > { %18513 = vmatpush1.bf16.msra.mxu0 %v25253_v9  ;;  %18309 = vmatprep.subr.bf16.mxu1 %v25258_v50  ;;  %v25298_v9 = vld [vmem:[%s31997_s16 + $0x1610] ss:$52 sps:$4 sm:$0xff]  }
0x10de   : > { %18514 = vmatprep.subr.bf16.mxu0 %v25261_v12 }
0x10e0   : > { %18310 = vmatpush1.bf16.msra.mxu1 %v25256_v5 }
0x10e1   : > { %18515 = vmatpush1.bf16.msra.mxu0 %v25259_v26  ;;  %18320 = vmatprep.subr.bf16.mxu1 %v25264_v59  ;;  %v25301_v26 = vld [vmem:[%s31997_s16 + $0x1618] ss:$52 sps:$4 sm:$0xff]   ;;  %v25306_v59 = vld [vmem:[%s31997_s16 + $0x167c] ss:$52 sps:$4 sm:$0xff]  }
0x10e2   : > { %18525 = vmatprep.subr.bf16.mxu0 %v25267_v62 }
0x10e3   : > { %18312 = vmatmul.mubr.bf16.vlgmr.msra.gmra.mrb[80].mxu1 %v28957_v44 }
0x10e4   : > { %18517 = vmatmul.mubr.bf16.vlgmr.msra.gmra.mrb[224].mxu0 %v28957_v44  ;;  %18321 = vmatpush1.bf16.msra.mxu1 %v25262_v51 }
0x10e5   : > { %18352 = vmatprep.mubr.bf16.mxu1 %v28962_v22  ;;  %18526 = vmatpush1.bf16.msra.mxu0 %v25265_v8  ;;  %v25309_v8 = vld [vmem:[%s31997_s16 + $0x1684] ss:$52 sps:$4 sm:$0xff]  }
0x10e6   : > { %18557 = vmatprep.mubr.bf16.mxu0 %v28962_v22  ;;  %18322 = vmatprep.subr.bf16.mxu1 %v25270_v14 }
0x10e7   : > { %18527 = vmatprep.subr.bf16.mxu0 %v25273_v25 }
0x10e8   : > { %18323 = vmatpush1.bf16.msra.mxu1 %v25268_v1  ;;  %v25304_v1 = vld [vmem:[%s31997_s16 + $0x1678] ss:$52 sps:$4 sm:$0xff]  }
0x10e9   : > { %18528 = vmatpush1.bf16.msra.mxu0 %v25271_v7  ;;  %18324 = vmatprep.subr.bf16.mxu1 %v25276_v55  ;;  %v25307_v55 = vld [vmem:[%s31997_s16 + $0x1680] ss:$52 sps:$4 sm:$0xff]  }
0x10ea   : > { %18529 = vmatprep.subr.bf16.mxu0 %v25279_v34  ;;  %v25312_v34 = vld [vmem:[%s31997_s16 + $0x16e4] ss:$52 sps:$4 sm:$0xff]  }
0x10ec   : > { %18325 = vmatpush1.bf16.msra.mxu1 %v25274_v10  ;;  %v25315_v10 = vld [vmem:[%s31997_s16 + $0x16ec] ss:$52 sps:$4 sm:$0xff]  }
0x10ed   : > { %18530 = vmatpush1.bf16.msra.mxu0 %v25277_v63  ;;  %18326 = vmatprep.subr.bf16.mxu1 %v25282_v20  ;;  %v25310_v20 = vld [vmem:[%s31997_s16 + $0x16e0] ss:$52 sps:$4 sm:$0xff]  }
0x10ee   : > { %18531 = vmatprep.subr.bf16.mxu0 %v25285_v36  ;;  %v18860_v36 = vrot.slane %v18852_v17, %v28354_v40  ;;  %v25316_v17 = vld [vmem:[%s31997_s16 + $0x1748] ss:$52 sps:$4 sm:$0xff]  }
0x10f0   : > { %18327 = vmatpush1.bf16.msra.mxu1 %v25280_v21 }
0x10f1   : > { %18532 = vmatpush1.bf16.msra.mxu0 %v25283_v6  ;;  %18328 = vmatprep.subr.bf16.mxu1 %v25288_v49  ;;  %v25313_v6 = vld [vmem:[%s31997_s16 + $0x16e8] ss:$52 sps:$4 sm:$0xff]   ;;  %v25318_v49 = vld [vmem:[%s31997_s16 + $0x174c] ss:$52 sps:$4 sm:$0xff]  }
0x10f2   : > { %18533 = vmatprep.subr.bf16.mxu0 %v25291_v39  ;;  %v25319_v39 = vld [vmem:[%s31997_s16 + $0x1750] ss:$52 sps:$4 sm:$0xff]  }
0x10f4   : > { %18329 = vmatpush1.bf16.msra.mxu1 %v25286_v27  ;;  %v25324_v27 = vld [vmem:[%s31997_s16 + $0x17b4] ss:$52 sps:$4 sm:$0xff]  }
0x10f5   : > { %18534 = vmatpush1.bf16.msra.mxu0 %v25289_v41  ;;  %18330 = vmatprep.subr.bf16.mxu1 %v25294_v56  ;;  %v25327_v41 = vld [vmem:[%s31997_s16 + $0x17bc] ss:$52 sps:$4 sm:$0xff]  }
0x10f6   : > { %v17985_v48 = vpop.f32.mrb[76].mxu1  ;;  %18535 = vmatprep.subr.bf16.mxu0 %v25297_v11  ;;  %v25322_v56 = vld [vmem:[%s31997_s16 + $0x17b0] ss:$52 sps:$4 sm:$0xff]   ;;  %v25325_v11 = vld [vmem:[%s31997_s16 + $0x17b8] ss:$52 sps:$4 sm:$0xff]  }
0x10f7   : > { %v22785_v4 = vadd.f32 %v17985_v48, %v17331_v46  ;;  %v18190_v0 = vpop.f32.mrb[220].mxu0  ;;  %v17987_v53 = vpop.f32.mrb[77].mxu1  ;;  %v25333_v46 = vld [vmem:[%s31997_s16 + $0x1824] ss:$52 sps:$4 sm:$0xff]   ;;  %v25342_v48 = vld [vmem:[%s31997_s16 + $0x18ec] ss:$52 sps:$4 sm:$0xff]  }
0x10f8   : > { %v22787_v35 = vadd.f32 %v18190_v0, %v17339_v52  ;;  %v22786_v24 = vadd.f32 %v17987_v53, %v17335_v16  ;;  %v18192_v43 = vpop.f32.mrb[221].mxu0  ;;  %v17989_v38 = vpop.f32.mrb[78].mxu1  ;;  %18331 = vmatpush1.bf16.msra.mxu1 %v25292_v29  ;;  %v25328_v52 = vld [vmem:[%s31997_s16 + $0x1818] ss:$52 sps:$4 sm:$0xff]   ;;  %v25331_v16 = vld [vmem:[%s31997_s16 + $0x1820] ss:$52 sps:$4 sm:$0xff]  }
0x10f9   : > { %v22788_v50 = vadd.f32 %v18192_v43, %v17343_v33  ;;  %v18194_v12 = vpop.f32.mrb[222].mxu0  ;;  %18536 = vmatpush1.bf16.msra.mxu0 %v25295_v18  ;;  %v17990_v5 = vpop.f32.mrb[79].mxu1  ;;  %18332 = vmatprep.subr.bf16.mxu1 %v25300_v30  ;;  %v25336_v29 = vld [vmem:[%s31997_s16 + $0x1884] ss:$52 sps:$4 sm:$0xff]   ;;  %v25339_v33 = vld [vmem:[%s31997_s16 + $0x188c] ss:$52 sps:$4 sm:$0xff]  }
0x10fa   : > { %v18822_v62 = vcombine.low %v22785_v4, %v22786_v24  ;;  %v18195_v51 = vpop.f32.mrb[223].mxu0  ;;  %18537 = vmatprep.subr.bf16.mxu0 %v25303_v45  ;;  %v25334_v18 = vld [vmem:[%s31997_s16 + $0x1880] ss:$52 sps:$4 sm:$0xff]   ;;  %v25337_v30 = vld [vmem:[%s31997_s16 + $0x1888] ss:$52 sps:$4 sm:$0xff]  }
0x10fb   : > { %v18823_v14 = vcombine.low %v22787_v35, %v22788_v50  ;;  %v25345_v45 = vld [vmem:[%s31997_s16 + $0x18f4] ss:$52 sps:$4 sm:$0xff]   ;;  %v25343_v0 = vld [vmem:[%s31997_s16 + $0x18f0] ss:$52 sps:$4 sm:$0xff]   ;;  %v25349_v43 = vld [vmem:[%s31997_s16 + $0x1958] ss:$52 sps:$4 sm:$0xff]  }
0x10fc   : > { %v18844_v25 = vrot.slane %v18822_v62, %v28354_v40  ;;  %18333 = vmatpush1.bf16.msra.mxu1 %v25298_v9  ;;  %v25340_v4 = vld [vmem:[%s31997_s16 + $0x18e8] ss:$52 sps:$4 sm:$0xff]   ;;  %v25346_v24 = vld [vmem:[%s31997_s16 + $0x1950] ss:$52 sps:$4 sm:$0xff]   ;;  %v25352_v50 = vld [vmem:[%s31997_s16 + $0x19b8] ss:$52 sps:$4 sm:$0xff]  }
0x10fd   : > { %v18851_v7 = vrot.slane %v18823_v14, %v28354_v40  ;;  %18538 = vmatpush1.bf16.msra.mxu0 %v25301_v26  ;;  %18334 = vmatprep.subr.bf16.mxu1 %v25306_v59  ;;  %v25348_v53 = vld [vmem:[%s31997_s16 + $0x1954] ss:$52 sps:$4 sm:$0xff]   ;;  %v25351_v35 = vld [vmem:[%s31997_s16 + $0x195c] ss:$52 sps:$4 sm:$0xff]   ;;  %v25357_v9 = vld [vmem:[%s31997_s16 + $0x19c4] ss:$52 sps:$4 sm:$0xff]  }
0x10fe   : > { %18539 = vmatprep.subr.bf16.mxu0 %v25309_v8  ;;  %v25354_v38 = vld [vmem:[%s31997_s16 + $0x19bc] ss:$52 sps:$4 sm:$0xff]   ;;  %v25355_v12 = vld [vmem:[%s31997_s16 + $0x19c0] ss:$52 sps:$4 sm:$0xff]   ;;  %v25360_v5 = vld [vmem:[%s31997_s16 + $0x1a24] ss:$52 sps:$4 sm:$0xff]  }
0x10ff   : > { %v18853_v63 = vcombine.low %v18844_v25, %v18851_v7  ;;  %v25363_v26 = vld [vmem:[%s31997_s16 + $0x1a2c] ss:$52 sps:$4 sm:$0xff]   ;;  %v25361_v62 = vld [vmem:[%s31997_s16 + $0x1a28] ss:$52 sps:$4 sm:$0xff]   ;;  %v25367_v25 = vld [vmem:[%s31997_s16 + $0x1a90] ss:$52 sps:$4 sm:$0xff]  }
0x1100   : > { %18335 = vmatpush1.bf16.msra.mxu1 %v25304_v1  ;;  %v25358_v59 = vld [vmem:[%s31997_s16 + $0x1a20] ss:$52 sps:$4 sm:$0xff]   ;;  %v25364_v14 = vld [vmem:[%s31997_s16 + $0x1a88] ss:$52 sps:$4 sm:$0xff]  }
0x1101   : > { %v18867_v21 = vrot.slane %v18853_v63, %v28354_v40  ;;  %18540 = vmatpush1.bf16.msra.mxu0 %v25307_v55  ;;  %18336 = vmatprep.subr.bf16.mxu1 %v25312_v34  ;;  %v25366_v51 = vld [vmem:[%s31997_s16 + $0x1a8c] ss:$52 sps:$4 sm:$0xff]   ;;  %v25369_v8 = vld [vmem:[%s31997_s16 + $0x1a94] ss:$52 sps:$4 sm:$0xff]   ;;  %v25375_v7 = vld [vmem:[%s31997_s16 + $0x1afc] ss:$52 sps:$4 sm:$0xff]  }
0x1102   : > { %18541 = vmatprep.subr.bf16.mxu0 %v25315_v10  ;;  %v25372_v1 = vld [vmem:[%s31997_s16 + $0x1af4] ss:$52 sps:$4 sm:$0xff]   ;;  %v25370_v55 = vld [vmem:[%s31997_s16 + $0x1af0] ss:$52 sps:$4 sm:$0xff]   ;;  %v25373_v34 = vld [vmem:[%s31997_s16 + $0x1af8] ss:$52 sps:$4 sm:$0xff]  }
0x1103   : > { %v18868_v42 = vcombine.low %v18860_v36, %v18867_v21  ;;  %v25378_v10 = vld [vmem:[%s31997_s16 + $0x1b5c] ss:$52 sps:$4 sm:$0xff]   ;;  %v25381_v63 = vld [vmem:[%s31997_s16 + $0x1b64] ss:$52 sps:$4 sm:$0xff]   ;;  %v25379_v36 = vld [vmem:[%s31997_s16 + $0x1b60] ss:$52 sps:$4 sm:$0xff]  }
0x1104   : > { %18337 = vmatpush1.bf16.msra.mxu1 %v25310_v20  ;;  %v25376_v20 = vld [vmem:[%s31997_s16 + $0x1b58] ss:$52 sps:$4 sm:$0xff]  }
0x1105   : > { %18910 = vst [vmem:[%s31431_s30] sm:$0xff] %v18868_v42  ;;  %18542 = vmatpush1.bf16.msra.mxu0 %v25313_v6  ;;  %18338 = vmatprep.subr.bf16.mxu1 %v25318_v49  ;;  %v25384_v21 = vld [vmem:[%s31997_s16 + $0x1bc4] ss:$52 sps:$4 sm:$0xff]   ;;  %v25387_v6 = vld [vmem:[%s31997_s16 + $0x1bcc] ss:$52 sps:$4 sm:$0xff]  }
0x1106   : > { %18543 = vmatprep.subr.bf16.mxu0 %v25321_v19  ;;  %v25382_v49 = vld [vmem:[%s31997_s16 + $0x1bc0] ss:$52 sps:$4 sm:$0xff]   ;;  %v25385_v19 = vld [vmem:[%s31997_s16 + $0x1bc8] ss:$52 sps:$4 sm:$0xff]  }
0x1107   : > { %v25390_v42 = vld [vmem:[%s31997_s16 + $0x1c2c] ss:$52 sps:$4 sm:$0xff]  }
0x1108   : > { %18339 = vmatpush1.bf16.msra.mxu1 %v25316_v17  ;;  %v25393_v17 = vld [vmem:[%s31997_s16 + $0x1c34] ss:$52 sps:$4 sm:$0xff]  }
0x1109   : > { %18544 = vmatpush1.bf16.msra.mxu0 %v25319_v39  ;;  %18340 = vmatprep.subr.bf16.mxu1 %v25324_v27  ;;  %v25388_v39 = vld [vmem:[%s31997_s16 + $0x1c28] ss:$52 sps:$4 sm:$0xff]   ;;  %v25391_v27 = vld [vmem:[%s31997_s16 + $0x1c30] ss:$52 sps:$4 sm:$0xff]  }
0x110a   : > { %18545 = vmatprep.subr.bf16.mxu0 %v25327_v41  ;;  %v25396_v41 = vld [vmem:[%s31997_s16 + $0x1c94] ss:$52 sps:$4 sm:$0xff]  }
0x110c   : > { %18341 = vmatpush1.bf16.msra.mxu1 %v25322_v56  ;;  %v25399_v56 = vld [vmem:[%s31997_s16 + $0x1c9c] ss:$52 sps:$4 sm:$0xff]  }
0x110d   : > { %18546 = vmatpush1.bf16.msra.mxu0 %v25325_v11  ;;  %18342 = vmatprep.subr.bf16.mxu1 %v25330_v37  ;;  %v25394_v11 = vld [vmem:[%s31997_s16 + $0x1c90] ss:$52 sps:$4 sm:$0xff]   ;;  %v25397_v37 = vld [vmem:[%s31997_s16 + $0x1c98] ss:$52 sps:$4 sm:$0xff]  }
0x110e   : > { %18547 = vmatprep.subr.bf16.mxu0 %v25333_v46  ;;  %v25402_v46 = vld [vmem:[%s31997_s16 + $0x1cfc] ss:$52 sps:$4 sm:$0xff]  }
0x1110   : > { %18343 = vmatpush1.bf16.msra.mxu1 %v25328_v52  ;;  %v25405_v52 = vld [vmem:[%s31997_s16 + $0x1d04] ss:$52 sps:$4 sm:$0xff]  }
0x1111   : > { %18548 = vmatpush1.bf16.msra.mxu0 %v25331_v16  ;;  %18344 = vmatprep.subr.bf16.mxu1 %v25336_v29  ;;  %v25400_v16 = vld [vmem:[%s31997_s16 + $0x1cf8] ss:$52 sps:$4 sm:$0xff]   ;;  %v25403_v29 = vld [vmem:[%s31997_s16 + $0x1d00] ss:$52 sps:$4 sm:$0xff]  }
0x1112   : > { %18549 = vmatprep.subr.bf16.mxu0 %v25339_v33  ;;  %v25408_v33 = vld [vmem:[%s31997_s16 + $0x1d64] ss:$52 sps:$4 sm:$0xff]  }
0x1114   : > { %18345 = vmatpush1.bf16.msra.mxu1 %v25334_v18  ;;  %v25411_v18 = vld [vmem:[%s31997_s16 + $0x1d6c] ss:$52 sps:$4 sm:$0xff]  }
0x1115   : > { %18550 = vmatpush1.bf16.msra.mxu0 %v25337_v30  ;;  %18346 = vmatprep.subr.bf16.mxu1 %v25342_v48  ;;  %v25406_v30 = vld [vmem:[%s31997_s16 + $0x1d60] ss:$52 sps:$4 sm:$0xff]   ;;  %v25409_v48 = vld [vmem:[%s31997_s16 + $0x1d68] ss:$52 sps:$4 sm:$0xff]  }
0x1116   : > { %18551 = vmatprep.subr.bf16.mxu0 %v25345_v45  ;;  %v25414_v45 = vld [vmem:[%s31997_s16 + $0x1dcc] ss:$52 sps:$4 sm:$0xff]  }
0x1118   : > { %18347 = vmatpush1.bf16.msra.mxu1 %v25340_v4  ;;  %v25417_v4 = vld [vmem:[%s31997_s16 + $0x1dd4] ss:$52 sps:$4 sm:$0xff]  }
0x1119   : > { %18552 = vmatpush1.bf16.msra.mxu0 %v25343_v0  ;;  %18348 = vmatprep.subr.bf16.mxu1 %v25348_v53  ;;  %v25412_v0 = vld [vmem:[%s31997_s16 + $0x1dc8] ss:$52 sps:$4 sm:$0xff]   ;;  %v25415_v53 = vld [vmem:[%s31997_s16 + $0x1dd0] ss:$52 sps:$4 sm:$0xff]  }
0x111a   : > { %18553 = vmatprep.subr.bf16.mxu0 %v25351_v35  ;;  %v25420_v35 = vld [vmem:[%s31997_s16 + $0x1e34] ss:$52 sps:$4 sm:$0xff]  }
0x111c   : > { %18349 = vmatpush1.bf16.msra.mxu1 %v25346_v24  ;;  %v25423_v24 = vld [vmem:[%s31997_s16 + $0x1e3c] ss:$52 sps:$4 sm:$0xff]  }
0x111d   : > { %18554 = vmatpush1.bf16.msra.mxu0 %v25349_v43  ;;  %18350 = vmatprep.subr.bf16.mxu1 %v25354_v38  ;;  %v25418_v43 = vld [vmem:[%s31997_s16 + $0x1e30] ss:$52 sps:$4 sm:$0xff]   ;;  %v25421_v38 = vld [vmem:[%s31997_s16 + $0x1e38] ss:$52 sps:$4 sm:$0xff]  }
0x111e   : > { %18555 = vmatprep.subr.bf16.mxu0 %v25357_v9  ;;  %v25426_v9 = vld [vmem:[%s31997_s16 + $0x1e9c] ss:$52 sps:$4 sm:$0xff]  }
0x1120   : > { %18351 = vmatpush1.bf16.msra.mxu1 %v25352_v50  ;;  %v25429_v50 = vld [vmem:[%s31997_s16 + $0x1ea4] ss:$52 sps:$4 sm:$0xff]  }
0x1121   : > { %18556 = vmatpush1.bf16.msra.mxu0 %v25355_v12  ;;  %18361 = vmatprep.subr.bf16.mxu1 %v25360_v5  ;;  %v25424_v12 = vld [vmem:[%s31997_s16 + $0x1e98] ss:$52 sps:$4 sm:$0xff]   ;;  %v25427_v5 = vld [vmem:[%s31997_s16 + $0x1ea0] ss:$52 sps:$4 sm:$0xff]  }
0x1122   : > { %18566 = vmatprep.subr.bf16.mxu0 %v25363_v26  ;;  %v25432_v26 = vld [vmem:[%s31997_s16 + $0x1f04] ss:$52 sps:$4 sm:$0xff]  }
0x1123   : > { %18353 = vmatmul.mubr.bf16.vlgmr.msra.gmra.mrb[80].mxu1 %v29111_v13 }
0x1124   : > { %18558 = vmatmul.mubr.bf16.vlgmr.msra.gmra.mrb[224].mxu0 %v29111_v13  ;;  %18362 = vmatpush1.bf16.msra.mxu1 %v25358_v59  ;;  %v25435_v59 = vld [vmem:[%s31997_s16 + $0x1f0c] ss:$52 sps:$4 sm:$0xff]  }
0x1125   : > { %18393 = vmatprep.mubr.bf16.mxu1 %v29714_v3  ;;  %18567 = vmatpush1.bf16.msra.mxu0 %v25361_v62  ;;  %v25430_v62 = vld [vmem:[%s31997_s16 + $0x1f00] ss:$52 sps:$4 sm:$0xff]  }
0x1126   : > { %18598 = vmatprep.mubr.bf16.mxu0 %v29714_v3  ;;  %18363 = vmatprep.subr.bf16.mxu1 %v25366_v51  ;;  %v25433_v51 = vld [vmem:[%s31997_s16 + $0x1f08] ss:$52 sps:$4 sm:$0xff]  }
0x1127   : > { %18568 = vmatprep.subr.bf16.mxu0 %v25369_v8  ;;  %v25438_v8 = vld [vmem:[%s31997_s16 + $0x1f6c] ss:$52 sps:$4 sm:$0xff]  }
0x1128   : > { %18364 = vmatpush1.bf16.msra.mxu1 %v25364_v14  ;;  %v25441_v14 = vld [vmem:[%s31997_s16 + $0x1f74] ss:$52 sps:$4 sm:$0xff]  }
0x1129   : > { %18569 = vmatpush1.bf16.msra.mxu0 %v25367_v25  ;;  %18365 = vmatprep.subr.bf16.mxu1 %v25372_v1  ;;  %v25436_v25 = vld [vmem:[%s31997_s16 + $0x1f68] ss:$52 sps:$4 sm:$0xff]   ;;  %v25439_v1 = vld [vmem:[%s31997_s16 + $0x1f70] ss:$52 sps:$4 sm:$0xff]  }
0x112a   : > { %18570 = vmatprep.subr.bf16.mxu0 %v25375_v7  ;;  %v25444_v7 = vld [vmem:[%s31997_s16 + $0x1fd4] ss:$52 sps:$4 sm:$0xff]  }
0x112c   : > { %18366 = vmatpush1.bf16.msra.mxu1 %v25370_v55  ;;  %v25447_v55 = vld [vmem:[%s31997_s16 + $0x1fdc] ss:$52 sps:$4 sm:$0xff]  }
0x112d   : > { %18571 = vmatpush1.bf16.msra.mxu0 %v25373_v34  ;;  %18367 = vmatprep.subr.bf16.mxu1 %v25378_v10  ;;  %v25442_v34 = vld [vmem:[%s31997_s16 + $0x1fd0] ss:$52 sps:$4 sm:$0xff]   ;;  %v25445_v10 = vld [vmem:[%s31997_s16 + $0x1fd8] ss:$52 sps:$4 sm:$0xff]  }
0x112e   : > { %18572 = vmatprep.subr.bf16.mxu0 %v25381_v63  ;;  %v25450_v63 = vld [vmem:[%s31997_s16 + $0x203c] ss:$52 sps:$4 sm:$0xff]  }
0x1130   : > { %18368 = vmatpush1.bf16.msra.mxu1 %v25376_v20  ;;  %v25453_v20 = vld [vmem:[%s31997_s16 + $0x2044] ss:$52 sps:$4 sm:$0xff]  }
0x1131   : > { %18573 = vmatpush1.bf16.msra.mxu0 %v25379_v36  ;;  %18369 = vmatprep.subr.bf16.mxu1 %v25384_v21  ;;  %v25448_v36 = vld [vmem:[%s31997_s16 + $0x2038] ss:$52 sps:$4 sm:$0xff]   ;;  %v25451_v21 = vld [vmem:[%s31997_s16 + $0x2040] ss:$52 sps:$4 sm:$0xff]  }
0x1132   : > { %18574 = vmatprep.subr.bf16.mxu0 %v25387_v6  ;;  %v25454_v6 = vld [vmem:[%s31997_s16 + $0x370] ss:$52 sps:$4 sm:$0xff]  }
0x1134   : > { %18370 = vmatpush1.bf16.msra.mxu1 %v25382_v49  ;;  %v25455_v49 = vld [vmem:[%s31997_s16 + $0x9f0] ss:$52 sps:$4 sm:$0xff]  }
0x1135   : > { %18575 = vmatpush1.bf16.msra.mxu0 %v25385_v19  ;;  %18371 = vmatprep.subr.bf16.mxu1 %v25390_v42  ;;  %v25456_v19 = vld [vmem:[%s31997_s16 + $0x30] ss:$52 sps:$4 sm:$0xff]  }
0x1136   : > { %18576 = vmatprep.subr.bf16.mxu0 %v25393_v17  ;;  %v25457_v42 = vld [vmem:[%s31997_s16 + $0x6b0] ss:$52 sps:$4 sm:$0xff]   ;;  %v25458_v17 = vld [vmem:[%s31997_s16 + $0x3d8] ss:$52 sps:$4 sm:$0xff]  }
0x1138   : > { %18372 = vmatpush1.bf16.msra.mxu1 %v25388_v39  ;;  %v25459_v39 = vld [vmem:[%s31997_s16 + $0xa58] ss:$52 sps:$4 sm:$0xff]  }
0x1139   : > { %18577 = vmatpush1.bf16.msra.mxu0 %v25391_v27  ;;  %18373 = vmatprep.subr.bf16.mxu1 %v25396_v41  ;;  %v25460_v27 = vld [vmem:[%s31997_s16 + $0x98] ss:$52 sps:$4 sm:$0xff]  }
0x113a   : > { %18578 = vmatprep.subr.bf16.mxu0 %v25399_v56  ;;  %v25461_v41 = vld [vmem:[%s31997_s16 + $0x718] ss:$52 sps:$4 sm:$0xff]   ;;  %v25462_v56 = vld [vmem:[%s31997_s16 + $0x440] ss:$52 sps:$4 sm:$0xff]  }
0x113c   : > { %18374 = vmatpush1.bf16.msra.mxu1 %v25394_v11  ;;  %v25463_v11 = vld [vmem:[%s31997_s16 + $0xac0] ss:$52 sps:$4 sm:$0xff]  }
0x113d   : > { %18579 = vmatpush1.bf16.msra.mxu0 %v25397_v37  ;;  %18375 = vmatprep.subr.bf16.mxu1 %v25402_v46  ;;  %v25465_v37 = vld [vmem:[%s31997_s16 + $0x780] ss:$52 sps:$4 sm:$0xff]   ;;  %v25467_v46 = vld [vmem:[%s31997_s16 + $0xb28] ss:$52 sps:$4 sm:$0xff]  }
0x113e   : > { %18580 = vmatprep.subr.bf16.mxu0 %v25405_v52  ;;  %v25468_v52 = vld [vmem:[%s31997_s16 + $0x168] ss:$52 sps:$4 sm:$0xff]  }
0x1140   : > { %18376 = vmatpush1.bf16.msra.mxu1 %v25400_v16  ;;  %v25469_v16 = vld [vmem:[%s31997_s16 + $0x7e8] ss:$52 sps:$4 sm:$0xff]  }
0x1141   : > { %18581 = vmatpush1.bf16.msra.mxu0 %v25403_v29  ;;  %18377 = vmatprep.subr.bf16.mxu1 %v25408_v33  ;;  %v25470_v29 = vld [vmem:[%s31997_s16 + $0x510] ss:$52 sps:$4 sm:$0xff]  }
0x1142   : > { %18582 = vmatprep.subr.bf16.mxu0 %v25411_v18  ;;  %v25471_v33 = vld [vmem:[%s31997_s16 + $0xb90] ss:$52 sps:$4 sm:$0xff]  }
0x1143   : > { %v25472_v18 = vld [vmem:[%s31997_s16 + $0x1d0] ss:$52 sps:$4 sm:$0xff]  }
0x1144   : > { %18378 = vmatpush1.bf16.msra.mxu1 %v25406_v30  ;;  %v25473_v30 = vld [vmem:[%s31997_s16 + $0x850] ss:$52 sps:$4 sm:$0xff]  }
0x1145   : > { %18583 = vmatpush1.bf16.msra.mxu0 %v25409_v48  ;;  %18379 = vmatprep.subr.bf16.mxu1 %v25414_v45  ;;  %v25474_v48 = vld [vmem:[%s31997_s16 + $0x578] ss:$52 sps:$4 sm:$0xff]  }
0x1146   : > { %18584 = vmatprep.subr.bf16.mxu0 %v25417_v4  ;;  %v25475_v45 = vld [vmem:[%s31997_s16 + $0xbf8] ss:$52 sps:$4 sm:$0xff]  }
0x1147   : > { %v25476_v4 = vld [vmem:[%s31997_s16 + $0x238] ss:$52 sps:$4 sm:$0xff]  }
0x1148   : > { %18380 = vmatpush1.bf16.msra.mxu1 %v25412_v0  ;;  %v25477_v0 = vld [vmem:[%s31997_s16 + $0x8b8] ss:$52 sps:$4 sm:$0xff]  }
0x1149   : > { %18585 = vmatpush1.bf16.msra.mxu0 %v25415_v53  ;;  %18381 = vmatprep.subr.bf16.mxu1 %v25420_v35  ;;  %v25478_v53 = vld [vmem:[%s31997_s16 + $0x5e0] ss:$52 sps:$4 sm:$0xff]  }
0x114a   : > { %18586 = vmatprep.subr.bf16.mxu0 %v25423_v24  ;;  %v25479_v35 = vld [vmem:[%s31997_s16 + $0xc60] ss:$52 sps:$4 sm:$0xff]  }
0x114b   : > { %v25480_v24 = vld [vmem:[%s31997_s16 + $0x2a0] ss:$52 sps:$4 sm:$0xff]  }
0x114c   : > { %18382 = vmatpush1.bf16.msra.mxu1 %v25418_v43  ;;  %v25481_v43 = vld [vmem:[%s31997_s16 + $0x920] ss:$52 sps:$4 sm:$0xff]  }
0x114d   : > { %18587 = vmatpush1.bf16.msra.mxu0 %v25421_v38  ;;  %18383 = vmatprep.subr.bf16.mxu1 %v25426_v9  ;;  %v25482_v38 = vld [vmem:[%s31997_s16 + $0x648] ss:$52 sps:$4 sm:$0xff]  }
0x114e   : > { %18588 = vmatprep.subr.bf16.mxu0 %v25429_v50  ;;  %v25483_v9 = vld [vmem:[%s31997_s16 + $0xcc8] ss:$52 sps:$4 sm:$0xff]  }
0x114f   : > { %v25484_v50 = vld [vmem:[%s31997_s16 + $0x308] ss:$52 sps:$4 sm:$0xff]  }
0x1150   : > { %18384 = vmatpush1.bf16.msra.mxu1 %v25424_v12  ;;  %v25485_v12 = vld [vmem:[%s31997_s16 + $0x988] ss:$52 sps:$4 sm:$0xff]  }
0x1151   : > { %18589 = vmatpush1.bf16.msra.mxu0 %v25427_v5  ;;  %18385 = vmatprep.subr.bf16.mxu1 %v25432_v26  ;;  %v25486_v5 = vld [vmem:[%s31997_s16 + $0x1070] ss:$52 sps:$4 sm:$0xff]  }
0x1152   : > { %18590 = vmatprep.subr.bf16.mxu0 %v25435_v59  ;;  %v25487_v26 = vld [vmem:[%s31997_s16 + $0x16f0] ss:$52 sps:$4 sm:$0xff]  }
0x1153   : > { %v25488_v59 = vld [vmem:[%s31997_s16 + $0xd30] ss:$52 sps:$4 sm:$0xff]  }
0x1154   : > { %18386 = vmatpush1.bf16.msra.mxu1 %v25430_v62  ;;  %v25489_v62 = vld [vmem:[%s31997_s16 + $0x13b0] ss:$52 sps:$4 sm:$0xff]  }
0x1155   : > { %18591 = vmatpush1.bf16.msra.mxu0 %v25433_v51  ;;  %18387 = vmatprep.subr.bf16.mxu1 %v25438_v8  ;;  %v25490_v51 = vld [vmem:[%s31997_s16 + $0x10d8] ss:$52 sps:$4 sm:$0xff]  }
0x1156   : > { %18592 = vmatprep.subr.bf16.mxu0 %v25441_v14  ;;  %v25491_v8 = vld [vmem:[%s31997_s16 + $0x1758] ss:$52 sps:$4 sm:$0xff]  }
0x1157   : > { %v25492_v14 = vld [vmem:[%s31997_s16 + $0xd98] ss:$52 sps:$4 sm:$0xff]  }
0x1158   : > { %18388 = vmatpush1.bf16.msra.mxu1 %v25436_v25  ;;  %v25493_v25 = vld [vmem:[%s31997_s16 + $0x1418] ss:$52 sps:$4 sm:$0xff]  }
0x1159   : > { %18593 = vmatpush1.bf16.msra.mxu0 %v25439_v1  ;;  %18389 = vmatprep.subr.bf16.mxu1 %v25444_v7  ;;  %v25497_v1 = vld [vmem:[%s31997_s16 + $0x1480] ss:$52 sps:$4 sm:$0xff]   ;;  %v25499_v7 = vld [vmem:[%s31997_s16 + $0x1828] ss:$52 sps:$4 sm:$0xff]  }
0x115a   : > { %18594 = vmatprep.subr.bf16.mxu0 %v25447_v55  ;;  %v25500_v55 = vld [vmem:[%s31997_s16 + $0xe68] ss:$52 sps:$4 sm:$0xff]  }
0x115c   : > { %18390 = vmatpush1.bf16.msra.mxu1 %v25442_v34  ;;  %v25501_v34 = vld [vmem:[%s31997_s16 + $0x14e8] ss:$52 sps:$4 sm:$0xff]  }
0x115d   : > { %18595 = vmatpush1.bf16.msra.mxu0 %v25445_v10  ;;  %18391 = vmatprep.subr.bf16.mxu1 %v25450_v63  ;;  %v25502_v10 = vld [vmem:[%s31997_s16 + $0x1210] ss:$52 sps:$4 sm:$0xff]  }
0x115e   : > { %18596 = vmatprep.subr.bf16.mxu0 %v25453_v20  ;;  %v25503_v63 = vld [vmem:[%s31997_s16 + $0x1890] ss:$52 sps:$4 sm:$0xff]  }
0x115f   : > { %v25504_v20 = vld [vmem:[%s31997_s16 + $0xed0] ss:$52 sps:$4 sm:$0xff]  }
0x1160   : > { %18392 = vmatpush1.bf16.msra.mxu1 %v25448_v36  ;;  %v25505_v36 = vld [vmem:[%s31997_s16 + $0x1550] ss:$52 sps:$4 sm:$0xff]  }
0x1161   : > { %18597 = vmatpush1.bf16.msra.mxu0 %v25451_v21  ;;  %21857 = vmatprep.subr.bf16.mxu1 %v25454_v6  ;;  %v25506_v21 = vld [vmem:[%s31997_s16 + $0x1278] ss:$52 sps:$4 sm:$0xff]  }
0x1162   : > { %21879 = vmatprep.subr.bf16.mxu0 %v25455_v49  ;;  %v25507_v6 = vld [vmem:[%s31997_s16 + $0x18f8] ss:$52 sps:$4 sm:$0xff]  }
0x1163   : > { %18394 = vmatmul.mubr.bf16.vlgmr.msra.gmra.mrb[80].mxu1 %v29712_v32  ;;  %v25508_v49 = vld [vmem:[%s31997_s16 + $0xf38] ss:$52 sps:$4 sm:$0xff]  }
0x1164   : > { %18599 = vmatmul.mubr.bf16.vlgmr.msra.gmra.mrb[224].mxu0 %v29712_v32  ;;  %21858 = vmatpush3.bf16.msra.mxu1 %v25456_v19  ;;  %v25509_v19 = vld [vmem:[%s31997_s16 + $0x15b8] ss:$52 sps:$4 sm:$0xff]  }
0x1165   : > { %18639 = vmatprep.mubr.bf16.mxu1 %v28725_v23  ;;  %21880 = vmatpush3.bf16.msra.mxu0 %v25457_v42  ;;  %v25464_v23 = vld [vmem:[%s31997_s16 + $0x100] ss:$52 sps:$4 sm:$0xff]  }
0x1166   : > { %18679 = vmatprep.mubr.bf16.mxu0 %v28736_v15  ;;  %21859 = vmatprep.subr.bf16.mxu1 %v25458_v17  ;;  %v25466_v15 = vld [vmem:[%s31997_s16 + $0x4a8] ss:$52 sps:$4 sm:$0xff]   ;;  %v25510_v42 = vld [vmem:[%s31997_s16 + $0x12e0] ss:$52 sps:$4 sm:$0xff]  }
0x1167   : > { %21881 = vmatprep.subr.bf16.mxu0 %v25459_v39  ;;  %v25511_v17 = vld [vmem:[%s31997_s16 + $0x1960] ss:$52 sps:$4 sm:$0xff]  }
0x1168   : > { %21860 = vmatpush3.bf16.msra.mxu1 %v25460_v27  ;;  %v25512_v39 = vld [vmem:[%s31997_s16 + $0xfa0] ss:$52 sps:$4 sm:$0xff]  }
0x1169   : > { %21882 = vmatpush3.bf16.msra.mxu0 %v25461_v41  ;;  %21861 = vmatprep.subr.bf16.mxu1 %v25462_v56  ;;  %v25513_v27 = vld [vmem:[%s31997_s16 + $0x1620] ss:$52 sps:$4 sm:$0xff]   ;;  %v25514_v41 = vld [vmem:[%s31997_s16 + $0x1348] ss:$52 sps:$4 sm:$0xff]  }
0x116a   : > { %21883 = vmatprep.subr.bf16.mxu0 %v25463_v11  ;;  %v25515_v56 = vld [vmem:[%s31997_s16 + $0x19c8] ss:$52 sps:$4 sm:$0xff]  }
0x116b   : > { %v25516_v11 = vld [vmem:[%s31997_s16 + $0x1008] ss:$52 sps:$4 sm:$0xff]  }
0x116c   : > { %21862 = vmatpush3.bf16.msra.mxu1 %v25464_v23  ;;  %v25517_v23 = vld [vmem:[%s31997_s16 + $0x1688] ss:$52 sps:$4 sm:$0xff]  }
0x116d   : > { %21884 = vmatpush3.bf16.msra.mxu0 %v25465_v37  ;;  %21863 = vmatprep.subr.bf16.mxu1 %v25466_v15  ;;  %v25518_v37 = vld [vmem:[%s31997_s16 + $0x1d70] ss:$52 sps:$4 sm:$0xff]  }
0x116e   : > { %21885 = vmatprep.subr.bf16.mxu0 %v25467_v46  ;;  %v25519_v15 = vld [vmem:[%s31997_s16 + $0x1a30] ss:$52 sps:$4 sm:$0xff]   ;;  %v25520_v46 = vld [vmem:[%s31997_s16 + $0x1dd8] ss:$52 sps:$4 sm:$0xff]  }
0x1170   : > { %21864 = vmatpush3.bf16.msra.mxu1 %v25468_v52  ;;  %v25521_v52 = vld [vmem:[%s31997_s16 + $0x1a98] ss:$52 sps:$4 sm:$0xff]  }
0x1171   : > { %21886 = vmatpush3.bf16.msra.mxu0 %v25469_v16  ;;  %21865 = vmatprep.subr.bf16.mxu1 %v25470_v29  ;;  %v25522_v16 = vld [vmem:[%s31997_s16 + $0x1e40] ss:$52 sps:$4 sm:$0xff]  }
0x1172   : > { %21887 = vmatprep.subr.bf16.mxu0 %v25471_v33  ;;  %v25523_v29 = vld [vmem:[%s31997_s16 + $0x1b00] ss:$52 sps:$4 sm:$0xff]   ;;  %v25527_v33 = vld [vmem:[%s31997_s16 + $0x1bd0] ss:$52 sps:$4 sm:$0xff]  }
0x1174   : > { %21866 = vmatpush3.bf16.msra.mxu1 %v25472_v18  ;;  %v25528_v18 = vld [vmem:[%s31997_s16 + $0x1f78] ss:$52 sps:$4 sm:$0xff]  }
0x1175   : > { %21888 = vmatpush3.bf16.msra.mxu0 %v25473_v30  ;;  %21867 = vmatprep.subr.bf16.mxu1 %v25474_v48  ;;  %v25529_v30 = vld [vmem:[%s31997_s16 + $0x1c38] ss:$52 sps:$4 sm:$0xff]   ;;  %v25530_v48 = vld [vmem:[%s31997_s16 + $0x1fe0] ss:$52 sps:$4 sm:$0xff]  }
0x1176   : > { %21889 = vmatprep.subr.bf16.mxu0 %v25475_v45  ;;  %v25531_v45 = vld [vmem:[%s31997_s16 + $0x1ca0] ss:$52 sps:$4 sm:$0xff]  }
0x1178   : > { %21868 = vmatpush3.bf16.msra.mxu1 %v25476_v4  ;;  %v25532_v4 = vld [vmem:[%s31997_s16 + $0x2048] ss:$52 sps:$4 sm:$0xff]  }
0x1179   : > { %21890 = vmatpush3.bf16.msra.mxu0 %v25477_v0  ;;  %21869 = vmatprep.subr.bf16.mxu1 %v25478_v53  ;;  %v25533_v0 = vld [vmem:[%s31997_s16 + $0x1d08] ss:$52 sps:$4 sm:$0xff]  }
0x117a   : > { %21891 = vmatprep.subr.bf16.mxu0 %v25479_v35  ;;  %v12029_v53 = vld [vmem:[%s31998_s17 + $0x8] sm:$0x1f] }
0x117b   : > { %v17347_v35 = vrot.slane %v12029_v53, %v28712_v60 }
0x117c   : > { %21870 = vmatpush3.bf16.msra.mxu1 %v25480_v24  ;;  %v17355_v24 = vrot.slane %v12029_v53, %v28829_v58 }
0x117d   : > { %21892 = vmatpush3.bf16.msra.mxu0 %v25481_v43  ;;  %21871 = vmatprep.subr.bf16.mxu1 %v25482_v38  ;;  %v17351_v43 = vrot.slane %v12029_v53, %v28709_v47  ;;  %v17359_v38 = vrot.slane %v12029_v53, %v28715_v28 }
0x117e   : > { %21893 = vmatprep.subr.bf16.mxu0 %v25483_v9 }
0x1180   : > { %21872 = vmatpush3.bf16.msra.mxu1 %v25484_v50 }
0x1181   : > { %21894 = vmatpush3.bf16.msra.mxu0 %v25485_v12  ;;  %21901 = vmatprep.subr.bf16.mxu1 %v25486_v5 }
0x1182   : > { %21923 = vmatprep.subr.bf16.mxu0 %v25487_v26 }
0x1183   : > { %18640 = vmatmul.mubr.bf16.vlgmr.msra.gmra.mrb[84].mxu1 %v28730_v61  ;;  %v25494_v61 = vld [vmem:[%s31997_s16 + $0x1140] ss:$52 sps:$4 sm:$0xff]  }
0x1184   : > { %18680 = vmatmul.mubr.bf16.vlgmr.msra.gmra.mrb[228].mxu0 %v28846_v54  ;;  %21902 = vmatpush3.bf16.msra.mxu1 %v25488_v59  ;;  %v25495_v54 = vld [vmem:[%s31997_s16 + $0x17c0] ss:$52 sps:$4 sm:$0xff]  }
0x1185   : > { %18719 = vmatprep.mubr.bf16.mxu1 %v28851_v31  ;;  %21924 = vmatpush3.bf16.msra.mxu0 %v25489_v62  ;;  %v25496_v31 = vld [vmem:[%s31997_s16 + $0xe00] ss:$52 sps:$4 sm:$0xff]  }
0x1186   : > { %18759 = vmatprep.mubr.bf16.mxu0 %v28962_v22  ;;  %21903 = vmatprep.subr.bf16.mxu1 %v25490_v51  ;;  %v25498_v22 = vld [vmem:[%s31997_s16 + $0x11a8] ss:$52 sps:$4 sm:$0xff]  }
0x1187   : > { %21925 = vmatprep.subr.bf16.mxu0 %v25491_v8 }
0x1188   : > { %21904 = vmatpush3.bf16.msra.mxu1 %v25492_v14 }
0x1189   : > { %21926 = vmatpush3.bf16.msra.mxu0 %v25493_v25  ;;  %21905 = vmatprep.subr.bf16.mxu1 %v25494_v61 }
0x118a   : > { %21927 = vmatprep.subr.bf16.mxu0 %v25495_v54 }
0x118c   : > { %21906 = vmatpush3.bf16.msra.mxu1 %v25496_v31  ;;  %v17363_v31 = vrot.slane %v12029_v53, %v28940_v57 }
0x118d   : > { %21928 = vmatpush3.bf16.msra.mxu0 %v25497_v1  ;;  %21907 = vmatprep.subr.bf16.mxu1 %v25498_v22 }
0x118e   : > { %21929 = vmatprep.subr.bf16.mxu0 %v25499_v7 }
0x1190   : > { %21908 = vmatpush3.bf16.msra.mxu1 %v25500_v55 }
0x1191   : > { %21930 = vmatpush3.bf16.msra.mxu0 %v25501_v34  ;;  %21909 = vmatprep.subr.bf16.mxu1 %v25502_v10 }
0x1192   : > { %21931 = vmatprep.subr.bf16.mxu0 %v25503_v63 }
0x1194   : > { %21910 = vmatpush3.bf16.msra.mxu1 %v25504_v20 }
0x1195   : > { %21932 = vmatpush3.bf16.msra.mxu0 %v25505_v36  ;;  %21911 = vmatprep.subr.bf16.mxu1 %v25506_v21 }
0x1196   : > { %21933 = vmatprep.subr.bf16.mxu0 %v25507_v6 }
0x1198   : > { %21912 = vmatpush3.bf16.msra.mxu1 %v25508_v49 }
0x1199   : > { %21934 = vmatpush3.bf16.msra.mxu0 %v25509_v19  ;;  %21913 = vmatprep.subr.bf16.mxu1 %v25510_v42 }
0x119a   : > { %21935 = vmatprep.subr.bf16.mxu0 %v25511_v17 }
0x119c   : > { %21914 = vmatpush3.bf16.msra.mxu1 %v25512_v39 }
0x119d   : > { %21936 = vmatpush3.bf16.msra.mxu0 %v25513_v27  ;;  %21915 = vmatprep.subr.bf16.mxu1 %v25514_v41 }
0x119e   : > { %21937 = vmatprep.subr.bf16.mxu0 %v25515_v56 }
0x11a0   : > { %21916 = vmatpush3.bf16.msra.mxu1 %v25516_v11 }
0x11a1   : > { %21938 = vmatpush3.bf16.msra.mxu0 %v25517_v23  ;;  %21945 = vmatprep.subr.bf16.mxu1 %v25518_v37 }
0x11a3   : > { %18720 = vmatmul.mubr.bf16.vlgmr.msra.gmra.mrb[88].mxu1 %v28957_v44  ;;  %v25524_v44 = vld [vmem:[%s31997_s16 + $0x1ea8] ss:$52 sps:$4 sm:$0xff]  }
0x11a4   : > { %18760 = vmatmul.mubr.bf16.vlgmr.msra.gmra.mrb[232].mxu0 %v29111_v13  ;;  %21946 = vmatpush3.bf16.msra.mxu1 %v25519_v15  ;;  %v25525_v13 = vld [vmem:[%s31997_s16 + $0x1b68] ss:$52 sps:$4 sm:$0xff]  }
0x11a5   : > { %18799 = vmatprep.mubr.bf16.mxu1 %v29714_v3  ;;  %21947 = vmatprep.subr.bf16.mxu1 %v25520_v46  ;;  %v25526_v3 = vld [vmem:[%s31997_s16 + $0x1f10] ss:$52 sps:$4 sm:$0xff]  }
0x11a8   : > { %21948 = vmatpush3.bf16.msra.mxu1 %v25521_v52 }
0x11a9   : > { %21949 = vmatprep.subr.bf16.mxu1 %v25522_v16 }
0x11ac   : > { %21950 = vmatpush3.bf16.msra.mxu1 %v25523_v29 }
0x11ad   : > { %21951 = vmatprep.subr.bf16.mxu1 %v25524_v44 }
0x11b0   : > { %21952 = vmatpush3.bf16.msra.mxu1 %v25525_v13 }
0x11b1   : > { %21953 = vmatprep.subr.bf16.mxu1 %v25526_v3 }
0x11b4   : > { %21954 = vmatpush3.bf16.msra.mxu1 %v25527_v33 }
0x11b5   : > { %21955 = vmatprep.subr.bf16.mxu1 %v25528_v18 }
0x11b8   : > { %21956 = vmatpush3.bf16.msra.mxu1 %v25529_v30 }
0x11b9   : > { %21957 = vmatprep.subr.bf16.mxu1 %v25530_v48 }
0x11bc   : > { %21958 = vmatpush3.bf16.msra.mxu1 %v25531_v45 }
0x11bd   : > { %21959 = vmatprep.subr.bf16.mxu1 %v25532_v4 }
0x11c0   : > { %21960 = vmatpush3.bf16.msra.mxu1 %v25533_v0 }
0x11c3   : > { %18800 = vmatmul.mubr.bf16.vlgmr.msra.gmra.mrb[92].mxu1 %v29712_v32 }
0x1236   : > { %v18395_v9 = vpop.f32.mrb[80].mxu1 }
0x1237   : > { %v22789_v50 = vadd.f32 %v18395_v9, %v17347_v35  ;;  %v18600_v12 = vpop.f32.mrb[224].mxu0  ;;  %v18397_v5 = vpop.f32.mrb[81].mxu1 }
0x1238   : > { %v22791_v26 = vadd.f32 %v18600_v12, %v17355_v24  ;;  %v22790_v59 = vadd.f32 %v18397_v5, %v17351_v43  ;;  %v18602_v62 = vpop.f32.mrb[225].mxu0  ;;  %v18399_v32 = vpop.f32.mrb[82].mxu1 }
0x1239   : > { %v22792_v51 = vadd.f32 %v18602_v62, %v17359_v38  ;;  %v18604_v8 = vpop.f32.mrb[226].mxu0  ;;  %v18400_v14 = vpop.f32.mrb[83].mxu1 }
0x123a   : > { %v18869_v25 = vcombine.low %v22789_v50, %v22790_v59  ;;  %v18605_v61 = vpop.f32.mrb[227].mxu0 }
0x123b   : > { %v18870_v60 = vcombine.low %v22791_v26, %v22792_v51 }
0x123c   : > { %v18877_v58 = vrot.slane %v18869_v25, %v28354_v40 }
0x123d   : > { %v18884_v47 = vrot.slane %v18870_v60, %v28354_v40 }
0x123f   : > { %v18892_v54 = vcombine.low %v18877_v58, %v18884_v47 }
0x1241   : > { %v18899_v3 = vrot.slane %v18892_v54, %v28354_v40 }
0x1256   : > { %v21873_v28 = vpop.f32.mrb[84].mxu1 }
0x1257   : > { %v21895_v1 = vpop.f32.mrb[228].mxu0  ;;  %v21874_v22 = vpop.f32.mrb[85].mxu1 }
0x1258   : > { %v21875_v7 = vadd.f32 %v21874_v22, %v21873_v28  ;;  %v21896_v55 = vpop.f32.mrb[229].mxu0  ;;  %v21876_v34 = vpop.f32.mrb[86].mxu1 }
0x1259   : > { %v21897_v10 = vadd.f32 %v21896_v55, %v21895_v1  ;;  %v21898_v63 = vpop.f32.mrb[230].mxu0  ;;  %v21877_v20 = vpop.f32.mrb[87].mxu1 }
0x125a   : > { %v18642_v36 = vadd.f32 %v21875_v7, %v17363_v31  ;;  %v21899_v21 = vpop.f32.mrb[231].mxu0 }
0x125c   : > { %v18682_v6 = vadd.f32 %v21897_v10, %v18642_v36 }
0x1276   : > { %v21917_v49 = vpop.f32.mrb[88].mxu1 }
0x1277   : > { %v21939_v19 = vpop.f32.mrb[232].mxu0  ;;  %v21918_v42 = vpop.f32.mrb[89].mxu1 }
0x1278   : > { %v21919_v17 = vadd.f32 %v21918_v42, %v21917_v49  ;;  %v21940_v39 = vpop.f32.mrb[233].mxu0  ;;  %v21920_v27 = vpop.f32.mrb[90].mxu1 }
0x1279   : > { %v21941_v41 = vadd.f32 %v21940_v39, %v21939_v19  ;;  %v21942_v56 = vpop.f32.mrb[234].mxu0  ;;  %v21921_v57 = vpop.f32.mrb[91].mxu1 }
0x127a   : > { %v18722_v11 = vadd.f32 %v21919_v17, %v18682_v6  ;;  %v21943_v23 = vpop.f32.mrb[235].mxu0 }
0x127c   : > { %v18762_v37 = vadd.f32 %v21941_v41, %v18722_v11 }
0x1296   : > { %v21961_v15 = vpop.f32.mrb[92].mxu1 }
0x1297   : > { %v21962_v46 = vpop.f32.mrb[93].mxu1 }
0x1298   : > { %v21963_v52 = vadd.f32 %v21962_v46, %v21961_v15  ;;  %v21964_v16 = vpop.f32.mrb[94].mxu1 }
0x1299   : > { %v21965_v29 = vpop.f32.mrb[95].mxu1 }
0x129a   : > { %v18802_v44 = vadd.f32 %v21963_v52, %v18762_v37 }
0x129c   : > { %v18891_v13 = vrot.slane %v18802_v44, %v28354_v40 }
0x129e   : > { %v18906_v33 = vrot.slane %v18891_v13, %v28354_v40 }
0x12a0   : > { %v18907_v18 = vcombine.low %v18899_v3, %v18906_v33 }
0x12a2   : > { %18913 = vst.msk [vmem:[%s31431_s30 + $0x8] sm:$0x1f] %vm18911_vm15, %v18907_v18 }
0x12a3 PF: > { %s32037_s27 = sld [smem:[#allocation3_spill]] }
0x12a9   : > { %s28_s27 = sadd.s32 1, %s32037_s27  }
0x12aa   : > { %p25_p4 = scmp.ge.s32.totalorder %s28_s27, 4  }
0x12ac   :  { %27 = sbr.rel (!%p25_p4) target bundleno = 4 (0x4), region = 170 }

</bundles_post_ra>
